<compile_context>
chip_gen: v6e
topology: v6e:2x2x1
jax: 0.10.0
libtpu: 0.0.40
codegen_flags: <defaults>
</compile_context>

<pallas_src>
import functools

import jax
import jax.numpy as jnp
from jax.experimental import pallas as pl
from jax.experimental.pallas import tpu as pltpu

_EPS = 1e-5
_SLOPE = 0.2
_TILE_M_TARGET = 512


def _vmem_limit_bytes():
    try:
        cap = pltpu.get_tpu_info().vmem_capacity_bytes
    except Exception:
        cap = 64 * 1024 * 1024
    return int(min(cap * 3 // 4, 96 * 1024 * 1024))


_VMEM_LIMIT = _vmem_limit_bytes()


def _round_up(x, m):
    return (x + m - 1) // m * m


def _pick_tile_m(M, target=_TILE_M_TARGET):
    """Largest tile <= target that divides M (no masked / partial tiles)."""
    if M <= target:
        return M
    t = target
    while t >= 8:
        if M % t == 0:
            return t
        t //= 2
    return M


def _mosaic_params():
    return pltpu.CompilerParams(
        dimension_semantics=("parallel",),
        vmem_limit_bytes=_VMEM_LIMIT,
    )


# ---------------------------------------------------------------------------
# Kernel 1a: conv-as-matmul tile with fused LeakyReLU (no-BN first layer)
# ---------------------------------------------------------------------------
def _conv_lrelu_kernel(p_ref, w_ref, y_ref):
    acc = jnp.dot(p_ref[...], w_ref[...], preferred_element_type=jnp.float32)
    y_ref[...] = jnp.maximum(acc, _SLOPE * acc).astype(y_ref.dtype)


def _conv_matmul_lrelu(patches, w2d, out_dtype):
    M, K = patches.shape
    _, OC = w2d.shape
    tm = _pick_tile_m(M)
    return pl.pallas_call(
        _conv_lrelu_kernel,
        out_shape=jax.ShapeDtypeStruct((M, OC), out_dtype),
        grid=(M // tm,),
        in_specs=[
            pl.BlockSpec((tm, K), lambda i: (i, 0)),   # patch tiles stream over M
            pl.BlockSpec((K, OC), lambda i: (0, 0)),   # weight stays resident
        ],
        out_specs=pl.BlockSpec((tm, OC), lambda i: (i, 0)),
        compiler_params=_mosaic_params(),
    )(patches, w2d)


# ---------------------------------------------------------------------------
# Kernel 1b: conv-as-matmul tile + fused per-tile BatchNorm statistics
#            (per-channel sum and sum-of-squares from the f32 accumulator)
# ---------------------------------------------------------------------------
def _conv_stats_kernel(p_ref, w_ref, y_ref, stat_ref):
    acc = jnp.dot(p_ref[...], w_ref[...], preferred_element_type=jnp.float32)
    y_ref[...] = acc
    s = jnp.sum(acc, axis=0, keepdims=True)            # (1, OC)
    q = jnp.sum(acc * acc, axis=0, keepdims=True)      # (1, OC)
    stat_ref[...] = jnp.concatenate([s, q], axis=0).reshape(1, 2, -1)


def _conv_matmul_stats(patches, w2d):
    M, K = patches.shape
    _, OC = w2d.shape
    tm = _pick_tile_m(M)
    nt = M // tm
    return pl.pallas_call(
        _conv_stats_kernel,
        out_shape=(
            jax.ShapeDtypeStruct((M, OC), jnp.float32),
            jax.ShapeDtypeStruct((nt, 2, OC), jnp.float32),
        ),
        grid=(nt,),
        in_specs=[
            pl.BlockSpec((tm, K), lambda i: (i, 0)),
            pl.BlockSpec((K, OC), lambda i: (0, 0)),
        ],
        out_specs=[
            pl.BlockSpec((tm, OC), lambda i: (i, 0)),
            pl.BlockSpec((1, 2, OC), lambda i: (i, 0, 0)),   # per-tile partial stats
        ],
        compiler_params=_mosaic_params(),
    )(patches, w2d)


# ---------------------------------------------------------------------------
# Kernel 2: per-channel affine (BatchNorm, precomputed batch stats) + LeakyReLU
# ---------------------------------------------------------------------------
def _bn_lrelu_kernel(y_ref, s_ref, b_ref, o_ref):
    y = y_ref[...] * s_ref[...] + b_ref[...]
    o_ref[...] = jnp.maximum(y, _SLOPE * y).astype(o_ref.dtype)


def _bn_lrelu(y, scale, shift, out_dtype):
    M, OC = y.shape
    tm = _pick_tile_m(M)
    return pl.pallas_call(
        _bn_lrelu_kernel,
        out_shape=jax.ShapeDtypeStruct((M, OC), out_dtype),
        grid=(M // tm,),
        in_specs=[
            pl.BlockSpec((tm, OC), lambda i: (i, 0)),
            pl.BlockSpec((1, OC), lambda i: (0, 0)),
            pl.BlockSpec((1, OC), lambda i: (0, 0)),
        ],
        out_specs=pl.BlockSpec((tm, OC), lambda i: (i, 0)),
        compiler_params=_mosaic_params(),
    )(y, scale.reshape(1, OC).astype(jnp.float32),
      shift.reshape(1, OC).astype(jnp.float32))


# ---------------------------------------------------------------------------
# JAX glue: NHWC im2col for a 4x4 / stride 2 / pad 1 conv (bf16)
# ---------------------------------------------------------------------------
def _im2col_4x4_s2_p1_nhwc(x):
    # x: (N, H, W, C) -> patches (N*OH*OW, 16*C), K flatten order (kh, kw, C)
    N, H, W, C = x.shape
    OH, OW = H // 2, W // 2
    xp = jnp.pad(x, ((0, 0), (1, 1), (1, 1), (0, 0)))
    cols = [xp[:, kh:kh + 2 * OH:2, kw:kw + 2 * OW:2, :]
            for kh in range(4) for kw in range(4)]
    pat = jnp.stack(cols, axis=3)                 # (N, OH, OW, 16, C)
    return pat.reshape(N * OH * OW, 16 * C), (N, OH, OW)


def conv_block(x, weight, gamma=None, beta=None, *, out_dtype=jnp.float32):
    """Conv2d(k=4,s=2,p=1,bias=False) [+ BatchNorm2d(batch stats)] + LeakyReLU(0.2).

    x: (N, H, W, Cin) NHWC; weight: (OC, Cin, 4, 4). Returns (N, OH, OW, OC).
    """
    OC, Cin, _, _ = weight.shape

    # Lane density: make K = 16*Cin a multiple of 128 (pads layer-1 Cin 3 -> 8).
    Cp = _round_up(Cin, 8)
    if Cp != Cin:
        x = jnp.pad(x, ((0, 0), (0, 0), (0, 0), (0, Cp - Cin)))
        weight = jnp.pad(weight, ((0, 0), (0, Cp - Cin), (0, 0), (0, 0)))
    # Lane-dense output stores: pad OC to a multiple of 128 (layer-1 64 -> 128).
    OCp = _round_up(OC, 128)
    if OCp != OC:
        weight = jnp.pad(weight, ((0, OCp - OC), (0, 0), (0, 0), (0, 0)))
        if gamma is not None:
            gamma = jnp.pad(gamma, (0, OCp - OC))
            beta = jnp.pad(beta, (0, OCp - OC))

    patches, (N, OH, OW) = _im2col_4x4_s2_p1_nhwc(x.astype(jnp.bfloat16))
    # (kh, kw, Cin, OC) flatten order matches the patch K layout.
    w2d = jnp.transpose(weight, (2, 3, 1, 0)).reshape(16 * Cp, OCp).astype(jnp.bfloat16)

    if gamma is None:
        y = _conv_matmul_lrelu(patches, w2d, out_dtype)            # (M, OCp)
    else:
        y_raw, stats = _conv_matmul_stats(patches, w2d)            # (M, OCp), (nt, 2, OCp)
        M = y_raw.shape[0]
        tot = jnp.sum(stats, axis=0)                               # (2, OCp)
        mean = tot[0] / M
        var = jnp.maximum(tot[1] / M - mean * mean, 0.0)           # biased var (PyTorch BN)
        scale = gamma * jax.lax.rsqrt(var + _EPS)
        shift = beta - mean * scale
        y = _bn_lrelu(y_raw, scale, shift, out_dtype)

    if OCp != OC:
        y = y[:, :OC]
    return y.reshape(N, OH, OW, OC)


# ---------------------------------------------------------------------------
# DiscriminatorNetwork (b_jcu=True, down_sample_count=0) forward == encode_x16(64)
# ---------------------------------------------------------------------------
def init_params(key):
    ndf = 64
    chans = [(3, ndf), (ndf, ndf * 2), (ndf * 2, ndf * 4), (ndf * 4, ndf * 8)]
    keys = jax.random.split(key, len(chans))
    params = []
    for idx, (k, (cin, cout)) in enumerate(zip(keys, chans)):
        w = jax.random.normal(k, (cout, cin, 4, 4), jnp.float32) / jnp.sqrt(cin * 16.0)
        if idx == 0:
            params.append((w, None, None))                   # first conv: no BatchNorm
        else:
            params.append((w,
                           jnp.ones((cout,), jnp.float32),   # BN weight (gamma)
                           jnp.zeros((cout,), jnp.float32))) # BN bias (beta)
    return params


@jax.jit
def discriminator_forward(x, params):
    # down_sample_count=0 -> sample_list is empty; GetLogits heads are not called here.
    h = jnp.transpose(x, (0, 2, 3, 1))            # NCHW -> NHWC once
    n_layers = len(params)
    for idx, (w, g, b) in enumerate(params):
        last = idx == n_layers - 1
        h = conv_block(h, w, g, b,
                       out_dtype=jnp.float32 if last else jnp.bfloat16)
    return jnp.transpose(h, (0, 3, 1, 2)).astype(jnp.float32)   # back to NCHW


if __name__ == "__main__":
    key = jax.random.PRNGKey(0)
    k_x, k_p = jax.random.split(key)
    # NCHW, 3 channels, spatial 32 -> output (2, 512, 2, 2)
    x = jax.random.normal(k_x, (2, 3, 32, 32), jnp.float32)
    params = init_params(k_p)

    out = jax.block_until_ready(discriminator_forward(x, params))

    assert out.shape == (2, 512, 2, 2), out.shape
    assert jnp.isfinite(out).all()
    print("KERNEL_OK")
</pallas_src>

<mosaic_0001>
module attributes {stable_mosaic.version = 11 : i64} {
  func.func @_conv_lrelu_kernel(%arg0: i32, %arg1: memref<512x128xbf16, #tpu.memory_space<vmem>>, %arg2: memref<128x128xbf16, #tpu.memory_space<vmem>>, %arg3: memref<512x128xbf16, #tpu.memory_space<vmem>>) attributes {dimension_semantics = [#tpu.dimension_semantics<parallel>], iteration_bounds = array<i64: 1>, scalar_prefetch = 0 : i64, scratch_operands = 0 : i64, tpu.core_type = #tpu.core_type<tc>, window_params = [{transform_indices = @transform_0, window_bounds = array<i64: 512, 128>}, {pipeline_mode = #tpu.pipeline_mode<synchronous>, transform_indices = @transform_1, window_bounds = array<i64: 128, 128>}, {transform_indices = @transform_2, window_bounds = array<i64: 512, 128>}]} {
    %c0 = arith.constant 0 : index
    %c0_0 = arith.constant 0 : index
    %0 = vector.load %arg1[%c0, %c0_0] : memref<512x128xbf16, #tpu.memory_space<vmem>>, vector<512x128xbf16>
    %c0_1 = arith.constant 0 : index
    %c0_2 = arith.constant 0 : index
    %1 = vector.load %arg2[%c0_1, %c0_2] : memref<128x128xbf16, #tpu.memory_space<vmem>>, vector<128x128xbf16>
    %cst = arith.constant dense<0.000000e+00> : vector<512x128xf32>
    %2 = tpu.matmul %0, %1, %cst {dimension_numbers = #tpu.dot_dimension_numbers<[1], [0], [0], [1], [0, 0, 1, 1], [], []>} : vector<512x128xbf16>, vector<128x128xbf16>, vector<512x128xf32> -> vector<512x128xf32>
    %cst_3 = arith.constant 2.000000e-01 : f32
    %3 = vector.broadcast %cst_3 : f32 to vector<512x128xf32>
    %4 = arith.mulf %3, %2 : vector<512x128xf32>
    %5 = arith.maximumf %2, %4 : vector<512x128xf32>
    %6 = arith.truncf %5 : vector<512x128xf32> to vector<512x128xbf16>
    %c0_4 = arith.constant 0 : index
    %c0_5 = arith.constant 0 : index
    %7 = vector.load %arg3[%c0_4, %c0_5] : memref<512x128xbf16, #tpu.memory_space<vmem>>, vector<512x128xbf16>
    tpu.vector_store %arg3[%c0_4, %c0_5], %6 {strides = array<i32>} : memref<512x128xbf16, #tpu.memory_space<vmem>>, vector<512x128xbf16>,
    return
  }
  func.func @transform_0(%arg0: i32) -> (i32, i32) {
    %c0_i32 = arith.constant 0 : i32
    %c0_i32_0 = arith.constant 0 : i32
    return %arg0, %c0_i32 : i32, i32
  }
  func.func @transform_1(%arg0: i32) -> (i32, i32) {
    %c0_i32 = arith.constant 0 : i32
    %c0_i32_0 = arith.constant 0 : i32
    %c0_i32_1 = arith.constant 0 : i32
    return %c0_i32, %c0_i32_0 : i32, i32
  }
  func.func @transform_2(%arg0: i32) -> (i32, i32) {
    %c0_i32 = arith.constant 0 : i32
    %c0_i32_0 = arith.constant 0 : i32
    return %arg0, %c0_i32 : i32, i32
  }
}

module attributes {stable_mosaic.version = 11 : i64} {
  func.func @_conv_stats_kernel(%arg0: i32, %arg1: memref<128x1024xbf16, #tpu.memory_space<vmem>>, %arg2: memref<1024x128xbf16, #tpu.memory_space<vmem>>, %arg3: memref<128x128xf32, #tpu.memory_space<vmem>>, %arg4: memref<1x2x128xf32, #tpu.memory_space<vmem>>) attributes {dimension_semantics = [#tpu.dimension_semantics<parallel>], iteration_bounds = array<i64: 1>, scalar_prefetch = 0 : i64, scratch_operands = 0 : i64, tpu.core_type = #tpu.core_type<tc>, window_params = [{transform_indices = @transform_0, window_bounds = array<i64: 128, 1024>}, {pipeline_mode = #tpu.pipeline_mode<synchronous>, transform_indices = @transform_1, window_bounds = array<i64: 1024, 128>}, {transform_indices = @transform_2, window_bounds = array<i64: 128, 128>}, {transform_indices = @transform_3, window_bounds = array<i64: 1, 2, 128>}]} {
    %c0 = arith.constant 0 : index
    %c0_0 = arith.constant 0 : index
    %0 = vector.load %arg1[%c0, %c0_0] : memref<128x1024xbf16, #tpu.memory_space<vmem>>, vector<128x1024xbf16>
    %c0_1 = arith.constant 0 : index
    %c0_2 = arith.constant 0 : index
    %1 = vector.load %arg2[%c0_1, %c0_2] : memref<1024x128xbf16, #tpu.memory_space<vmem>>, vector<1024x128xbf16>
    %cst = arith.constant dense<0.000000e+00> : vector<128x128xf32>
    %2 = tpu.matmul %0, %1, %cst {dimension_numbers = #tpu.dot_dimension_numbers<[1], [0], [0], [1], [0, 0, 1, 1], [], []>} : vector<128x1024xbf16>, vector<1024x128xbf16>, vector<128x128xf32> -> vector<128x128xf32>
    %c0_3 = arith.constant 0 : index
    %c0_4 = arith.constant 0 : index
    %3 = vector.load %arg3[%c0_3, %c0_4] : memref<128x128xf32, #tpu.memory_space<vmem>>, vector<128x128xf32>
    tpu.vector_store %arg3[%c0_3, %c0_4], %2 {strides = array<i32>} : memref<128x128xf32, #tpu.memory_space<vmem>>, vector<128x128xf32>,
    %cst_5 = arith.constant dense<0.000000e+00> : vector<128xf32>
    %4 = vector.multi_reduction <add>, %2, %cst_5 [0] : vector<128x128xf32> to vector<128xf32>
    %5 = vector.shape_cast %4 : vector<128xf32> to vector<1x128xf32>
    %6 = arith.mulf %2, %2 : vector<128x128xf32>
    %cst_6 = arith.constant dense<0.000000e+00> : vector<128xf32>
    %7 = vector.multi_reduction <add>, %6, %cst_6 [0] : vector<128x128xf32> to vector<128xf32>
    %8 = vector.shape_cast %7 : vector<128xf32> to vector<1x128xf32>
    %9 = tpu.concatenate %5, %8 in 0 : vector<1x128xf32>, vector<1x128xf32> -> vector<2x128xf32>
    %10 = vector.shape_cast %9 : vector<2x128xf32> to vector<1x2x128xf32>
    %c0_7 = arith.constant 0 : index
    %c0_8 = arith.constant 0 : index
    %c0_9 = arith.constant 0 : index
    %11 = vector.load %arg4[%c0_7, %c0_8, %c0_9] : memref<1x2x128xf32, #tpu.memory_space<vmem>>, vector<1x2x128xf32>
    tpu.vector_store %arg4[%c0_7, %c0_8, %c0_9], %10 {strides = array<i32>} : memref<1x2x128xf32, #tpu.memory_space<vmem>>, vector<1x2x128xf32>,
    return
  }
  func.func @transform_0(%arg0: i32) -> (i32, i32) {
    %c0_i32 = arith.constant 0 : i32
    %c0_i32_0 = arith.constant 0 : i32
    return %arg0, %c0_i32 : i32, i32
  }
  func.func @transform_1(%arg0: i32) -> (i32, i32) {
    %c0_i32 = arith.constant 0 : i32
    %c0_i32_0 = arith.constant 0 : i32
    %c0_i32_1 = arith.constant 0 : i32
    return %c0_i32, %c0_i32_0 : i32, i32
  }
  func.func @transform_2(%arg0: i32) -> (i32, i32) {
    %c0_i32 = arith.constant 0 : i32
    %c0_i32_0 = arith.constant 0 : i32
    return %arg0, %c0_i32 : i32, i32
  }
  func.func @transform_3(%arg0: i32) -> (i32, i32, i32) {
    %c0_i32 = arith.constant 0 : i32
    %c0_i32_0 = arith.constant 0 : i32
    %c0_i32_1 = arith.constant 0 : i32
    return %arg0, %c0_i32, %c0_i32_0 : i32, i32, i32
  }
}

module attributes {stable_mosaic.version = 11 : i64} {
  func.func @_bn_lrelu_kernel(%arg0: i32, %arg1: memref<128x128xf32, #tpu.memory_space<vmem>>, %arg2: memref<1x128xf32, #tpu.memory_space<vmem>>, %arg3: memref<1x128xf32, #tpu.memory_space<vmem>>, %arg4: memref<128x128xbf16, #tpu.memory_space<vmem>>) attributes {dimension_semantics = [#tpu.dimension_semantics<parallel>], iteration_bounds = array<i64: 1>, scalar_prefetch = 0 : i64, scratch_operands = 0 : i64, tpu.core_type = #tpu.core_type<tc>, window_params = [{transform_indices = @transform_0, window_bounds = array<i64: 128, 128>}, {pipeline_mode = #tpu.pipeline_mode<synchronous>, transform_indices = @transform_1, window_bounds = array<i64: 1, 128>}, {pipeline_mode = #tpu.pipeline_mode<synchronous>, transform_indices = @transform_2, window_bounds = array<i64: 1, 128>}, {transform_indices = @transform_3, window_bounds = array<i64: 128, 128>}]} {
    %c0 = arith.constant 0 : index
    %c0_0 = arith.constant 0 : index
    %0 = vector.load %arg1[%c0, %c0_0] : memref<128x128xf32, #tpu.memory_space<vmem>>, vector<128x128xf32>
    %c0_1 = arith.constant 0 : index
    %c0_2 = arith.constant 0 : index
    %1 = vector.load %arg2[%c0_1, %c0_2] : memref<1x128xf32, #tpu.memory_space<vmem>>, vector<1x128xf32>
    %2 = vector.broadcast %1 : vector<1x128xf32> to vector<128x128xf32>
    %3 = arith.mulf %0, %2 : vector<128x128xf32>
    %c0_3 = arith.constant 0 : index
    %c0_4 = arith.constant 0 : index
    %4 = vector.load %arg3[%c0_3, %c0_4] : memref<1x128xf32, #tpu.memory_space<vmem>>, vector<1x128xf32>
    %5 = vector.broadcast %4 : vector<1x128xf32> to vector<128x128xf32>
    %6 = arith.addf %3, %5 : vector<128x128xf32>
    %cst = arith.constant 2.000000e-01 : f32
    %7 = vector.broadcast %cst : f32 to vector<128x128xf32>
    %8 = arith.mulf %7, %6 : vector<128x128xf32>
    %9 = arith.maximumf %6, %8 : vector<128x128xf32>
    %10 = arith.truncf %9 : vector<128x128xf32> to vector<128x128xbf16>
    %c0_5 = arith.constant 0 : index
    %c0_6 = arith.constant 0 : index
    %11 = vector.load %arg4[%c0_5, %c0_6] : memref<128x128xbf16, #tpu.memory_space<vmem>>, vector<128x128xbf16>
    tpu.vector_store %arg4[%c0_5, %c0_6], %10 {strides = array<i32>} : memref<128x128xbf16, #tpu.memory_space<vmem>>, vector<128x128xbf16>,
    return
  }
  func.func @transform_0(%arg0: i32) -> (i32, i32) {
    %c0_i32 = arith.constant 0 : i32
    %c0_i32_0 = arith.constant 0 : i32
    return %arg0, %c0_i32 : i32, i32
  }
  func.func @transform_1(%arg0: i32) -> (i32, i32) {
    %c0_i32 = arith.constant 0 : i32
    %c0_i32_0 = arith.constant 0 : i32
    %c0_i32_1 = arith.constant 0 : i32
    return %c0_i32, %c0_i32_0 : i32, i32
  }
  func.func @transform_2(%arg0: i32) -> (i32, i32) {
    %c0_i32 = arith.constant 0 : i32
    %c0_i32_0 = arith.constant 0 : i32
    %c0_i32_1 = arith.constant 0 : i32
    return %c0_i32, %c0_i32_0 : i32, i32
  }
  func.func @transform_3(%arg0: i32) -> (i32, i32) {
    %c0_i32 = arith.constant 0 : i32
    %c0_i32_0 = arith.constant 0 : i32
    return %arg0, %c0_i32 : i32, i32
  }
}

module attributes {stable_mosaic.version = 11 : i64} {
  func.func @_conv_stats_kernel(%arg0: i32, %arg1: memref<32x2048xbf16, #tpu.memory_space<vmem>>, %arg2: memref<2048x256xbf16, #tpu.memory_space<vmem>>, %arg3: memref<32x256xf32, #tpu.memory_space<vmem>>, %arg4: memref<1x2x256xf32, #tpu.memory_space<vmem>>) attributes {dimension_semantics = [#tpu.dimension_semantics<parallel>], iteration_bounds = array<i64: 1>, scalar_prefetch = 0 : i64, scratch_operands = 0 : i64, tpu.core_type = #tpu.core_type<tc>, window_params = [{transform_indices = @transform_0, window_bounds = array<i64: 32, 2048>}, {pipeline_mode = #tpu.pipeline_mode<synchronous>, transform_indices = @transform_1, window_bounds = array<i64: 2048, 256>}, {transform_indices = @transform_2, window_bounds = array<i64: 32, 256>}, {transform_indices = @transform_3, window_bounds = array<i64: 1, 2, 256>}]} {
    %c0 = arith.constant 0 : index
    %c0_0 = arith.constant 0 : index
    %0 = vector.load %arg1[%c0, %c0_0] : memref<32x2048xbf16, #tpu.memory_space<vmem>>, vector<32x2048xbf16>
    %c0_1 = arith.constant 0 : index
    %c0_2 = arith.constant 0 : index
    %1 = vector.load %arg2[%c0_1, %c0_2] : memref<2048x256xbf16, #tpu.memory_space<vmem>>, vector<2048x256xbf16>
    %cst = arith.constant dense<0.000000e+00> : vector<32x256xf32>
    %2 = tpu.matmul %0, %1, %cst {dimension_numbers = #tpu.dot_dimension_numbers<[1], [0], [0], [1], [0, 0, 1, 1], [], []>} : vector<32x2048xbf16>, vector<2048x256xbf16>, vector<32x256xf32> -> vector<32x256xf32>
    %c0_3 = arith.constant 0 : index
    %c0_4 = arith.constant 0 : index
    %3 = vector.load %arg3[%c0_3, %c0_4] : memref<32x256xf32, #tpu.memory_space<vmem>>, vector<32x256xf32>
    tpu.vector_store %arg3[%c0_3, %c0_4], %2 {strides = array<i32>} : memref<32x256xf32, #tpu.memory_space<vmem>>, vector<32x256xf32>,
    %cst_5 = arith.constant dense<0.000000e+00> : vector<256xf32>
    %4 = vector.multi_reduction <add>, %2, %cst_5 [0] : vector<32x256xf32> to vector<256xf32>
    %5 = vector.shape_cast %4 : vector<256xf32> to vector<1x256xf32>
    %6 = arith.mulf %2, %2 : vector<32x256xf32>
    %cst_6 = arith.constant dense<0.000000e+00> : vector<256xf32>
    %7 = vector.multi_reduction <add>, %6, %cst_6 [0] : vector<32x256xf32> to vector<256xf32>
    %8 = vector.shape_cast %7 : vector<256xf32> to vector<1x256xf32>
    %9 = tpu.concatenate %5, %8 in 0 : vector<1x256xf32>, vector<1x256xf32> -> vector<2x256xf32>
    %10 = vector.shape_cast %9 : vector<2x256xf32> to vector<1x2x256xf32>
    %c0_7 = arith.constant 0 : index
    %c0_8 = arith.constant 0 : index
    %c0_9 = arith.constant 0 : index
    %11 = vector.load %arg4[%c0_7, %c0_8, %c0_9] : memref<1x2x256xf32, #tpu.memory_space<vmem>>, vector<1x2x256xf32>
    tpu.vector_store %arg4[%c0_7, %c0_8, %c0_9], %10 {strides = array<i32>} : memref<1x2x256xf32, #tpu.memory_space<vmem>>, vector<1x2x256xf32>,
    return
  }
  func.func @transform_0(%arg0: i32) -> (i32, i32) {
    %c0_i32 = arith.constant 0 : i32
    %c0_i32_0 = arith.constant 0 : i32
    return %arg0, %c0_i32 : i32, i32
  }
  func.func @transform_1(%arg0: i32) -> (i32, i32) {
    %c0_i32 = arith.constant 0 : i32
    %c0_i32_0 = arith.constant 0 : i32
    %c0_i32_1 = arith.constant 0 : i32
    return %c0_i32, %c0_i32_0 : i32, i32
  }
  func.func @transform_2(%arg0: i32) -> (i32, i32) {
    %c0_i32 = arith.constant 0 : i32
    %c0_i32_0 = arith.constant 0 : i32
    return %arg0, %c0_i32 : i32, i32
  }
  func.func @transform_3(%arg0: i32) -> (i32, i32, i32) {
    %c0_i32 = arith.constant 0 : i32
    %c0_i32_0 = arith.constant 0 : i32
    %c0_i32_1 = arith.constant 0 : i32
    return %arg0, %c0_i32, %c0_i32_0 : i32, i32, i32
  }
}

module attributes {stable_mosaic.version = 11 : i64} {
  func.func @_bn_lrelu_kernel(%arg0: i32, %arg1: memref<32x256xf32, #tpu.memory_space<vmem>>, %arg2: memref<1x256xf32, #tpu.memory_space<vmem>>, %arg3: memref<1x256xf32, #tpu.memory_space<vmem>>, %arg4: memref<32x256xbf16, #tpu.memory_space<vmem>>) attributes {dimension_semantics = [#tpu.dimension_semantics<parallel>], iteration_bounds = array<i64: 1>, scalar_prefetch = 0 : i64, scratch_operands = 0 : i64, tpu.core_type = #tpu.core_type<tc>, window_params = [{transform_indices = @transform_0, window_bounds = array<i64: 32, 256>}, {pipeline_mode = #tpu.pipeline_mode<synchronous>, transform_indices = @transform_1, window_bounds = array<i64: 1, 256>}, {pipeline_mode = #tpu.pipeline_mode<synchronous>, transform_indices = @transform_2, window_bounds = array<i64: 1, 256>}, {transform_indices = @transform_3, window_bounds = array<i64: 32, 256>}]} {
    %c0 = arith.constant 0 : index
    %c0_0 = arith.constant 0 : index
    %0 = vector.load %arg1[%c0, %c0_0] : memref<32x256xf32, #tpu.memory_space<vmem>>, vector<32x256xf32>
    %c0_1 = arith.constant 0 : index
    %c0_2 = arith.constant 0 : index
    %1 = vector.load %arg2[%c0_1, %c0_2] : memref<1x256xf32, #tpu.memory_space<vmem>>, vector<1x256xf32>
    %2 = vector.broadcast %1 : vector<1x256xf32> to vector<32x256xf32>
    %3 = arith.mulf %0, %2 : vector<32x256xf32>
    %c0_3 = arith.constant 0 : index
    %c0_4 = arith.constant 0 : index
    %4 = vector.load %arg3[%c0_3, %c0_4] : memref<1x256xf32, #tpu.memory_space<vmem>>, vector<1x256xf32>
    %5 = vector.broadcast %4 : vector<1x256xf32> to vector<32x256xf32>
    %6 = arith.addf %3, %5 : vector<32x256xf32>
    %cst = arith.constant 2.000000e-01 : f32
    %7 = vector.broadcast %cst : f32 to vector<32x256xf32>
    %8 = arith.mulf %7, %6 : vector<32x256xf32>
    %9 = arith.maximumf %6, %8 : vector<32x256xf32>
    %10 = arith.truncf %9 : vector<32x256xf32> to vector<32x256xbf16>
    %c0_5 = arith.constant 0 : index
    %c0_6 = arith.constant 0 : index
    %11 = vector.load %arg4[%c0_5, %c0_6] : memref<32x256xbf16, #tpu.memory_space<vmem>>, vector<32x256xbf16>
    tpu.vector_store %arg4[%c0_5, %c0_6], %10 {strides = array<i32>} : memref<32x256xbf16, #tpu.memory_space<vmem>>, vector<32x256xbf16>,
    return
  }
  func.func @transform_0(%arg0: i32) -> (i32, i32) {
    %c0_i32 = arith.constant 0 : i32
    %c0_i32_0 = arith.constant 0 : i32
    return %arg0, %c0_i32 : i32, i32
  }
  func.func @transform_1(%arg0: i32) -> (i32, i32) {
    %c0_i32 = arith.constant 0 : i32
    %c0_i32_0 = arith.constant 0 : i32
    %c0_i32_1 = arith.constant 0 : i32
    return %c0_i32, %c0_i32_0 : i32, i32
  }
  func.func @transform_2(%arg0: i32) -> (i32, i32) {
    %c0_i32 = arith.constant 0 : i32
    %c0_i32_0 = arith.constant 0 : i32
    %c0_i32_1 = arith.constant 0 : i32
    return %c0_i32, %c0_i32_0 : i32, i32
  }
  func.func @transform_3(%arg0: i32) -> (i32, i32) {
    %c0_i32 = arith.constant 0 : i32
    %c0_i32_0 = arith.constant 0 : i32
    return %arg0, %c0_i32 : i32, i32
  }
}

module attributes {stable_mosaic.version = 11 : i64} {
  func.func @_conv_stats_kernel(%arg0: i32, %arg1: memref<8x4096xbf16, #tpu.memory_space<vmem>>, %arg2: memref<4096x512xbf16, #tpu.memory_space<vmem>>, %arg3: memref<8x512xf32, #tpu.memory_space<vmem>>, %arg4: memref<1x2x512xf32, #tpu.memory_space<vmem>>) attributes {dimension_semantics = [#tpu.dimension_semantics<parallel>], iteration_bounds = array<i64: 1>, scalar_prefetch = 0 : i64, scratch_operands = 0 : i64, tpu.core_type = #tpu.core_type<tc>, window_params = [{transform_indices = @transform_0, window_bounds = array<i64: 8, 4096>}, {pipeline_mode = #tpu.pipeline_mode<synchronous>, transform_indices = @transform_1, window_bounds = array<i64: 4096, 512>}, {transform_indices = @transform_2, window_bounds = array<i64: 8, 512>}, {transform_indices = @transform_3, window_bounds = array<i64: 1, 2, 512>}]} {
    %c0 = arith.constant 0 : index
    %c0_0 = arith.constant 0 : index
    %0 = vector.load %arg1[%c0, %c0_0] : memref<8x4096xbf16, #tpu.memory_space<vmem>>, vector<8x4096xbf16>
    %c0_1 = arith.constant 0 : index
    %c0_2 = arith.constant 0 : index
    %1 = vector.load %arg2[%c0_1, %c0_2] : memref<4096x512xbf16, #tpu.memory_space<vmem>>, vector<4096x512xbf16>
    %cst = arith.constant dense<0.000000e+00> : vector<8x512xf32>
    %2 = tpu.matmul %0, %1, %cst {dimension_numbers = #tpu.dot_dimension_numbers<[1], [0], [0], [1], [0, 0, 1, 1], [], []>} : vector<8x4096xbf16>, vector<4096x512xbf16>, vector<8x512xf32> -> vector<8x512xf32>
    %c0_3 = arith.constant 0 : index
    %c0_4 = arith.constant 0 : index
    %3 = vector.load %arg3[%c0_3, %c0_4] : memref<8x512xf32, #tpu.memory_space<vmem>>, vector<8x512xf32>
    tpu.vector_store %arg3[%c0_3, %c0_4], %2 {strides = array<i32>} : memref<8x512xf32, #tpu.memory_space<vmem>>, vector<8x512xf32>,
    %cst_5 = arith.constant dense<0.000000e+00> : vector<512xf32>
    %4 = vector.multi_reduction <add>, %2, %cst_5 [0] : vector<8x512xf32> to vector<512xf32>
    %5 = vector.shape_cast %4 : vector<512xf32> to vector<1x512xf32>
    %6 = arith.mulf %2, %2 : vector<8x512xf32>
    %cst_6 = arith.constant dense<0.000000e+00> : vector<512xf32>
    %7 = vector.multi_reduction <add>, %6, %cst_6 [0] : vector<8x512xf32> to vector<512xf32>
    %8 = vector.shape_cast %7 : vector<512xf32> to vector<1x512xf32>
    %9 = tpu.concatenate %5, %8 in 0 : vector<1x512xf32>, vector<1x512xf32> -> vector<2x512xf32>
    %10 = vector.shape_cast %9 : vector<2x512xf32> to vector<1x2x512xf32>
    %c0_7 = arith.constant 0 : index
    %c0_8 = arith.constant 0 : index
    %c0_9 = arith.constant 0 : index
    %11 = vector.load %arg4[%c0_7, %c0_8, %c0_9] : memref<1x2x512xf32, #tpu.memory_space<vmem>>, vector<1x2x512xf32>
    tpu.vector_store %arg4[%c0_7, %c0_8, %c0_9], %10 {strides = array<i32>} : memref<1x2x512xf32, #tpu.memory_space<vmem>>, vector<1x2x512xf32>,
    return
  }
  func.func @transform_0(%arg0: i32) -> (i32, i32) {
    %c0_i32 = arith.constant 0 : i32
    %c0_i32_0 = arith.constant 0 : i32
    return %arg0, %c0_i32 : i32, i32
  }
  func.func @transform_1(%arg0: i32) -> (i32, i32) {
    %c0_i32 = arith.constant 0 : i32
    %c0_i32_0 = arith.constant 0 : i32
    %c0_i32_1 = arith.constant 0 : i32
    return %c0_i32, %c0_i32_0 : i32, i32
  }
  func.func @transform_2(%arg0: i32) -> (i32, i32) {
    %c0_i32 = arith.constant 0 : i32
    %c0_i32_0 = arith.constant 0 : i32
    return %arg0, %c0_i32 : i32, i32
  }
  func.func @transform_3(%arg0: i32) -> (i32, i32, i32) {
    %c0_i32 = arith.constant 0 : i32
    %c0_i32_0 = arith.constant 0 : i32
    %c0_i32_1 = arith.constant 0 : i32
    return %arg0, %c0_i32, %c0_i32_0 : i32, i32, i32
  }
}

module attributes {stable_mosaic.version = 11 : i64} {
  func.func @_bn_lrelu_kernel(%arg0: i32, %arg1: memref<8x512xf32, #tpu.memory_space<vmem>>, %arg2: memref<1x512xf32, #tpu.memory_space<vmem>>, %arg3: memref<1x512xf32, #tpu.memory_space<vmem>>, %arg4: memref<8x512xf32, #tpu.memory_space<vmem>>) attributes {dimension_semantics = [#tpu.dimension_semantics<parallel>], iteration_bounds = array<i64: 1>, scalar_prefetch = 0 : i64, scratch_operands = 0 : i64, tpu.core_type = #tpu.core_type<tc>, window_params = [{transform_indices = @transform_0, window_bounds = array<i64: 8, 512>}, {pipeline_mode = #tpu.pipeline_mode<synchronous>, transform_indices = @transform_1, window_bounds = array<i64: 1, 512>}, {pipeline_mode = #tpu.pipeline_mode<synchronous>, transform_indices = @transform_2, window_bounds = array<i64: 1, 512>}, {transform_indices = @transform_3, window_bounds = array<i64: 8, 512>}]} {
    %c0 = arith.constant 0 : index
    %c0_0 = arith.constant 0 : index
    %0 = vector.load %arg1[%c0, %c0_0] : memref<8x512xf32, #tpu.memory_space<vmem>>, vector<8x512xf32>
    %c0_1 = arith.constant 0 : index
    %c0_2 = arith.constant 0 : index
    %1 = vector.load %arg2[%c0_1, %c0_2] : memref<1x512xf32, #tpu.memory_space<vmem>>, vector<1x512xf32>
    %2 = vector.broadcast %1 : vector<1x512xf32> to vector<8x512xf32>
    %3 = arith.mulf %0, %2 : vector<8x512xf32>
    %c0_3 = arith.constant 0 : index
    %c0_4 = arith.constant 0 : index
    %4 = vector.load %arg3[%c0_3, %c0_4] : memref<1x512xf32, #tpu.memory_space<vmem>>, vector<1x512xf32>
    %5 = vector.broadcast %4 : vector<1x512xf32> to vector<8x512xf32>
    %6 = arith.addf %3, %5 : vector<8x512xf32>
    %cst = arith.constant 2.000000e-01 : f32
    %7 = vector.broadcast %cst : f32 to vector<8x512xf32>
    %8 = arith.mulf %7, %6 : vector<8x512xf32>
    %9 = arith.maximumf %6, %8 : vector<8x512xf32>
    %c0_5 = arith.constant 0 : index
    %c0_6 = arith.constant 0 : index
    %10 = vector.load %arg4[%c0_5, %c0_6] : memref<8x512xf32, #tpu.memory_space<vmem>>, vector<8x512xf32>
    tpu.vector_store %arg4[%c0_5, %c0_6], %9 {strides = array<i32>} : memref<8x512xf32, #tpu.memory_space<vmem>>, vector<8x512xf32>,
    return
  }
  func.func @transform_0(%arg0: i32) -> (i32, i32) {
    %c0_i32 = arith.constant 0 : i32
    %c0_i32_0 = arith.constant 0 : i32
    return %arg0, %c0_i32 : i32, i32
  }
  func.func @transform_1(%arg0: i32) -> (i32, i32) {
    %c0_i32 = arith.constant 0 : i32
    %c0_i32_0 = arith.constant 0 : i32
    %c0_i32_1 = arith.constant 0 : i32
    return %c0_i32, %c0_i32_0 : i32, i32
  }
  func.func @transform_2(%arg0: i32) -> (i32, i32) {
    %c0_i32 = arith.constant 0 : i32
    %c0_i32_0 = arith.constant 0 : i32
    %c0_i32_1 = arith.constant 0 : i32
    return %c0_i32, %c0_i32_0 : i32, i32
  }
  func.func @transform_3(%arg0: i32) -> (i32, i32) {
    %c0_i32 = arith.constant 0 : i32
    %c0_i32_0 = arith.constant 0 : i32
    return %arg0, %c0_i32 : i32, i32
  }
}

</mosaic_0001>

<bundles_post_ra>
// kernel: discriminator_forward.7
= control target key start
LH: loop header
LB: loop body
LE: loop exit
PB: predicated region body
PF: predicated region fallthrough
CT: control target
= control target key end

     0   :  { %s1839_s1 = inlined_call_operand.vmem [shape: bf16[128,128], index: 1, kind: input, shape index: {}]   ;;  %s1840_s0 = inlined_call_operand.vmem [shape: bf16[512,128], index: 0, kind: input, shape index: {}]   ;;  %s1841_s2 = inlined_call_operand.vmem [shape: bf16[512,128], index: 2, kind: output, shape index: {}]  }
   0x1   :  { %v1568_v0 = vld [vmem:[%s1839_s1 + $0x38] sm:$0xff]   ;;  %v1569_v1 = vld [vmem:[%s1839_s1 + $0x30] sm:$0xff]   ;;  %v1570_v2 = vld [vmem:[%s1839_s1 + $0x28] sm:$0xff]  }
   0x2   :  { %1472 = vmatprep.subr.bf16.mxu0 %v1568_v0  ;;  %1552 = vmatprep.subr.bf16.mxu1 %v1568_v0  ;;  %v1571_v3 = vld [vmem:[%s1839_s1 + $0x20] sm:$0xff]   ;;  %v1572_v6 = vld [vmem:[%s1839_s1 + $0x18] sm:$0xff]   ;;  %v1573_v7 = vld [vmem:[%s1839_s1 + $0x10] sm:$0xff]  }
   0x3   :  { %1473 = vmatpush3.bf16.msra.mxu0 %v1568_v0  ;;  %1560 = vmatpush3.bf16.msra.mxu1 %v1568_v0  ;;  %v1576_v4 = vld [vmem:[%s1840_s0] sm:$0xff]   ;;  %v1574_v8 = vld [vmem:[%s1839_s1 + $0x8] sm:$0xff]   ;;  %v1580_v12 = vld [vmem:[%s1840_s0 + $0x10] sm:$0xff]  }
   0x4   :  { %1474 = vmatprep.subr.bf16.mxu0 %v1569_v1  ;;  %1553 = vmatprep.subr.bf16.mxu1 %v1569_v1  ;;  %v1577_v5 = vld [vmem:[%s1840_s0 + $0x80] sm:$0xff]   ;;  %v1578_v10 = vld [vmem:[%s1840_s0 + $0x8] sm:$0xff]   ;;  %v1581_v13 = vld [vmem:[%s1840_s0 + $0x90] sm:$0xff]  }
   0x5   :  { %1488 = vmatprep.mubr.bf16.mxu0 %v1576_v4  ;;  %1520 = vmatprep.mubr.bf16.mxu1 %v1577_v5  ;;  %v1575_v9 = vld [vmem:[%s1839_s1] sm:$0xff]   ;;  %v1579_v11 = vld [vmem:[%s1840_s0 + $0x88] sm:$0xff]   ;;  %v1582_v14 = vld [vmem:[%s1840_s0 + $0x18] sm:$0xff]  }
   0x6   :  { %v1583_v15 = vld [vmem:[%s1840_s0 + $0x98] sm:$0xff]   ;;  %v1584_v16 = vld [vmem:[%s1840_s0 + $0x20] sm:$0xff]   ;;  %v1586_v18 = vld [vmem:[%s1840_s0 + $0x28] sm:$0xff]  }
   0x7   :  { %1475 = vmatpush3.bf16.msra.mxu0 %v1569_v1  ;;  %1561 = vmatpush3.bf16.msra.mxu1 %v1569_v1  ;;  %v1585_v17 = vld [vmem:[%s1840_s0 + $0xa0] sm:$0xff]   ;;  %v1587_v19 = vld [vmem:[%s1840_s0 + $0xa8] sm:$0xff]   ;;  %v1588_v20 = vld [vmem:[%s1840_s0 + $0x30] sm:$0xff]  }
   0x8   :  { %1476 = vmatprep.subr.bf16.mxu0 %v1570_v2  ;;  %1554 = vmatprep.subr.bf16.mxu1 %v1570_v2  ;;  %v1589_v21 = vld [vmem:[%s1840_s0 + $0xb0] sm:$0xff]   ;;  %v1590_v22 = vld [vmem:[%s1840_s0 + $0x38] sm:$0xff]   ;;  %v1592_v24 = vld [vmem:[%s1840_s0 + $0x40] sm:$0xff]  }
   0x9   :  { %v1591_v23 = vld [vmem:[%s1840_s0 + $0xb8] sm:$0xff]   ;;  %v1593_v25 = vld [vmem:[%s1840_s0 + $0xc0] sm:$0xff]   ;;  %v1594_v26 = vld [vmem:[%s1840_s0 + $0x48] sm:$0xff]  }
   0xa   :  { %v1595_v27 = vld [vmem:[%s1840_s0 + $0xc8] sm:$0xff]   ;;  %v1596_v28 = vld [vmem:[%s1840_s0 + $0x50] sm:$0xff]   ;;  %v1598_v30 = vld [vmem:[%s1840_s0 + $0x58] sm:$0xff]  }
   0xb   :  { %1477 = vmatpush3.bf16.msra.mxu0 %v1570_v2  ;;  %1562 = vmatpush3.bf16.msra.mxu1 %v1570_v2  ;;  %v1597_v29 = vld [vmem:[%s1840_s0 + $0xd0] sm:$0xff]   ;;  %v1599_v31 = vld [vmem:[%s1840_s0 + $0xd8] sm:$0xff]   ;;  %v1600_v32 = vld [vmem:[%s1840_s0 + $0x60] sm:$0xff]  }
   0xc   :  { %1478 = vmatprep.subr.bf16.mxu0 %v1571_v3  ;;  %1555 = vmatprep.subr.bf16.mxu1 %v1571_v3  ;;  %v1601_v33 = vld [vmem:[%s1840_s0 + $0xe0] sm:$0xff]   ;;  %v1602_v34 = vld [vmem:[%s1840_s0 + $0x68] sm:$0xff]   ;;  %v1604_v36 = vld [vmem:[%s1840_s0 + $0x70] sm:$0xff]  }
   0xd   :  { %v1603_v35 = vld [vmem:[%s1840_s0 + $0xe8] sm:$0xff]   ;;  %v1605_v37 = vld [vmem:[%s1840_s0 + $0xf0] sm:$0xff]   ;;  %v1606_v38 = vld [vmem:[%s1840_s0 + $0x78] sm:$0xff]  }
   0xe   :  { %v1607_v39 = vld [vmem:[%s1840_s0 + $0xf8] sm:$0xff]  }
   0xf   :  { %1479 = vmatpush3.bf16.msra.mxu0 %v1571_v3  ;;  %1563 = vmatpush3.bf16.msra.mxu1 %v1571_v3 }
  0x10   :  { %1480 = vmatprep.subr.bf16.mxu0 %v1572_v6  ;;  %1556 = vmatprep.subr.bf16.mxu1 %v1572_v6 }
  0x13   :  { %1481 = vmatpush3.bf16.msra.mxu0 %v1572_v6  ;;  %1564 = vmatpush3.bf16.msra.mxu1 %v1572_v6 }
  0x14   :  { %1482 = vmatprep.subr.bf16.mxu0 %v1573_v7  ;;  %1557 = vmatprep.subr.bf16.mxu1 %v1573_v7 }
  0x17   :  { %1483 = vmatpush3.bf16.msra.mxu0 %v1573_v7  ;;  %1565 = vmatpush3.bf16.msra.mxu1 %v1573_v7 }
  0x18   :  { %1484 = vmatprep.subr.bf16.mxu0 %v1574_v8  ;;  %1558 = vmatprep.subr.bf16.mxu1 %v1574_v8 }
  0x1b   :  { %1485 = vmatpush3.bf16.msra.mxu0 %v1574_v8  ;;  %1566 = vmatpush3.bf16.msra.mxu1 %v1574_v8 }
  0x1c   :  { %1486 = vmatprep.subr.bf16.mxu0 %v1575_v9  ;;  %1559 = vmatprep.subr.bf16.mxu1 %v1575_v9 }
  0x1f   :  { %1487 = vmatpush3.bf16.msra.mxu0 %v1575_v9  ;;  %1567 = vmatpush3.bf16.msra.mxu1 %v1575_v9 }
  0x22   :  { %1489 = vmatmul.mubr.bf16.vlgmr.msra.gmra.mxu0 %v1578_v10  ;;  %1521 = vmatmul.mubr.bf16.vlgmr.msra.gmra.mxu1 %v1579_v11 }
  0x23   :  { %1492 = vmatprep.mubr.bf16.mxu0 %v1580_v12  ;;  %1524 = vmatprep.mubr.bf16.mxu1 %v1581_v13 }
  0x2a   :  { %1493 = vmatmul.mubr.bf16.gmra.mxu0 %v1582_v14  ;;  %1525 = vmatmul.mubr.bf16.gmra.mxu1 %v1583_v15 }
  0x2b   :  { %1496 = vmatprep.mubr.bf16.mxu0 %v1584_v16  ;;  %1528 = vmatprep.mubr.bf16.mxu1 %v1585_v17 }
  0x32   :  { %1497 = vmatmul.mubr.bf16.gmra.mxu0 %v1586_v18  ;;  %1529 = vmatmul.mubr.bf16.gmra.mxu1 %v1587_v19 }
  0x33   :  { %1500 = vmatprep.mubr.bf16.mxu0 %v1588_v20  ;;  %1532 = vmatprep.mubr.bf16.mxu1 %v1589_v21 }
  0x3a   :  { %1501 = vmatmul.mubr.bf16.gmra.mxu0 %v1590_v22  ;;  %1533 = vmatmul.mubr.bf16.gmra.mxu1 %v1591_v23 }
  0x3b   :  { %1504 = vmatprep.mubr.bf16.mxu0 %v1592_v24  ;;  %1536 = vmatprep.mubr.bf16.mxu1 %v1593_v25 }
  0x42   :  { %1505 = vmatmul.mubr.bf16.gmra.mxu0 %v1594_v26  ;;  %1537 = vmatmul.mubr.bf16.gmra.mxu1 %v1595_v27 }
  0x43   :  { %1508 = vmatprep.mubr.bf16.mxu0 %v1596_v28  ;;  %1540 = vmatprep.mubr.bf16.mxu1 %v1597_v29 }
  0x4a   :  { %1509 = vmatmul.mubr.bf16.gmra.mxu0 %v1598_v30  ;;  %1541 = vmatmul.mubr.bf16.gmra.mxu1 %v1599_v31 }
  0x4b   :  { %1512 = vmatprep.mubr.bf16.mxu0 %v1600_v32  ;;  %1544 = vmatprep.mubr.bf16.mxu1 %v1601_v33 }
  0x52   :  { %1513 = vmatmul.mubr.bf16.gmra.mxu0 %v1602_v34  ;;  %1545 = vmatmul.mubr.bf16.gmra.mxu1 %v1603_v35 }
  0x53   :  { %1516 = vmatprep.mubr.bf16.mxu0 %v1604_v36  ;;  %1548 = vmatprep.mubr.bf16.mxu1 %v1605_v37 }
  0x5a   :  { %1517 = vmatmul.mubr.bf16.gmra.mxu0 %v1606_v38  ;;  %1549 = vmatmul.mubr.bf16.gmra.mxu1 %v1607_v39 }
  0xe2   :  { %v1490_v40 = vpop.f32.mrf.mxu0  ;;  %v1522_v41 = vpop.f32.mrf.mxu1 }
  0xe3   :  { %v623_v42 = vmul.f32 0.2, %v1490_v40  ;;  %v655_v43 = vmul.f32 0.2, %v1522_v41 }
  0xe4   :  { %v366_v44 = vpop.f32.mrf.mxu0  ;;  %v494_v45 = vpop.f32.mrf.mxu1 }
  0xe5   :  { %v621_v46 = vmul.f32 0.2, %v366_v44  ;;  %v653_v47 = vmul.f32 0.2, %v494_v45  ;;  %v687_v52 = vmax.f32 %v1490_v40, %v623_v42  ;;  %v719_v53 = vmax.f32 %v1522_v41, %v655_v43 }
  0xe6   :  { %v1491_v48 = vpop.f32.mrf.mxu0  ;;  %v1523_v49 = vpop.f32.mrf.mxu1 }
  0xe7   :  { %v624_v50 = vmul.f32 0.2, %v1491_v48  ;;  %v656_v51 = vmul.f32 0.2, %v1523_v49  ;;  %v685_v60 = vmax.f32 %v366_v44, %v621_v46  ;;  %v717_v61 = vmax.f32 %v494_v45, %v653_v47 }
  0xe8   :  { %v369_v54 = vpop.f32.mrf.mxu0  ;;  %v497_v55 = vpop.f32.mrf.mxu1 }
  0xe9   :  { %v688_v56 = vmax.f32 %v1491_v48, %v624_v50  ;;  %v720_v57 = vmax.f32 %v1523_v49, %v656_v51  ;;  %v622_v58 = vmul.f32 0.2, %v369_v54  ;;  %v654_v59 = vmul.f32 0.2, %v497_v55 }
  0xea   :  { %v1494_v62 = vpop.f32.mrf.mxu0  ;;  %v1526_v63 = vpop.f32.mrf.mxu1 }
  0xeb   :  { %v1249_v0 = vpack.c.bf16 %v688_v56, %v687_v52  ;;  %v1329_v1 = vpack.c.bf16 %v720_v57, %v719_v53  ;;  %v686_v2 = vmax.f32 %v369_v54, %v622_v58  ;;  %v718_v3 = vmax.f32 %v497_v55, %v654_v59 }
  0xec   :  { %v627_v4 = vmul.f32 0.2, %v1494_v62  ;;  %v659_v5 = vmul.f32 0.2, %v1526_v63  ;;  %v382_v6 = vpop.f32.mrf.mxu0  ;;  %v510_v7 = vpop.f32.mrf.mxu1 }
  0xed   :  { %1401 = vst [vmem:[%s1841_s2 + $0x8] sm:$0xff] %v1249_v0   ;;  %1417 = vst [vmem:[%s1841_s2 + $0x88] sm:$0xff] %v1329_v1   ;;  %v1244_v8 = vpack.c.bf16 %v686_v2, %v685_v60  ;;  %v1324_v9 = vpack.c.bf16 %v718_v3, %v717_v61  ;;  %v625_v10 = vmul.f32 0.2, %v382_v6  ;;  %v657_v11 = vmul.f32 0.2, %v510_v7 }
  0xee   :  { %v1495_v12 = vpop.f32.mrf.mxu0  ;;  %v1527_v13 = vpop.f32.mrf.mxu1  ;;  %v691_v16 = vmax.f32 %v1494_v62, %v627_v4  ;;  %v723_v17 = vmax.f32 %v1526_v63, %v659_v5 }
  0xef   :  { %1245 = vst [vmem:[%s1841_s2] sm:$0xff] %v1244_v8   ;;  %1416 = vst [vmem:[%s1841_s2 + $0x80] sm:$0xff] %v1324_v9   ;;  %v628_v14 = vmul.f32 0.2, %v1495_v12  ;;  %v660_v15 = vmul.f32 0.2, %v1527_v13  ;;  %v689_v24 = vmax.f32 %v382_v6, %v625_v10  ;;  %v721_v25 = vmax.f32 %v510_v7, %v657_v11 }
  0xf0   :  { %v385_v18 = vpop.f32.mrf.mxu0  ;;  %v513_v19 = vpop.f32.mrf.mxu1 }
  0xf1   :  { %v692_v20 = vmax.f32 %v1495_v12, %v628_v14  ;;  %v724_v21 = vmax.f32 %v1527_v13, %v660_v15  ;;  %v626_v22 = vmul.f32 0.2, %v385_v18  ;;  %v658_v23 = vmul.f32 0.2, %v513_v19 }
  0xf2   :  { %v1498_v26 = vpop.f32.mrf.mxu0  ;;  %v1530_v27 = vpop.f32.mrf.mxu1 }
  0xf3   :  { %v1259_v28 = vpack.c.bf16 %v692_v20, %v691_v16  ;;  %v1339_v29 = vpack.c.bf16 %v724_v21, %v723_v17  ;;  %v690_v30 = vmax.f32 %v385_v18, %v626_v22  ;;  %v722_v31 = vmax.f32 %v513_v19, %v658_v23 }
  0xf4   :  { %v631_v32 = vmul.f32 0.2, %v1498_v26  ;;  %v663_v33 = vmul.f32 0.2, %v1530_v27  ;;  %v398_v34 = vpop.f32.mrf.mxu0  ;;  %v526_v35 = vpop.f32.mrf.mxu1 }
  0xf5   :  { %1403 = vst [vmem:[%s1841_s2 + $0x18] sm:$0xff] %v1259_v28   ;;  %1419 = vst [vmem:[%s1841_s2 + $0x98] sm:$0xff] %v1339_v29   ;;  %v1254_v36 = vpack.c.bf16 %v690_v30, %v689_v24  ;;  %v1334_v37 = vpack.c.bf16 %v722_v31, %v721_v25  ;;  %v629_v38 = vmul.f32 0.2, %v398_v34  ;;  %v661_v39 = vmul.f32 0.2, %v526_v35 }
  0xf6   :  { %v1499_v40 = vpop.f32.mrf.mxu0  ;;  %v1531_v41 = vpop.f32.mrf.mxu1  ;;  %v695_v44 = vmax.f32 %v1498_v26, %v631_v32  ;;  %v727_v45 = vmax.f32 %v1530_v27, %v663_v33 }
  0xf7   :  { %1402 = vst [vmem:[%s1841_s2 + $0x10] sm:$0xff] %v1254_v36   ;;  %1418 = vst [vmem:[%s1841_s2 + $0x90] sm:$0xff] %v1334_v37   ;;  %v632_v42 = vmul.f32 0.2, %v1499_v40  ;;  %v664_v43 = vmul.f32 0.2, %v1531_v41  ;;  %v693_v52 = vmax.f32 %v398_v34, %v629_v38  ;;  %v725_v53 = vmax.f32 %v526_v35, %v661_v39 }
  0xf8   :  { %v401_v46 = vpop.f32.mrf.mxu0  ;;  %v529_v47 = vpop.f32.mrf.mxu1 }
  0xf9   :  { %v696_v48 = vmax.f32 %v1499_v40, %v632_v42  ;;  %v728_v49 = vmax.f32 %v1531_v41, %v664_v43  ;;  %v630_v50 = vmul.f32 0.2, %v401_v46  ;;  %v662_v51 = vmul.f32 0.2, %v529_v47 }
  0xfa   :  { %v1502_v54 = vpop.f32.mrf.mxu0  ;;  %v1534_v55 = vpop.f32.mrf.mxu1 }
  0xfb   :  { %v1269_v56 = vpack.c.bf16 %v696_v48, %v695_v44  ;;  %v1349_v57 = vpack.c.bf16 %v728_v49, %v727_v45  ;;  %v694_v58 = vmax.f32 %v401_v46, %v630_v50  ;;  %v726_v59 = vmax.f32 %v529_v47, %v662_v51 }
  0xfc   :  { %v635_v60 = vmul.f32 0.2, %v1502_v54  ;;  %v667_v61 = vmul.f32 0.2, %v1534_v55  ;;  %v414_v62 = vpop.f32.mrf.mxu0  ;;  %v542_v63 = vpop.f32.mrf.mxu1 }
  0xfd   :  { %1405 = vst [vmem:[%s1841_s2 + $0x28] sm:$0xff] %v1269_v56   ;;  %1421 = vst [vmem:[%s1841_s2 + $0xa8] sm:$0xff] %v1349_v57   ;;  %v1264_v0 = vpack.c.bf16 %v694_v58, %v693_v52  ;;  %v1344_v1 = vpack.c.bf16 %v726_v59, %v725_v53  ;;  %v633_v2 = vmul.f32 0.2, %v414_v62  ;;  %v665_v3 = vmul.f32 0.2, %v542_v63 }
  0xfe   :  { %v1503_v4 = vpop.f32.mrf.mxu0  ;;  %v1535_v5 = vpop.f32.mrf.mxu1  ;;  %v699_v8 = vmax.f32 %v1502_v54, %v635_v60  ;;  %v731_v9 = vmax.f32 %v1534_v55, %v667_v61 }
  0xff   :  { %1404 = vst [vmem:[%s1841_s2 + $0x20] sm:$0xff] %v1264_v0   ;;  %1420 = vst [vmem:[%s1841_s2 + $0xa0] sm:$0xff] %v1344_v1   ;;  %v636_v6 = vmul.f32 0.2, %v1503_v4  ;;  %v668_v7 = vmul.f32 0.2, %v1535_v5  ;;  %v697_v16 = vmax.f32 %v414_v62, %v633_v2  ;;  %v729_v17 = vmax.f32 %v542_v63, %v665_v3 }
 0x100   :  { %v417_v10 = vpop.f32.mrf.mxu0  ;;  %v545_v11 = vpop.f32.mrf.mxu1 }
 0x101   :  { %v700_v12 = vmax.f32 %v1503_v4, %v636_v6  ;;  %v732_v13 = vmax.f32 %v1535_v5, %v668_v7  ;;  %v634_v14 = vmul.f32 0.2, %v417_v10  ;;  %v666_v15 = vmul.f32 0.2, %v545_v11 }
 0x102   :  { %v1506_v18 = vpop.f32.mrf.mxu0  ;;  %v1538_v19 = vpop.f32.mrf.mxu1 }
 0x103   :  { %v1279_v20 = vpack.c.bf16 %v700_v12, %v699_v8  ;;  %v1359_v21 = vpack.c.bf16 %v732_v13, %v731_v9  ;;  %v698_v22 = vmax.f32 %v417_v10, %v634_v14  ;;  %v730_v23 = vmax.f32 %v545_v11, %v666_v15 }
 0x104   :  { %v639_v24 = vmul.f32 0.2, %v1506_v18  ;;  %v671_v25 = vmul.f32 0.2, %v1538_v19  ;;  %v430_v26 = vpop.f32.mrf.mxu0  ;;  %v558_v27 = vpop.f32.mrf.mxu1 }
 0x105   :  { %1407 = vst [vmem:[%s1841_s2 + $0x38] sm:$0xff] %v1279_v20   ;;  %1423 = vst [vmem:[%s1841_s2 + $0xb8] sm:$0xff] %v1359_v21   ;;  %v1274_v28 = vpack.c.bf16 %v698_v22, %v697_v16  ;;  %v1354_v29 = vpack.c.bf16 %v730_v23, %v729_v17  ;;  %v637_v30 = vmul.f32 0.2, %v430_v26  ;;  %v669_v31 = vmul.f32 0.2, %v558_v27 }
 0x106   :  { %v1507_v32 = vpop.f32.mrf.mxu0  ;;  %v1539_v33 = vpop.f32.mrf.mxu1  ;;  %v703_v36 = vmax.f32 %v1506_v18, %v639_v24  ;;  %v735_v37 = vmax.f32 %v1538_v19, %v671_v25 }
 0x107   :  { %1406 = vst [vmem:[%s1841_s2 + $0x30] sm:$0xff] %v1274_v28   ;;  %1422 = vst [vmem:[%s1841_s2 + $0xb0] sm:$0xff] %v1354_v29   ;;  %v640_v34 = vmul.f32 0.2, %v1507_v32  ;;  %v672_v35 = vmul.f32 0.2, %v1539_v33  ;;  %v701_v44 = vmax.f32 %v430_v26, %v637_v30  ;;  %v733_v45 = vmax.f32 %v558_v27, %v669_v31 }
 0x108   :  { %v433_v38 = vpop.f32.mrf.mxu0  ;;  %v561_v39 = vpop.f32.mrf.mxu1 }
 0x109   :  { %v704_v40 = vmax.f32 %v1507_v32, %v640_v34  ;;  %v736_v41 = vmax.f32 %v1539_v33, %v672_v35  ;;  %v638_v42 = vmul.f32 0.2, %v433_v38  ;;  %v670_v43 = vmul.f32 0.2, %v561_v39 }
 0x10a   :  { %v1510_v46 = vpop.f32.mrf.mxu0  ;;  %v1542_v47 = vpop.f32.mrf.mxu1 }
 0x10b   :  { %v1289_v48 = vpack.c.bf16 %v704_v40, %v703_v36  ;;  %v1369_v49 = vpack.c.bf16 %v736_v41, %v735_v37  ;;  %v702_v50 = vmax.f32 %v433_v38, %v638_v42  ;;  %v734_v51 = vmax.f32 %v561_v39, %v670_v43 }
 0x10c   :  { %v643_v52 = vmul.f32 0.2, %v1510_v46  ;;  %v675_v53 = vmul.f32 0.2, %v1542_v47  ;;  %v446_v54 = vpop.f32.mrf.mxu0  ;;  %v574_v55 = vpop.f32.mrf.mxu1 }
 0x10d   :  { %1409 = vst [vmem:[%s1841_s2 + $0x48] sm:$0xff] %v1289_v48   ;;  %1425 = vst [vmem:[%s1841_s2 + $0xc8] sm:$0xff] %v1369_v49   ;;  %v1284_v56 = vpack.c.bf16 %v702_v50, %v701_v44  ;;  %v1364_v57 = vpack.c.bf16 %v734_v51, %v733_v45  ;;  %v641_v58 = vmul.f32 0.2, %v446_v54  ;;  %v673_v59 = vmul.f32 0.2, %v574_v55 }
 0x10e   :  { %v1511_v60 = vpop.f32.mrf.mxu0  ;;  %v1543_v61 = vpop.f32.mrf.mxu1  ;;  %v707_v0 = vmax.f32 %v1510_v46, %v643_v52  ;;  %v739_v1 = vmax.f32 %v1542_v47, %v675_v53 }
 0x10f   :  { %1408 = vst [vmem:[%s1841_s2 + $0x40] sm:$0xff] %v1284_v56   ;;  %1424 = vst [vmem:[%s1841_s2 + $0xc0] sm:$0xff] %v1364_v57   ;;  %v644_v62 = vmul.f32 0.2, %v1511_v60  ;;  %v676_v63 = vmul.f32 0.2, %v1543_v61  ;;  %v705_v8 = vmax.f32 %v446_v54, %v641_v58  ;;  %v737_v9 = vmax.f32 %v574_v55, %v673_v59 }
 0x110   :  { %v449_v2 = vpop.f32.mrf.mxu0  ;;  %v577_v3 = vpop.f32.mrf.mxu1 }
 0x111   :  { %v708_v4 = vmax.f32 %v1511_v60, %v644_v62  ;;  %v740_v5 = vmax.f32 %v1543_v61, %v676_v63  ;;  %v642_v6 = vmul.f32 0.2, %v449_v2  ;;  %v674_v7 = vmul.f32 0.2, %v577_v3 }
 0x112   :  { %v1514_v10 = vpop.f32.mrf.mxu0  ;;  %v1546_v11 = vpop.f32.mrf.mxu1 }
 0x113   :  { %v1299_v12 = vpack.c.bf16 %v708_v4, %v707_v0  ;;  %v1379_v13 = vpack.c.bf16 %v740_v5, %v739_v1  ;;  %v706_v14 = vmax.f32 %v449_v2, %v642_v6  ;;  %v738_v15 = vmax.f32 %v577_v3, %v674_v7 }
 0x114   :  { %v647_v16 = vmul.f32 0.2, %v1514_v10  ;;  %v679_v17 = vmul.f32 0.2, %v1546_v11  ;;  %v462_v18 = vpop.f32.mrf.mxu0  ;;  %v590_v19 = vpop.f32.mrf.mxu1 }
 0x115   :  { %1411 = vst [vmem:[%s1841_s2 + $0x58] sm:$0xff] %v1299_v12   ;;  %1427 = vst [vmem:[%s1841_s2 + $0xd8] sm:$0xff] %v1379_v13   ;;  %v1294_v20 = vpack.c.bf16 %v706_v14, %v705_v8  ;;  %v1374_v21 = vpack.c.bf16 %v738_v15, %v737_v9  ;;  %v645_v22 = vmul.f32 0.2, %v462_v18  ;;  %v677_v23 = vmul.f32 0.2, %v590_v19 }
 0x116   :  { %v1515_v24 = vpop.f32.mrf.mxu0  ;;  %v1547_v25 = vpop.f32.mrf.mxu1  ;;  %v711_v28 = vmax.f32 %v1514_v10, %v647_v16  ;;  %v743_v29 = vmax.f32 %v1546_v11, %v679_v17 }
 0x117   :  { %1410 = vst [vmem:[%s1841_s2 + $0x50] sm:$0xff] %v1294_v20   ;;  %1426 = vst [vmem:[%s1841_s2 + $0xd0] sm:$0xff] %v1374_v21   ;;  %v648_v26 = vmul.f32 0.2, %v1515_v24  ;;  %v680_v27 = vmul.f32 0.2, %v1547_v25  ;;  %v709_v36 = vmax.f32 %v462_v18, %v645_v22  ;;  %v741_v37 = vmax.f32 %v590_v19, %v677_v23 }
 0x118   :  { %v465_v30 = vpop.f32.mrf.mxu0  ;;  %v593_v31 = vpop.f32.mrf.mxu1 }
 0x119   :  { %v712_v32 = vmax.f32 %v1515_v24, %v648_v26  ;;  %v744_v33 = vmax.f32 %v1547_v25, %v680_v27  ;;  %v646_v34 = vmul.f32 0.2, %v465_v30  ;;  %v678_v35 = vmul.f32 0.2, %v593_v31 }
 0x11a   :  { %v1518_v38 = vpop.f32.mrf.mxu0  ;;  %v1550_v39 = vpop.f32.mrf.mxu1 }
 0x11b   :  { %v1309_v40 = vpack.c.bf16 %v712_v32, %v711_v28  ;;  %v1389_v41 = vpack.c.bf16 %v744_v33, %v743_v29  ;;  %v710_v42 = vmax.f32 %v465_v30, %v646_v34  ;;  %v742_v43 = vmax.f32 %v593_v31, %v678_v35 }
 0x11c   :  { %v651_v44 = vmul.f32 0.2, %v1518_v38  ;;  %v683_v45 = vmul.f32 0.2, %v1550_v39  ;;  %v478_v46 = vpop.f32.mrf.mxu0  ;;  %v606_v47 = vpop.f32.mrf.mxu1 }
 0x11d   :  { %1413 = vst [vmem:[%s1841_s2 + $0x68] sm:$0xff] %v1309_v40   ;;  %1429 = vst [vmem:[%s1841_s2 + $0xe8] sm:$0xff] %v1389_v41   ;;  %v1304_v48 = vpack.c.bf16 %v710_v42, %v709_v36  ;;  %v1384_v49 = vpack.c.bf16 %v742_v43, %v741_v37  ;;  %v649_v50 = vmul.f32 0.2, %v478_v46  ;;  %v681_v51 = vmul.f32 0.2, %v606_v47 }
 0x11e   :  { %v1519_v52 = vpop.f32.mrf.mxu0  ;;  %v1551_v53 = vpop.f32.mrf.mxu1  ;;  %v715_v56 = vmax.f32 %v1518_v38, %v651_v44  ;;  %v747_v57 = vmax.f32 %v1550_v39, %v683_v45 }
 0x11f   :  { %1412 = vst [vmem:[%s1841_s2 + $0x60] sm:$0xff] %v1304_v48   ;;  %1428 = vst [vmem:[%s1841_s2 + $0xe0] sm:$0xff] %v1384_v49   ;;  %v652_v54 = vmul.f32 0.2, %v1519_v52  ;;  %v684_v55 = vmul.f32 0.2, %v1551_v53  ;;  %v713_v0 = vmax.f32 %v478_v46, %v649_v50  ;;  %v745_v1 = vmax.f32 %v606_v47, %v681_v51 }
 0x120   :  { %v481_v58 = vpop.f32.mrf.mxu0  ;;  %v609_v59 = vpop.f32.mrf.mxu1 }
 0x121   :  { %v716_v60 = vmax.f32 %v1519_v52, %v652_v54  ;;  %v748_v61 = vmax.f32 %v1551_v53, %v684_v55  ;;  %v650_v62 = vmul.f32 0.2, %v481_v58  ;;  %v682_v63 = vmul.f32 0.2, %v609_v59 }
 0x123   :  { %v1319_v2 = vpack.c.bf16 %v716_v60, %v715_v56  ;;  %v1399_v3 = vpack.c.bf16 %v748_v61, %v747_v57  ;;  %v714_v4 = vmax.f32 %v481_v58, %v650_v62  ;;  %v746_v5 = vmax.f32 %v609_v59, %v682_v63 }
 0x125   :  { %1415 = vst [vmem:[%s1841_s2 + $0x78] sm:$0xff] %v1319_v2   ;;  %1431 = vst [vmem:[%s1841_s2 + $0xf8] sm:$0xff] %v1399_v3   ;;  %v1314_v6 = vpack.c.bf16 %v714_v4, %v713_v0  ;;  %v1394_v7 = vpack.c.bf16 %v746_v5, %v745_v1 }
 0x127   :  { %1414 = vst [vmem:[%s1841_s2 + $0x70] sm:$0xff] %v1314_v6   ;;  %1430 = vst [vmem:[%s1841_s2 + $0xf0] sm:$0xff] %v1394_v7  }

// kernel: discriminator_forward.8
= control target key start
LH: loop header
LB: loop body
LE: loop exit
PB: predicated region body
PF: predicated region fallthrough
CT: control target
= control target key end

     0   :  { %vm1372_vm0 = vcmask 1040384   ;;  %s2472_s1 = inlined_call_operand.vmem [shape: bf16[1024,128], index: 1, kind: input, shape index: {}]   ;;  %s2473_s0 = inlined_call_operand.vmem [shape: bf16[128,1024], index: 0, kind: input, shape index: {}]   ;;  %s2474_s2 = inlined_call_operand.vmem [shape: f32[128,128], index: 2, kind: output, shape index: {0}]   ;;  %s2475_s3 = inlined_call_operand.vmem [shape: f32[1,2,128], index: 3, kind: output, shape index: {1}]  }
   0x1   :  { %v1767_v0 = vld [vmem:[%s2472_s1 + $0x78] sm:$0xff]   ;;  %v1771_v4 = vld [vmem:[%s2472_s1 + $0x70] sm:$0xff]   ;;  %v1775_v8 = vld [vmem:[%s2472_s1 + $0x68] sm:$0xff]  }
   0x2   :  { %v1768_v1 = vld [vmem:[%s2472_s1 + $0xf8] sm:$0xff]   ;;  %1511 = vmatprep.subr.bf16.mxu0 %v1767_v0  ;;  %v1772_v5 = vld [vmem:[%s2472_s1 + $0xf0] sm:$0xff]   ;;  %v1776_v9 = vld [vmem:[%s2472_s1 + $0xe8] sm:$0xff]  }
   0x3   :  { %v1769_v2 = vld [vmem:[%s2472_s1 + $0x38] sm:$0xff]   ;;  %1575 = vmatprep.subr.bf16.mxu1 %v1768_v1  ;;  %v1773_v6 = vld [vmem:[%s2472_s1 + $0x30] sm:$0xff]   ;;  %v1777_v10 = vld [vmem:[%s2472_s1 + $0x28] sm:$0xff]  }
   0x4   :  { %v1770_v3 = vld [vmem:[%s2472_s1 + $0xb8] sm:$0xff]   ;;  %1512 = vmatpush3.bf16.msra.mxu0 %v1769_v2  ;;  %v1774_v7 = vld [vmem:[%s2472_s1 + $0xb0] sm:$0xff]   ;;  %v1778_v11 = vld [vmem:[%s2472_s1 + $0xa8] sm:$0xff]  }
   0x5   :  { %1576 = vmatpush3.bf16.msra.mxu1 %v1770_v3  ;;  %1513 = vmatprep.subr.bf16.mxu0 %v1771_v4  ;;  %v1779_v12 = vld [vmem:[%s2472_s1 + $0x60] sm:$0xff]   ;;  %v1783_v16 = vld [vmem:[%s2472_s1 + $0x58] sm:$0xff]   ;;  %v1787_v20 = vld [vmem:[%s2472_s1 + $0x50] sm:$0xff]  }
   0x6   :  { %1577 = vmatprep.subr.bf16.mxu1 %v1772_v5  ;;  %v1780_v13 = vld [vmem:[%s2472_s1 + $0xe0] sm:$0xff]   ;;  %v1784_v17 = vld [vmem:[%s2472_s1 + $0xd8] sm:$0xff]   ;;  %v1788_v21 = vld [vmem:[%s2472_s1 + $0xd0] sm:$0xff]  }
   0x7   :  { %v1781_v14 = vld [vmem:[%s2472_s1 + $0x20] sm:$0xff]   ;;  %v1785_v18 = vld [vmem:[%s2472_s1 + $0x18] sm:$0xff]   ;;  %v1789_v22 = vld [vmem:[%s2472_s1 + $0x10] sm:$0xff]  }
   0x8   :  { %1514 = vmatpush3.bf16.msra.mxu0 %v1773_v6  ;;  %v1782_v15 = vld [vmem:[%s2472_s1 + $0xa0] sm:$0xff]   ;;  %v1786_v19 = vld [vmem:[%s2472_s1 + $0x98] sm:$0xff]   ;;  %v1790_v23 = vld [vmem:[%s2472_s1 + $0x90] sm:$0xff]  }
   0x9   :  { %1578 = vmatpush3.bf16.msra.mxu1 %v1774_v7  ;;  %1515 = vmatprep.subr.bf16.mxu0 %v1775_v8  ;;  %v1791_v24 = vld [vmem:[%s2472_s1 + $0x48] sm:$0xff]   ;;  %v1795_v28 = vld [vmem:[%s2472_s1 + $0x40] sm:$0xff]   ;;  %v1799_v40 = vld [vmem:[%s2472_s1 + $0x178] sm:$0xff]  }
   0xa   :  { %1579 = vmatprep.subr.bf16.mxu1 %v1776_v9  ;;  %v1792_v25 = vld [vmem:[%s2472_s1 + $0xc8] sm:$0xff]   ;;  %v1796_v29 = vld [vmem:[%s2472_s1 + $0xc0] sm:$0xff]   ;;  %v1800_v41 = vld [vmem:[%s2472_s1 + $0x138] sm:$0xff]  }
   0xb   :  { %v1793_v26 = vld [vmem:[%s2472_s1 + $0x8] sm:$0xff]   ;;  %v1797_v30 = vld [vmem:[%s2472_s1] sm:$0xff]   ;;  %v1801_v42 = vld [vmem:[%s2472_s1 + $0x1f8] sm:$0xff]  }
   0xc   :  { %1516 = vmatpush3.bf16.msra.mxu0 %v1777_v10  ;;  %v1794_v27 = vld [vmem:[%s2472_s1 + $0x88] sm:$0xff]   ;;  %v1798_v31 = vld [vmem:[%s2472_s1 + $0x80] sm:$0xff]   ;;  %v1802_v43 = vld [vmem:[%s2472_s1 + $0x1b8] sm:$0xff]  }
   0xd   :  { %1580 = vmatpush3.bf16.msra.mxu1 %v1778_v11  ;;  %1517 = vmatprep.subr.bf16.mxu0 %v1779_v12  ;;  %v14_v32 = vld [vmem:[%s2473_s0] sm:$0xff]  ;;  %v15_v34 = vld [vmem:[%s2473_s0 + $0x8] sm:$0xff]  ;;  %v1803_v50 = vld [vmem:[%s2472_s1 + $0x170] sm:$0xff]  }
   0xe   :  { %1581 = vmatprep.subr.bf16.mxu1 %v1780_v13  ;;  %v18_v33 = vld [vmem:[%s2473_s0 + $0x20] sm:$0xff]  ;;  %v19_v37 = vld [vmem:[%s2473_s0 + $0x28] sm:$0xff]  ;;  %v1804_v52 = vld [vmem:[%s2472_s1 + $0x130] sm:$0xff]  }
   0xf   :  { %v1383_v35 = vcombine.low %v14_v32, %v18_v33  ;;  %v1384_v36 = vcombine.high %v14_v32, %v18_v33  ;;  %v1385_v38 = vcombine.low %v15_v34, %v19_v37  ;;  %v1386_v39 = vcombine.high %v15_v34, %v19_v37  ;;  %v22_v44 = vld [vmem:[%s2473_s0 + $0x40] sm:$0xff]  ;;  %v23_v47 = vld [vmem:[%s2473_s0 + $0x48] sm:$0xff]  ;;  %v1805_v54 = vld [vmem:[%s2472_s1 + $0x1f0] sm:$0xff]  }
  0x10   :  { %1518 = vmatpush3.bf16.msra.mxu0 %v1781_v14  ;;  %v26_v45 = vld [vmem:[%s2473_s0 + $0x60] sm:$0xff]  ;;  %v27_v48 = vld [vmem:[%s2473_s0 + $0x68] sm:$0xff]  ;;  %v1806_v55 = vld [vmem:[%s2472_s1 + $0x1b0] sm:$0xff]  }
  0x11   :  { %1582 = vmatpush3.bf16.msra.mxu1 %v1782_v15  ;;  %1519 = vmatprep.subr.bf16.mxu0 %v1783_v16  ;;  %v1392_v46 = vcombine.high %v22_v44, %v26_v45  ;;  %v1394_v49 = vcombine.high %v23_v47, %v27_v48  ;;  %v1391_v51 = vcombine.low %v22_v44, %v26_v45  ;;  %v30_v56 = vld [vmem:[%s2473_s0 + $0x80] sm:$0xff]  ;;  %v31_v58 = vld [vmem:[%s2473_s0 + $0x88] sm:$0xff]  ;;  %v1821_v32 = vld [vmem:[%s2472_s1 + $0x1d0] sm:$0xff]  }
  0x12   :  { %1583 = vmatprep.subr.bf16.mxu1 %v1784_v17  ;;  %942 = vmatprep.mubr.bf16.mxu0 %v1384_v36  ;;  %v1393_v53 = vcombine.low %v23_v47, %v27_v48  ;;  %v34_v57 = vld [vmem:[%s2473_s0 + $0xa0] sm:$0xff]  ;;  %v35_v59 = vld [vmem:[%s2473_s0 + $0xa8] sm:$0xff]  ;;  %v1822_v33 = vld [vmem:[%s2472_s1 + $0x190] sm:$0xff]  }
  0x13   :  { %1039 = vmatprep.mubr.bf16.mxu1 %v1386_v39  ;;  %v1400_v60 = vcombine.high %v30_v56, %v34_v57  ;;  %v1402_v61 = vcombine.high %v31_v58, %v35_v59  ;;  %v1807_v62 = vld [vmem:[%s2472_s1 + $0x168] sm:$0xff]   ;;  %v1399_v2 = vcombine.low %v30_v56, %v34_v57  ;;  %v38_v3 = vld [vmem:[%s2473_s0 + $0xc0] sm:$0xff]  ;;  %v1401_v6 = vcombine.low %v31_v58, %v35_v59 }
  0x14   :  { %1520 = vmatpush3.bf16.msra.mxu0 %v1785_v18  ;;  %v1808_v63 = vld [vmem:[%s2472_s1 + $0x128] sm:$0xff]   ;;  %v42_v4 = vld [vmem:[%s2473_s0 + $0xe0] sm:$0xff]  ;;  %v1815_v18 = vld [vmem:[%s2472_s1 + $0x158] sm:$0xff]  }
  0x15   :  { %1584 = vmatpush3.bf16.msra.mxu1 %v1786_v19  ;;  %1521 = vmatprep.subr.bf16.mxu0 %v1787_v20  ;;  %v1809_v0 = vld [vmem:[%s2472_s1 + $0x1e8] sm:$0xff]   ;;  %v1408_v7 = vcombine.high %v38_v3, %v42_v4  ;;  %v1811_v10 = vld [vmem:[%s2472_s1 + $0x160] sm:$0xff]   ;;  %v1407_v19 = vcombine.low %v38_v3, %v42_v4  ;;  %v1816_v20 = vld [vmem:[%s2472_s1 + $0x118] sm:$0xff]  }
  0x16   :  { %1585 = vmatprep.subr.bf16.mxu1 %v1788_v21  ;;  %v1810_v1 = vld [vmem:[%s2472_s1 + $0x1a8] sm:$0xff]   ;;  %v1812_v11 = vld [vmem:[%s2472_s1 + $0x120] sm:$0xff]  }
  0x17   :  { %v39_v5 = vld [vmem:[%s2473_s0 + $0xc8] sm:$0xff]  ;;  %v1813_v12 = vld [vmem:[%s2472_s1 + $0x1e0] sm:$0xff]  }
  0x18   :  { %1522 = vmatpush3.bf16.msra.mxu0 %v1789_v22  ;;  %v43_v8 = vld [vmem:[%s2473_s0 + $0xe8] sm:$0xff]  ;;  %v1814_v13 = vld [vmem:[%s2472_s1 + $0x1a0] sm:$0xff]  }
  0x19   :  { %1586 = vmatpush3.bf16.msra.mxu1 %v1790_v23  ;;  %1523 = vmatprep.subr.bf16.mxu0 %v1791_v24  ;;  %v1410_v9 = vcombine.high %v39_v5, %v43_v8  ;;  %v46_v14 = vld [vmem:[%s2473_s0 + $0x100] sm:$0xff]  ;;  %v47_v16 = vld [vmem:[%s2473_s0 + $0x108] sm:$0xff]  ;;  %v1409_v21 = vcombine.low %v39_v5, %v43_v8  ;;  %v1817_v23 = vld [vmem:[%s2472_s1 + $0x1d8] sm:$0xff]  }
  0x1a   :  { %1587 = vmatprep.subr.bf16.mxu1 %v1792_v25  ;;  %v50_v15 = vld [vmem:[%s2473_s0 + $0x120] sm:$0xff]  ;;  %v51_v17 = vld [vmem:[%s2473_s0 + $0x128] sm:$0xff]  ;;  %v1818_v25 = vld [vmem:[%s2472_s1 + $0x198] sm:$0xff]  }
  0x1b   :  { %v1416_v22 = vcombine.high %v46_v14, %v50_v15  ;;  %v1418_v24 = vcombine.high %v47_v16, %v51_v17  ;;  %v1415_v34 = vcombine.low %v46_v14, %v50_v15  ;;  %v1824_v39 = vld [vmem:[%s2472_s1 + $0x108] sm:$0xff]   ;;  %v1828_v48 = vld [vmem:[%s2472_s1 + $0x100] sm:$0xff]   ;;  %v25_v8 = vld [vmem:[%s2473_s0 + $0x58] sm:$0xff] }
  0x1c   :  { %1524 = vmatpush3.bf16.msra.mxu0 %v1793_v26  ;;  %v54_v26 = vld [vmem:[%s2473_s0 + $0x140] sm:$0xff]  ;;  %v63_v44 = vld [vmem:[%s2473_s0 + $0x188] sm:$0xff]  ;;  %v32_v14 = vld [vmem:[%s2473_s0 + $0x90] sm:$0xff] }
  0x1d   :  { %1588 = vmatpush3.bf16.msra.mxu1 %v1794_v27  ;;  %1525 = vmatprep.subr.bf16.mxu0 %v1795_v28  ;;  %v58_v27 = vld [vmem:[%s2473_s0 + $0x160] sm:$0xff]  ;;  %v1819_v28 = vld [vmem:[%s2472_s1 + $0x150] sm:$0xff]   ;;  %v67_v45 = vld [vmem:[%s2473_s0 + $0x1a8] sm:$0xff] }
  0x1e   :  { %1589 = vmatprep.subr.bf16.mxu1 %v1796_v29  ;;  %v55_v29 = vld [vmem:[%s2473_s0 + $0x148] sm:$0xff]  ;;  %v1424_v36 = vcombine.high %v54_v26, %v58_v27  ;;  %v1423_v47 = vcombine.low %v54_v26, %v58_v27  ;;  %v1433_v59 = vcombine.low %v63_v44, %v67_v45  ;;  %v36_v15 = vld [vmem:[%s2473_s0 + $0xb0] sm:$0xff] }
  0x1f   :  { %v71_v56 = vld [vmem:[%s2473_s0 + $0x1c8] sm:$0xff]  ;;  %v1403_v26 = vcombine.low %v32_v14, %v36_v15 }
  0x20   :  { %1526 = vmatpush3.bf16.msra.mxu0 %v1797_v30  ;;  %v59_v30 = vld [vmem:[%s2473_s0 + $0x168] sm:$0xff] }
  0x21   :  { %1590 = vmatpush3.bf16.msra.mxu1 %v1798_v31  ;;  %1639 = vmatprep.subr.bf16.mxu0 %v1799_v40  ;;  %v1820_v31 = vld [vmem:[%s2472_s1 + $0x110] sm:$0xff]   ;;  %v1426_v37 = vcombine.high %v55_v29, %v59_v30  ;;  %v1825_v40 = vld [vmem:[%s2472_s1 + $0x1c8] sm:$0xff]  }
  0x22   :  { %1703 = vmatprep.subr.bf16.mxu1 %v1801_v42  ;;  %v66_v42 = vld [vmem:[%s2473_s0 + $0x1a0] sm:$0xff]  ;;  %v75_v57 = vld [vmem:[%s2473_s0 + $0x1e8] sm:$0xff] }
  0x23   :  { %943 = vmatmul.mubr.bf16.vlgmr.msra.gmra.mxu0 %v1383_v35  ;;  %v1417_v35 = vcombine.low %v47_v16, %v51_v17  ;;  %v1441_v3 = vcombine.low %v71_v56, %v75_v57  ;;  %v33_v16 = vld [vmem:[%s2473_s0 + $0x98] sm:$0xff] }
  0x24   :  { %1040 = vmatmul.mubr.bf16.vlgmr.msra.gmra.mxu1 %v1385_v38  ;;  %1640 = vmatpush3.bf16.msra.mxu0 %v1800_v41  ;;  %v1823_v38 = vld [vmem:[%s2472_s1 + $0x148] sm:$0xff]   ;;  %v62_v41 = vld [vmem:[%s2473_s0 + $0x180] sm:$0xff]  ;;  %v37_v17 = vld [vmem:[%s2473_s0 + $0xb8] sm:$0xff] }
  0x25   :  { %1704 = vmatpush3.bf16.msra.mxu1 %v1802_v43  ;;  %950 = vmatprep.mubr.bf16.mxu0 %v1392_v46  ;;  %v1826_v43 = vld [vmem:[%s2472_s1 + $0x188] sm:$0xff]   ;;  %v1827_v46 = vld [vmem:[%s2472_s1 + $0x140] sm:$0xff]   ;;  %v1431_v58 = vcombine.low %v62_v41, %v66_v42  ;;  %v1405_v27 = vcombine.low %v33_v16, %v37_v17 }
  0x26   :  { %1047 = vmatprep.mubr.bf16.mxu1 %v1394_v49  ;;  %1641 = vmatprep.subr.bf16.mxu0 %v1803_v50  ;;  %v1425_v49 = vcombine.low %v55_v29, %v59_v30  ;;  %v1432_v50 = vcombine.high %v62_v41, %v66_v42  ;;  %v48_v30 = vld [vmem:[%s2473_s0 + $0x110] sm:$0xff]  ;;  %v61_v41 = vld [vmem:[%s2473_s0 + $0x178] sm:$0xff] }
  0x27   :  { %1705 = vmatprep.subr.bf16.mxu1 %v1805_v54  ;;  %v70_v54 = vld [vmem:[%s2473_s0 + $0x1c0] sm:$0xff] }
  0x28   :  { %1642 = vmatpush3.bf16.msra.mxu0 %v1804_v52  ;;  %v1434_v52 = vcombine.high %v63_v44, %v67_v45 }
  0x29   :  { %1706 = vmatpush3.bf16.msra.mxu1 %v1806_v55  ;;  %1643 = vmatprep.subr.bf16.mxu0 %v1807_v62  ;;  %v74_v55 = vld [vmem:[%s2473_s0 + $0x1e0] sm:$0xff]  ;;  %v16_v62 = vld [vmem:[%s2473_s0 + $0x10] sm:$0xff] }
  0x2a   :  { %1707 = vmatprep.subr.bf16.mxu1 %v1809_v0  ;;  %v17_v0 = vld [vmem:[%s2473_s0 + $0x18] sm:$0xff] }
  0x2b   :  { %951 = vmatmul.mubr.bf16.gmra.mxu0 %v1391_v51  ;;  %v1829_v51 = vld [vmem:[%s2472_s1 + $0x1c0] sm:$0xff]  }
  0x2c   :  { %1048 = vmatmul.mubr.bf16.gmra.mxu1 %v1393_v53  ;;  %958 = vmatprep.mubr.bf16.mxu0 %v1400_v60  ;;  %v1830_v53 = vld [vmem:[%s2472_s1 + $0x180] sm:$0xff]   ;;  %v1440_v60 = vcombine.high %v70_v54, %v74_v55 }
  0x2d   :  { %1055 = vmatprep.mubr.bf16.mxu1 %v1402_v61  ;;  %1644 = vmatpush3.bf16.msra.mxu0 %v1808_v63  ;;  %v1442_v61 = vcombine.high %v71_v56, %v75_v57  ;;  %v20_v63 = vld [vmem:[%s2473_s0 + $0x30] sm:$0xff]  ;;  %v73_v56 = vld [vmem:[%s2473_s0 + $0x1d8] sm:$0xff] }
  0x2e   :  { %1708 = vmatpush3.bf16.msra.mxu1 %v1810_v1  ;;  %1645 = vmatprep.subr.bf16.mxu0 %v1811_v10  ;;  %v21_v1 = vld [vmem:[%s2473_s0 + $0x38] sm:$0xff]  ;;  %v1388_v4 = vcombine.high %v16_v62, %v20_v63  ;;  %v1387_v10 = vcombine.low %v16_v62, %v20_v63 }
  0x2f   :  { %1709 = vmatprep.subr.bf16.mxu1 %v1813_v12  ;;  %v1390_v5 = vcombine.high %v17_v0, %v21_v1  ;;  %v77_v57 = vld [vmem:[%s2473_s0 + $0x1f8] sm:$0xff] }
  0x30   :  { %v1445_v63 = vcombine.low %v73_v56, %v77_v57 }
  0x31   :  { %1646 = vmatpush3.bf16.msra.mxu0 %v1812_v11  ;;  %v1389_v11 = vcombine.low %v17_v0, %v21_v1 }
  0x32   :  { %1710 = vmatpush3.bf16.msra.mxu1 %v1814_v13  ;;  %1647 = vmatprep.subr.bf16.mxu0 %v1815_v18 }
  0x33   :  { %959 = vmatmul.mubr.bf16.gmra.mxu0 %v1399_v2  ;;  %1711 = vmatprep.subr.bf16.mxu1 %v1817_v23  ;;  %v1439_v2 = vcombine.low %v70_v54, %v74_v55  ;;  %v44_v23 = vld [vmem:[%s2473_s0 + $0xf0] sm:$0xff] }
  0x34   :  { %1056 = vmatmul.mubr.bf16.gmra.mxu1 %v1401_v6  ;;  %966 = vmatprep.mubr.bf16.mxu0 %v1408_v7  ;;  %v24_v6 = vld [vmem:[%s2473_s0 + $0x50] sm:$0xff] }
  0x35   :  { %1063 = vmatprep.mubr.bf16.mxu1 %v1410_v9  ;;  %1648 = vmatpush3.bf16.msra.mxu0 %v1816_v20  ;;  %v28_v7 = vld [vmem:[%s2473_s0 + $0x70] sm:$0xff]  ;;  %v29_v9 = vld [vmem:[%s2473_s0 + $0x78] sm:$0xff]  ;;  %v1404_v20 = vcombine.high %v32_v14, %v36_v15 }
  0x36   :  { %1712 = vmatpush3.bf16.msra.mxu1 %v1818_v25  ;;  %1649 = vmatprep.subr.bf16.mxu0 %v1819_v28  ;;  %v1396_v12 = vcombine.high %v24_v6, %v28_v7  ;;  %v1398_v13 = vcombine.high %v25_v8, %v29_v9  ;;  %v1395_v18 = vcombine.low %v24_v6, %v28_v7  ;;  %v45_v25 = vld [vmem:[%s2473_s0 + $0xf8] sm:$0xff]  ;;  %v72_v54 = vld [vmem:[%s2473_s0 + $0x1d0] sm:$0xff] }
  0x37   :  { %1713 = vmatprep.subr.bf16.mxu1 %v1821_v32  ;;  %v49_v32 = vld [vmem:[%s2473_s0 + $0x118] sm:$0xff]  ;;  %v76_v55 = vld [vmem:[%s2473_s0 + $0x1f0] sm:$0xff] }
  0x38   :  { %v1443_v62 = vcombine.low %v72_v54, %v76_v55 }
  0x39   :  { %1650 = vmatpush3.bf16.msra.mxu0 %v1820_v31  ;;  %v52_v31 = vld [vmem:[%s2473_s0 + $0x130] sm:$0xff] }
  0x3a   :  { %1714 = vmatpush3.bf16.msra.mxu1 %v1822_v33  ;;  %1651 = vmatprep.subr.bf16.mxu0 %v1823_v38  ;;  %v53_v33 = vld [vmem:[%s2473_s0 + $0x138] sm:$0xff]  ;;  %v56_v38 = vld [vmem:[%s2473_s0 + $0x150] sm:$0xff]  ;;  %v1419_v42 = vcombine.low %v48_v30, %v52_v31 }
  0x3b   :  { %967 = vmatmul.mubr.bf16.gmra.mxu0 %v1407_v19  ;;  %1715 = vmatprep.subr.bf16.mxu1 %v1825_v40  ;;  %v1397_v19 = vcombine.low %v25_v8, %v29_v9  ;;  %v57_v40 = vld [vmem:[%s2473_s0 + $0x158] sm:$0xff] }
  0x3c   :  { %1064 = vmatmul.mubr.bf16.gmra.mxu1 %v1409_v21  ;;  %974 = vmatprep.mubr.bf16.mxu0 %v1416_v22  ;;  %v1406_v21 = vcombine.high %v33_v16, %v37_v17  ;;  %v40_v22 = vld [vmem:[%s2473_s0 + $0xd0] sm:$0xff]  ;;  %v1430_v45 = vcombine.high %v57_v40, %v61_v41 }
  0x3d   :  { %1071 = vmatprep.mubr.bf16.mxu1 %v1418_v24  ;;  %1652 = vmatpush3.bf16.msra.mxu0 %v1824_v39  ;;  %v41_v24 = vld [vmem:[%s2473_s0 + $0xd8] sm:$0xff]  ;;  %v1412_v28 = vcombine.high %v40_v22, %v44_v23  ;;  %v60_v39 = vld [vmem:[%s2473_s0 + $0x170] sm:$0xff] }
  0x3e   :  { %1716 = vmatpush3.bf16.msra.mxu1 %v1826_v43  ;;  %1653 = vmatprep.subr.bf16.mxu0 %v1827_v46  ;;  %v1414_v29 = vcombine.high %v41_v24, %v45_v25  ;;  %v1421_v43 = vcombine.low %v49_v32, %v53_v33  ;;  %v1428_v44 = vcombine.high %v56_v38, %v60_v39  ;;  %v64_v46 = vld [vmem:[%s2473_s0 + $0x190] sm:$0xff] }
  0x3f   :  { %1717 = vmatprep.subr.bf16.mxu1 %v1829_v51  ;;  %v1429_v51 = vcombine.low %v57_v40, %v61_v41 }
  0x41   :  { %1654 = vmatpush3.bf16.msra.mxu0 %v1828_v48  ;;  %v65_v48 = vld [vmem:[%s2473_s0 + $0x198] sm:$0xff] }
  0x42   :  { %1718 = vmatpush3.bf16.msra.mxu1 %v1830_v53 }
  0x43   :  { %975 = vmatmul.mubr.bf16.gmra.mxu0 %v1415_v34  ;;  %v1411_v34 = vcombine.low %v40_v22, %v44_v23 }
  0x44   :  { %1072 = vmatmul.mubr.bf16.gmra.mxu1 %v1417_v35  ;;  %982 = vmatprep.mubr.bf16.mxu0 %v1424_v36  ;;  %v1413_v35 = vcombine.low %v41_v24, %v45_v25  ;;  %v1420_v36 = vcombine.high %v48_v30, %v52_v31 }
  0x45   :  { %1079 = vmatprep.mubr.bf16.mxu1 %v1426_v37  ;;  %v1422_v37 = vcombine.high %v49_v32, %v53_v33 }
  0x4b   :  { %983 = vmatmul.mubr.bf16.gmra.mxu0 %v1423_v47  ;;  %v68_v47 = vld [vmem:[%s2473_s0 + $0x1b0] sm:$0xff] }
  0x4c   :  { %1080 = vmatmul.mubr.bf16.gmra.mxu1 %v1425_v49  ;;  %990 = vmatprep.mubr.bf16.mxu0 %v1432_v50  ;;  %v69_v49 = vld [vmem:[%s2473_s0 + $0x1b8] sm:$0xff]  ;;  %v1427_v50 = vcombine.low %v56_v38, %v60_v39 }
  0x4d   :  { %1087 = vmatprep.mubr.bf16.mxu1 %v1434_v52  ;;  %v1436_v52 = vcombine.high %v64_v46, %v68_v47  ;;  %v1438_v53 = vcombine.high %v65_v48, %v69_v49 }
  0x53   :  { %991 = vmatmul.mubr.bf16.gmra.mxu0 %v1431_v58  ;;  %v1435_v58 = vcombine.low %v64_v46, %v68_v47 }
  0x54   :  { %1088 = vmatmul.mubr.bf16.gmra.mxu1 %v1433_v59  ;;  %998 = vmatprep.mubr.bf16.mxu0 %v1440_v60  ;;  %v1437_v59 = vcombine.low %v65_v48, %v69_v49  ;;  %v1444_v60 = vcombine.high %v72_v54, %v76_v55 }
  0x55   :  { %1095 = vmatprep.mubr.bf16.mxu1 %v1442_v61  ;;  %v1446_v61 = vcombine.high %v73_v56, %v77_v57 }
  0x5b   :  { %999 = vmatmul.mubr.bf16.gmra.mxu0 %v1439_v2 }
  0x5c   :  { %1096 = vmatmul.mubr.bf16.gmra.mxu1 %v1441_v3  ;;  %1136 = vmatprep.mubr.bf16.mxu0 %v1388_v4 }
  0x5d   :  { %1233 = vmatprep.mubr.bf16.mxu1 %v1390_v5 }
  0x63   :  { %1137 = vmatmul.mubr.bf16.vlgmr.msra.gmra.mxu0 %v1387_v10 }
  0x64   :  { %1234 = vmatmul.mubr.bf16.vlgmr.msra.gmra.mxu1 %v1389_v11  ;;  %1144 = vmatprep.mubr.bf16.mxu0 %v1396_v12 }
  0x65   :  { %1241 = vmatprep.mubr.bf16.mxu1 %v1398_v13 }
  0x6b   :  { %1145 = vmatmul.mubr.bf16.gmra.mxu0 %v1395_v18 }
  0x6c   :  { %1242 = vmatmul.mubr.bf16.gmra.mxu1 %v1397_v19  ;;  %1152 = vmatprep.mubr.bf16.mxu0 %v1404_v20 }
  0x6d   :  { %1249 = vmatprep.mubr.bf16.mxu1 %v1406_v21 }
  0x73   :  { %1153 = vmatmul.mubr.bf16.gmra.mxu0 %v1403_v26 }
  0x74   :  { %1250 = vmatmul.mubr.bf16.gmra.mxu1 %v1405_v27  ;;  %1160 = vmatprep.mubr.bf16.mxu0 %v1412_v28 }
  0x75   :  { %1257 = vmatprep.mubr.bf16.mxu1 %v1414_v29 }
  0x7b   :  { %1161 = vmatmul.mubr.bf16.gmra.mxu0 %v1411_v34 }
  0x7c   :  { %1258 = vmatmul.mubr.bf16.gmra.mxu1 %v1413_v35  ;;  %1168 = vmatprep.mubr.bf16.mxu0 %v1420_v36 }
  0x7d   :  { %1265 = vmatprep.mubr.bf16.mxu1 %v1422_v37 }
  0x83   :  { %1169 = vmatmul.mubr.bf16.gmra.mxu0 %v1419_v42 }
  0x84   :  { %1266 = vmatmul.mubr.bf16.gmra.mxu1 %v1421_v43  ;;  %1176 = vmatprep.mubr.bf16.mxu0 %v1428_v44 }
  0x85   :  { %1273 = vmatprep.mubr.bf16.mxu1 %v1430_v45 }
  0x8b   :  { %1177 = vmatmul.mubr.bf16.gmra.mxu0 %v1427_v50 }
  0x8c   :  { %1274 = vmatmul.mubr.bf16.gmra.mxu1 %v1429_v51  ;;  %1184 = vmatprep.mubr.bf16.mxu0 %v1436_v52 }
  0x8d   :  { %1281 = vmatprep.mubr.bf16.mxu1 %v1438_v53 }
  0x93   :  { %1185 = vmatmul.mubr.bf16.gmra.mxu0 %v1435_v58 }
  0x94   :  { %1282 = vmatmul.mubr.bf16.gmra.mxu1 %v1437_v59  ;;  %1192 = vmatprep.mubr.bf16.mxu0 %v1444_v60 }
  0x95   :  { %1289 = vmatprep.mubr.bf16.mxu1 %v1446_v61 }
  0x9b   :  { %1193 = vmatmul.mubr.bf16.gmra.mxu0 %v1443_v62 }
  0x9c   :  { %1290 = vmatmul.mubr.bf16.gmra.mxu1 %v1445_v63 }
  0xe3   :  { %v2235_v0 = vpop.f32.mrf.mxu0 }
  0xe4   :  { %v2237_v1 = vpop.f32.mrf.mxu1 }
  0xe5   :  { %v1528_v2 = vpop.f32.mrf.mxu0 }
  0xe6   :  { %v1592_v3 = vpop.f32.mrf.mxu1  ;;  %v1529_v63 = vadd.f32 %v1528_v2, %v2235_v0 }
  0xe7   :  { %v2239_v4 = vpop.f32.mrf.mxu0 }
  0xe8   :  { %v2241_v5 = vpop.f32.mrf.mxu1 }
  0xe9   :  { %v2243_v6 = vpop.f32.mrf.mxu0 }
  0xea   :  { %v2245_v7 = vpop.f32.mrf.mxu1 }
  0xeb   :  { %v2247_v8 = vpop.f32.mrf.mxu0 }
  0xec   :  { %v2249_v9 = vpop.f32.mrf.mxu1 }
  0xed   :  { %v2251_v10 = vpop.f32.mrf.mxu0 }
  0xee   :  { %v2253_v11 = vpop.f32.mrf.mxu1 }
  0xef   :  { %v2255_v12 = vpop.f32.mrf.mxu0  ;;  %v1599_v2 = vadd.f32 %v2253_v11, %v2249_v9 }
  0xf0   :  { %v2257_v13 = vpop.f32.mrf.mxu1 }
  0xf1   :  { %v2259_v14 = vpop.f32.mrf.mxu0 }
  0xf2   :  { %v2261_v15 = vpop.f32.mrf.mxu1 }
  0xf3   :  { %v2263_v16 = vpop.f32.mrf.mxu0  ;;  %v1602_v9 = vadd.f32 %v2261_v15, %v2257_v13 }
  0xf4   :  { %v2265_v17 = vpop.f32.mrf.mxu1 }
  0xf5   :  { %v2267_v18 = vpop.f32.mrf.mxu0 }
  0xf6   :  { %v2269_v19 = vpop.f32.mrf.mxu1 }
  0xf7   :  { %v2271_v20 = vpop.f32.mrf.mxu0  ;;  %v1605_v13 = vadd.f32 %v2269_v19, %v2265_v17 }
  0xf8   :  { %v2273_v21 = vpop.f32.mrf.mxu1 }
  0xf9   :  { %v2275_v22 = vpop.f32.mrf.mxu0 }
  0xfa   :  { %v2277_v23 = vpop.f32.mrf.mxu1  ;;  %v1544_v17 = vadd.f32 %v2275_v22, %v2271_v20 }
  0xfb   :  { %v2279_v24 = vpop.f32.mrf.mxu0  ;;  %v1608_v19 = vadd.f32 %v2277_v23, %v2273_v21 }
  0xfc   :  { %v2281_v25 = vpop.f32.mrf.mxu1 }
  0xfd   :  { %v2283_v26 = vpop.f32.mrf.mxu0  ;;  %v1061_v23 = vadd.f32 %v1608_v19, %v1544_v17 }
  0xfe   :  { %v2285_v27 = vpop.f32.mrf.mxu1  ;;  %v1547_v20 = vadd.f32 %v2283_v26, %v2279_v24 }
  0xff   :  { %v2287_v28 = vpop.f32.mrf.mxu0  ;;  %v1611_v21 = vadd.f32 %v2285_v27, %v2281_v25 }
 0x100   :  { %v2289_v29 = vpop.f32.mrf.mxu1 }
 0x101   :  { %v2291_v30 = vpop.f32.mrf.mxu0  ;;  %v1066_v24 = vadd.f32 %v1611_v21, %v1547_v20 }
 0x102   :  { %v2293_v31 = vpop.f32.mrf.mxu1  ;;  %v1550_v25 = vadd.f32 %v2291_v30, %v2287_v28 }
 0x103   :  { %v2295_v32 = vpop.f32.mrf.mxu0  ;;  %v1614_v27 = vadd.f32 %v2293_v31, %v2289_v29 }
 0x104   :  { %v2297_v33 = vpop.f32.mrf.mxu1 }
 0x105   :  { %v2299_v34 = vpop.f32.mrf.mxu0  ;;  %v1069_v31 = vadd.f32 %v1614_v27, %v1550_v25 }
 0x106   :  { %v2301_v35 = vpop.f32.mrf.mxu1  ;;  %v1553_v28 = vadd.f32 %v2299_v34, %v2295_v32 }
 0x107   :  { %v2303_v36 = vpop.f32.mrf.mxu0  ;;  %v1617_v29 = vadd.f32 %v2301_v35, %v2297_v33 }
 0x108   :  { %v2305_v37 = vpop.f32.mrf.mxu1 }
 0x109   :  { %v2307_v38 = vpop.f32.mrf.mxu0  ;;  %v1074_v32 = vadd.f32 %v1617_v29, %v1553_v28 }
 0x10a   :  { %v2309_v39 = vpop.f32.mrf.mxu1  ;;  %v1556_v33 = vadd.f32 %v2307_v38, %v2303_v36 }
 0x10b   :  { %v2311_v40 = vpop.f32.mrf.mxu0  ;;  %v1620_v35 = vadd.f32 %v2309_v39, %v2305_v37 }
 0x10c   :  { %v2313_v41 = vpop.f32.mrf.mxu1 }
 0x10d   :  { %v2315_v42 = vpop.f32.mrf.mxu0  ;;  %v1077_v39 = vadd.f32 %v1620_v35, %v1556_v33 }
 0x10e   :  { %v2317_v43 = vpop.f32.mrf.mxu1  ;;  %v1559_v36 = vadd.f32 %v2315_v42, %v2311_v40 }
 0x10f   :  { %v2319_v44 = vpop.f32.mrf.mxu0  ;;  %v1623_v37 = vadd.f32 %v2317_v43, %v2313_v41 }
 0x110   :  { %v2321_v45 = vpop.f32.mrf.mxu1 }
 0x111   :  { %v2323_v46 = vpop.f32.mrf.mxu0  ;;  %v1082_v40 = vadd.f32 %v1623_v37, %v1559_v36 }
 0x112   :  { %v2325_v47 = vpop.f32.mrf.mxu1  ;;  %v1562_v41 = vadd.f32 %v2323_v46, %v2319_v44 }
 0x113   :  { %v2327_v48 = vpop.f32.mrf.mxu0  ;;  %v1626_v43 = vadd.f32 %v2325_v47, %v2321_v45 }
 0x114   :  { %v2329_v49 = vpop.f32.mrf.mxu1 }
 0x115   :  { %2476 = vst [vmem:[#allocation2_spill] sm:$0xff] %v2329_v49  ;;  %v2331_v50 = vpop.f32.mrf.mxu0 }
 0x116   :  { %v2333_v51 = vpop.f32.mrf.mxu1  ;;  %v1565_v44 = vadd.f32 %v2331_v50, %v2327_v48 }
 0x117   :  { %2477 = vst [vmem:[#allocation3_spill] sm:$0xff] %v2333_v51  ;;  %v2335_v52 = vpop.f32.mrf.mxu0 }
 0x118   :  { %2478 = vst [vmem:[#allocation4_spill] sm:$0xff] %v2335_v52  ;;  %v2337_v53 = vpop.f32.mrf.mxu1 }
 0x119   :  { %2479 = vst [vmem:[#allocation5_spill] sm:$0xff] %v2337_v53  ;;  %v2339_v54 = vpop.f32.mrf.mxu0  ;;  %v1593_v53 = vadd.f32 %v1592_v3, %v2237_v1  ;;  %v1535_v1 = vadd.f32 %v2251_v10, %v2247_v8  ;;  %v1538_v8 = vadd.f32 %v2259_v14, %v2255_v12  ;;  %v1541_v12 = vadd.f32 %v2267_v18, %v2263_v16 }
 0x11a   :  { %2480 = vst [vmem:[#allocation6_spill] sm:$0xff] %v2339_v54  ;;  %v2341_v55 = vpop.f32.mrf.mxu1 }
 0x11b   :  { %2481 = vst [vmem:[#allocation7_spill] sm:$0xff] %v2341_v55  ;;  %v2343_v56 = vpop.f32.mrf.mxu0  ;;  %v1053_v15 = vadd.f32 %v1602_v9, %v1538_v8  ;;  %v1058_v16 = vadd.f32 %v1605_v13, %v1541_v12 }
 0x11c   :  { %2482 = vst [vmem:[#allocation8_spill] sm:$0xff] %v2343_v56  ;;  %v2345_v57 = vpop.f32.mrf.mxu1  ;;  %v2490_v46 = vld [vmem:[#allocation2_spill] sm:$0xff] }
 0x11d   :  { %2483 = vst [vmem:[#allocation9_spill] sm:$0xff] %v2345_v57  ;;  %v2347_v58 = vpop.f32.mrf.mxu0  ;;  %v1042_v57 = vadd.f32 %v1593_v53, %v1529_v63 }
 0x11e   :  { %2484 = vst [vmem:[#allocation10_spill] sm:$0xff] %v2347_v58  ;;  %v2349_v59 = vpop.f32.mrf.mxu1  ;;  %v1532_v58 = vadd.f32 %v2243_v6, %v2239_v4 }
 0x11f   :  { %2485 = vst [vmem:[#allocation11_spill] sm:$0xff] %v2349_v59  ;;  %v2351_v60 = vpop.f32.mrf.mxu0  ;;  %v2492_v50 = vld [vmem:[#allocation4_spill] sm:$0xff] }
 0x120   :  { %2486 = vst [vmem:[#allocation12_spill] sm:$0xff] %v2351_v60  ;;  %v2353_v61 = vpop.f32.mrf.mxu1  ;;  %v1596_v60 = vadd.f32 %v2245_v7, %v2241_v5 }
 0x121   :  { %2487 = vst [vmem:[#allocation13_spill] sm:$0xff] %v2353_v61  ;;  %v2355_v62 = vpop.f32.mrf.mxu0 }
 0x122   :  { %2488 = vst [vmem:[#allocation14_spill] sm:$0xff] %v2355_v62  ;;  %v2359_v54 = vpop.f32.mrf.mxu1  ;;  %v1045_v53 = vadd.f32 %v1596_v60, %v1532_v58 }
 0x123   :  { %2489 = vst [vmem:[#allocation15_spill] sm:$0xff] %v2359_v54  ;;  %v1655_v55 = vpop.f32.mrf.mxu0 }
 0x124   :  { %v1719_v56 = vpop.f32.mrf.mxu1  ;;  %v2498_v37 = vld [vmem:[#allocation9_spill] sm:$0xff] }
 0x125   :  { %v1656_v52 = vpop.f32.mrf.mxu0 }
 0x126   :  { %v1657_v59 = vadd.f32 %v1656_v52, %v1655_v55  ;;  %v1720_v61 = vpop.f32.mrf.mxu1  ;;  %v1050_v55 = vadd.f32 %v1599_v2, %v1535_v1 }
 0x127   :  { %v1658_v51 = vpop.f32.mrf.mxu0  ;;  %v1721_v49 = vadd.f32 %v1720_v61, %v1719_v56 }
 0x128   :  { %v1139_v62 = vadd.f32 %v1657_v59, %v1042_v57  ;;  %v1722_v0 = vpop.f32.mrf.mxu1 }
 0x129   :  { %v1659_v3 = vpop.f32.mrf.mxu0 }
 0x12a   :  { %v1236_v63 = vadd.f32 %v1721_v49, %v1139_v62  ;;  %v1660_v54 = vadd.f32 %v1659_v3, %v1658_v51  ;;  %v1723_v4 = vpop.f32.mrf.mxu1 }
 0x12b   :  { %v1661_v6 = vpop.f32.mrf.mxu0  ;;  %v1724_v7 = vadd.f32 %v1723_v4, %v1722_v0 }
 0x12c   :  { %1298 = vst [vmem:[%s2474_s2] sm:$0xff] %v1236_v63  ;;  %v1142_v5 = vadd.f32 %v1660_v54, %v1045_v53  ;;  %v1725_v52 = vpop.f32.mrf.mxu1  ;;  %v1335_v51 = vmul.f32 %v1236_v63, %v1236_v63 }
 0x12d   :  { %v1662_v56 = vpop.f32.mrf.mxu0 }
 0x12e   :  { %v1239_v10 = vadd.f32 %v1724_v7, %v1142_v5  ;;  %v1663_v11 = vadd.f32 %v1662_v56, %v1661_v6  ;;  %v1726_v49 = vpop.f32.mrf.mxu1 }
 0x12f   :  { %v1664_v57 = vpop.f32.mrf.mxu0  ;;  %v1727_v60 = vadd.f32 %v1726_v49, %v1725_v52 }
 0x130   :  { %1299 = vst [vmem:[%s2474_s2 + $0x8] sm:$0xff] %v1239_v10  ;;  %v1314_v54 = vadd.f32 %v1239_v10, %v1236_v63  ;;  %v1336_v58 = vmul.f32 %v1239_v10, %v1239_v10  ;;  %v1147_v59 = vadd.f32 %v1663_v11, %v1050_v55  ;;  %v1728_v61 = vpop.f32.mrf.mxu1 }
 0x131   :  { %v1665_v14 = vpop.f32.mrf.mxu0 }
 0x132   :  { %v1351_v62 = vadd.f32 %v1336_v58, %v1335_v51  ;;  %v1244_v0 = vadd.f32 %v1727_v60, %v1147_v59  ;;  %v1666_v1 = vadd.f32 %v1665_v14, %v1664_v57  ;;  %v1729_v2 = vpop.f32.mrf.mxu1 }
 0x133   :  { %v1667_v3 = vpop.f32.mrf.mxu0  ;;  %v1730_v6 = vadd.f32 %v1729_v2, %v1728_v61 }
 0x134   :  { %1300 = vst [vmem:[%s2474_s2 + $0x10] sm:$0xff] %v1244_v0  ;;  %v1315_v53 = vadd.f32 %v1314_v54, %v1244_v0  ;;  %v1337_v63 = vmul.f32 %v1244_v0, %v1244_v0  ;;  %v1150_v4 = vadd.f32 %v1666_v1, %v1053_v15  ;;  %v1731_v5 = vpop.f32.mrf.mxu1 }
 0x135   :  { %v1668_v18 = vpop.f32.mrf.mxu0 }
 0x136   :  { %v1352_v7 = vadd.f32 %v1351_v62, %v1337_v63  ;;  %v1247_v52 = vadd.f32 %v1730_v6, %v1150_v4  ;;  %v1669_v55 = vadd.f32 %v1668_v18, %v1667_v3  ;;  %v1732_v56 = vpop.f32.mrf.mxu1 }
 0x137   :  { %v1670_v8 = vpop.f32.mrf.mxu0  ;;  %v1733_v49 = vadd.f32 %v1732_v56, %v1731_v5 }
 0x138   :  { %1301 = vst [vmem:[%s2474_s2 + $0x18] sm:$0xff] %v1247_v52  ;;  %v1316_v9 = vadd.f32 %v1315_v53, %v1247_v52  ;;  %v1338_v10 = vmul.f32 %v1247_v52, %v1247_v52  ;;  %v1155_v11 = vadd.f32 %v1669_v55, %v1058_v16  ;;  %v1734_v51 = vpop.f32.mrf.mxu1 }
 0x139   :  { %v1671_v22 = vpop.f32.mrf.mxu0 }
 0x13a   :  { %v1353_v57 = vadd.f32 %v1352_v7, %v1338_v10  ;;  %v1252_v54 = vadd.f32 %v1733_v49, %v1155_v11  ;;  %v1672_v58 = vadd.f32 %v1671_v22, %v1670_v8  ;;  %v1735_v59 = vpop.f32.mrf.mxu1 }
 0x13b   :  { %v1673_v60 = vpop.f32.mrf.mxu0  ;;  %v1736_v14 = vadd.f32 %v1735_v59, %v1734_v51 }
 0x13c   :  { %1302 = vst [vmem:[%s2474_s2 + $0x20] sm:$0xff] %v1252_v54  ;;  %v1317_v61 = vadd.f32 %v1316_v9, %v1252_v54  ;;  %v1339_v12 = vmul.f32 %v1252_v54, %v1252_v54  ;;  %v1158_v13 = vadd.f32 %v1672_v58, %v1061_v23  ;;  %v1737_v15 = vpop.f32.mrf.mxu1 }
 0x13d   :  { %v1674_v26 = vpop.f32.mrf.mxu0 }
 0x13e   :  { %v1354_v62 = vadd.f32 %v1353_v57, %v1339_v12  ;;  %v1255_v0 = vadd.f32 %v1736_v14, %v1158_v13  ;;  %v1675_v1 = vadd.f32 %v1674_v26, %v1673_v60  ;;  %v1738_v2 = vpop.f32.mrf.mxu1 }
 0x13f   :  { %v1676_v3 = vpop.f32.mrf.mxu0  ;;  %v1739_v6 = vadd.f32 %v1738_v2, %v1737_v15 }
 0x140   :  { %1303 = vst [vmem:[%s2474_s2 + $0x28] sm:$0xff] %v1255_v0  ;;  %v1318_v53 = vadd.f32 %v1317_v61, %v1255_v0  ;;  %v1340_v63 = vmul.f32 %v1255_v0, %v1255_v0  ;;  %v1163_v4 = vadd.f32 %v1675_v1, %v1066_v24  ;;  %v1740_v5 = vpop.f32.mrf.mxu1 }
 0x141   :  { %v1677_v30 = vpop.f32.mrf.mxu0 }
 0x142   :  { %v1355_v16 = vadd.f32 %v1354_v62, %v1340_v63  ;;  %v1260_v17 = vadd.f32 %v1739_v6, %v1163_v4  ;;  %v1678_v18 = vadd.f32 %v1677_v30, %v1676_v3  ;;  %v1741_v19 = vpop.f32.mrf.mxu1  ;;  %v2491_v6 = vld [vmem:[#allocation3_spill] sm:$0xff] }
 0x143   :  { %v1679_v7 = vpop.f32.mrf.mxu0  ;;  %v1742_v8 = vadd.f32 %v1741_v19, %v1740_v5  ;;  %v1629_v45 = vadd.f32 %v2491_v6, %v2490_v46  ;;  %v1085_v5 = vadd.f32 %v1626_v43, %v1562_v41  ;;  %v2500_v43 = vld [vmem:[#allocation12_spill] sm:$0xff] }
 0x144   :  { %1304 = vst [vmem:[%s2474_s2 + $0x30] sm:$0xff] %v1260_v17  ;;  %v1319_v52 = vadd.f32 %v1318_v53, %v1260_v17  ;;  %v1341_v55 = vmul.f32 %v1260_v17, %v1260_v17  ;;  %v1166_v56 = vadd.f32 %v1678_v18, %v1069_v31  ;;  %v1743_v9 = vpop.f32.mrf.mxu1 }
 0x145   :  { %v1680_v34 = vpop.f32.mrf.mxu0  ;;  %v1090_v48 = vadd.f32 %v1629_v45, %v1565_v44 }
 0x146   :  { %v1356_v10 = vadd.f32 %v1355_v16, %v1341_v55  ;;  %v1263_v11 = vadd.f32 %v1742_v8, %v1166_v56  ;;  %v1681_v49 = vadd.f32 %v1680_v34, %v1679_v7  ;;  %v1744_v51 = vpop.f32.mrf.mxu1  ;;  %v2493_v55 = vld [vmem:[#allocation6_spill] sm:$0xff] }
 0x147   :  { %v1682_v20 = vpop.f32.mrf.mxu0  ;;  %v1745_v57 = vadd.f32 %v1744_v51, %v1743_v9  ;;  %v1568_v56 = vadd.f32 %v2493_v55, %v2492_v50  ;;  %v2494_v9 = vld [vmem:[#allocation5_spill] sm:$0xff] }
 0x148   :  { %1305 = vst [vmem:[%s2474_s2 + $0x38] sm:$0xff] %v1263_v11  ;;  %v1320_v21 = vadd.f32 %v1319_v52, %v1263_v11  ;;  %v1342_v22 = vmul.f32 %v1263_v11, %v1263_v11  ;;  %v1171_v23 = vadd.f32 %v1681_v49, %v1074_v32  ;;  %v1746_v54 = vpop.f32.mrf.mxu1  ;;  %v2495_v32 = vld [vmem:[#allocation7_spill] sm:$0xff] }
 0x149   :  { %v1683_v38 = vpop.f32.mrf.mxu0  ;;  %v1632_v33 = vadd.f32 %v2495_v32, %v2494_v9 }
 0x14a   :  { %v1357_v58 = vadd.f32 %v1356_v10, %v1342_v22  ;;  %v1268_v59 = vadd.f32 %v1745_v57, %v1171_v23  ;;  %v1684_v60 = vadd.f32 %v1683_v38, %v1682_v20  ;;  %v1747_v61 = vpop.f32.mrf.mxu1  ;;  %v2496_v57 = vld [vmem:[#allocation8_spill] sm:$0xff]  ;;  %v2499_v38 = vld [vmem:[#allocation11_spill] sm:$0xff] }
 0x14b   :  { %v1685_v12 = vpop.f32.mrf.mxu0  ;;  %v1748_v24 = vadd.f32 %v1747_v61, %v1746_v54  ;;  %v2497_v54 = vld [vmem:[#allocation10_spill] sm:$0xff] }
 0x14c   :  { %1306 = vst [vmem:[%s2474_s2 + $0x40] sm:$0xff] %v1268_v59  ;;  %v1321_v13 = vadd.f32 %v1320_v21, %v1268_v59  ;;  %v1343_v14 = vmul.f32 %v1268_v59, %v1268_v59  ;;  %v1174_v15 = vadd.f32 %v1684_v60, %v1077_v39  ;;  %v1749_v25 = vpop.f32.mrf.mxu1  ;;  %v1571_v36 = vadd.f32 %v2497_v54, %v2496_v57 }
 0x14d   :  { %v1686_v42 = vpop.f32.mrf.mxu0  ;;  %v1635_v39 = vadd.f32 %v2499_v38, %v2498_v37  ;;  %v1093_v59 = vadd.f32 %v1632_v33, %v1568_v56 }
 0x14e   :  { %v1358_v26 = vadd.f32 %v1357_v58, %v1343_v14  ;;  %v1271_v27 = vadd.f32 %v1748_v24, %v1174_v15  ;;  %v1687_v62 = vadd.f32 %v1686_v42, %v1685_v12  ;;  %v1750_v0 = vpop.f32.mrf.mxu1 }
 0x14f   :  { %v1688_v1 = vpop.f32.mrf.mxu0  ;;  %v1751_v63 = vadd.f32 %v1750_v0, %v1749_v25  ;;  %v1098_v42 = vadd.f32 %v1635_v39, %v1571_v36  ;;  %v2502_v0 = vld [vmem:[#allocation13_spill] sm:$0xff] }
 0x150   :  { %1307 = vst [vmem:[%s2474_s2 + $0x48] sm:$0xff] %v1271_v27  ;;  %v1322_v2 = vadd.f32 %v1321_v13, %v1271_v27  ;;  %v1344_v3 = vmul.f32 %v1271_v27, %v1271_v27  ;;  %v1179_v53 = vadd.f32 %v1687_v62, %v1082_v40  ;;  %v1752_v4 = vpop.f32.mrf.mxu1 }
 0x151   :  { %v1689_v47 = vpop.f32.mrf.mxu0 }
 0x152   :  { %v1359_v28 = vadd.f32 %v1358_v26, %v1344_v3  ;;  %v1276_v29 = vadd.f32 %v1751_v63, %v1179_v53  ;;  %v1690_v30 = vadd.f32 %v1689_v47, %v1688_v1  ;;  %v1753_v31 = vpop.f32.mrf.mxu1  ;;  %v2501_v26 = vld [vmem:[#allocation14_spill] sm:$0xff]  ;;  %v2503_v1 = vld [vmem:[#allocation15_spill] sm:$0xff] }
 0x153   :  { %v1691_v16 = vpop.f32.mrf.mxu0  ;;  %v1754_v7 = vadd.f32 %v1753_v31, %v1752_v4  ;;  %v1574_v27 = vadd.f32 %v2501_v26, %v2500_v43 }
 0x154   :  { %1308 = vst [vmem:[%s2474_s2 + $0x50] sm:$0xff] %v1276_v29  ;;  %v1323_v17 = vadd.f32 %v1322_v2, %v1276_v29  ;;  %v1345_v18 = vmul.f32 %v1276_v29, %v1276_v29  ;;  %v1182_v19 = vadd.f32 %v1690_v30, %v1085_v5  ;;  %v1755_v52 = vpop.f32.mrf.mxu1  ;;  %v1638_v2 = vadd.f32 %v2503_v1, %v2502_v0 }
 0x155   :  { %v1692_v8 = vpop.f32.mrf.mxu0 }
 0x156   :  { %v1360_v34 = vadd.f32 %v1359_v28, %v1345_v18  ;;  %v1279_v35 = vadd.f32 %v1754_v7, %v1182_v19  ;;  %v1693_v10 = vadd.f32 %v1692_v8, %v1691_v16  ;;  %v1756_v11 = vpop.f32.mrf.mxu1  ;;  %v1101_v29 = vadd.f32 %v1638_v2, %v1574_v27 }
 0x157   :  { %v1694_v49 = vpop.f32.mrf.mxu0  ;;  %v1757_v22 = vadd.f32 %v1756_v11, %v1755_v52 }
 0x158   :  { %1309 = vst [vmem:[%s2474_s2 + $0x58] sm:$0xff] %v1279_v35  ;;  %v1324_v51 = vadd.f32 %v1323_v17, %v1279_v35  ;;  %v1346_v20 = vmul.f32 %v1279_v35, %v1279_v35  ;;  %v1187_v21 = vadd.f32 %v1693_v10, %v1090_v48  ;;  %v1758_v23 = vpop.f32.mrf.mxu1 }
 0x159   :  { %v1695_v58 = vpop.f32.mrf.mxu0 }
 0x15a   :  { %v1361_v60 = vadd.f32 %v1360_v34, %v1346_v20  ;;  %v1284_v61 = vadd.f32 %v1757_v22, %v1187_v21  ;;  %v1696_v12 = vadd.f32 %v1695_v58, %v1694_v49  ;;  %v1759_v13 = vpop.f32.mrf.mxu1 }
 0x15b   :  { %v1697_v14 = vpop.f32.mrf.mxu0  ;;  %v1760_v40 = vadd.f32 %v1759_v13, %v1758_v23 }
 0x15c   :  { %1310 = vst [vmem:[%s2474_s2 + $0x60] sm:$0xff] %v1284_v61  ;;  %v1325_v15 = vadd.f32 %v1324_v51, %v1284_v61  ;;  %v1347_v24 = vmul.f32 %v1284_v61, %v1284_v61  ;;  %v1190_v25 = vadd.f32 %v1696_v12, %v1093_v59  ;;  %v1761_v41 = vpop.f32.mrf.mxu1 }
 0x15d   :  { %v1698_v62 = vpop.f32.mrf.mxu0 }
 0x15e   :  { %v1362_v3 = vadd.f32 %v1361_v60, %v1347_v24  ;;  %v1287_v53 = vadd.f32 %v1760_v40, %v1190_v25  ;;  %v1699_v63 = vadd.f32 %v1698_v62, %v1697_v14  ;;  %v1762_v4 = vpop.f32.mrf.mxu1 }
 0x15f   :  { %v1700_v44 = vpop.f32.mrf.mxu0  ;;  %v1763_v47 = vadd.f32 %v1762_v4, %v1761_v41 }
 0x160   :  { %1311 = vst [vmem:[%s2474_s2 + $0x68] sm:$0xff] %v1287_v53  ;;  %v1326_v46 = vadd.f32 %v1325_v15, %v1287_v53  ;;  %v1348_v6 = vmul.f32 %v1287_v53, %v1287_v53  ;;  %v1195_v45 = vadd.f32 %v1699_v63, %v1098_v42  ;;  %v1764_v5 = vpop.f32.mrf.mxu1 }
 0x161   :  { %v1701_v28 = vpop.f32.mrf.mxu0 }
 0x162   :  { %v1363_v30 = vadd.f32 %v1362_v3, %v1348_v6  ;;  %v1292_v31 = vadd.f32 %v1763_v47, %v1195_v45  ;;  %v1702_v16 = vadd.f32 %v1701_v28, %v1700_v44  ;;  %v1765_v17 = vpop.f32.mrf.mxu1 }
 0x163   :  { %v1766_v52 = vadd.f32 %v1765_v17, %v1764_v5 }
 0x164   :  { %1312 = vst [vmem:[%s2474_s2 + $0x70] sm:$0xff] %v1292_v31  ;;  %v1327_v18 = vadd.f32 %v1326_v46, %v1292_v31  ;;  %v1349_v19 = vmul.f32 %v1292_v31, %v1292_v31  ;;  %v1198_v7 = vadd.f32 %v1702_v16, %v1101_v29 }
 0x166   :  { %v1364_v48 = vadd.f32 %v1363_v30, %v1349_v19  ;;  %v1295_v50 = vadd.f32 %v1766_v52, %v1198_v7 }
 0x168   :  { %1313 = vst [vmem:[%s2474_s2 + $0x78] sm:$0xff] %v1295_v50  ;;  %v1328_v55 = vadd.f32 %v1327_v18, %v1295_v50  ;;  %v1350_v56 = vmul.f32 %v1295_v50, %v1295_v50 }
 0x16a   :  { %v1329_v8 = vrot.slane %v1328_v55, 4  ;;  %v1365_v9 = vadd.f32 %v1364_v48, %v1350_v56 }
 0x16c   :  { %v1330_v32 = vadd.f32 %v1329_v8, %v1328_v55  ;;  %v1366_v33 = vrot.slane %v1365_v9, 4 }
 0x16e   :  { %v1331_v34 = vrot.slane %v1330_v32, 2  ;;  %v1367_v35 = vadd.f32 %v1366_v33, %v1365_v9 }
 0x170   :  { %v1332_v10 = vadd.f32 %v1331_v34, %v1330_v32  ;;  %v1368_v11 = vrot.slane %v1367_v35, 2 }
 0x172   :  { %v1333_v49 = vrot.slane %v1332_v10, 1  ;;  %v1369_v51 = vadd.f32 %v1368_v11, %v1367_v35 }
 0x174   :  { %v1370_v20 = vrot.slane %v1369_v51, 1  ;;  %v1334_v21 = vadd.f32 %v1333_v49, %v1332_v10 }
 0x176   :  { %v1371_v22 = vadd.f32 %v1370_v20, %v1369_v51 }
 0x178   :  { %v1373_v23 = vsel %vm1372_vm0, %v1334_v21, %v1371_v22 }
 0x179   :  { %1374 = vst [vmem:[%s2475_s3] sm:$0x3] %v1373_v23 }

// kernel: discriminator_forward.9
= control target key start
LH: loop header
LB: loop body
LE: loop exit
PB: predicated region body
PF: predicated region fallthrough
CT: control target
= control target key end

     0   :  { %s407_s0 = inlined_call_operand.vmem [shape: f32[128,128], index: 0, kind: input, shape index: {}]   ;;  %s408_s1 = inlined_call_operand.vmem [shape: f32[1,128], index: 1, kind: input, shape index: {}]   ;;  %s409_s2 = inlined_call_operand.vmem [shape: f32[1,128], index: 2, kind: input, shape index: {}]   ;;  %s410_s3 = inlined_call_operand.vmem [shape: bf16[128,128], index: 3, kind: output, shape index: {}]  }
   0x1   :  { %v14_v0 = vld [vmem:[%s407_s0] sm:$0xff]  ;;  %v15_v1 = vld [vmem:[%s407_s0 + $0x8] sm:$0xff]  ;;  %v16_v6 = vld [vmem:[%s407_s0 + $0x10] sm:$0xff] }
   0x2   :  { %v302_v2 = vld [vmem:[%s408_s1] ss:$0 sm:$0xff]  ;;  %v17_v7 = vld [vmem:[%s407_s0 + $0x18] sm:$0xff]  ;;  %v19_v11 = vld [vmem:[%s407_s0 + $0x28] sm:$0xff] }
   0x3   :  { %v37_v3 = vmul.f32 %v302_v2, %v14_v0  ;;  %v38_v4 = vmul.f32 %v302_v2, %v15_v1  ;;  %v309_v5 = vld [vmem:[%s409_s2] ss:$0 sm:$0xff]  ;;  %v39_v8 = vmul.f32 %v302_v2, %v16_v6  ;;  %v40_v9 = vmul.f32 %v302_v2, %v17_v7  ;;  %v20_v12 = vld [vmem:[%s407_s0 + $0x30] sm:$0xff]  ;;  %v21_v17 = vld [vmem:[%s407_s0 + $0x38] sm:$0xff] }
   0x4   :  { %v18_v10 = vld [vmem:[%s407_s0 + $0x20] sm:$0xff]  ;;  %v42_v16 = vmul.f32 %v302_v2, %v19_v11  ;;  %v43_v20 = vmul.f32 %v302_v2, %v20_v12  ;;  %v44_v21 = vmul.f32 %v302_v2, %v21_v17  ;;  %v23_v35 = vld [vmem:[%s407_s0 + $0x48] sm:$0xff]  ;;  %v24_v40 = vld [vmem:[%s407_s0 + $0x50] sm:$0xff] }
   0x5   :  { %v60_v13 = vadd.f32 %v309_v5, %v37_v3  ;;  %v61_v14 = vadd.f32 %v309_v5, %v38_v4  ;;  %v41_v15 = vmul.f32 %v302_v2, %v18_v10  ;;  %v62_v18 = vadd.f32 %v309_v5, %v39_v8  ;;  %v22_v30 = vld [vmem:[%s407_s0 + $0x40] sm:$0xff]  ;;  %v25_v41 = vld [vmem:[%s407_s0 + $0x58] sm:$0xff]  ;;  %v27_v47 = vld [vmem:[%s407_s0 + $0x68] sm:$0xff] }
   0x6   :  { %v63_v19 = vadd.f32 %v309_v5, %v40_v9  ;;  %v65_v25 = vadd.f32 %v309_v5, %v42_v16  ;;  %v66_v28 = vadd.f32 %v309_v5, %v43_v20  ;;  %v67_v29 = vadd.f32 %v309_v5, %v44_v21  ;;  %v26_v46 = vld [vmem:[%s407_s0 + $0x60] sm:$0xff]  ;;  %v28_v52 = vld [vmem:[%s407_s0 + $0x70] sm:$0xff]  ;;  %v29_v57 = vld [vmem:[%s407_s0 + $0x78] sm:$0xff] }
   0x7   :  { %v76_v22 = vmul.f32 0.2, %v60_v13  ;;  %v77_v23 = vmul.f32 0.2, %v61_v14  ;;  %v64_v24 = vadd.f32 %v309_v5, %v41_v15  ;;  %v78_v26 = vmul.f32 0.2, %v62_v18 }
   0x8   :  { %v79_v27 = vmul.f32 0.2, %v63_v19  ;;  %v81_v34 = vmul.f32 0.2, %v65_v25  ;;  %v82_v38 = vmul.f32 0.2, %v66_v28  ;;  %v45_v45 = vmul.f32 %v302_v2, %v22_v30 }
   0x9   :  { %v92_v31 = vmax.f32 %v60_v13, %v76_v22  ;;  %v93_v32 = vmax.f32 %v61_v14, %v77_v23  ;;  %v80_v33 = vmul.f32 0.2, %v64_v24  ;;  %v94_v36 = vmax.f32 %v62_v18, %v78_v26 }
   0xa   :  { %v95_v37 = vmax.f32 %v63_v19, %v79_v27  ;;  %v83_v39 = vmul.f32 0.2, %v67_v29  ;;  %v97_v44 = vmax.f32 %v65_v25, %v81_v34  ;;  %v98_v49 = vmax.f32 %v66_v28, %v82_v38 }
   0xb   :  { %v229_v42 = vpack.c.bf16 %v93_v32, %v92_v31  ;;  %v96_v43 = vmax.f32 %v64_v24, %v80_v33  ;;  %v46_v51 = vmul.f32 %v302_v2, %v23_v35  ;;  %v68_v54 = vadd.f32 %v309_v5, %v45_v45 }
   0xc   :  { %v234_v48 = vpack.c.bf16 %v95_v37, %v94_v36  ;;  %v99_v50 = vmax.f32 %v67_v29, %v83_v39  ;;  %v47_v55 = vmul.f32 %v302_v2, %v24_v40  ;;  %v48_v56 = vmul.f32 %v302_v2, %v25_v41 }
   0xd   :  { %230 = vst [vmem:[%s410_s3] sm:$0xff] %v229_v42   ;;  %v239_v53 = vpack.c.bf16 %v97_v44, %v96_v43  ;;  %v69_v59 = vadd.f32 %v309_v5, %v46_v51  ;;  %v49_v60 = vmul.f32 %v302_v2, %v26_v46  ;;  %v50_v61 = vmul.f32 %v302_v2, %v27_v47 }
   0xe   :  { %266 = vst [vmem:[%s410_s3 + $0x8] sm:$0xff] %v234_v48   ;;  %v244_v58 = vpack.c.bf16 %v99_v50, %v98_v49  ;;  %v84_v62 = vmul.f32 0.2, %v68_v54  ;;  %v70_v63 = vadd.f32 %v309_v5, %v47_v55  ;;  %v71_v0 = vadd.f32 %v309_v5, %v48_v56 }
   0xf   :  { %267 = vst [vmem:[%s410_s3 + $0x10] sm:$0xff] %v239_v53   ;;  %v51_v1 = vmul.f32 %v302_v2, %v28_v52  ;;  %v85_v3 = vmul.f32 0.2, %v69_v59  ;;  %v72_v4 = vadd.f32 %v309_v5, %v49_v60  ;;  %v73_v6 = vadd.f32 %v309_v5, %v50_v61 }
  0x10   :  { %268 = vst [vmem:[%s410_s3 + $0x18] sm:$0xff] %v244_v58   ;;  %v52_v7 = vmul.f32 %v302_v2, %v29_v57  ;;  %v100_v8 = vmax.f32 %v68_v54, %v84_v62  ;;  %v86_v9 = vmul.f32 0.2, %v70_v63  ;;  %v87_v10 = vmul.f32 0.2, %v71_v0 }
  0x11   :  { %v74_v11 = vadd.f32 %v309_v5, %v51_v1  ;;  %v101_v12 = vmax.f32 %v69_v59, %v85_v3  ;;  %v88_v13 = vmul.f32 0.2, %v72_v4  ;;  %v89_v14 = vmul.f32 0.2, %v73_v6 }
  0x12   :  { %v75_v15 = vadd.f32 %v309_v5, %v52_v7  ;;  %v102_v16 = vmax.f32 %v70_v63, %v86_v9  ;;  %v103_v17 = vmax.f32 %v71_v0, %v87_v10 }
  0x13   :  { %v90_v18 = vmul.f32 0.2, %v74_v11  ;;  %v249_v19 = vpack.c.bf16 %v101_v12, %v100_v8  ;;  %v104_v20 = vmax.f32 %v72_v4, %v88_v13  ;;  %v105_v21 = vmax.f32 %v73_v6, %v89_v14 }
  0x14   :  { %v91_v22 = vmul.f32 0.2, %v75_v15  ;;  %v254_v23 = vpack.c.bf16 %v103_v17, %v102_v16 }
  0x15   :  { %v106_v24 = vmax.f32 %v74_v11, %v90_v18  ;;  %269 = vst [vmem:[%s410_s3 + $0x20] sm:$0xff] %v249_v19   ;;  %v259_v2 = vpack.c.bf16 %v105_v21, %v104_v20 }
  0x16   :  { %v107_v25 = vmax.f32 %v75_v15, %v91_v22  ;;  %270 = vst [vmem:[%s410_s3 + $0x28] sm:$0xff] %v254_v23  }
  0x17   :  { %271 = vst [vmem:[%s410_s3 + $0x30] sm:$0xff] %v259_v2  }
  0x18   :  { %v264_v5 = vpack.c.bf16 %v107_v25, %v106_v24 }
  0x1a   :  { %272 = vst [vmem:[%s410_s3 + $0x38] sm:$0xff] %v264_v5  }

// kernel: discriminator_forward.10
= control target key start
LH: loop header
LB: loop body
LE: loop exit
PB: predicated region body
PF: predicated region fallthrough
CT: control target
= control target key end

     0   :  { %vm2217_vm0 = vcmask 1040384   ;;  %s3872_s1 = inlined_call_operand.vmem [shape: bf16[2048,256], index: 1, kind: input, shape index: {}]   ;;  %s3873_s0 = inlined_call_operand.vmem [shape: bf16[32,2048], index: 0, kind: input, shape index: {}]   ;;  %s3874_s2 = inlined_call_operand.vmem [shape: f32[32,256], index: 2, kind: output, shape index: {0}]   ;;  %s3875_s3 = inlined_call_operand.vmem [shape: f32[1,2,256], index: 3, kind: output, shape index: {1}]  }
   0x1   :  { %v2529_v0 = vld [vmem:[%s3872_s1 + $0x74] ss:$8 sps:$4 sm:$0xff]   ;;  %v2533_v2 = vld [vmem:[%s3872_s1 + $0x70] ss:$8 sps:$4 sm:$0xff]   ;;  %v2535_v4 = vld [vmem:[%s3872_s1 + $0x64] ss:$8 sps:$4 sm:$0xff]  }
   0x2   :  { %v2531_v1 = vld [vmem:[%s3872_s1 + $0x174] ss:$8 sps:$4 sm:$0xff]   ;;  %1741 = vmatprep.subr.bf16.mxu0 %v2529_v0  ;;  %v2534_v3 = vld [vmem:[%s3872_s1 + $0x170] ss:$8 sps:$4 sm:$0xff]   ;;  %v2537_v5 = vld [vmem:[%s3872_s1 + $0x164] ss:$8 sps:$4 sm:$0xff]  }
   0x3   :  { %1794 = vmatprep.subr.bf16.mxu1 %v2531_v1  ;;  %1742 = vmatpush1.bf16.msra.mxu0 %v2533_v2  ;;  %v2539_v6 = vld [vmem:[%s3872_s1 + $0x60] ss:$8 sps:$4 sm:$0xff]   ;;  %v2541_v8 = vld [vmem:[%s3872_s1 + $0x54] ss:$8 sps:$4 sm:$0xff]   ;;  %v2545_v10 = vld [vmem:[%s3872_s1 + $0x50] ss:$8 sps:$4 sm:$0xff]  }
   0x4   :  { %1795 = vmatpush1.bf16.msra.mxu1 %v2534_v3  ;;  %1743 = vmatprep.subr.bf16.mxu0 %v2535_v4  ;;  %v2540_v7 = vld [vmem:[%s3872_s1 + $0x160] ss:$8 sps:$4 sm:$0xff]   ;;  %v2543_v9 = vld [vmem:[%s3872_s1 + $0x154] ss:$8 sps:$4 sm:$0xff]   ;;  %v2546_v11 = vld [vmem:[%s3872_s1 + $0x150] ss:$8 sps:$4 sm:$0xff]  }
   0x5   :  { %1796 = vmatprep.subr.bf16.mxu1 %v2537_v5  ;;  %v2547_v12 = vld [vmem:[%s3872_s1 + $0x44] ss:$8 sps:$4 sm:$0xff]   ;;  %v2551_v14 = vld [vmem:[%s3872_s1 + $0x40] ss:$8 sps:$4 sm:$0xff]   ;;  %v2553_v16 = vld [vmem:[%s3872_s1 + $0x34] ss:$8 sps:$4 sm:$0xff]  }
   0x6   :  { %v2549_v13 = vld [vmem:[%s3872_s1 + $0x144] ss:$8 sps:$4 sm:$0xff]   ;;  %v2552_v15 = vld [vmem:[%s3872_s1 + $0x140] ss:$8 sps:$4 sm:$0xff]   ;;  %v2555_v17 = vld [vmem:[%s3872_s1 + $0x134] ss:$8 sps:$4 sm:$0xff]  }
   0x7   :  { %1744 = vmatpush1.bf16.msra.mxu0 %v2539_v6  ;;  %v2557_v18 = vld [vmem:[%s3872_s1 + $0x30] ss:$8 sps:$4 sm:$0xff]   ;;  %v2559_v20 = vld [vmem:[%s3872_s1 + $0x24] ss:$8 sps:$4 sm:$0xff]   ;;  %v2563_v22 = vld [vmem:[%s3872_s1 + $0x20] ss:$8 sps:$4 sm:$0xff]  }
   0x8   :  { %1797 = vmatpush1.bf16.msra.mxu1 %v2540_v7  ;;  %1745 = vmatprep.subr.bf16.mxu0 %v2541_v8  ;;  %v2558_v19 = vld [vmem:[%s3872_s1 + $0x130] ss:$8 sps:$4 sm:$0xff]   ;;  %v2561_v21 = vld [vmem:[%s3872_s1 + $0x124] ss:$8 sps:$4 sm:$0xff]   ;;  %v2564_v23 = vld [vmem:[%s3872_s1 + $0x120] ss:$8 sps:$4 sm:$0xff]  }
   0x9   :  { %1798 = vmatprep.subr.bf16.mxu1 %v2543_v9  ;;  %v2565_v24 = vld [vmem:[%s3872_s1 + $0x14] ss:$8 sps:$4 sm:$0xff]   ;;  %v2569_v26 = vld [vmem:[%s3872_s1 + $0x10] ss:$8 sps:$4 sm:$0xff]   ;;  %v2571_v28 = vld [vmem:[%s3872_s1 + $0x4] ss:$8 sps:$4 sm:$0xff]  }
   0xa   :  { %v2567_v25 = vld [vmem:[%s3872_s1 + $0x114] ss:$8 sps:$4 sm:$0xff]   ;;  %v2570_v27 = vld [vmem:[%s3872_s1 + $0x110] ss:$8 sps:$4 sm:$0xff]   ;;  %v2573_v29 = vld [vmem:[%s3872_s1 + $0x104] ss:$8 sps:$4 sm:$0xff]  }
   0xb   :  { %1746 = vmatpush1.bf16.msra.mxu0 %v2545_v10  ;;  %v2575_v30 = vld [vmem:[%s3872_s1] ss:$8 sps:$4 sm:$0xff]   ;;  %v2577_v32 = vld [vmem:[%s3872_s1 + $0xf4] ss:$8 sps:$4 sm:$0xff]   ;;  %v2581_v34 = vld [vmem:[%s3872_s1 + $0xf0] ss:$8 sps:$4 sm:$0xff]  }
   0xc   :  { %1799 = vmatpush1.bf16.msra.mxu1 %v2546_v11  ;;  %1747 = vmatprep.subr.bf16.mxu0 %v2547_v12  ;;  %v2576_v31 = vld [vmem:[%s3872_s1 + $0x100] ss:$8 sps:$4 sm:$0xff]   ;;  %v2579_v33 = vld [vmem:[%s3872_s1 + $0x1f4] ss:$8 sps:$4 sm:$0xff]   ;;  %v2582_v35 = vld [vmem:[%s3872_s1 + $0x1f0] ss:$8 sps:$4 sm:$0xff]  }
   0xd   :  { %1800 = vmatprep.subr.bf16.mxu1 %v2549_v13  ;;  %v2583_v36 = vld [vmem:[%s3872_s1 + $0xe4] ss:$8 sps:$4 sm:$0xff]   ;;  %v2587_v38 = vld [vmem:[%s3872_s1 + $0xe0] ss:$8 sps:$4 sm:$0xff]   ;;  %v2589_v40 = vld [vmem:[%s3872_s1 + $0xd4] ss:$8 sps:$4 sm:$0xff]  }
   0xe   :  { %v2585_v37 = vld [vmem:[%s3872_s1 + $0x1e4] ss:$8 sps:$4 sm:$0xff]   ;;  %v2588_v39 = vld [vmem:[%s3872_s1 + $0x1e0] ss:$8 sps:$4 sm:$0xff]   ;;  %v2591_v41 = vld [vmem:[%s3872_s1 + $0x1d4] ss:$8 sps:$4 sm:$0xff]  }
   0xf   :  { %1748 = vmatpush1.bf16.msra.mxu0 %v2551_v14  ;;  %v2593_v42 = vld [vmem:[%s3872_s1 + $0xd0] ss:$8 sps:$4 sm:$0xff]   ;;  %v2595_v44 = vld [vmem:[%s3872_s1 + $0xc4] ss:$8 sps:$4 sm:$0xff]   ;;  %v2599_v46 = vld [vmem:[%s3872_s1 + $0xc0] ss:$8 sps:$4 sm:$0xff]  }
  0x10   :  { %1801 = vmatpush1.bf16.msra.mxu1 %v2552_v15  ;;  %1749 = vmatprep.subr.bf16.mxu0 %v2553_v16  ;;  %v2594_v43 = vld [vmem:[%s3872_s1 + $0x1d0] ss:$8 sps:$4 sm:$0xff]   ;;  %v2597_v45 = vld [vmem:[%s3872_s1 + $0x1c4] ss:$8 sps:$4 sm:$0xff]   ;;  %v2600_v47 = vld [vmem:[%s3872_s1 + $0x1c0] ss:$8 sps:$4 sm:$0xff]  }
  0x11   :  { %1802 = vmatprep.subr.bf16.mxu1 %v2555_v17  ;;  %v13_v48 = vld [vmem:[%s3873_s0] sm:$0xff]  ;;  %v14_v50 = vld [vmem:[%s3873_s0 + $0x8] sm:$0xff]  ;;  %v2601_v52 = vld [vmem:[%s3872_s1 + $0xb4] ss:$8 sps:$4 sm:$0xff]  }
  0x12   :  { %v21_v49 = vld [vmem:[%s3873_s0 + $0x40] sm:$0xff]  ;;  %v22_v51 = vld [vmem:[%s3873_s0 + $0x48] sm:$0xff]  ;;  %v2603_v54 = vld [vmem:[%s3872_s1 + $0x1b4] ss:$8 sps:$4 sm:$0xff]  }
  0x13   :  { %1750 = vmatpush1.bf16.msra.mxu0 %v2557_v18  ;;  %v2241_v53 = vcombine.high %v13_v48, %v21_v49  ;;  %v2243_v55 = vcombine.high %v14_v50, %v22_v51  ;;  %v2605_v56 = vld [vmem:[%s3872_s1 + $0xb0] ss:$8 sps:$4 sm:$0xff]   ;;  %v2607_v58 = vld [vmem:[%s3872_s1 + $0xa4] ss:$8 sps:$4 sm:$0xff]   ;;  %v2611_v60 = vld [vmem:[%s3872_s1 + $0xa0] ss:$8 sps:$4 sm:$0xff]   ;;  %v2240_v8 = vcombine.low %v13_v48, %v21_v49  ;;  %v2242_v9 = vcombine.low %v14_v50, %v22_v51 }
  0x14   :  { %1803 = vmatpush1.bf16.msra.mxu1 %v2558_v19  ;;  %1751 = vmatprep.subr.bf16.mxu0 %v2559_v20  ;;  %v2606_v57 = vld [vmem:[%s3872_s1 + $0x1b0] ss:$8 sps:$4 sm:$0xff]   ;;  %v2609_v59 = vld [vmem:[%s3872_s1 + $0x1a4] ss:$8 sps:$4 sm:$0xff]   ;;  %v2612_v61 = vld [vmem:[%s3872_s1 + $0x1a0] ss:$8 sps:$4 sm:$0xff]  }
  0x15   :  { %1804 = vmatprep.subr.bf16.mxu1 %v2561_v21  ;;  %1773 = vmatprep.mubr.bf16.mxu0 %v2241_v53  ;;  %v2613_v62 = vld [vmem:[%s3872_s1 + $0x94] ss:$8 sps:$4 sm:$0xff]   ;;  %v2617_v0 = vld [vmem:[%s3872_s1 + $0x90] ss:$8 sps:$4 sm:$0xff]   ;;  %v2619_v2 = vld [vmem:[%s3872_s1 + $0x84] ss:$8 sps:$4 sm:$0xff]  }
  0x16   :  { %1826 = vmatprep.mubr.bf16.mxu1 %v2243_v55  ;;  %v2615_v63 = vld [vmem:[%s3872_s1 + $0x194] ss:$8 sps:$4 sm:$0xff]   ;;  %v2618_v1 = vld [vmem:[%s3872_s1 + $0x190] ss:$8 sps:$4 sm:$0xff]   ;;  %v2621_v3 = vld [vmem:[%s3872_s1 + $0x184] ss:$8 sps:$4 sm:$0xff]  }
  0x17   :  { %1752 = vmatpush1.bf16.msra.mxu0 %v2563_v22  ;;  %v2623_v4 = vld [vmem:[%s3872_s1 + $0x80] ss:$8 sps:$4 sm:$0xff]   ;;  %v2627_v6 = vld [vmem:[%s3872_s1 + $0x274] ss:$8 sps:$4 sm:$0xff]   ;;  %v2625_v10 = vld [vmem:[%s3872_s1 + $0x270] ss:$8 sps:$4 sm:$0xff]  }
  0x18   :  { %1805 = vmatpush1.bf16.msra.mxu1 %v2564_v23  ;;  %1753 = vmatprep.subr.bf16.mxu0 %v2565_v24  ;;  %v2624_v5 = vld [vmem:[%s3872_s1 + $0x180] ss:$8 sps:$4 sm:$0xff]   ;;  %v2630_v7 = vld [vmem:[%s3872_s1 + $0x374] ss:$8 sps:$4 sm:$0xff]   ;;  %v2628_v11 = vld [vmem:[%s3872_s1 + $0x370] ss:$8 sps:$4 sm:$0xff]  }
  0x19   :  { %1806 = vmatprep.subr.bf16.mxu1 %v2567_v25  ;;  %v2633_v12 = vld [vmem:[%s3872_s1 + $0x264] ss:$8 sps:$4 sm:$0xff]   ;;  %v2631_v14 = vld [vmem:[%s3872_s1 + $0x260] ss:$8 sps:$4 sm:$0xff]   ;;  %v2639_v16 = vld [vmem:[%s3872_s1 + $0x254] ss:$8 sps:$4 sm:$0xff]  }
  0x1a   :  { %v2636_v13 = vld [vmem:[%s3872_s1 + $0x364] ss:$8 sps:$4 sm:$0xff]   ;;  %v2634_v15 = vld [vmem:[%s3872_s1 + $0x360] ss:$8 sps:$4 sm:$0xff]   ;;  %v2642_v17 = vld [vmem:[%s3872_s1 + $0x354] ss:$8 sps:$4 sm:$0xff]  }
  0x1b   :  { %1754 = vmatpush1.bf16.msra.mxu0 %v2569_v26  ;;  %v2637_v18 = vld [vmem:[%s3872_s1 + $0x250] ss:$8 sps:$4 sm:$0xff]   ;;  %v2645_v20 = vld [vmem:[%s3872_s1 + $0x244] ss:$8 sps:$4 sm:$0xff]   ;;  %v2643_v22 = vld [vmem:[%s3872_s1 + $0x240] ss:$8 sps:$4 sm:$0xff]  }
  0x1c   :  { %1807 = vmatpush1.bf16.msra.mxu1 %v2570_v27  ;;  %1755 = vmatprep.subr.bf16.mxu0 %v2571_v28  ;;  %v2640_v19 = vld [vmem:[%s3872_s1 + $0x350] ss:$8 sps:$4 sm:$0xff]   ;;  %v2648_v21 = vld [vmem:[%s3872_s1 + $0x344] ss:$8 sps:$4 sm:$0xff]   ;;  %v2646_v23 = vld [vmem:[%s3872_s1 + $0x340] ss:$8 sps:$4 sm:$0xff]  }
  0x1d   :  { %1808 = vmatprep.subr.bf16.mxu1 %v2573_v29  ;;  %v2651_v24 = vld [vmem:[%s3872_s1 + $0x234] ss:$8 sps:$4 sm:$0xff]   ;;  %v2649_v26 = vld [vmem:[%s3872_s1 + $0x230] ss:$8 sps:$4 sm:$0xff]   ;;  %v29_v28 = vld [vmem:[%s3873_s0 + $0x80] sm:$0xff] }
  0x1e   :  { %v2654_v25 = vld [vmem:[%s3872_s1 + $0x334] ss:$8 sps:$4 sm:$0xff]   ;;  %v2652_v27 = vld [vmem:[%s3872_s1 + $0x330] ss:$8 sps:$4 sm:$0xff]   ;;  %v37_v29 = vld [vmem:[%s3873_s0 + $0xc0] sm:$0xff] }
  0x1f   :  { %1756 = vmatpush1.bf16.msra.mxu0 %v2575_v30  ;;  %v30_v30 = vld [vmem:[%s3873_s0 + $0x88] sm:$0xff]  ;;  %v3252_v48 = vld [vmem:[%s3873_s0 + $0x18] sm:$0xff] }
  0x20   :  { %1809 = vmatpush1.bf16.msra.mxu1 %v2576_v31  ;;  %1757 = vmatprep.subr.bf16.mxu0 %v2577_v32  ;;  %v38_v31 = vld [vmem:[%s3873_s0 + $0xc8] sm:$0xff]  ;;  %v3259_v50 = vld [vmem:[%s3873_s0 + $0x58] sm:$0xff] }
  0x21   :  { %1810 = vmatprep.subr.bf16.mxu1 %v2579_v33  ;;  %v2657_v32 = vld [vmem:[%s3872_s1 + $0x224] ss:$8 sps:$4 sm:$0xff]   ;;  %v2257_v33 = vcombine.high %v29_v28, %v37_v29  ;;  %v2247_v51 = vcombine.high %v3252_v48, %v3259_v50  ;;  %v2670_v53 = vld [vmem:[%s3872_s1 + $0x300] ss:$8 sps:$4 sm:$0xff]   ;;  %v2678_v55 = vld [vmem:[%s3872_s1 + $0x3f4] ss:$8 sps:$4 sm:$0xff]  }
  0x23   :  { %1758 = vmatpush2.bf16.msra.mxu0 %v2581_v34  ;;  %v2259_v34 = vcombine.high %v30_v30, %v38_v31 }
  0x24   :  { %1811 = vmatpush2.bf16.msra.mxu1 %v2582_v35  ;;  %1759 = vmatprep.subr.bf16.mxu0 %v2583_v36  ;;  %v2256_v35 = vcombine.low %v29_v28, %v37_v29  ;;  %v2660_v36 = vld [vmem:[%s3872_s1 + $0x324] ss:$8 sps:$4 sm:$0xff]   ;;  %v2246_v29 = vcombine.low %v3252_v48, %v3259_v50 }
  0x25   :  { %1812 = vmatprep.subr.bf16.mxu1 %v2585_v37  ;;  %v2258_v37 = vcombine.low %v30_v30, %v38_v31  ;;  %v32_v30 = vld [vmem:[%s3873_s0 + $0x98] sm:$0xff]  ;;  %v2741_v48 = vld [vmem:[%s3872_s1 + $0x444] ss:$8 sps:$4 sm:$0xff]  }
  0x26   :  { %v40_v31 = vld [vmem:[%s3873_s0 + $0xd8] sm:$0xff] }
  0x27   :  { %1760 = vmatpush2.bf16.msra.mxu0 %v2587_v38  ;;  %v2655_v38 = vld [vmem:[%s3872_s1 + $0x220] ss:$8 sps:$4 sm:$0xff]  }
  0x28   :  { %1813 = vmatpush2.bf16.msra.mxu1 %v2588_v39  ;;  %1761 = vmatprep.subr.bf16.mxu0 %v2589_v40  ;;  %v2658_v39 = vld [vmem:[%s3872_s1 + $0x320] ss:$8 sps:$4 sm:$0xff]   ;;  %v2663_v40 = vld [vmem:[%s3872_s1 + $0x214] ss:$8 sps:$4 sm:$0xff]  }
  0x29   :  { %1814 = vmatprep.subr.bf16.mxu1 %v2591_v41  ;;  %v2666_v41 = vld [vmem:[%s3872_s1 + $0x314] ss:$8 sps:$4 sm:$0xff]  }
  0x2b   :  { %1762 = vmatpush2.bf16.msra.mxu0 %v2593_v42  ;;  %v2661_v42 = vld [vmem:[%s3872_s1 + $0x210] ss:$8 sps:$4 sm:$0xff]  }
  0x2c   :  { %1815 = vmatpush2.bf16.msra.mxu1 %v2594_v43  ;;  %1763 = vmatprep.subr.bf16.mxu0 %v2595_v44  ;;  %v2664_v43 = vld [vmem:[%s3872_s1 + $0x310] ss:$8 sps:$4 sm:$0xff]   ;;  %v2669_v44 = vld [vmem:[%s3872_s1 + $0x204] ss:$8 sps:$4 sm:$0xff]  }
  0x2d   :  { %1816 = vmatprep.subr.bf16.mxu1 %v2597_v45  ;;  %v2672_v45 = vld [vmem:[%s3872_s1 + $0x304] ss:$8 sps:$4 sm:$0xff]  }
  0x2f   :  { %1764 = vmatpush2.bf16.msra.mxu0 %v2599_v46  ;;  %v3242_v46 = vld [vmem:[%s3873_s0 + $0x10] sm:$0xff] }
  0x30   :  { %1817 = vmatpush2.bf16.msra.mxu1 %v2600_v47  ;;  %1765 = vmatprep.subr.bf16.mxu0 %v2601_v52  ;;  %v3247_v47 = vld [vmem:[%s3873_s0 + $0x50] sm:$0xff]  ;;  %v2667_v52 = vld [vmem:[%s3872_s1 + $0x200] ss:$8 sps:$4 sm:$0xff]  }
  0x31   :  { %1818 = vmatprep.subr.bf16.mxu1 %v2603_v54  ;;  %v2245_v49 = vcombine.high %v3242_v46, %v3247_v47  ;;  %v2675_v54 = vld [vmem:[%s3872_s1 + $0x2f4] ss:$8 sps:$4 sm:$0xff]   ;;  %v2244_v28 = vcombine.low %v3242_v46, %v3247_v47  ;;  %v3430_v46 = vld [vmem:[%s3873_s0 + $0x28] sm:$0xff] }
  0x32   :  { %v3435_v47 = vld [vmem:[%s3873_s0 + $0x68] sm:$0xff] }
  0x33   :  { %1766 = vmatpush2.bf16.msra.mxu0 %v2605_v56  ;;  %v2673_v56 = vld [vmem:[%s3872_s1 + $0x2f0] ss:$8 sps:$4 sm:$0xff]  }
  0x34   :  { %1819 = vmatpush2.bf16.msra.mxu1 %v2606_v57  ;;  %1767 = vmatprep.subr.bf16.mxu0 %v2607_v58  ;;  %v2676_v57 = vld [vmem:[%s3872_s1 + $0x3f0] ss:$8 sps:$4 sm:$0xff]   ;;  %v2681_v58 = vld [vmem:[%s3872_s1 + $0x2e4] ss:$8 sps:$4 sm:$0xff]  }
  0x35   :  { %1820 = vmatprep.subr.bf16.mxu1 %v2609_v59  ;;  %v2684_v59 = vld [vmem:[%s3872_s1 + $0x3e4] ss:$8 sps:$4 sm:$0xff]  }
  0x37   :  { %1768 = vmatpush2.bf16.msra.mxu0 %v2611_v60  ;;  %v2679_v60 = vld [vmem:[%s3872_s1 + $0x2e0] ss:$8 sps:$4 sm:$0xff]  }
  0x38   :  { %1821 = vmatpush2.bf16.msra.mxu1 %v2612_v61  ;;  %1769 = vmatprep.subr.bf16.mxu0 %v2613_v62  ;;  %v2682_v61 = vld [vmem:[%s3872_s1 + $0x3e0] ss:$8 sps:$4 sm:$0xff]   ;;  %v2687_v62 = vld [vmem:[%s3872_s1 + $0x2d4] ss:$8 sps:$4 sm:$0xff]  }
  0x39   :  { %1822 = vmatprep.subr.bf16.mxu1 %v2615_v63  ;;  %v2690_v63 = vld [vmem:[%s3872_s1 + $0x3d4] ss:$8 sps:$4 sm:$0xff]  }
  0x3b   :  { %1770 = vmatpush2.bf16.msra.mxu0 %v2617_v0  ;;  %v2685_v0 = vld [vmem:[%s3872_s1 + $0x2d0] ss:$8 sps:$4 sm:$0xff]  }
  0x3c   :  { %1823 = vmatpush2.bf16.msra.mxu1 %v2618_v1  ;;  %1771 = vmatprep.subr.bf16.mxu0 %v2619_v2  ;;  %v2688_v1 = vld [vmem:[%s3872_s1 + $0x3d0] ss:$8 sps:$4 sm:$0xff]   ;;  %v2693_v2 = vld [vmem:[%s3872_s1 + $0x2c4] ss:$8 sps:$4 sm:$0xff]  }
  0x3d   :  { %1824 = vmatprep.subr.bf16.mxu1 %v2621_v3  ;;  %v2696_v3 = vld [vmem:[%s3872_s1 + $0x3c4] ss:$8 sps:$4 sm:$0xff]  }
  0x3f   :  { %1772 = vmatpush2.bf16.msra.mxu0 %v2623_v4  ;;  %v2691_v4 = vld [vmem:[%s3872_s1 + $0x2c0] ss:$8 sps:$4 sm:$0xff]  }
  0x40   :  { %1825 = vmatpush2.bf16.msra.mxu1 %v2624_v5  ;;  %1847 = vmatprep.subr.bf16.mxu0 %v2627_v6  ;;  %v2694_v5 = vld [vmem:[%s3872_s1 + $0x3c0] ss:$8 sps:$4 sm:$0xff]   ;;  %v2699_v6 = vld [vmem:[%s3872_s1 + $0x2b4] ss:$8 sps:$4 sm:$0xff]  }
  0x41   :  { %1900 = vmatprep.subr.bf16.mxu1 %v2630_v7  ;;  %v2702_v7 = vld [vmem:[%s3872_s1 + $0x3b4] ss:$8 sps:$4 sm:$0xff]  }
  0x42   :  { %1774 = vmatmul.mubr.bf16.vlgmr.msra.gmra.mxu0 %v2240_v8  ;;  %v2697_v8 = vld [vmem:[%s3872_s1 + $0x2b0] ss:$8 sps:$4 sm:$0xff]  }
  0x43   :  { %1827 = vmatmul.mubr.bf16.vlgmr.msra.gmra.mxu1 %v2242_v9  ;;  %1848 = vmatpush1.bf16.msra.mxu0 %v2625_v10  ;;  %v2700_v9 = vld [vmem:[%s3872_s1 + $0x3b0] ss:$8 sps:$4 sm:$0xff]   ;;  %v2705_v10 = vld [vmem:[%s3872_s1 + $0x2a4] ss:$8 sps:$4 sm:$0xff]  }
  0x44   :  { %1901 = vmatpush1.bf16.msra.mxu1 %v2628_v11  ;;  %1849 = vmatprep.subr.bf16.mxu0 %v2633_v12  ;;  %v2708_v11 = vld [vmem:[%s3872_s1 + $0x3a4] ss:$8 sps:$4 sm:$0xff]   ;;  %v2703_v12 = vld [vmem:[%s3872_s1 + $0x2a0] ss:$8 sps:$4 sm:$0xff]  }
  0x45   :  { %1902 = vmatprep.subr.bf16.mxu1 %v2636_v13  ;;  %1783 = vmatprep.mubr.bf16.mxu0 %v2257_v33  ;;  %v2706_v13 = vld [vmem:[%s3872_s1 + $0x3a0] ss:$8 sps:$4 sm:$0xff]   ;;  %v2732_v33 = vld [vmem:[%s3872_s1 + $0x564] ss:$8 sps:$4 sm:$0xff]  }
  0x46   :  { %1836 = vmatprep.mubr.bf16.mxu1 %v2259_v34 }
  0x47   :  { %1850 = vmatpush1.bf16.msra.mxu0 %v2631_v14  ;;  %v2711_v14 = vld [vmem:[%s3872_s1 + $0x294] ss:$8 sps:$4 sm:$0xff]  }
  0x48   :  { %1903 = vmatpush1.bf16.msra.mxu1 %v2634_v15  ;;  %1851 = vmatprep.subr.bf16.mxu0 %v2639_v16  ;;  %v2714_v15 = vld [vmem:[%s3872_s1 + $0x394] ss:$8 sps:$4 sm:$0xff]   ;;  %v2709_v16 = vld [vmem:[%s3872_s1 + $0x290] ss:$8 sps:$4 sm:$0xff]  }
  0x49   :  { %1904 = vmatprep.subr.bf16.mxu1 %v2642_v17  ;;  %v2712_v17 = vld [vmem:[%s3872_s1 + $0x390] ss:$8 sps:$4 sm:$0xff]  }
  0x4a   :  { %1784 = vmatmul.mubr.bf16.gmra.mxu0 %v2256_v35  ;;  %v2263_v35 = vcombine.high %v32_v30, %v40_v31 }
  0x4b   :  { %1852 = vmatpush1.bf16.msra.mxu0 %v2637_v18  ;;  %1837 = vmatmul.mubr.bf16.gmra.mxu1 %v2258_v37  ;;  %v2717_v18 = vld [vmem:[%s3872_s1 + $0x284] ss:$8 sps:$4 sm:$0xff]   ;;  %v2730_v37 = vld [vmem:[%s3872_s1 + $0x560] ss:$8 sps:$4 sm:$0xff]  }
  0x4c   :  { %1905 = vmatpush1.bf16.msra.mxu1 %v2640_v19  ;;  %1853 = vmatprep.subr.bf16.mxu0 %v2645_v20  ;;  %v2720_v19 = vld [vmem:[%s3872_s1 + $0x384] ss:$8 sps:$4 sm:$0xff]   ;;  %v2715_v20 = vld [vmem:[%s3872_s1 + $0x280] ss:$8 sps:$4 sm:$0xff]  }
  0x4d   :  { %1906 = vmatprep.subr.bf16.mxu1 %v2648_v21  ;;  %1879 = vmatprep.mubr.bf16.mxu0 %v2245_v49  ;;  %v2718_v21 = vld [vmem:[%s3872_s1 + $0x380] ss:$8 sps:$4 sm:$0xff]   ;;  %v2744_v49 = vld [vmem:[%s3872_s1 + $0x544] ss:$8 sps:$4 sm:$0xff]  }
  0x4e   :  { %1932 = vmatprep.mubr.bf16.mxu1 %v2247_v51  ;;  %v2251_v51 = vcombine.high %v3430_v46, %v3435_v47 }
  0x4f   :  { %1854 = vmatpush1.bf16.msra.mxu0 %v2643_v22  ;;  %v2723_v22 = vld [vmem:[%s3872_s1 + $0x474] ss:$8 sps:$4 sm:$0xff]  }
  0x50   :  { %1907 = vmatpush1.bf16.msra.mxu1 %v2646_v23  ;;  %1855 = vmatprep.subr.bf16.mxu0 %v2651_v24  ;;  %v2726_v23 = vld [vmem:[%s3872_s1 + $0x574] ss:$8 sps:$4 sm:$0xff]   ;;  %v2721_v24 = vld [vmem:[%s3872_s1 + $0x470] ss:$8 sps:$4 sm:$0xff]  }
  0x51   :  { %1908 = vmatprep.subr.bf16.mxu1 %v2654_v25  ;;  %v2724_v25 = vld [vmem:[%s3872_s1 + $0x570] ss:$8 sps:$4 sm:$0xff]  }
  0x53   :  { %1856 = vmatpush1.bf16.msra.mxu0 %v2649_v26  ;;  %v31_v26 = vld [vmem:[%s3873_s0 + $0x90] sm:$0xff] }
  0x54   :  { %1909 = vmatpush1.bf16.msra.mxu1 %v2652_v27  ;;  %1857 = vmatprep.subr.bf16.mxu0 %v2657_v32  ;;  %v39_v27 = vld [vmem:[%s3873_s0 + $0xd0] sm:$0xff]  ;;  %v2729_v32 = vld [vmem:[%s3872_s1 + $0x464] ss:$8 sps:$4 sm:$0xff]  }
  0x55   :  { %1910 = vmatprep.subr.bf16.mxu1 %v2660_v36  ;;  %v2261_v34 = vcombine.high %v31_v26, %v39_v27  ;;  %v2727_v36 = vld [vmem:[%s3872_s1 + $0x460] ss:$8 sps:$4 sm:$0xff]  }
  0x57   :  { %1858 = vmatpush1.bf16.msra.mxu0 %v2655_v38  ;;  %v2735_v38 = vld [vmem:[%s3872_s1 + $0x454] ss:$8 sps:$4 sm:$0xff]  }
  0x58   :  { %1911 = vmatpush1.bf16.msra.mxu1 %v2658_v39  ;;  %1859 = vmatprep.subr.bf16.mxu0 %v2663_v40  ;;  %v2738_v39 = vld [vmem:[%s3872_s1 + $0x554] ss:$8 sps:$4 sm:$0xff]   ;;  %v2733_v40 = vld [vmem:[%s3872_s1 + $0x450] ss:$8 sps:$4 sm:$0xff]  }
  0x59   :  { %1912 = vmatprep.subr.bf16.mxu1 %v2666_v41  ;;  %v2736_v41 = vld [vmem:[%s3872_s1 + $0x550] ss:$8 sps:$4 sm:$0xff]  }
  0x5b   :  { %1860 = vmatpush1.bf16.msra.mxu0 %v2661_v42  ;;  %v3420_v42 = vld [vmem:[%s3873_s0 + $0x20] sm:$0xff] }
  0x5c   :  { %1913 = vmatpush1.bf16.msra.mxu1 %v2664_v43  ;;  %1861 = vmatprep.subr.bf16.mxu0 %v2669_v44  ;;  %v3425_v43 = vld [vmem:[%s3873_s0 + $0x60] sm:$0xff]  ;;  %v2260_v44 = vcombine.low %v31_v26, %v39_v27 }
  0x5d   :  { %1914 = vmatprep.subr.bf16.mxu1 %v2672_v45  ;;  %v2262_v45 = vcombine.low %v32_v30, %v40_v31  ;;  %v2249_v50 = vcombine.high %v3420_v42, %v3425_v43  ;;  %v2801_v26 = vld [vmem:[%s3872_s1 + $0x4a4] ss:$8 sps:$4 sm:$0xff]   ;;  %v2807_v30 = vld [vmem:[%s3872_s1 + $0x494] ss:$8 sps:$4 sm:$0xff]  }
  0x5e   :  { %v2804_v27 = vld [vmem:[%s3872_s1 + $0x5a4] ss:$8 sps:$4 sm:$0xff]   ;;  %v2810_v31 = vld [vmem:[%s3872_s1 + $0x594] ss:$8 sps:$4 sm:$0xff]  }
  0x5f   :  { %1862 = vmatpush1.bf16.msra.mxu0 %v2667_v52  ;;  %v2739_v52 = vld [vmem:[%s3872_s1 + $0x440] ss:$8 sps:$4 sm:$0xff]  }
  0x60   :  { %1915 = vmatpush1.bf16.msra.mxu1 %v2670_v53  ;;  %1863 = vmatprep.subr.bf16.mxu0 %v2675_v54  ;;  %v2742_v53 = vld [vmem:[%s3872_s1 + $0x540] ss:$8 sps:$4 sm:$0xff]   ;;  %v2747_v54 = vld [vmem:[%s3872_s1 + $0x434] ss:$8 sps:$4 sm:$0xff]  }
  0x61   :  { %1916 = vmatprep.subr.bf16.mxu1 %v2678_v55  ;;  %v2750_v55 = vld [vmem:[%s3872_s1 + $0x534] ss:$8 sps:$4 sm:$0xff]  }
  0x63   :  { %1864 = vmatpush2.bf16.msra.mxu0 %v2673_v56  ;;  %v2745_v56 = vld [vmem:[%s3872_s1 + $0x430] ss:$8 sps:$4 sm:$0xff]  }
  0x64   :  { %1917 = vmatpush2.bf16.msra.mxu1 %v2676_v57  ;;  %1865 = vmatprep.subr.bf16.mxu0 %v2681_v58  ;;  %v2748_v57 = vld [vmem:[%s3872_s1 + $0x530] ss:$8 sps:$4 sm:$0xff]   ;;  %v2753_v58 = vld [vmem:[%s3872_s1 + $0x424] ss:$8 sps:$4 sm:$0xff]  }
  0x65   :  { %1918 = vmatprep.subr.bf16.mxu1 %v2684_v59  ;;  %v2756_v59 = vld [vmem:[%s3872_s1 + $0x524] ss:$8 sps:$4 sm:$0xff]  }
  0x67   :  { %1866 = vmatpush2.bf16.msra.mxu0 %v2679_v60  ;;  %v2751_v60 = vld [vmem:[%s3872_s1 + $0x420] ss:$8 sps:$4 sm:$0xff]  }
  0x68   :  { %1919 = vmatpush2.bf16.msra.mxu1 %v2682_v61  ;;  %1867 = vmatprep.subr.bf16.mxu0 %v2687_v62  ;;  %v2754_v61 = vld [vmem:[%s3872_s1 + $0x520] ss:$8 sps:$4 sm:$0xff]   ;;  %v2759_v62 = vld [vmem:[%s3872_s1 + $0x414] ss:$8 sps:$4 sm:$0xff]  }
  0x69   :  { %1920 = vmatprep.subr.bf16.mxu1 %v2690_v63  ;;  %v2762_v63 = vld [vmem:[%s3872_s1 + $0x514] ss:$8 sps:$4 sm:$0xff]  }
  0x6b   :  { %1868 = vmatpush2.bf16.msra.mxu0 %v2685_v0  ;;  %v2757_v0 = vld [vmem:[%s3872_s1 + $0x410] ss:$8 sps:$4 sm:$0xff]  }
  0x6c   :  { %1921 = vmatpush2.bf16.msra.mxu1 %v2688_v1  ;;  %1869 = vmatprep.subr.bf16.mxu0 %v2693_v2  ;;  %v2760_v1 = vld [vmem:[%s3872_s1 + $0x510] ss:$8 sps:$4 sm:$0xff]   ;;  %v2765_v2 = vld [vmem:[%s3872_s1 + $0x404] ss:$8 sps:$4 sm:$0xff]  }
  0x6d   :  { %1922 = vmatprep.subr.bf16.mxu1 %v2696_v3  ;;  %v2768_v3 = vld [vmem:[%s3872_s1 + $0x504] ss:$8 sps:$4 sm:$0xff]  }
  0x6f   :  { %1870 = vmatpush2.bf16.msra.mxu0 %v2691_v4  ;;  %v2763_v4 = vld [vmem:[%s3872_s1 + $0x400] ss:$8 sps:$4 sm:$0xff]  }
  0x70   :  { %1923 = vmatpush2.bf16.msra.mxu1 %v2694_v5  ;;  %1871 = vmatprep.subr.bf16.mxu0 %v2699_v6  ;;  %v2766_v5 = vld [vmem:[%s3872_s1 + $0x500] ss:$8 sps:$4 sm:$0xff]   ;;  %v2771_v6 = vld [vmem:[%s3872_s1 + $0x4f4] ss:$8 sps:$4 sm:$0xff]  }
  0x71   :  { %1924 = vmatprep.subr.bf16.mxu1 %v2702_v7  ;;  %v2774_v7 = vld [vmem:[%s3872_s1 + $0x5f4] ss:$8 sps:$4 sm:$0xff]  }
  0x73   :  { %1872 = vmatpush2.bf16.msra.mxu0 %v2697_v8  ;;  %v2769_v8 = vld [vmem:[%s3872_s1 + $0x4f0] ss:$8 sps:$4 sm:$0xff]  }
  0x74   :  { %1925 = vmatpush2.bf16.msra.mxu1 %v2700_v9  ;;  %1873 = vmatprep.subr.bf16.mxu0 %v2705_v10  ;;  %v2772_v9 = vld [vmem:[%s3872_s1 + $0x5f0] ss:$8 sps:$4 sm:$0xff]   ;;  %v2777_v10 = vld [vmem:[%s3872_s1 + $0x4e4] ss:$8 sps:$4 sm:$0xff]  }
  0x75   :  { %1926 = vmatprep.subr.bf16.mxu1 %v2708_v11  ;;  %v2780_v11 = vld [vmem:[%s3872_s1 + $0x5e4] ss:$8 sps:$4 sm:$0xff]  }
  0x77   :  { %1874 = vmatpush2.bf16.msra.mxu0 %v2703_v12  ;;  %v2775_v12 = vld [vmem:[%s3872_s1 + $0x4e0] ss:$8 sps:$4 sm:$0xff]  }
  0x78   :  { %1927 = vmatpush2.bf16.msra.mxu1 %v2706_v13  ;;  %1875 = vmatprep.subr.bf16.mxu0 %v2711_v14  ;;  %v2778_v13 = vld [vmem:[%s3872_s1 + $0x5e0] ss:$8 sps:$4 sm:$0xff]   ;;  %v2783_v14 = vld [vmem:[%s3872_s1 + $0x4d4] ss:$8 sps:$4 sm:$0xff]  }
  0x79   :  { %1928 = vmatprep.subr.bf16.mxu1 %v2714_v15  ;;  %v2786_v15 = vld [vmem:[%s3872_s1 + $0x5d4] ss:$8 sps:$4 sm:$0xff]  }
  0x7b   :  { %1876 = vmatpush2.bf16.msra.mxu0 %v2709_v16  ;;  %v2781_v16 = vld [vmem:[%s3872_s1 + $0x4d0] ss:$8 sps:$4 sm:$0xff]  }
  0x7c   :  { %1929 = vmatpush2.bf16.msra.mxu1 %v2712_v17  ;;  %1877 = vmatprep.subr.bf16.mxu0 %v2717_v18  ;;  %v2784_v17 = vld [vmem:[%s3872_s1 + $0x5d0] ss:$8 sps:$4 sm:$0xff]   ;;  %v2789_v18 = vld [vmem:[%s3872_s1 + $0x4c4] ss:$8 sps:$4 sm:$0xff]  }
  0x7d   :  { %1930 = vmatprep.subr.bf16.mxu1 %v2720_v19  ;;  %v2792_v19 = vld [vmem:[%s3872_s1 + $0x5c4] ss:$8 sps:$4 sm:$0xff]  }
  0x7f   :  { %1878 = vmatpush2.bf16.msra.mxu0 %v2715_v20  ;;  %v2787_v20 = vld [vmem:[%s3872_s1 + $0x4c0] ss:$8 sps:$4 sm:$0xff]  }
  0x80   :  { %1931 = vmatpush2.bf16.msra.mxu1 %v2718_v21  ;;  %1953 = vmatprep.subr.bf16.mxu0 %v2723_v22  ;;  %v2790_v21 = vld [vmem:[%s3872_s1 + $0x5c0] ss:$8 sps:$4 sm:$0xff]   ;;  %v2795_v22 = vld [vmem:[%s3872_s1 + $0x4b4] ss:$8 sps:$4 sm:$0xff]  }
  0x81   :  { %2006 = vmatprep.subr.bf16.mxu1 %v2726_v23  ;;  %v2798_v23 = vld [vmem:[%s3872_s1 + $0x5b4] ss:$8 sps:$4 sm:$0xff]  }
  0x82   :  { %1880 = vmatmul.mubr.bf16.vlgmr.msra.gmra.mxu0 %v2244_v28  ;;  %v2799_v28 = vld [vmem:[%s3872_s1 + $0x4a0] ss:$8 sps:$4 sm:$0xff]  }
  0x83   :  { %1933 = vmatmul.mubr.bf16.vlgmr.msra.gmra.mxu1 %v2246_v29  ;;  %1954 = vmatpush1.bf16.msra.mxu0 %v2721_v24  ;;  %v2793_v24 = vld [vmem:[%s3872_s1 + $0x4b0] ss:$8 sps:$4 sm:$0xff]   ;;  %v2802_v29 = vld [vmem:[%s3872_s1 + $0x5a0] ss:$8 sps:$4 sm:$0xff]  }
  0x84   :  { %2007 = vmatpush1.bf16.msra.mxu1 %v2724_v25  ;;  %1955 = vmatprep.subr.bf16.mxu0 %v2729_v32  ;;  %v2796_v25 = vld [vmem:[%s3872_s1 + $0x5b0] ss:$8 sps:$4 sm:$0xff]  }
  0x85   :  { %2008 = vmatprep.subr.bf16.mxu1 %v2732_v33  ;;  %1889 = vmatprep.mubr.bf16.mxu0 %v2261_v34  ;;  %v2805_v32 = vld [vmem:[%s3872_s1 + $0x490] ss:$8 sps:$4 sm:$0xff]   ;;  %v2813_v34 = vld [vmem:[%s3872_s1 + $0x484] ss:$8 sps:$4 sm:$0xff]  }
  0x86   :  { %1942 = vmatprep.mubr.bf16.mxu1 %v2263_v35  ;;  %v2808_v33 = vld [vmem:[%s3872_s1 + $0x590] ss:$8 sps:$4 sm:$0xff]   ;;  %v2816_v35 = vld [vmem:[%s3872_s1 + $0x584] ss:$8 sps:$4 sm:$0xff]  }
  0x87   :  { %1956 = vmatpush1.bf16.msra.mxu0 %v2727_v36  ;;  %v2811_v36 = vld [vmem:[%s3872_s1 + $0x480] ss:$8 sps:$4 sm:$0xff]  }
  0x88   :  { %2009 = vmatpush1.bf16.msra.mxu1 %v2730_v37  ;;  %1957 = vmatprep.subr.bf16.mxu0 %v2735_v38  ;;  %v2814_v37 = vld [vmem:[%s3872_s1 + $0x580] ss:$8 sps:$4 sm:$0xff]   ;;  %v2819_v38 = vld [vmem:[%s3872_s1 + $0x674] ss:$8 sps:$4 sm:$0xff]  }
  0x89   :  { %2010 = vmatprep.subr.bf16.mxu1 %v2738_v39  ;;  %v2822_v39 = vld [vmem:[%s3872_s1 + $0x774] ss:$8 sps:$4 sm:$0xff]  }
  0x8a   :  { %1890 = vmatmul.mubr.bf16.gmra.mxu0 %v2260_v44  ;;  %v2250_v44 = vcombine.low %v3430_v46, %v3435_v47  ;;  %v2825_v46 = vld [vmem:[%s3872_s1 + $0x664] ss:$8 sps:$4 sm:$0xff]  }
  0x8b   :  { %1943 = vmatmul.mubr.bf16.gmra.mxu1 %v2262_v45  ;;  %1958 = vmatpush1.bf16.msra.mxu0 %v2733_v40  ;;  %v33_v40 = vld [vmem:[%s3873_s0 + $0xa0] sm:$0xff] }
  0x8c   :  { %2011 = vmatpush1.bf16.msra.mxu1 %v2736_v41  ;;  %1959 = vmatprep.subr.bf16.mxu0 %v2741_v48  ;;  %v2248_v41 = vcombine.low %v3420_v42, %v3425_v43  ;;  %v41_v45 = vld [vmem:[%s3873_s0 + $0xe0] sm:$0xff]  ;;  %v34_v48 = vld [vmem:[%s3873_s0 + $0xa8] sm:$0xff]  ;;  %v2817_v42 = vld [vmem:[%s3872_s1 + $0x670] ss:$8 sps:$4 sm:$0xff]  }
  0x8d   :  { %2012 = vmatprep.subr.bf16.mxu1 %v2744_v49  ;;  %1985 = vmatprep.mubr.bf16.mxu0 %v2249_v50  ;;  %v42_v49 = vld [vmem:[%s3873_s0 + $0xe8] sm:$0xff]  ;;  %v2820_v43 = vld [vmem:[%s3872_s1 + $0x770] ss:$8 sps:$4 sm:$0xff]   ;;  %v2265_v50 = vcombine.high %v33_v40, %v41_v45 }
  0x8e   :  { %2038 = vmatprep.mubr.bf16.mxu1 %v2251_v51  ;;  %v2828_v47 = vld [vmem:[%s3872_s1 + $0x764] ss:$8 sps:$4 sm:$0xff]   ;;  %v2267_v51 = vcombine.high %v34_v48, %v42_v49 }
  0x8f   :  { %1960 = vmatpush1.bf16.msra.mxu0 %v2739_v52  ;;  %v2823_v52 = vld [vmem:[%s3872_s1 + $0x660] ss:$8 sps:$4 sm:$0xff]  }
  0x90   :  { %2013 = vmatpush1.bf16.msra.mxu1 %v2742_v53  ;;  %1961 = vmatprep.subr.bf16.mxu0 %v2747_v54  ;;  %v2826_v53 = vld [vmem:[%s3872_s1 + $0x760] ss:$8 sps:$4 sm:$0xff]   ;;  %v2831_v54 = vld [vmem:[%s3872_s1 + $0x654] ss:$8 sps:$4 sm:$0xff]  }
  0x91   :  { %2014 = vmatprep.subr.bf16.mxu1 %v2750_v55  ;;  %v2834_v55 = vld [vmem:[%s3872_s1 + $0x754] ss:$8 sps:$4 sm:$0xff]  }
  0x93   :  { %1962 = vmatpush1.bf16.msra.mxu0 %v2745_v56  ;;  %v3646_v56 = vld [vmem:[%s3873_s0 + $0x30] sm:$0xff] }
  0x94   :  { %2015 = vmatpush1.bf16.msra.mxu1 %v2748_v57  ;;  %1963 = vmatprep.subr.bf16.mxu0 %v2753_v58  ;;  %v2264_v57 = vcombine.low %v33_v40, %v41_v45  ;;  %v2266_v58 = vcombine.low %v34_v48, %v42_v49  ;;  %v2889_v40 = vld [vmem:[%s3872_s1 + $0x6b0] ss:$8 sps:$4 sm:$0xff]   ;;  %v2900_v45 = vld [vmem:[%s3872_s1 + $0x7a4] ss:$8 sps:$4 sm:$0xff]   ;;  %v2895_v48 = vld [vmem:[%s3872_s1 + $0x6a0] ss:$8 sps:$4 sm:$0xff]  }
  0x95   :  { %2016 = vmatprep.subr.bf16.mxu1 %v2756_v59  ;;  %v3651_v59 = vld [vmem:[%s3873_s0 + $0x70] sm:$0xff]  ;;  %v2898_v49 = vld [vmem:[%s3872_s1 + $0x7a0] ss:$8 sps:$4 sm:$0xff]  }
  0x97   :  { %1964 = vmatpush1.bf16.msra.mxu0 %v2751_v60  ;;  %v3656_v60 = vld [vmem:[%s3873_s0 + $0x38] sm:$0xff] }
  0x98   :  { %2017 = vmatpush1.bf16.msra.mxu1 %v2754_v61  ;;  %1965 = vmatprep.subr.bf16.mxu0 %v2759_v62  ;;  %v3661_v61 = vld [vmem:[%s3873_s0 + $0x78] sm:$0xff] }
  0x99   :  { %2018 = vmatprep.subr.bf16.mxu1 %v2762_v63  ;;  %v2829_v62 = vld [vmem:[%s3872_s1 + $0x650] ss:$8 sps:$4 sm:$0xff]  }
  0x9a   :  { %v2832_v63 = vld [vmem:[%s3872_s1 + $0x750] ss:$8 sps:$4 sm:$0xff]  }
  0x9b   :  { %1966 = vmatpush1.bf16.msra.mxu0 %v2757_v0  ;;  %v2837_v0 = vld [vmem:[%s3872_s1 + $0x644] ss:$8 sps:$4 sm:$0xff]  }
  0x9c   :  { %2019 = vmatpush1.bf16.msra.mxu1 %v2760_v1  ;;  %1967 = vmatprep.subr.bf16.mxu0 %v2765_v2  ;;  %v2840_v1 = vld [vmem:[%s3872_s1 + $0x744] ss:$8 sps:$4 sm:$0xff]   ;;  %v2253_v2 = vcombine.high %v3646_v56, %v3651_v59 }
  0x9d   :  { %2020 = vmatprep.subr.bf16.mxu1 %v2768_v3  ;;  %v2255_v3 = vcombine.high %v3656_v60, %v3661_v61 }
  0x9f   :  { %1968 = vmatpush1.bf16.msra.mxu0 %v2763_v4  ;;  %v2835_v4 = vld [vmem:[%s3872_s1 + $0x640] ss:$8 sps:$4 sm:$0xff]  }
  0xa0   :  { %2021 = vmatpush1.bf16.msra.mxu1 %v2766_v5  ;;  %1969 = vmatprep.subr.bf16.mxu0 %v2771_v6  ;;  %v2838_v5 = vld [vmem:[%s3872_s1 + $0x740] ss:$8 sps:$4 sm:$0xff]   ;;  %v2843_v6 = vld [vmem:[%s3872_s1 + $0x634] ss:$8 sps:$4 sm:$0xff]  }
  0xa1   :  { %2022 = vmatprep.subr.bf16.mxu1 %v2774_v7  ;;  %v2846_v7 = vld [vmem:[%s3872_s1 + $0x734] ss:$8 sps:$4 sm:$0xff]  }
  0xa3   :  { %1970 = vmatpush2.bf16.msra.mxu0 %v2769_v8  ;;  %v2841_v8 = vld [vmem:[%s3872_s1 + $0x630] ss:$8 sps:$4 sm:$0xff]  }
  0xa4   :  { %2023 = vmatpush2.bf16.msra.mxu1 %v2772_v9  ;;  %1971 = vmatprep.subr.bf16.mxu0 %v2777_v10  ;;  %v2844_v9 = vld [vmem:[%s3872_s1 + $0x730] ss:$8 sps:$4 sm:$0xff]   ;;  %v2849_v10 = vld [vmem:[%s3872_s1 + $0x624] ss:$8 sps:$4 sm:$0xff]  }
  0xa5   :  { %2024 = vmatprep.subr.bf16.mxu1 %v2780_v11  ;;  %v2852_v11 = vld [vmem:[%s3872_s1 + $0x724] ss:$8 sps:$4 sm:$0xff]  }
  0xa7   :  { %1972 = vmatpush2.bf16.msra.mxu0 %v2775_v12  ;;  %v2847_v12 = vld [vmem:[%s3872_s1 + $0x620] ss:$8 sps:$4 sm:$0xff]  }
  0xa8   :  { %2025 = vmatpush2.bf16.msra.mxu1 %v2778_v13  ;;  %1973 = vmatprep.subr.bf16.mxu0 %v2783_v14  ;;  %v2850_v13 = vld [vmem:[%s3872_s1 + $0x720] ss:$8 sps:$4 sm:$0xff]   ;;  %v2855_v14 = vld [vmem:[%s3872_s1 + $0x614] ss:$8 sps:$4 sm:$0xff]  }
  0xa9   :  { %2026 = vmatprep.subr.bf16.mxu1 %v2786_v15  ;;  %v2858_v15 = vld [vmem:[%s3872_s1 + $0x714] ss:$8 sps:$4 sm:$0xff]  }
  0xab   :  { %1974 = vmatpush2.bf16.msra.mxu0 %v2781_v16  ;;  %v2853_v16 = vld [vmem:[%s3872_s1 + $0x610] ss:$8 sps:$4 sm:$0xff]  }
  0xac   :  { %2027 = vmatpush2.bf16.msra.mxu1 %v2784_v17  ;;  %1975 = vmatprep.subr.bf16.mxu0 %v2789_v18  ;;  %v2856_v17 = vld [vmem:[%s3872_s1 + $0x710] ss:$8 sps:$4 sm:$0xff]   ;;  %v2861_v18 = vld [vmem:[%s3872_s1 + $0x604] ss:$8 sps:$4 sm:$0xff]  }
  0xad   :  { %2028 = vmatprep.subr.bf16.mxu1 %v2792_v19  ;;  %v2864_v19 = vld [vmem:[%s3872_s1 + $0x704] ss:$8 sps:$4 sm:$0xff]  }
  0xaf   :  { %1976 = vmatpush2.bf16.msra.mxu0 %v2787_v20  ;;  %v2859_v20 = vld [vmem:[%s3872_s1 + $0x600] ss:$8 sps:$4 sm:$0xff]  }
  0xb0   :  { %2029 = vmatpush2.bf16.msra.mxu1 %v2790_v21  ;;  %1977 = vmatprep.subr.bf16.mxu0 %v2795_v22  ;;  %v2862_v21 = vld [vmem:[%s3872_s1 + $0x700] ss:$8 sps:$4 sm:$0xff]   ;;  %v2867_v22 = vld [vmem:[%s3872_s1 + $0x6f4] ss:$8 sps:$4 sm:$0xff]  }
  0xb1   :  { %2030 = vmatprep.subr.bf16.mxu1 %v2798_v23  ;;  %v2870_v23 = vld [vmem:[%s3872_s1 + $0x7f4] ss:$8 sps:$4 sm:$0xff]  }
  0xb3   :  { %1978 = vmatpush2.bf16.msra.mxu0 %v2793_v24  ;;  %v2865_v24 = vld [vmem:[%s3872_s1 + $0x6f0] ss:$8 sps:$4 sm:$0xff]  }
  0xb4   :  { %2031 = vmatpush2.bf16.msra.mxu1 %v2796_v25  ;;  %1979 = vmatprep.subr.bf16.mxu0 %v2801_v26  ;;  %v2868_v25 = vld [vmem:[%s3872_s1 + $0x7f0] ss:$8 sps:$4 sm:$0xff]   ;;  %v2873_v26 = vld [vmem:[%s3872_s1 + $0x6e4] ss:$8 sps:$4 sm:$0xff]  }
  0xb5   :  { %2032 = vmatprep.subr.bf16.mxu1 %v2804_v27  ;;  %v2876_v27 = vld [vmem:[%s3872_s1 + $0x7e4] ss:$8 sps:$4 sm:$0xff]  }
  0xb7   :  { %1980 = vmatpush2.bf16.msra.mxu0 %v2799_v28  ;;  %v2871_v28 = vld [vmem:[%s3872_s1 + $0x6e0] ss:$8 sps:$4 sm:$0xff]  }
  0xb8   :  { %2033 = vmatpush2.bf16.msra.mxu1 %v2802_v29  ;;  %1981 = vmatprep.subr.bf16.mxu0 %v2807_v30  ;;  %v2874_v29 = vld [vmem:[%s3872_s1 + $0x7e0] ss:$8 sps:$4 sm:$0xff]   ;;  %v2879_v30 = vld [vmem:[%s3872_s1 + $0x6d4] ss:$8 sps:$4 sm:$0xff]  }
  0xb9   :  { %2034 = vmatprep.subr.bf16.mxu1 %v2810_v31  ;;  %v2882_v31 = vld [vmem:[%s3872_s1 + $0x7d4] ss:$8 sps:$4 sm:$0xff]  }
  0xbb   :  { %1982 = vmatpush2.bf16.msra.mxu0 %v2805_v32  ;;  %v2877_v32 = vld [vmem:[%s3872_s1 + $0x6d0] ss:$8 sps:$4 sm:$0xff]  }
  0xbc   :  { %2035 = vmatpush2.bf16.msra.mxu1 %v2808_v33  ;;  %1983 = vmatprep.subr.bf16.mxu0 %v2813_v34  ;;  %v2880_v33 = vld [vmem:[%s3872_s1 + $0x7d0] ss:$8 sps:$4 sm:$0xff]   ;;  %v2885_v34 = vld [vmem:[%s3872_s1 + $0x6c4] ss:$8 sps:$4 sm:$0xff]  }
  0xbd   :  { %2036 = vmatprep.subr.bf16.mxu1 %v2816_v35  ;;  %v2888_v35 = vld [vmem:[%s3872_s1 + $0x7c4] ss:$8 sps:$4 sm:$0xff]  }
  0xbf   :  { %1984 = vmatpush2.bf16.msra.mxu0 %v2811_v36  ;;  %v2883_v36 = vld [vmem:[%s3872_s1 + $0x6c0] ss:$8 sps:$4 sm:$0xff]  }
  0xc0   :  { %2037 = vmatpush2.bf16.msra.mxu1 %v2814_v37  ;;  %2059 = vmatprep.subr.bf16.mxu0 %v2819_v38  ;;  %v2886_v37 = vld [vmem:[%s3872_s1 + $0x7c0] ss:$8 sps:$4 sm:$0xff]   ;;  %v2891_v38 = vld [vmem:[%s3872_s1 + $0x6b4] ss:$8 sps:$4 sm:$0xff]  }
  0xc1   :  { %2112 = vmatprep.subr.bf16.mxu1 %v2822_v39  ;;  %v2894_v39 = vld [vmem:[%s3872_s1 + $0x7b4] ss:$8 sps:$4 sm:$0xff]  }
  0xc2   :  { %1986 = vmatmul.mubr.bf16.vlgmr.msra.gmra.mxu0 %v2248_v41  ;;  %v2892_v41 = vld [vmem:[%s3872_s1 + $0x7b0] ss:$8 sps:$4 sm:$0xff]  }
  0xc3   :  { %2039 = vmatmul.mubr.bf16.vlgmr.msra.gmra.mxu1 %v2250_v44  ;;  %2060 = vmatpush1.bf16.msra.mxu0 %v2817_v42  ;;  %v2897_v44 = vld [vmem:[%s3872_s1 + $0x6a4] ss:$8 sps:$4 sm:$0xff]   ;;  %v2903_v42 = vld [vmem:[%s3872_s1 + $0x694] ss:$8 sps:$4 sm:$0xff]  }
  0xc4   :  { %2113 = vmatpush1.bf16.msra.mxu1 %v2820_v43  ;;  %2061 = vmatprep.subr.bf16.mxu0 %v2825_v46  ;;  %v2906_v43 = vld [vmem:[%s3872_s1 + $0x794] ss:$8 sps:$4 sm:$0xff]   ;;  %v2901_v46 = vld [vmem:[%s3872_s1 + $0x690] ss:$8 sps:$4 sm:$0xff]  }
  0xc5   :  { %2114 = vmatprep.subr.bf16.mxu1 %v2828_v47  ;;  %1995 = vmatprep.mubr.bf16.mxu0 %v2265_v50  ;;  %v2904_v47 = vld [vmem:[%s3872_s1 + $0x790] ss:$8 sps:$4 sm:$0xff]   ;;  %v2909_v50 = vld [vmem:[%s3872_s1 + $0x684] ss:$8 sps:$4 sm:$0xff]  }
  0xc6   :  { %2048 = vmatprep.mubr.bf16.mxu1 %v2267_v51  ;;  %v2912_v51 = vld [vmem:[%s3872_s1 + $0x784] ss:$8 sps:$4 sm:$0xff]  }
  0xc7   :  { %2062 = vmatpush1.bf16.msra.mxu0 %v2823_v52  ;;  %v2907_v52 = vld [vmem:[%s3872_s1 + $0x680] ss:$8 sps:$4 sm:$0xff]  }
  0xc8   :  { %2115 = vmatpush1.bf16.msra.mxu1 %v2826_v53  ;;  %2063 = vmatprep.subr.bf16.mxu0 %v2831_v54  ;;  %v2910_v53 = vld [vmem:[%s3872_s1 + $0x780] ss:$8 sps:$4 sm:$0xff]   ;;  %v35_v54 = vld [vmem:[%s3873_s0 + $0xb0] sm:$0xff] }
  0xc9   :  { %2116 = vmatprep.subr.bf16.mxu1 %v2834_v55  ;;  %v43_v55 = vld [vmem:[%s3873_s0 + $0xf0] sm:$0xff] }
  0xca   :  { %1996 = vmatmul.mubr.bf16.gmra.mxu0 %v2264_v57  ;;  %v36_v57 = vld [vmem:[%s3873_s0 + $0xb8] sm:$0xff] }
  0xcb   :  { %2049 = vmatmul.mubr.bf16.gmra.mxu1 %v2266_v58  ;;  %2064 = vmatpush1.bf16.msra.mxu0 %v2829_v62  ;;  %v44_v58 = vld [vmem:[%s3873_s0 + $0xf8] sm:$0xff]  ;;  %v2252_v62 = vcombine.low %v3646_v56, %v3651_v59 }
  0xcc   :  { %2117 = vmatpush1.bf16.msra.mxu1 %v2832_v63  ;;  %2065 = vmatprep.subr.bf16.mxu0 %v2837_v0  ;;  %v2254_v63 = vcombine.low %v3656_v60, %v3661_v61  ;;  %v2269_v0 = vcombine.high %v35_v54, %v43_v55 }
  0xcd   :  { %2118 = vmatprep.subr.bf16.mxu1 %v2840_v1  ;;  %2091 = vmatprep.mubr.bf16.mxu0 %v2253_v2  ;;  %v2271_v1 = vcombine.high %v36_v57, %v44_v58  ;;  %v2268_v2 = vcombine.low %v35_v54, %v43_v55 }
  0xce   :  { %2144 = vmatprep.mubr.bf16.mxu1 %v2255_v3  ;;  %v2270_v3 = vcombine.low %v36_v57, %v44_v58 }
  0xcf   :  { %2066 = vmatpush1.bf16.msra.mxu0 %v2835_v4 }
  0xd0   :  { %2119 = vmatpush1.bf16.msra.mxu1 %v2838_v5  ;;  %2067 = vmatprep.subr.bf16.mxu0 %v2843_v6 }
  0xd1   :  { %2120 = vmatprep.subr.bf16.mxu1 %v2846_v7 }
  0xd3   :  { %2068 = vmatpush1.bf16.msra.mxu0 %v2841_v8 }
  0xd4   :  { %2121 = vmatpush1.bf16.msra.mxu1 %v2844_v9  ;;  %2069 = vmatprep.subr.bf16.mxu0 %v2849_v10 }
  0xd5   :  { %2122 = vmatprep.subr.bf16.mxu1 %v2852_v11 }
  0xd7   :  { %2070 = vmatpush1.bf16.msra.mxu0 %v2847_v12 }
  0xd8   :  { %2123 = vmatpush1.bf16.msra.mxu1 %v2850_v13  ;;  %2071 = vmatprep.subr.bf16.mxu0 %v2855_v14 }
  0xd9   :  { %2124 = vmatprep.subr.bf16.mxu1 %v2858_v15 }
  0xdb   :  { %2072 = vmatpush1.bf16.msra.mxu0 %v2853_v16 }
  0xdc   :  { %2125 = vmatpush1.bf16.msra.mxu1 %v2856_v17  ;;  %2073 = vmatprep.subr.bf16.mxu0 %v2861_v18 }
  0xdd   :  { %2126 = vmatprep.subr.bf16.mxu1 %v2864_v19 }
  0xdf   :  { %2074 = vmatpush1.bf16.msra.mxu0 %v2859_v20 }
  0xe0   :  { %2127 = vmatpush1.bf16.msra.mxu1 %v2862_v21  ;;  %2075 = vmatprep.subr.bf16.mxu0 %v2867_v22 }
  0xe1   :  { %2128 = vmatprep.subr.bf16.mxu1 %v2870_v23 }
  0xe3   :  { %2076 = vmatpush2.bf16.msra.mxu0 %v2865_v24 }
  0xe4   :  { %2129 = vmatpush2.bf16.msra.mxu1 %v2868_v25  ;;  %2077 = vmatprep.subr.bf16.mxu0 %v2873_v26 }
  0xe5   :  { %2130 = vmatprep.subr.bf16.mxu1 %v2876_v27 }
  0xe7   :  { %2078 = vmatpush2.bf16.msra.mxu0 %v2871_v28 }
  0xe8   :  { %2131 = vmatpush2.bf16.msra.mxu1 %v2874_v29  ;;  %2079 = vmatprep.subr.bf16.mxu0 %v2879_v30 }
  0xe9   :  { %2132 = vmatprep.subr.bf16.mxu1 %v2882_v31 }
  0xeb   :  { %2080 = vmatpush2.bf16.msra.mxu0 %v2877_v32 }
  0xec   :  { %2133 = vmatpush2.bf16.msra.mxu1 %v2880_v33  ;;  %2081 = vmatprep.subr.bf16.mxu0 %v2885_v34 }
  0xed   :  { %2134 = vmatprep.subr.bf16.mxu1 %v2888_v35 }
  0xef   :  { %2082 = vmatpush2.bf16.msra.mxu0 %v2883_v36 }
  0xf0   :  { %2135 = vmatpush2.bf16.msra.mxu1 %v2886_v37  ;;  %2083 = vmatprep.subr.bf16.mxu0 %v2891_v38 }
  0xf1   :  { %2136 = vmatprep.subr.bf16.mxu1 %v2894_v39 }
  0xf3   :  { %2084 = vmatpush2.bf16.msra.mxu0 %v2889_v40 }
  0xf4   :  { %2137 = vmatpush2.bf16.msra.mxu1 %v2892_v41  ;;  %2085 = vmatprep.subr.bf16.mxu0 %v2897_v44 }
  0xf5   :  { %2138 = vmatprep.subr.bf16.mxu1 %v2900_v45 }
  0xf7   :  { %2086 = vmatpush2.bf16.msra.mxu0 %v2895_v48 }
  0xf8   :  { %2139 = vmatpush2.bf16.msra.mxu1 %v2898_v49  ;;  %2087 = vmatprep.subr.bf16.mxu0 %v2903_v42 }
  0xf9   :  { %2140 = vmatprep.subr.bf16.mxu1 %v2906_v43 }
  0xfb   :  { %2088 = vmatpush2.bf16.msra.mxu0 %v2901_v46 }
  0xfc   :  { %2141 = vmatpush2.bf16.msra.mxu1 %v2904_v47  ;;  %2089 = vmatprep.subr.bf16.mxu0 %v2909_v50 }
  0xfd   :  { %2142 = vmatprep.subr.bf16.mxu1 %v2912_v51 }
  0xff   :  { %2090 = vmatpush2.bf16.msra.mxu0 %v2907_v52 }
 0x100   :  { %2143 = vmatpush2.bf16.msra.mxu1 %v2910_v53 }
 0x102   :  { %2092 = vmatmul.mubr.bf16.vlgmr.msra.gmra.mxu0 %v2252_v62  ;;  %v1775_v4 = vpop.f32.mrf.mxu0 }
 0x103   :  { %2145 = vmatmul.mubr.bf16.vlgmr.msra.gmra.mxu1 %v2254_v63  ;;  %2101 = vmatprep.mubr.bf16.mxu0 %v2269_v0  ;;  %v1828_v5 = vpop.f32.mrf.mxu1 }
 0x104   :  { %2154 = vmatprep.mubr.bf16.mxu1 %v2271_v1  ;;  %v1777_v6 = vpop.f32.mrf.mxu0  ;;  %v1829_v44 = vadd.f32 %v1828_v5, %v1775_v4 }
 0x105   :  { %v1830_v7 = vpop.f32.mrf.mxu1 }
 0x106   :  { %v1779_v56 = vpop.f32.mrf.mxu0  ;;  %v1831_v45 = vadd.f32 %v1830_v7, %v1777_v6 }
 0x107   :  { %v1832_v59 = vpop.f32.mrf.mxu1 }
 0x108   :  { %v1781_v8 = vpop.f32.mrf.mxu0  ;;  %v1833_v43 = vadd.f32 %v1832_v59, %v1779_v56 }
 0x109   :  { %v1834_v61 = vpop.f32.mrf.mxu1 }
 0x10a   :  { %2102 = vmatmul.mubr.bf16.gmra.mxu0 %v2268_v2  ;;  %v1785_v60 = vpop.f32.mrf.mxu0  ;;  %v1835_v47 = vadd.f32 %v1834_v61, %v1781_v8 }
 0x10b   :  { %2155 = vmatmul.mubr.bf16.gmra.mxu1 %v2270_v3  ;;  %v1838_v9 = vpop.f32.mrf.mxu1 }
 0x10c   :  { %v1787_v10 = vpop.f32.mrf.mxu0  ;;  %v1839_v52 = vadd.f32 %v1838_v9, %v1785_v60 }
 0x10d   :  { %v1840_v11 = vpop.f32.mrf.mxu1 }
 0x10e   :  { %v1789_v12 = vpop.f32.mrf.mxu0  ;;  %v1841_v1 = vadd.f32 %v1840_v11, %v1787_v10 }
 0x10f   :  { %v1842_v13 = vpop.f32.mrf.mxu1 }
 0x110   :  { %v1791_v14 = vpop.f32.mrf.mxu0  ;;  %v1843_v4 = vadd.f32 %v1842_v13, %v1789_v12 }
 0x111   :  { %v1844_v16 = vpop.f32.mrf.mxu1 }
 0x112   :  { %v1845_v56 = vadd.f32 %v1844_v16, %v1791_v14 }
 0x142   :  { %v1881_v15 = vpop.f32.mrf.mxu0 }
 0x143   :  { %v1934_v17 = vpop.f32.mrf.mxu1  ;;  %v1882_v48 = vadd.f32 %v1881_v15, %v1829_v44 }
 0x144   :  { %v1883_v18 = vpop.f32.mrf.mxu0 }
 0x145   :  { %v1936_v19 = vpop.f32.mrf.mxu1  ;;  %v1884_v46 = vadd.f32 %v1883_v18, %v1831_v45  ;;  %v1935_v50 = vadd.f32 %v1934_v17, %v1882_v48 }
 0x146   :  { %v1885_v20 = vpop.f32.mrf.mxu0 }
 0x147   :  { %v1938_v21 = vpop.f32.mrf.mxu1  ;;  %v1886_v51 = vadd.f32 %v1885_v20, %v1833_v43  ;;  %v1937_v55 = vadd.f32 %v1936_v19, %v1884_v46 }
 0x148   :  { %v1887_v22 = vpop.f32.mrf.mxu0 }
 0x149   :  { %v1940_v23 = vpop.f32.mrf.mxu1  ;;  %v1888_v57 = vadd.f32 %v1887_v22, %v1835_v47  ;;  %v1939_v63 = vadd.f32 %v1938_v21, %v1886_v51 }
 0x14a   :  { %v1891_v24 = vpop.f32.mrf.mxu0 }
 0x14b   :  { %v1944_v25 = vpop.f32.mrf.mxu1  ;;  %v1892_v62 = vadd.f32 %v1891_v24, %v1839_v52  ;;  %v1941_v5 = vadd.f32 %v1940_v23, %v1888_v57 }
 0x14c   :  { %v1893_v26 = vpop.f32.mrf.mxu0 }
 0x14d   :  { %v1946_v27 = vpop.f32.mrf.mxu1  ;;  %v1894_v59 = vadd.f32 %v1893_v26, %v1841_v1  ;;  %v1945_v8 = vadd.f32 %v1944_v25, %v1892_v62 }
 0x14e   :  { %v1895_v28 = vpop.f32.mrf.mxu0 }
 0x14f   :  { %v1948_v29 = vpop.f32.mrf.mxu1  ;;  %v1896_v9 = vadd.f32 %v1895_v28, %v1843_v4  ;;  %v1947_v12 = vadd.f32 %v1946_v27, %v1894_v59 }
 0x150   :  { %v1897_v30 = vpop.f32.mrf.mxu0 }
 0x151   :  { %v1950_v31 = vpop.f32.mrf.mxu1  ;;  %v1898_v19 = vadd.f32 %v1897_v30, %v1845_v56 }
 0x153   :  { %v1951_v26 = vadd.f32 %v1950_v31, %v1898_v19 }
 0x182   :  { %v1987_v32 = vpop.f32.mrf.mxu0 }
 0x183   :  { %v2040_v33 = vpop.f32.mrf.mxu1  ;;  %v1988_v58 = vadd.f32 %v1987_v32, %v1935_v50  ;;  %v1949_v32 = vadd.f32 %v1948_v29, %v1896_v9 }
 0x184   :  { %v1989_v34 = vpop.f32.mrf.mxu0 }
 0x185   :  { %v2042_v35 = vpop.f32.mrf.mxu1  ;;  %v1990_v0 = vadd.f32 %v1989_v34, %v1937_v55  ;;  %v2041_v6 = vadd.f32 %v2040_v33, %v1988_v58 }
 0x186   :  { %v1991_v36 = vpop.f32.mrf.mxu0 }
 0x187   :  { %v2044_v37 = vpop.f32.mrf.mxu1  ;;  %v1992_v7 = vadd.f32 %v1991_v36, %v1939_v63  ;;  %v2043_v15 = vadd.f32 %v2042_v35, %v1990_v0 }
 0x188   :  { %v1993_v38 = vpop.f32.mrf.mxu0 }
 0x189   :  { %v2046_v39 = vpop.f32.mrf.mxu1  ;;  %v1994_v17 = vadd.f32 %v1993_v38, %v1941_v5  ;;  %v2045_v22 = vadd.f32 %v2044_v37, %v1992_v7 }
 0x18a   :  { %v1997_v40 = vpop.f32.mrf.mxu0 }
 0x18b   :  { %v2050_v41 = vpop.f32.mrf.mxu1  ;;  %v1998_v10 = vadd.f32 %v1997_v40, %v1945_v8  ;;  %v2047_v14 = vadd.f32 %v2046_v39, %v1994_v17 }
 0x18c   :  { %v1999_v49 = vpop.f32.mrf.mxu0 }
 0x18d   :  { %v2052_v42 = vpop.f32.mrf.mxu1  ;;  %v2000_v28 = vadd.f32 %v1999_v49, %v1947_v12  ;;  %v2051_v34 = vadd.f32 %v2050_v41, %v1998_v10 }
 0x18e   :  { %v2001_v53 = vpop.f32.mrf.mxu0 }
 0x18f   :  { %v2054_v54 = vpop.f32.mrf.mxu1  ;;  %v2002_v35 = vadd.f32 %v2001_v53, %v1949_v32  ;;  %v2053_v40 = vadd.f32 %v2052_v42, %v2000_v28 }
 0x190   :  { %v2003_v2 = vpop.f32.mrf.mxu0 }
 0x191   :  { %v2056_v3 = vpop.f32.mrf.mxu1  ;;  %v2004_v38 = vadd.f32 %v2003_v2, %v1951_v26  ;;  %v2055_v48 = vadd.f32 %v2054_v54, %v2002_v35 }
 0x193   :  { %v2057_v52 = vadd.f32 %v2056_v3, %v2004_v38 }
 0x1c2   :  { %v2093_v61 = vpop.f32.mrf.mxu0 }
 0x1c3   :  { %v2146_v60 = vpop.f32.mrf.mxu1  ;;  %v2094_v18 = vadd.f32 %v2093_v61, %v2041_v6 }
 0x1c4   :  { %v2095_v20 = vpop.f32.mrf.mxu0 }
 0x1c5   :  { %v2148_v21 = vpop.f32.mrf.mxu1  ;;  %v2147_v11 = vadd.f32 %v2146_v60, %v2094_v18  ;;  %v2096_v24 = vadd.f32 %v2095_v20, %v2043_v15 }
 0x1c6   :  { %v2097_v13 = vpop.f32.mrf.mxu0 }
 0x1c7   :  { %v2150_v23 = vpop.f32.mrf.mxu1  ;;  %2165 = vst [vmem:[%s3874_s2] sm:$0xff] %v2147_v11  ;;  %v2149_v16 = vadd.f32 %v2148_v21, %v2096_v24  ;;  %v2098_v25 = vadd.f32 %v2097_v13, %v2045_v22  ;;  %v2191_v43 = vmul.f32 %v2147_v11, %v2147_v11 }
 0x1c8   :  { %v2099_v30 = vpop.f32.mrf.mxu0 }
 0x1c9   :  { %v2152_v33 = vpop.f32.mrf.mxu1  ;;  %2166 = vst [vmem:[%s3874_s2 + $0x8] sm:$0xff] %v2149_v16  ;;  %v2151_v27 = vadd.f32 %v2150_v23, %v2098_v25  ;;  %v2100_v36 = vadd.f32 %v2099_v30, %v2047_v14  ;;  %v2192_v57 = vmul.f32 %v2149_v16, %v2149_v16 }
 0x1ca   :  { %v2103_v29 = vpop.f32.mrf.mxu0 }
 0x1cb   :  { %v2156_v37 = vpop.f32.mrf.mxu1  ;;  %2167 = vst [vmem:[%s3874_s2 + $0x10] sm:$0xff] %v2151_v27  ;;  %v2153_v39 = vadd.f32 %v2152_v33, %v2100_v36  ;;  %v2104_v31 = vadd.f32 %v2103_v29, %v2051_v34  ;;  %v2193_v44 = vmul.f32 %v2151_v27, %v2151_v27  ;;  %v2173_v53 = vadd.f32 %v2151_v27, %v2147_v11 }
 0x1cc   :  { %v2105_v45 = vpop.f32.mrf.mxu0 }
 0x1cd   :  { %v2158_v41 = vpop.f32.mrf.mxu1  ;;  %2168 = vst [vmem:[%s3874_s2 + $0x18] sm:$0xff] %v2153_v39  ;;  %v2157_v49 = vadd.f32 %v2156_v37, %v2104_v31  ;;  %v2194_v46 = vmul.f32 %v2153_v39, %v2153_v39  ;;  %v2106_v47 = vadd.f32 %v2105_v45, %v2053_v40  ;;  %v2199_v54 = vadd.f32 %v2193_v44, %v2191_v43 }
 0x1ce   :  { %v2107_v50 = vpop.f32.mrf.mxu0  ;;  %v2182_v63 = vadd.f32 %v2153_v39, %v2149_v16 }
 0x1cf   :  { %v2160_v51 = vpop.f32.mrf.mxu1  ;;  %2169 = vst [vmem:[%s3874_s2 + $0x20] sm:$0xff] %v2157_v49  ;;  %v2195_v42 = vmul.f32 %v2157_v49, %v2157_v49  ;;  %v2108_v55 = vadd.f32 %v2107_v50, %v2055_v48  ;;  %v2159_v58 = vadd.f32 %v2158_v41, %v2106_v47  ;;  %v2174_v0 = vadd.f32 %v2173_v53, %v2157_v49 }
 0x1d0   :  { %v2109_v62 = vpop.f32.mrf.mxu0  ;;  %v2208_v4 = vadd.f32 %v2194_v46, %v2192_v57 }
 0x1d1   :  { %v2161_v1 = vadd.f32 %v2160_v51, %v2108_v55  ;;  %v2110_v2 = vadd.f32 %v2109_v62, %v2057_v52  ;;  %v2200_v5 = vadd.f32 %v2199_v54, %v2195_v42  ;;  %2170 = vst [vmem:[%s3874_s2 + $0x28] sm:$0xff] %v2159_v58  ;;  %v2196_v3 = vmul.f32 %v2159_v58, %v2159_v58  ;;  %v2162_v6 = vpop.f32.mrf.mxu1 }
 0x1d2   :  { %v2183_v7 = vadd.f32 %v2182_v63, %v2159_v58 }
 0x1d3   :  { %2171 = vst [vmem:[%s3874_s2 + $0x30] sm:$0xff] %v2161_v1  ;;  %v2175_v56 = vadd.f32 %v2174_v0, %v2161_v1  ;;  %v2197_v59 = vmul.f32 %v2161_v1, %v2161_v1  ;;  %v2163_v8 = vadd.f32 %v2162_v6, %v2110_v2  ;;  %v2209_v61 = vadd.f32 %v2208_v4, %v2196_v3 }
 0x1d5   :  { %v2176_v60 = vrot.slane %v2175_v56, 4  ;;  %v2201_v9 = vadd.f32 %v2200_v5, %v2197_v59  ;;  %2172 = vst [vmem:[%s3874_s2 + $0x38] sm:$0xff] %v2163_v8  ;;  %v2184_v15 = vadd.f32 %v2183_v7, %v2163_v8  ;;  %v2198_v17 = vmul.f32 %v2163_v8, %v2163_v8 }
 0x1d7   :  { %v2177_v18 = vadd.f32 %v2176_v60, %v2175_v56  ;;  %v2202_v19 = vrot.slane %v2201_v9, 4  ;;  %v2185_v20 = vrot.slane %v2184_v15, 4  ;;  %v2210_v21 = vadd.f32 %v2209_v61, %v2198_v17 }
 0x1d9   :  { %v2178_v22 = vrot.slane %v2177_v18, 2  ;;  %v2203_v10 = vadd.f32 %v2202_v19, %v2201_v9  ;;  %v2186_v11 = vadd.f32 %v2185_v20, %v2184_v15  ;;  %v2211_v24 = vrot.slane %v2210_v21, 4 }
 0x1db   :  { %v2179_v12 = vadd.f32 %v2178_v22, %v2177_v18  ;;  %v2204_v13 = vrot.slane %v2203_v10, 2  ;;  %v2187_v23 = vrot.slane %v2186_v11, 2  ;;  %v2212_v32 = vadd.f32 %v2211_v24, %v2210_v21 }
 0x1dd   :  { %v2205_v14 = vadd.f32 %v2204_v13, %v2203_v10  ;;  %v2188_v16 = vadd.f32 %v2187_v23, %v2186_v11  ;;  %v2213_v25 = vrot.slane %v2212_v32, 2  ;;  %v2180_v26 = vrot.slane %v2179_v12, 1 }
 0x1df   :  { %v2206_v28 = vrot.slane %v2205_v14, 1  ;;  %v2189_v30 = vrot.slane %v2188_v16, 1  ;;  %v2214_v33 = vadd.f32 %v2213_v25, %v2212_v32  ;;  %v2181_v27 = vadd.f32 %v2180_v26, %v2179_v12 }
 0x1e1   :  { %v2207_v34 = vadd.f32 %v2206_v28, %v2205_v14  ;;  %v2215_v35 = vrot.slane %v2214_v33, 1  ;;  %v2190_v36 = vadd.f32 %v2189_v30, %v2188_v16 }
 0x1e3   :  { %v2216_v29 = vadd.f32 %v2215_v35, %v2214_v33  ;;  %v2218_v37 = vsel %vm2217_vm0, %v2181_v27, %v2207_v34 }
 0x1e5   :  { %v2219_v38 = vsel %vm2217_vm0, %v2190_v36, %v2216_v29 }
 0x1e6   :  { %v2222_v39 = vcombine.low %v2218_v37, %v2219_v38 }
 0x1e8   :  { %2528 = vst.sshfl [vmem:[%s3875_s3] sm:$0x33 pattern:$0x76325410] %v2222_v39 }

// kernel: discriminator_forward.11
= control target key start
LH: loop header
LB: loop body
LE: loop exit
PB: predicated region body
PF: predicated region fallthrough
CT: control target
= control target key end

     0   :  { %v24_v0 = vlaneseq  ;;  %s180_s1 = inlined_call_operand.vmem [shape: f32[1,256], index: 1, kind: input, shape index: {}]   ;;  %s181_s2 = inlined_call_operand.vmem [shape: f32[1,256], index: 2, kind: input, shape index: {}]   ;;  %s182_s0 = inlined_call_operand.vmem [shape: f32[32,256], index: 0, kind: input, shape index: {}]   ;;  %s183_s3 = inlined_call_operand.vmem [shape: bf16[32,256], index: 3, kind: output, shape index: {}]  }
   0x1   :  { %v22_v2 = vld [vmem:[%s180_s1] sm:$0x3]  ;;  %v15_v5 = vld [vmem:[%s182_s0 + $0x8] sm:$0xff]  ;;  %v16_v8 = vld [vmem:[%s182_s0 + $0x10] sm:$0xff] }
   0x2   :  { %v25_v1 = vshrl.u32 %v24_v0, 7  ;;  %v42_v3 = vld [vmem:[%s181_s2] sm:$0x3]  ;;  %v17_v9 = vld [vmem:[%s182_s0 + $0x18] sm:$0xff]  ;;  %v19_v15 = vld [vmem:[%s182_s0 + $0x28] sm:$0xff] }
   0x3   :  { %v14_v4 = vld [vmem:[%s182_s0] sm:$0xff]  ;;  %v20_v16 = vld [vmem:[%s182_s0 + $0x30] sm:$0xff]  ;;  %v21_v17 = vld [vmem:[%s182_s0 + $0x38] sm:$0xff] }
   0x4   :  { %v26_v6 = vsub.s32 0, %v25_v1  ;;  %v30_v7 = vsub.s32 1, %v25_v1  ;;  %v18_v10 = vld [vmem:[%s182_s0 + $0x20] sm:$0xff] }
   0x6   :  { %v27_v11 = vrot.slane %v22_v2, %v26_v6  ;;  %v31_v12 = vrot.slane %v22_v2, %v30_v7  ;;  %v47_v13 = vrot.slane %v42_v3, %v26_v6  ;;  %v51_v14 = vrot.slane %v42_v3, %v30_v7 }
   0x8   :  { %v34_v18 = vmul.f32 %v27_v11, %v14_v4  ;;  %v35_v19 = vmul.f32 %v31_v12, %v15_v5  ;;  %v36_v20 = vmul.f32 %v27_v11, %v16_v8  ;;  %v37_v21 = vmul.f32 %v31_v12, %v17_v9 }
   0x9   :  { %v38_v22 = vmul.f32 %v27_v11, %v18_v10  ;;  %v39_v23 = vmul.f32 %v31_v12, %v19_v15  ;;  %v40_v24 = vmul.f32 %v27_v11, %v20_v16  ;;  %v41_v25 = vmul.f32 %v31_v12, %v21_v17 }
   0xa   :  { %v54_v26 = vadd.f32 %v47_v13, %v34_v18  ;;  %v55_v27 = vadd.f32 %v51_v14, %v35_v19  ;;  %v56_v28 = vadd.f32 %v47_v13, %v36_v20  ;;  %v57_v29 = vadd.f32 %v51_v14, %v37_v21 }
   0xb   :  { %v58_v30 = vadd.f32 %v47_v13, %v38_v22  ;;  %v59_v31 = vadd.f32 %v51_v14, %v39_v23  ;;  %v60_v32 = vadd.f32 %v47_v13, %v40_v24  ;;  %v61_v33 = vadd.f32 %v51_v14, %v41_v25 }
   0xc   :  { %v62_v34 = vmul.f32 0.2, %v54_v26  ;;  %v63_v35 = vmul.f32 0.2, %v55_v27  ;;  %v64_v36 = vmul.f32 0.2, %v56_v28 }
   0xd   :  { %v65_v37 = vmul.f32 0.2, %v57_v29  ;;  %v66_v38 = vmul.f32 0.2, %v58_v30  ;;  %v67_v39 = vmul.f32 0.2, %v59_v31 }
   0xe   :  { %v70_v40 = vmax.f32 %v54_v26, %v62_v34  ;;  %v71_v41 = vmax.f32 %v55_v27, %v63_v35  ;;  %v72_v42 = vmax.f32 %v56_v28, %v64_v36  ;;  %v68_v43 = vmul.f32 0.2, %v60_v32 }
   0xf   :  { %v73_v44 = vmax.f32 %v57_v29, %v65_v37  ;;  %v74_v45 = vmax.f32 %v58_v30, %v66_v38  ;;  %v75_v46 = vmax.f32 %v59_v31, %v67_v39  ;;  %v69_v47 = vmul.f32 0.2, %v61_v33 }
  0x10   :  { %v114_v48 = vpack.c.bf16 %v71_v41, %v70_v40  ;;  %v76_v49 = vmax.f32 %v60_v32, %v68_v43 }
  0x11   :  { %v115_v50 = vpack.c.bf16 %v73_v44, %v72_v42  ;;  %v116_v51 = vpack.c.bf16 %v75_v46, %v74_v45  ;;  %v77_v52 = vmax.f32 %v61_v33, %v69_v47 }
  0x12   :  { %102 = vst [vmem:[%s183_s3] sm:$0xff] %v114_v48 }
  0x13   :  { %103 = vst [vmem:[%s183_s3 + $0x8] sm:$0xff] %v115_v50  ;;  %104 = vst [vmem:[%s183_s3 + $0x10] sm:$0xff] %v116_v51  ;;  %v117_v53 = vpack.c.bf16 %v77_v52, %v76_v49 }
  0x15   :  { %105 = vst [vmem:[%s183_s3 + $0x18] sm:$0xff] %v117_v53 }

// kernel: discriminator_forward.13
= control target key start
LH: loop header
LB: loop body
LE: loop exit
PB: predicated region body
PF: predicated region fallthrough
CT: control target
= control target key end

     0   :  { %v20_v0 = vlaneseq  ;;  %s136_s1 = inlined_call_operand.vmem [shape: f32[1,512], index: 1, kind: input, shape index: {}]   ;;  %s137_s2 = inlined_call_operand.vmem [shape: f32[1,512], index: 2, kind: input, shape index: {}]   ;;  %s138_s0 = inlined_call_operand.vmem [shape: f32[8,512], index: 0, kind: input, shape index: {}]   ;;  %s139_s3 = inlined_call_operand.vmem [shape: f32[8,512], index: 3, kind: output, shape index: {}]  }
   0x1   :  { %v18_v2 = vld [vmem:[%s136_s1] sm:$0xf]  ;;  %v15_v9 = vld [vmem:[%s138_s0 + $0x8] sm:$0xff]  ;;  %v16_v14 = vld [vmem:[%s138_s0 + $0x10] sm:$0xff] }
   0x2   :  { %v21_v1 = vshrl.u32 %v20_v0, 7  ;;  %v44_v3 = vld [vmem:[%s137_s2] sm:$0xf]  ;;  %v17_v15 = vld [vmem:[%s138_s0 + $0x18] sm:$0xff] }
   0x3   :  { %v14_v8 = vld [vmem:[%s138_s0] sm:$0xff] }
   0x4   :  { %v22_v4 = vsub.s32 0, %v21_v1  ;;  %v26_v5 = vsub.s32 1, %v21_v1  ;;  %v30_v6 = vsub.s32 2, %v21_v1  ;;  %v34_v7 = vsub.s32 3, %v21_v1 }
   0x6   :  { %v23_v10 = vrot.slane %v18_v2, %v22_v4  ;;  %v49_v11 = vrot.slane %v44_v3, %v22_v4  ;;  %v27_v12 = vrot.slane %v18_v2, %v26_v5  ;;  %v53_v13 = vrot.slane %v44_v3, %v26_v5 }
   0x7   :  { %v31_v16 = vrot.slane %v18_v2, %v30_v6  ;;  %v57_v17 = vrot.slane %v44_v3, %v30_v6  ;;  %v35_v18 = vrot.slane %v18_v2, %v34_v7  ;;  %v61_v19 = vrot.slane %v44_v3, %v34_v7 }
   0x8   :  { %v40_v20 = vmul.f32 %v23_v10, %v14_v8  ;;  %v41_v21 = vmul.f32 %v27_v12, %v15_v9 }
   0x9   :  { %v42_v22 = vmul.f32 %v31_v16, %v16_v14  ;;  %v43_v23 = vmul.f32 %v35_v18, %v17_v15 }
   0xa   :  { %v66_v24 = vadd.f32 %v49_v11, %v40_v20  ;;  %v67_v25 = vadd.f32 %v53_v13, %v41_v21 }
   0xb   :  { %v68_v26 = vadd.f32 %v57_v17, %v42_v22  ;;  %v69_v27 = vadd.f32 %v61_v19, %v43_v23 }
   0xc   :  { %v70_v28 = vmul.f32 0.2, %v66_v24  ;;  %v71_v29 = vmul.f32 0.2, %v67_v25 }
   0xd   :  { %v72_v30 = vmul.f32 0.2, %v68_v26  ;;  %v73_v31 = vmul.f32 0.2, %v69_v27 }
   0xe   :  { %v74_v32 = vmax.f32 %v66_v24, %v70_v28  ;;  %v75_v33 = vmax.f32 %v67_v25, %v71_v29 }
   0xf   :  { %v76_v34 = vmax.f32 %v68_v26, %v72_v30  ;;  %v77_v35 = vmax.f32 %v69_v27, %v73_v31 }
  0x10   :  { %78 = vst [vmem:[%s139_s3] sm:$0xff] %v74_v32  ;;  %79 = vst [vmem:[%s139_s3 + $0x8] sm:$0xff] %v75_v33 }
  0x11   :  { %80 = vst [vmem:[%s139_s3 + $0x10] sm:$0xff] %v76_v34  ;;  %81 = vst [vmem:[%s139_s3 + $0x18] sm:$0xff] %v77_v35 }

// kernel: discriminator_forward.12
= control target key start
LH: loop header
LB: loop body
LE: loop exit
PB: predicated region body
PF: predicated region fallthrough
CT: control target
= control target key end

     0   :  { %vm7653_vm0 = vcmask 1040384   ;;  %s13767_s1 = inlined_call_operand.vmem [shape: bf16[4096,512], index: 1, kind: input, shape index: {}]   ;;  %s13768_s0 = inlined_call_operand.vmem [shape: bf16[8,4096], index: 0, kind: input, shape index: {}]   ;;  %s13769_s2 = inlined_call_operand.vmem [shape: f32[8,512], index: 2, kind: output, shape index: {0}]   ;;  %s13770_s3 = inlined_call_operand.vmem [shape: f32[1,2,512], index: 3, kind: output, shape index: {1}]  }
   0x1   :  { %v8746_v0 = vld [vmem:[%s13767_s1 + $0xe4] ss:$16 sps:$4 sm:$0xff]   ;;  %v8750_v2 = vld [vmem:[%s13767_s1 + $0xe0] ss:$16 sps:$4 sm:$0xff]   ;;  %v14_v48 = vld [vmem:[%s13768_s0 + $0x8] sm:$0xff] }
   0x2   :  { %v8748_v1 = vld [vmem:[%s13767_s1 + $0x2e4] ss:$16 sps:$4 sm:$0xff]   ;;  %6285 = vmatprep.subr.bf16.mxu0 %v8746_v0  ;;  %v8751_v3 = vld [vmem:[%s13767_s1 + $0x2e0] ss:$16 sps:$4 sm:$0xff]   ;;  %v10487_v51 = vcombine.high %v14_v48, %v14_v48 }
   0x3   :  { %6326 = vmatprep.subr.bf16.mxu1 %v8748_v1  ;;  %v8752_v4 = vld [vmem:[%s13767_s1 + $0xc4] ss:$16 sps:$4 sm:$0xff]   ;;  %6286 = vmatpush1.bf16.msra.mxu0 %v8750_v2  ;;  %v8756_v6 = vld [vmem:[%s13767_s1 + $0xc0] ss:$16 sps:$4 sm:$0xff]  }
   0x4   :  { %6327 = vmatpush1.bf16.msra.mxu1 %v8751_v3  ;;  %v8754_v5 = vld [vmem:[%s13767_s1 + $0x2c4] ss:$16 sps:$4 sm:$0xff]   ;;  %6287 = vmatprep.subr.bf16.mxu0 %v8752_v4  ;;  %v8757_v7 = vld [vmem:[%s13767_s1 + $0x2c0] ss:$16 sps:$4 sm:$0xff]  }
   0x5   :  { %6328 = vmatprep.subr.bf16.mxu1 %v8754_v5  ;;  %v8758_v8 = vld [vmem:[%s13767_s1 + $0xa4] ss:$16 sps:$4 sm:$0xff]   ;;  %v8762_v10 = vld [vmem:[%s13767_s1 + $0xa0] ss:$16 sps:$4 sm:$0xff]   ;;  %6358 = vmatprep.mubr.bf16.mxu1 %v10487_v51 }
   0x6   :  { %v8760_v9 = vld [vmem:[%s13767_s1 + $0x2a4] ss:$16 sps:$4 sm:$0xff]   ;;  %v8763_v11 = vld [vmem:[%s13767_s1 + $0x2a0] ss:$16 sps:$4 sm:$0xff]  }
   0x7   :  { %6288 = vmatpush1.bf16.msra.mxu0 %v8756_v6  ;;  %v8764_v12 = vld [vmem:[%s13767_s1 + $0x84] ss:$16 sps:$4 sm:$0xff]   ;;  %v8768_v14 = vld [vmem:[%s13767_s1 + $0x80] ss:$16 sps:$4 sm:$0xff]  }
   0x8   :  { %6329 = vmatpush1.bf16.msra.mxu1 %v8757_v7  ;;  %6289 = vmatprep.subr.bf16.mxu0 %v8758_v8  ;;  %v8766_v13 = vld [vmem:[%s13767_s1 + $0x284] ss:$16 sps:$4 sm:$0xff]   ;;  %v8769_v15 = vld [vmem:[%s13767_s1 + $0x280] ss:$16 sps:$4 sm:$0xff]   ;;  %v10547_v7 = vcombine.low %v14_v48, %v14_v48 }
   0x9   :  { %6330 = vmatprep.subr.bf16.mxu1 %v8760_v9  ;;  %v8770_v16 = vld [vmem:[%s13767_s1 + $0x64] ss:$16 sps:$4 sm:$0xff]   ;;  %v8774_v18 = vld [vmem:[%s13767_s1 + $0x60] ss:$16 sps:$4 sm:$0xff]  }
   0xa   :  { %v8772_v17 = vld [vmem:[%s13767_s1 + $0x264] ss:$16 sps:$4 sm:$0xff]   ;;  %v8775_v19 = vld [vmem:[%s13767_s1 + $0x260] ss:$16 sps:$4 sm:$0xff]  }
   0xb   :  { %6290 = vmatpush1.bf16.msra.mxu0 %v8762_v10  ;;  %v8776_v20 = vld [vmem:[%s13767_s1 + $0x44] ss:$16 sps:$4 sm:$0xff]   ;;  %v8780_v22 = vld [vmem:[%s13767_s1 + $0x40] ss:$16 sps:$4 sm:$0xff]  }
   0xc   :  { %6331 = vmatpush1.bf16.msra.mxu1 %v8763_v11  ;;  %6291 = vmatprep.subr.bf16.mxu0 %v8764_v12  ;;  %v8778_v21 = vld [vmem:[%s13767_s1 + $0x244] ss:$16 sps:$4 sm:$0xff]   ;;  %v8781_v23 = vld [vmem:[%s13767_s1 + $0x240] ss:$16 sps:$4 sm:$0xff]  }
   0xd   :  { %6332 = vmatprep.subr.bf16.mxu1 %v8766_v13  ;;  %v8782_v24 = vld [vmem:[%s13767_s1 + $0x24] ss:$16 sps:$4 sm:$0xff]   ;;  %v8786_v26 = vld [vmem:[%s13767_s1 + $0x20] ss:$16 sps:$4 sm:$0xff]  }
   0xe   :  { %v8784_v25 = vld [vmem:[%s13767_s1 + $0x224] ss:$16 sps:$4 sm:$0xff]   ;;  %v8787_v27 = vld [vmem:[%s13767_s1 + $0x220] ss:$16 sps:$4 sm:$0xff]  }
   0xf   :  { %6292 = vmatpush1.bf16.msra.mxu0 %v8768_v14  ;;  %v8788_v28 = vld [vmem:[%s13767_s1 + $0x4] ss:$16 sps:$4 sm:$0xff]   ;;  %v8792_v30 = vld [vmem:[%s13767_s1] ss:$16 sps:$4 sm:$0xff]  }
  0x10   :  { %6333 = vmatpush1.bf16.msra.mxu1 %v8769_v15  ;;  %6293 = vmatprep.subr.bf16.mxu0 %v8770_v16  ;;  %v8790_v29 = vld [vmem:[%s13767_s1 + $0x204] ss:$16 sps:$4 sm:$0xff]   ;;  %v8793_v31 = vld [vmem:[%s13767_s1 + $0x200] ss:$16 sps:$4 sm:$0xff]  }
  0x11   :  { %6334 = vmatprep.subr.bf16.mxu1 %v8772_v17  ;;  %v8794_v32 = vld [vmem:[%s13767_s1 + $0x1e4] ss:$16 sps:$4 sm:$0xff]   ;;  %v8798_v34 = vld [vmem:[%s13767_s1 + $0x1e0] ss:$16 sps:$4 sm:$0xff]  }
  0x12   :  { %v8796_v33 = vld [vmem:[%s13767_s1 + $0x3e4] ss:$16 sps:$4 sm:$0xff]   ;;  %v8799_v35 = vld [vmem:[%s13767_s1 + $0x3e0] ss:$16 sps:$4 sm:$0xff]  }
  0x13   :  { %6294 = vmatpush1.bf16.msra.mxu0 %v8774_v18  ;;  %v8800_v36 = vld [vmem:[%s13767_s1 + $0x1c4] ss:$16 sps:$4 sm:$0xff]   ;;  %v8804_v38 = vld [vmem:[%s13767_s1 + $0x1c0] ss:$16 sps:$4 sm:$0xff]  }
  0x14   :  { %6335 = vmatpush1.bf16.msra.mxu1 %v8775_v19  ;;  %6295 = vmatprep.subr.bf16.mxu0 %v8776_v20  ;;  %v8802_v37 = vld [vmem:[%s13767_s1 + $0x3c4] ss:$16 sps:$4 sm:$0xff]   ;;  %v8805_v39 = vld [vmem:[%s13767_s1 + $0x3c0] ss:$16 sps:$4 sm:$0xff]  }
  0x15   :  { %6336 = vmatprep.subr.bf16.mxu1 %v8778_v21  ;;  %v8806_v40 = vld [vmem:[%s13767_s1 + $0x1a4] ss:$16 sps:$4 sm:$0xff]   ;;  %v8810_v42 = vld [vmem:[%s13767_s1 + $0x1a0] ss:$16 sps:$4 sm:$0xff]  }
  0x16   :  { %v8808_v41 = vld [vmem:[%s13767_s1 + $0x3a4] ss:$16 sps:$4 sm:$0xff]   ;;  %v8811_v43 = vld [vmem:[%s13767_s1 + $0x3a0] ss:$16 sps:$4 sm:$0xff]  }
  0x17   :  { %6296 = vmatpush1.bf16.msra.mxu0 %v8780_v22  ;;  %v8812_v44 = vld [vmem:[%s13767_s1 + $0x184] ss:$16 sps:$4 sm:$0xff]   ;;  %v8816_v49 = vld [vmem:[%s13767_s1 + $0x180] ss:$16 sps:$4 sm:$0xff]  }
  0x18   :  { %6337 = vmatpush1.bf16.msra.mxu1 %v8781_v23  ;;  %6297 = vmatprep.subr.bf16.mxu0 %v8782_v24  ;;  %v8814_v45 = vld [vmem:[%s13767_s1 + $0x384] ss:$16 sps:$4 sm:$0xff]   ;;  %v8817_v50 = vld [vmem:[%s13767_s1 + $0x380] ss:$16 sps:$4 sm:$0xff]  }
  0x19   :  { %6338 = vmatprep.subr.bf16.mxu1 %v8784_v25  ;;  %v13_v46 = vld [vmem:[%s13768_s0] sm:$0xff] }
  0x1a   :  { %v10476_v47 = vcombine.high %v13_v46, %v13_v46  ;;  %v8818_v52 = vld [vmem:[%s13767_s1 + $0x164] ss:$16 sps:$4 sm:$0xff]   ;;  %v8822_v54 = vld [vmem:[%s13767_s1 + $0x160] ss:$16 sps:$4 sm:$0xff]   ;;  %v10545_v6 = vcombine.low %v13_v46, %v13_v46 }
  0x1b   :  { %6298 = vmatpush1.bf16.msra.mxu0 %v8786_v26  ;;  %v8820_v53 = vld [vmem:[%s13767_s1 + $0x364] ss:$16 sps:$4 sm:$0xff]   ;;  %v8823_v55 = vld [vmem:[%s13767_s1 + $0x360] ss:$16 sps:$4 sm:$0xff]  }
  0x1c   :  { %6339 = vmatpush1.bf16.msra.mxu1 %v8787_v27  ;;  %6299 = vmatprep.subr.bf16.mxu0 %v8788_v28  ;;  %v8824_v56 = vld [vmem:[%s13767_s1 + $0x144] ss:$16 sps:$4 sm:$0xff]   ;;  %v8828_v58 = vld [vmem:[%s13767_s1 + $0x140] ss:$16 sps:$4 sm:$0xff]  }
  0x1d   :  { %6340 = vmatprep.subr.bf16.mxu1 %v8790_v29  ;;  %6317 = vmatprep.mubr.bf16.mxu0 %v10476_v47  ;;  %v8826_v57 = vld [vmem:[%s13767_s1 + $0x344] ss:$16 sps:$4 sm:$0xff]   ;;  %v8829_v59 = vld [vmem:[%s13767_s1 + $0x340] ss:$16 sps:$4 sm:$0xff]  }
  0x1e   :  { %v8830_v60 = vld [vmem:[%s13767_s1 + $0x124] ss:$16 sps:$4 sm:$0xff]   ;;  %v8834_v62 = vld [vmem:[%s13767_s1 + $0x120] ss:$16 sps:$4 sm:$0xff]  }
  0x1f   :  { %6300 = vmatpush1.bf16.msra.mxu0 %v8792_v30  ;;  %v8832_v61 = vld [vmem:[%s13767_s1 + $0x324] ss:$16 sps:$4 sm:$0xff]   ;;  %v8835_v63 = vld [vmem:[%s13767_s1 + $0x320] ss:$16 sps:$4 sm:$0xff]  }
  0x20   :  { %6341 = vmatpush1.bf16.msra.mxu1 %v8793_v31  ;;  %6301 = vmatprep.subr.bf16.mxu0 %v8794_v32  ;;  %v8836_v0 = vld [vmem:[%s13767_s1 + $0x104] ss:$16 sps:$4 sm:$0xff]   ;;  %v8840_v2 = vld [vmem:[%s13767_s1 + $0x100] ss:$16 sps:$4 sm:$0xff]  }
  0x21   :  { %6342 = vmatprep.subr.bf16.mxu1 %v8796_v33  ;;  %v8838_v1 = vld [vmem:[%s13767_s1 + $0x304] ss:$16 sps:$4 sm:$0xff]   ;;  %v8841_v3 = vld [vmem:[%s13767_s1 + $0x300] ss:$16 sps:$4 sm:$0xff]   ;;  %v10631_v33 = vld [vmem:[%s13768_s0 + $0x18] sm:$0xff] }
  0x22   :  { %v8848_v4 = vld [vmem:[%s13767_s1 + $0x4e4] ss:$16 sps:$4 sm:$0xff]   ;;  %v8846_v8 = vld [vmem:[%s13767_s1 + $0x4e0] ss:$16 sps:$4 sm:$0xff]  }
  0x23   :  { %6302 = vmatpush2.bf16.msra.mxu0 %v8798_v34  ;;  %v8851_v5 = vld [vmem:[%s13767_s1 + $0x6e4] ss:$16 sps:$4 sm:$0xff]   ;;  %v8849_v9 = vld [vmem:[%s13767_s1 + $0x6e0] ss:$16 sps:$4 sm:$0xff]  }
  0x24   :  { %6343 = vmatpush2.bf16.msra.mxu1 %v8799_v35  ;;  %6303 = vmatprep.subr.bf16.mxu0 %v8800_v36  ;;  %v8854_v10 = vld [vmem:[%s13767_s1 + $0x4c4] ss:$16 sps:$4 sm:$0xff]   ;;  %v8852_v12 = vld [vmem:[%s13767_s1 + $0x4c0] ss:$16 sps:$4 sm:$0xff]  }
  0x25   :  { %6344 = vmatprep.subr.bf16.mxu1 %v8802_v37  ;;  %v8857_v11 = vld [vmem:[%s13767_s1 + $0x6c4] ss:$16 sps:$4 sm:$0xff]   ;;  %v8855_v13 = vld [vmem:[%s13767_s1 + $0x6c0] ss:$16 sps:$4 sm:$0xff]   ;;  %v10645_v37 = vcombine.high %v10631_v33, %v10631_v33 }
  0x26   :  { %v8860_v14 = vld [vmem:[%s13767_s1 + $0x4a4] ss:$16 sps:$4 sm:$0xff]   ;;  %v8858_v16 = vld [vmem:[%s13767_s1 + $0x4a0] ss:$16 sps:$4 sm:$0xff]  }
  0x27   :  { %6304 = vmatpush2.bf16.msra.mxu0 %v8804_v38  ;;  %v8863_v15 = vld [vmem:[%s13767_s1 + $0x6a4] ss:$16 sps:$4 sm:$0xff]   ;;  %v8861_v17 = vld [vmem:[%s13767_s1 + $0x6a0] ss:$16 sps:$4 sm:$0xff]  }
  0x28   :  { %6345 = vmatpush2.bf16.msra.mxu1 %v8805_v39  ;;  %6305 = vmatprep.subr.bf16.mxu0 %v8806_v40  ;;  %v8866_v18 = vld [vmem:[%s13767_s1 + $0x484] ss:$16 sps:$4 sm:$0xff]   ;;  %v8864_v20 = vld [vmem:[%s13767_s1 + $0x480] ss:$16 sps:$4 sm:$0xff]  }
  0x29   :  { %6346 = vmatprep.subr.bf16.mxu1 %v8808_v41  ;;  %v8869_v19 = vld [vmem:[%s13767_s1 + $0x684] ss:$16 sps:$4 sm:$0xff]   ;;  %v8867_v21 = vld [vmem:[%s13767_s1 + $0x680] ss:$16 sps:$4 sm:$0xff]  }
  0x2a   :  { %v8872_v22 = vld [vmem:[%s13767_s1 + $0x464] ss:$16 sps:$4 sm:$0xff]   ;;  %v8870_v24 = vld [vmem:[%s13767_s1 + $0x460] ss:$16 sps:$4 sm:$0xff]  }
  0x2b   :  { %6306 = vmatpush2.bf16.msra.mxu0 %v8810_v42  ;;  %v8875_v23 = vld [vmem:[%s13767_s1 + $0x664] ss:$16 sps:$4 sm:$0xff]   ;;  %v8873_v25 = vld [vmem:[%s13767_s1 + $0x660] ss:$16 sps:$4 sm:$0xff]  }
  0x2c   :  { %6347 = vmatpush2.bf16.msra.mxu1 %v8811_v43  ;;  %6307 = vmatprep.subr.bf16.mxu0 %v8812_v44  ;;  %v8878_v26 = vld [vmem:[%s13767_s1 + $0x444] ss:$16 sps:$4 sm:$0xff]   ;;  %v8876_v28 = vld [vmem:[%s13767_s1 + $0x440] ss:$16 sps:$4 sm:$0xff]  }
  0x2d   :  { %6348 = vmatprep.subr.bf16.mxu1 %v8814_v45  ;;  %v8881_v27 = vld [vmem:[%s13767_s1 + $0x644] ss:$16 sps:$4 sm:$0xff]   ;;  %v8879_v29 = vld [vmem:[%s13767_s1 + $0x640] ss:$16 sps:$4 sm:$0xff]  }
  0x2e   :  { %v8884_v30 = vld [vmem:[%s13767_s1 + $0x424] ss:$16 sps:$4 sm:$0xff]   ;;  %v8882_v34 = vld [vmem:[%s13767_s1 + $0x420] ss:$16 sps:$4 sm:$0xff]  }
  0x2f   :  { %6308 = vmatpush2.bf16.msra.mxu0 %v8816_v49  ;;  %v8887_v31 = vld [vmem:[%s13767_s1 + $0x624] ss:$16 sps:$4 sm:$0xff]   ;;  %v8885_v35 = vld [vmem:[%s13767_s1 + $0x620] ss:$16 sps:$4 sm:$0xff]  }
  0x30   :  { %6349 = vmatpush2.bf16.msra.mxu1 %v8817_v50  ;;  %6309 = vmatprep.subr.bf16.mxu0 %v8818_v52  ;;  %v10626_v32 = vld [vmem:[%s13768_s0 + $0x10] sm:$0xff] }
  0x31   :  { %6350 = vmatprep.subr.bf16.mxu1 %v8820_v53  ;;  %v10641_v36 = vcombine.high %v10626_v32, %v10626_v32  ;;  %v8890_v38 = vld [vmem:[%s13767_s1 + $0x404] ss:$16 sps:$4 sm:$0xff]   ;;  %v8888_v40 = vld [vmem:[%s13767_s1 + $0x400] ss:$16 sps:$4 sm:$0xff]  }
  0x32   :  { %v8893_v39 = vld [vmem:[%s13767_s1 + $0x604] ss:$16 sps:$4 sm:$0xff]   ;;  %v8891_v41 = vld [vmem:[%s13767_s1 + $0x600] ss:$16 sps:$4 sm:$0xff]  }
  0x33   :  { %6310 = vmatpush2.bf16.msra.mxu0 %v8822_v54  ;;  %v8896_v42 = vld [vmem:[%s13767_s1 + $0x5e4] ss:$16 sps:$4 sm:$0xff]   ;;  %v8894_v44 = vld [vmem:[%s13767_s1 + $0x5e0] ss:$16 sps:$4 sm:$0xff]  }
  0x34   :  { %6351 = vmatpush2.bf16.msra.mxu1 %v8823_v55  ;;  %6311 = vmatprep.subr.bf16.mxu0 %v8824_v56  ;;  %v8899_v43 = vld [vmem:[%s13767_s1 + $0x7e4] ss:$16 sps:$4 sm:$0xff]   ;;  %v8897_v45 = vld [vmem:[%s13767_s1 + $0x7e0] ss:$16 sps:$4 sm:$0xff]  }
  0x35   :  { %6352 = vmatprep.subr.bf16.mxu1 %v8826_v57  ;;  %v8902_v46 = vld [vmem:[%s13767_s1 + $0x5c4] ss:$16 sps:$4 sm:$0xff]   ;;  %v8900_v49 = vld [vmem:[%s13767_s1 + $0x5c0] ss:$16 sps:$4 sm:$0xff]  }
  0x36   :  { %v8905_v48 = vld [vmem:[%s13767_s1 + $0x7c4] ss:$16 sps:$4 sm:$0xff]   ;;  %v8903_v50 = vld [vmem:[%s13767_s1 + $0x7c0] ss:$16 sps:$4 sm:$0xff]  }
  0x37   :  { %6312 = vmatpush2.bf16.msra.mxu0 %v8828_v58  ;;  %v8908_v52 = vld [vmem:[%s13767_s1 + $0x5a4] ss:$16 sps:$4 sm:$0xff]   ;;  %v8906_v54 = vld [vmem:[%s13767_s1 + $0x5a0] ss:$16 sps:$4 sm:$0xff]  }
  0x38   :  { %6353 = vmatpush2.bf16.msra.mxu1 %v8829_v59  ;;  %6313 = vmatprep.subr.bf16.mxu0 %v8830_v60  ;;  %v8911_v53 = vld [vmem:[%s13767_s1 + $0x7a4] ss:$16 sps:$4 sm:$0xff]   ;;  %v8909_v55 = vld [vmem:[%s13767_s1 + $0x7a0] ss:$16 sps:$4 sm:$0xff]  }
  0x39   :  { %6354 = vmatprep.subr.bf16.mxu1 %v8832_v61  ;;  %v8914_v56 = vld [vmem:[%s13767_s1 + $0x584] ss:$16 sps:$4 sm:$0xff]   ;;  %v8912_v58 = vld [vmem:[%s13767_s1 + $0x580] ss:$16 sps:$4 sm:$0xff]  }
  0x3a   :  { %v8917_v57 = vld [vmem:[%s13767_s1 + $0x784] ss:$16 sps:$4 sm:$0xff]   ;;  %v8915_v59 = vld [vmem:[%s13767_s1 + $0x780] ss:$16 sps:$4 sm:$0xff]  }
  0x3b   :  { %6314 = vmatpush2.bf16.msra.mxu0 %v8834_v62  ;;  %v8920_v60 = vld [vmem:[%s13767_s1 + $0x564] ss:$16 sps:$4 sm:$0xff]   ;;  %v8918_v62 = vld [vmem:[%s13767_s1 + $0x560] ss:$16 sps:$4 sm:$0xff]  }
  0x3c   :  { %6355 = vmatpush2.bf16.msra.mxu1 %v8835_v63  ;;  %6315 = vmatprep.subr.bf16.mxu0 %v8836_v0  ;;  %v8923_v61 = vld [vmem:[%s13767_s1 + $0x764] ss:$16 sps:$4 sm:$0xff]   ;;  %v8921_v63 = vld [vmem:[%s13767_s1 + $0x760] ss:$16 sps:$4 sm:$0xff]  }
  0x3d   :  { %6356 = vmatprep.subr.bf16.mxu1 %v8838_v1  ;;  %v8926_v0 = vld [vmem:[%s13767_s1 + $0x544] ss:$16 sps:$4 sm:$0xff]  }
  0x3e   :  { %v8929_v1 = vld [vmem:[%s13767_s1 + $0x744] ss:$16 sps:$4 sm:$0xff]  }
  0x3f   :  { %6316 = vmatpush2.bf16.msra.mxu0 %v8840_v2  ;;  %v8924_v2 = vld [vmem:[%s13767_s1 + $0x540] ss:$16 sps:$4 sm:$0xff]  }
  0x40   :  { %6357 = vmatpush2.bf16.msra.mxu1 %v8841_v3  ;;  %6367 = vmatprep.subr.bf16.mxu0 %v8848_v4  ;;  %v8927_v3 = vld [vmem:[%s13767_s1 + $0x740] ss:$16 sps:$4 sm:$0xff]   ;;  %v8932_v4 = vld [vmem:[%s13767_s1 + $0x524] ss:$16 sps:$4 sm:$0xff]  }
  0x41   :  { %6408 = vmatprep.subr.bf16.mxu1 %v8851_v5  ;;  %v8935_v5 = vld [vmem:[%s13767_s1 + $0x724] ss:$16 sps:$4 sm:$0xff]  }
  0x42   :  { %6318 = vmatmul.mubr.bf16.vlgmr.msra.gmra.mxu0 %v10545_v6 }
  0x43   :  { %6359 = vmatmul.mubr.bf16.vlgmr.msra.gmra.mxu1 %v10547_v7  ;;  %6368 = vmatpush1.bf16.msra.mxu0 %v8846_v8  ;;  %v8930_v8 = vld [vmem:[%s13767_s1 + $0x520] ss:$16 sps:$4 sm:$0xff]  }
  0x44   :  { %6409 = vmatpush1.bf16.msra.mxu1 %v8849_v9  ;;  %6369 = vmatprep.subr.bf16.mxu0 %v8854_v10  ;;  %v8933_v9 = vld [vmem:[%s13767_s1 + $0x720] ss:$16 sps:$4 sm:$0xff]   ;;  %v8938_v10 = vld [vmem:[%s13767_s1 + $0x504] ss:$16 sps:$4 sm:$0xff]  }
  0x45   :  { %6410 = vmatprep.subr.bf16.mxu1 %v8857_v11  ;;  %6399 = vmatprep.mubr.bf16.mxu0 %v10641_v36  ;;  %v8941_v11 = vld [vmem:[%s13767_s1 + $0x704] ss:$16 sps:$4 sm:$0xff]  }
  0x46   :  { %6440 = vmatprep.mubr.bf16.mxu1 %v10645_v37 }
  0x47   :  { %6370 = vmatpush1.bf16.msra.mxu0 %v8852_v12  ;;  %v8936_v12 = vld [vmem:[%s13767_s1 + $0x500] ss:$16 sps:$4 sm:$0xff]  }
  0x48   :  { %6411 = vmatpush1.bf16.msra.mxu1 %v8855_v13  ;;  %6371 = vmatprep.subr.bf16.mxu0 %v8860_v14  ;;  %v8939_v13 = vld [vmem:[%s13767_s1 + $0x700] ss:$16 sps:$4 sm:$0xff]   ;;  %v8948_v14 = vld [vmem:[%s13767_s1 + $0x8e4] ss:$16 sps:$4 sm:$0xff]  }
  0x49   :  { %6412 = vmatprep.subr.bf16.mxu1 %v8863_v15  ;;  %v8951_v15 = vld [vmem:[%s13767_s1 + $0xae4] ss:$16 sps:$4 sm:$0xff]  }
  0x4b   :  { %6372 = vmatpush1.bf16.msra.mxu0 %v8858_v16  ;;  %v10765_v16 = vcombine.low %v10626_v32, %v10626_v32  ;;  %v8966_v32 = vld [vmem:[%s13767_s1 + $0x884] ss:$16 sps:$4 sm:$0xff]  }
  0x4c   :  { %6413 = vmatpush1.bf16.msra.mxu1 %v8861_v17  ;;  %6373 = vmatprep.subr.bf16.mxu0 %v8866_v18  ;;  %v10769_v17 = vcombine.low %v10631_v33, %v10631_v33  ;;  %v8946_v18 = vld [vmem:[%s13767_s1 + $0x8e0] ss:$16 sps:$4 sm:$0xff]   ;;  %v8969_v33 = vld [vmem:[%s13767_s1 + $0xa84] ss:$16 sps:$4 sm:$0xff]  }
  0x4d   :  { %6414 = vmatprep.subr.bf16.mxu1 %v8869_v19  ;;  %v8949_v19 = vld [vmem:[%s13767_s1 + $0xae0] ss:$16 sps:$4 sm:$0xff]  }
  0x4f   :  { %6374 = vmatpush1.bf16.msra.mxu0 %v8864_v20  ;;  %v8954_v20 = vld [vmem:[%s13767_s1 + $0x8c4] ss:$16 sps:$4 sm:$0xff]  }
  0x50   :  { %6415 = vmatpush1.bf16.msra.mxu1 %v8867_v21  ;;  %6375 = vmatprep.subr.bf16.mxu0 %v8872_v22  ;;  %v8957_v21 = vld [vmem:[%s13767_s1 + $0xac4] ss:$16 sps:$4 sm:$0xff]  }
  0x51   :  { %6416 = vmatprep.subr.bf16.mxu1 %v8875_v23  ;;  %v10786_v22 = vld [vmem:[%s13768_s0 + $0x20] sm:$0xff]  ;;  %v10791_v23 = vld [vmem:[%s13768_s0 + $0x28] sm:$0xff] }
  0x53   :  { %6376 = vmatpush1.bf16.msra.mxu0 %v8870_v24  ;;  %v10795_v24 = vcombine.high %v10786_v22, %v10786_v22 }
  0x54   :  { %6417 = vmatpush1.bf16.msra.mxu1 %v8873_v25  ;;  %6377 = vmatprep.subr.bf16.mxu0 %v8878_v26  ;;  %v10799_v25 = vcombine.high %v10791_v23, %v10791_v23  ;;  %v8952_v26 = vld [vmem:[%s13767_s1 + $0x8c0] ss:$16 sps:$4 sm:$0xff]  }
  0x55   :  { %6418 = vmatprep.subr.bf16.mxu1 %v8881_v27  ;;  %v8955_v27 = vld [vmem:[%s13767_s1 + $0xac0] ss:$16 sps:$4 sm:$0xff]  }
  0x57   :  { %6378 = vmatpush1.bf16.msra.mxu0 %v8876_v28  ;;  %v8960_v28 = vld [vmem:[%s13767_s1 + $0x8a4] ss:$16 sps:$4 sm:$0xff]  }
  0x58   :  { %6419 = vmatpush1.bf16.msra.mxu1 %v8879_v29  ;;  %6379 = vmatprep.subr.bf16.mxu0 %v8884_v30  ;;  %v8963_v29 = vld [vmem:[%s13767_s1 + $0xaa4] ss:$16 sps:$4 sm:$0xff]   ;;  %v8958_v30 = vld [vmem:[%s13767_s1 + $0x8a0] ss:$16 sps:$4 sm:$0xff]  }
  0x59   :  { %6420 = vmatprep.subr.bf16.mxu1 %v8887_v31  ;;  %v8961_v31 = vld [vmem:[%s13767_s1 + $0xaa0] ss:$16 sps:$4 sm:$0xff]  }
  0x5b   :  { %6380 = vmatpush1.bf16.msra.mxu0 %v8882_v34  ;;  %v8964_v34 = vld [vmem:[%s13767_s1 + $0x880] ss:$16 sps:$4 sm:$0xff]  }
  0x5c   :  { %6421 = vmatpush1.bf16.msra.mxu1 %v8885_v35  ;;  %6381 = vmatprep.subr.bf16.mxu0 %v8890_v38  ;;  %v8967_v35 = vld [vmem:[%s13767_s1 + $0xa80] ss:$16 sps:$4 sm:$0xff]   ;;  %v8972_v38 = vld [vmem:[%s13767_s1 + $0x864] ss:$16 sps:$4 sm:$0xff]  }
  0x5d   :  { %6422 = vmatprep.subr.bf16.mxu1 %v8893_v39  ;;  %v8975_v39 = vld [vmem:[%s13767_s1 + $0xa64] ss:$16 sps:$4 sm:$0xff]  }
  0x5f   :  { %6382 = vmatpush1.bf16.msra.mxu0 %v8888_v40  ;;  %v8970_v40 = vld [vmem:[%s13767_s1 + $0x860] ss:$16 sps:$4 sm:$0xff]  }
  0x60   :  { %6423 = vmatpush1.bf16.msra.mxu1 %v8891_v41  ;;  %6383 = vmatprep.subr.bf16.mxu0 %v8896_v42  ;;  %v8973_v41 = vld [vmem:[%s13767_s1 + $0xa60] ss:$16 sps:$4 sm:$0xff]   ;;  %v8978_v42 = vld [vmem:[%s13767_s1 + $0x844] ss:$16 sps:$4 sm:$0xff]  }
  0x61   :  { %6424 = vmatprep.subr.bf16.mxu1 %v8899_v43  ;;  %v8981_v43 = vld [vmem:[%s13767_s1 + $0xa44] ss:$16 sps:$4 sm:$0xff]  }
  0x63   :  { %6384 = vmatpush2.bf16.msra.mxu0 %v8894_v44  ;;  %v8976_v44 = vld [vmem:[%s13767_s1 + $0x840] ss:$16 sps:$4 sm:$0xff]  }
  0x64   :  { %6425 = vmatpush2.bf16.msra.mxu1 %v8897_v45  ;;  %6385 = vmatprep.subr.bf16.mxu0 %v8902_v46  ;;  %v8979_v45 = vld [vmem:[%s13767_s1 + $0xa40] ss:$16 sps:$4 sm:$0xff]   ;;  %v8984_v46 = vld [vmem:[%s13767_s1 + $0x824] ss:$16 sps:$4 sm:$0xff]  }
  0x65   :  { %6426 = vmatprep.subr.bf16.mxu1 %v8905_v48  ;;  %v8987_v48 = vld [vmem:[%s13767_s1 + $0xa24] ss:$16 sps:$4 sm:$0xff]  }
  0x67   :  { %6386 = vmatpush2.bf16.msra.mxu0 %v8900_v49  ;;  %v8982_v49 = vld [vmem:[%s13767_s1 + $0x820] ss:$16 sps:$4 sm:$0xff]  }
  0x68   :  { %6427 = vmatpush2.bf16.msra.mxu1 %v8903_v50  ;;  %6387 = vmatprep.subr.bf16.mxu0 %v8908_v52  ;;  %v8985_v50 = vld [vmem:[%s13767_s1 + $0xa20] ss:$16 sps:$4 sm:$0xff]   ;;  %v8990_v52 = vld [vmem:[%s13767_s1 + $0x804] ss:$16 sps:$4 sm:$0xff]  }
  0x69   :  { %6428 = vmatprep.subr.bf16.mxu1 %v8911_v53  ;;  %v8993_v53 = vld [vmem:[%s13767_s1 + $0xa04] ss:$16 sps:$4 sm:$0xff]  }
  0x6b   :  { %6388 = vmatpush2.bf16.msra.mxu0 %v8906_v54  ;;  %v8988_v54 = vld [vmem:[%s13767_s1 + $0x800] ss:$16 sps:$4 sm:$0xff]  }
  0x6c   :  { %6429 = vmatpush2.bf16.msra.mxu1 %v8909_v55  ;;  %6389 = vmatprep.subr.bf16.mxu0 %v8914_v56  ;;  %v8991_v55 = vld [vmem:[%s13767_s1 + $0xa00] ss:$16 sps:$4 sm:$0xff]   ;;  %v8996_v56 = vld [vmem:[%s13767_s1 + $0x9e4] ss:$16 sps:$4 sm:$0xff]  }
  0x6d   :  { %6430 = vmatprep.subr.bf16.mxu1 %v8917_v57  ;;  %v8999_v57 = vld [vmem:[%s13767_s1 + $0xbe4] ss:$16 sps:$4 sm:$0xff]  }
  0x6f   :  { %6390 = vmatpush2.bf16.msra.mxu0 %v8912_v58  ;;  %v8994_v58 = vld [vmem:[%s13767_s1 + $0x9e0] ss:$16 sps:$4 sm:$0xff]  }
  0x70   :  { %6431 = vmatpush2.bf16.msra.mxu1 %v8915_v59  ;;  %6391 = vmatprep.subr.bf16.mxu0 %v8920_v60  ;;  %v8997_v59 = vld [vmem:[%s13767_s1 + $0xbe0] ss:$16 sps:$4 sm:$0xff]   ;;  %v9002_v60 = vld [vmem:[%s13767_s1 + $0x9c4] ss:$16 sps:$4 sm:$0xff]  }
  0x71   :  { %6432 = vmatprep.subr.bf16.mxu1 %v8923_v61  ;;  %v9005_v61 = vld [vmem:[%s13767_s1 + $0xbc4] ss:$16 sps:$4 sm:$0xff]  }
  0x73   :  { %6392 = vmatpush2.bf16.msra.mxu0 %v8918_v62  ;;  %v9000_v62 = vld [vmem:[%s13767_s1 + $0x9c0] ss:$16 sps:$4 sm:$0xff]  }
  0x74   :  { %6433 = vmatpush2.bf16.msra.mxu1 %v8921_v63  ;;  %6393 = vmatprep.subr.bf16.mxu0 %v8926_v0  ;;  %v9003_v63 = vld [vmem:[%s13767_s1 + $0xbc0] ss:$16 sps:$4 sm:$0xff]   ;;  %v9008_v0 = vld [vmem:[%s13767_s1 + $0x9a4] ss:$16 sps:$4 sm:$0xff]  }
  0x75   :  { %6434 = vmatprep.subr.bf16.mxu1 %v8929_v1  ;;  %v9011_v1 = vld [vmem:[%s13767_s1 + $0xba4] ss:$16 sps:$4 sm:$0xff]  }
  0x77   :  { %6394 = vmatpush2.bf16.msra.mxu0 %v8924_v2  ;;  %v9006_v2 = vld [vmem:[%s13767_s1 + $0x9a0] ss:$16 sps:$4 sm:$0xff]  }
  0x78   :  { %6435 = vmatpush2.bf16.msra.mxu1 %v8927_v3  ;;  %6395 = vmatprep.subr.bf16.mxu0 %v8932_v4  ;;  %v9009_v3 = vld [vmem:[%s13767_s1 + $0xba0] ss:$16 sps:$4 sm:$0xff]   ;;  %v9014_v4 = vld [vmem:[%s13767_s1 + $0x984] ss:$16 sps:$4 sm:$0xff]  }
  0x79   :  { %6436 = vmatprep.subr.bf16.mxu1 %v8935_v5  ;;  %v9017_v5 = vld [vmem:[%s13767_s1 + $0xb84] ss:$16 sps:$4 sm:$0xff]  }
  0x7b   :  { %6396 = vmatpush2.bf16.msra.mxu0 %v8930_v8  ;;  %v9012_v8 = vld [vmem:[%s13767_s1 + $0x980] ss:$16 sps:$4 sm:$0xff]  }
  0x7c   :  { %6437 = vmatpush2.bf16.msra.mxu1 %v8933_v9  ;;  %6397 = vmatprep.subr.bf16.mxu0 %v8938_v10  ;;  %v9015_v9 = vld [vmem:[%s13767_s1 + $0xb80] ss:$16 sps:$4 sm:$0xff]   ;;  %v9020_v10 = vld [vmem:[%s13767_s1 + $0x964] ss:$16 sps:$4 sm:$0xff]  }
  0x7d   :  { %6438 = vmatprep.subr.bf16.mxu1 %v8941_v11  ;;  %v9023_v11 = vld [vmem:[%s13767_s1 + $0xb64] ss:$16 sps:$4 sm:$0xff]  }
  0x7f   :  { %6398 = vmatpush2.bf16.msra.mxu0 %v8936_v12  ;;  %v9018_v12 = vld [vmem:[%s13767_s1 + $0x960] ss:$16 sps:$4 sm:$0xff]  }
  0x80   :  { %6439 = vmatpush2.bf16.msra.mxu1 %v8939_v13  ;;  %6449 = vmatprep.subr.bf16.mxu0 %v8948_v14  ;;  %v9021_v13 = vld [vmem:[%s13767_s1 + $0xb60] ss:$16 sps:$4 sm:$0xff]   ;;  %v9026_v14 = vld [vmem:[%s13767_s1 + $0x944] ss:$16 sps:$4 sm:$0xff]  }
  0x81   :  { %6490 = vmatprep.subr.bf16.mxu1 %v8951_v15  ;;  %v9029_v15 = vld [vmem:[%s13767_s1 + $0xb44] ss:$16 sps:$4 sm:$0xff]  }
  0x82   :  { %6400 = vmatmul.mubr.bf16.vlgmr.msra.gmra.mxu0 %v10765_v16 }
  0x83   :  { %6441 = vmatmul.mubr.bf16.vlgmr.msra.gmra.mxu1 %v10769_v17  ;;  %6450 = vmatpush1.bf16.msra.mxu0 %v8946_v18  ;;  %v9024_v18 = vld [vmem:[%s13767_s1 + $0x940] ss:$16 sps:$4 sm:$0xff]  }
  0x84   :  { %6491 = vmatpush1.bf16.msra.mxu1 %v8949_v19  ;;  %6451 = vmatprep.subr.bf16.mxu0 %v8954_v20  ;;  %v9027_v19 = vld [vmem:[%s13767_s1 + $0xb40] ss:$16 sps:$4 sm:$0xff]   ;;  %v9032_v20 = vld [vmem:[%s13767_s1 + $0x924] ss:$16 sps:$4 sm:$0xff]  }
  0x85   :  { %6492 = vmatprep.subr.bf16.mxu1 %v8957_v21  ;;  %6481 = vmatprep.mubr.bf16.mxu0 %v10795_v24  ;;  %v9035_v21 = vld [vmem:[%s13767_s1 + $0xb24] ss:$16 sps:$4 sm:$0xff]  }
  0x86   :  { %6522 = vmatprep.mubr.bf16.mxu1 %v10799_v25 }
  0x87   :  { %6452 = vmatpush1.bf16.msra.mxu0 %v8952_v26  ;;  %v9030_v26 = vld [vmem:[%s13767_s1 + $0x920] ss:$16 sps:$4 sm:$0xff]  }
  0x88   :  { %6493 = vmatpush1.bf16.msra.mxu1 %v8955_v27  ;;  %6453 = vmatprep.subr.bf16.mxu0 %v8960_v28  ;;  %v9033_v27 = vld [vmem:[%s13767_s1 + $0xb20] ss:$16 sps:$4 sm:$0xff]   ;;  %v9038_v28 = vld [vmem:[%s13767_s1 + $0x904] ss:$16 sps:$4 sm:$0xff]  }
  0x89   :  { %6494 = vmatprep.subr.bf16.mxu1 %v8963_v29  ;;  %v9041_v29 = vld [vmem:[%s13767_s1 + $0xb04] ss:$16 sps:$4 sm:$0xff]  }
  0x8b   :  { %6454 = vmatpush1.bf16.msra.mxu0 %v8958_v30  ;;  %v9036_v30 = vld [vmem:[%s13767_s1 + $0x900] ss:$16 sps:$4 sm:$0xff]  }
  0x8c   :  { %6495 = vmatpush1.bf16.msra.mxu1 %v8961_v31  ;;  %6455 = vmatprep.subr.bf16.mxu0 %v8966_v32  ;;  %v9039_v31 = vld [vmem:[%s13767_s1 + $0xb00] ss:$16 sps:$4 sm:$0xff]   ;;  %v9048_v32 = vld [vmem:[%s13767_s1 + $0xce4] ss:$16 sps:$4 sm:$0xff]  }
  0x8d   :  { %6496 = vmatprep.subr.bf16.mxu1 %v8969_v33  ;;  %v9051_v33 = vld [vmem:[%s13767_s1 + $0xee4] ss:$16 sps:$4 sm:$0xff]  }
  0x8f   :  { %6456 = vmatpush1.bf16.msra.mxu0 %v8964_v34  ;;  %v9046_v34 = vld [vmem:[%s13767_s1 + $0xce0] ss:$16 sps:$4 sm:$0xff]  }
  0x90   :  { %6497 = vmatpush1.bf16.msra.mxu1 %v8967_v35  ;;  %6457 = vmatprep.subr.bf16.mxu0 %v8972_v38  ;;  %v9049_v35 = vld [vmem:[%s13767_s1 + $0xee0] ss:$16 sps:$4 sm:$0xff]   ;;  %v10993_v38 = vcombine.low %v10786_v22, %v10786_v22  ;;  %v9054_v22 = vld [vmem:[%s13767_s1 + $0xcc4] ss:$16 sps:$4 sm:$0xff]  }
  0x91   :  { %6498 = vmatprep.subr.bf16.mxu1 %v8975_v39  ;;  %v10997_v39 = vcombine.low %v10791_v23, %v10791_v23  ;;  %v9057_v23 = vld [vmem:[%s13767_s1 + $0xec4] ss:$16 sps:$4 sm:$0xff]  }
  0x93   :  { %6458 = vmatpush1.bf16.msra.mxu0 %v8970_v40  ;;  %v11002_v40 = vld [vmem:[%s13768_s0 + $0x30] sm:$0xff] }
  0x94   :  { %6499 = vmatpush1.bf16.msra.mxu1 %v8973_v41  ;;  %6459 = vmatprep.subr.bf16.mxu0 %v8978_v42  ;;  %v11007_v41 = vld [vmem:[%s13768_s0 + $0x38] sm:$0xff]  ;;  %v11017_v42 = vcombine.high %v11002_v40, %v11002_v40 }
  0x95   :  { %6500 = vmatprep.subr.bf16.mxu1 %v8981_v43  ;;  %v11021_v43 = vcombine.high %v11007_v41, %v11007_v41 }
  0x97   :  { %6460 = vmatpush1.bf16.msra.mxu0 %v8976_v44  ;;  %v9052_v44 = vld [vmem:[%s13767_s1 + $0xcc0] ss:$16 sps:$4 sm:$0xff]  }
  0x98   :  { %6501 = vmatpush1.bf16.msra.mxu1 %v8979_v45  ;;  %6461 = vmatprep.subr.bf16.mxu0 %v8984_v46  ;;  %v9055_v45 = vld [vmem:[%s13767_s1 + $0xec0] ss:$16 sps:$4 sm:$0xff]   ;;  %v9060_v46 = vld [vmem:[%s13767_s1 + $0xca4] ss:$16 sps:$4 sm:$0xff]  }
  0x99   :  { %6502 = vmatprep.subr.bf16.mxu1 %v8987_v48  ;;  %v9063_v48 = vld [vmem:[%s13767_s1 + $0xea4] ss:$16 sps:$4 sm:$0xff]  }
  0x9b   :  { %6462 = vmatpush1.bf16.msra.mxu0 %v8982_v49  ;;  %v9058_v49 = vld [vmem:[%s13767_s1 + $0xca0] ss:$16 sps:$4 sm:$0xff]  }
  0x9c   :  { %6503 = vmatpush1.bf16.msra.mxu1 %v8985_v50  ;;  %6463 = vmatprep.subr.bf16.mxu0 %v8990_v52  ;;  %v9061_v50 = vld [vmem:[%s13767_s1 + $0xea0] ss:$16 sps:$4 sm:$0xff]   ;;  %v9066_v52 = vld [vmem:[%s13767_s1 + $0xc84] ss:$16 sps:$4 sm:$0xff]  }
  0x9d   :  { %6504 = vmatprep.subr.bf16.mxu1 %v8993_v53  ;;  %v9069_v53 = vld [vmem:[%s13767_s1 + $0xe84] ss:$16 sps:$4 sm:$0xff]  }
  0x9f   :  { %6464 = vmatpush1.bf16.msra.mxu0 %v8988_v54  ;;  %v9064_v54 = vld [vmem:[%s13767_s1 + $0xc80] ss:$16 sps:$4 sm:$0xff]  }
  0xa0   :  { %6505 = vmatpush1.bf16.msra.mxu1 %v8991_v55  ;;  %6465 = vmatprep.subr.bf16.mxu0 %v8996_v56  ;;  %v9067_v55 = vld [vmem:[%s13767_s1 + $0xe80] ss:$16 sps:$4 sm:$0xff]   ;;  %v9072_v56 = vld [vmem:[%s13767_s1 + $0xc64] ss:$16 sps:$4 sm:$0xff]  }
  0xa1   :  { %6506 = vmatprep.subr.bf16.mxu1 %v8999_v57  ;;  %v9075_v57 = vld [vmem:[%s13767_s1 + $0xe64] ss:$16 sps:$4 sm:$0xff]  }
  0xa3   :  { %6466 = vmatpush2.bf16.msra.mxu0 %v8994_v58  ;;  %v9070_v58 = vld [vmem:[%s13767_s1 + $0xc60] ss:$16 sps:$4 sm:$0xff]  }
  0xa4   :  { %6507 = vmatpush2.bf16.msra.mxu1 %v8997_v59  ;;  %6467 = vmatprep.subr.bf16.mxu0 %v9002_v60  ;;  %v9073_v59 = vld [vmem:[%s13767_s1 + $0xe60] ss:$16 sps:$4 sm:$0xff]   ;;  %v9078_v60 = vld [vmem:[%s13767_s1 + $0xc44] ss:$16 sps:$4 sm:$0xff]  }
  0xa5   :  { %6508 = vmatprep.subr.bf16.mxu1 %v9005_v61  ;;  %v9081_v61 = vld [vmem:[%s13767_s1 + $0xe44] ss:$16 sps:$4 sm:$0xff]  }
  0xa7   :  { %6468 = vmatpush2.bf16.msra.mxu0 %v9000_v62  ;;  %v9076_v62 = vld [vmem:[%s13767_s1 + $0xc40] ss:$16 sps:$4 sm:$0xff]  }
  0xa8   :  { %6509 = vmatpush2.bf16.msra.mxu1 %v9003_v63  ;;  %6469 = vmatprep.subr.bf16.mxu0 %v9008_v0  ;;  %v9079_v63 = vld [vmem:[%s13767_s1 + $0xe40] ss:$16 sps:$4 sm:$0xff]   ;;  %v9084_v0 = vld [vmem:[%s13767_s1 + $0xc24] ss:$16 sps:$4 sm:$0xff]  }
  0xa9   :  { %6510 = vmatprep.subr.bf16.mxu1 %v9011_v1  ;;  %v9087_v1 = vld [vmem:[%s13767_s1 + $0xe24] ss:$16 sps:$4 sm:$0xff]  }
  0xab   :  { %6470 = vmatpush2.bf16.msra.mxu0 %v9006_v2  ;;  %v9082_v2 = vld [vmem:[%s13767_s1 + $0xc20] ss:$16 sps:$4 sm:$0xff]  }
  0xac   :  { %6511 = vmatpush2.bf16.msra.mxu1 %v9009_v3  ;;  %6471 = vmatprep.subr.bf16.mxu0 %v9014_v4  ;;  %v9085_v3 = vld [vmem:[%s13767_s1 + $0xe20] ss:$16 sps:$4 sm:$0xff]   ;;  %v9090_v4 = vld [vmem:[%s13767_s1 + $0xc04] ss:$16 sps:$4 sm:$0xff]  }
  0xad   :  { %6512 = vmatprep.subr.bf16.mxu1 %v9017_v5  ;;  %v9093_v5 = vld [vmem:[%s13767_s1 + $0xe04] ss:$16 sps:$4 sm:$0xff]  }
  0xaf   :  { %6472 = vmatpush2.bf16.msra.mxu0 %v9012_v8  ;;  %v9088_v8 = vld [vmem:[%s13767_s1 + $0xc00] ss:$16 sps:$4 sm:$0xff]  }
  0xb0   :  { %6513 = vmatpush2.bf16.msra.mxu1 %v9015_v9  ;;  %6473 = vmatprep.subr.bf16.mxu0 %v9020_v10  ;;  %v9091_v9 = vld [vmem:[%s13767_s1 + $0xe00] ss:$16 sps:$4 sm:$0xff]   ;;  %v9096_v10 = vld [vmem:[%s13767_s1 + $0xde4] ss:$16 sps:$4 sm:$0xff]  }
  0xb1   :  { %6514 = vmatprep.subr.bf16.mxu1 %v9023_v11  ;;  %v9099_v11 = vld [vmem:[%s13767_s1 + $0xfe4] ss:$16 sps:$4 sm:$0xff]  }
  0xb3   :  { %6474 = vmatpush2.bf16.msra.mxu0 %v9018_v12  ;;  %v9094_v12 = vld [vmem:[%s13767_s1 + $0xde0] ss:$16 sps:$4 sm:$0xff]  }
  0xb4   :  { %6515 = vmatpush2.bf16.msra.mxu1 %v9021_v13  ;;  %6475 = vmatprep.subr.bf16.mxu0 %v9026_v14  ;;  %v9097_v13 = vld [vmem:[%s13767_s1 + $0xfe0] ss:$16 sps:$4 sm:$0xff]   ;;  %v9102_v14 = vld [vmem:[%s13767_s1 + $0xdc4] ss:$16 sps:$4 sm:$0xff]  }
  0xb5   :  { %6516 = vmatprep.subr.bf16.mxu1 %v9029_v15  ;;  %v9105_v15 = vld [vmem:[%s13767_s1 + $0xfc4] ss:$16 sps:$4 sm:$0xff]  }
  0xb7   :  { %6476 = vmatpush2.bf16.msra.mxu0 %v9024_v18  ;;  %v9100_v18 = vld [vmem:[%s13767_s1 + $0xdc0] ss:$16 sps:$4 sm:$0xff]  }
  0xb8   :  { %6517 = vmatpush2.bf16.msra.mxu1 %v9027_v19  ;;  %6477 = vmatprep.subr.bf16.mxu0 %v9032_v20  ;;  %v9103_v19 = vld [vmem:[%s13767_s1 + $0xfc0] ss:$16 sps:$4 sm:$0xff]   ;;  %v9108_v20 = vld [vmem:[%s13767_s1 + $0xda4] ss:$16 sps:$4 sm:$0xff]  }
  0xb9   :  { %6518 = vmatprep.subr.bf16.mxu1 %v9035_v21  ;;  %v9111_v21 = vld [vmem:[%s13767_s1 + $0xfa4] ss:$16 sps:$4 sm:$0xff]  }
  0xbb   :  { %6478 = vmatpush2.bf16.msra.mxu0 %v9030_v26  ;;  %v9106_v26 = vld [vmem:[%s13767_s1 + $0xda0] ss:$16 sps:$4 sm:$0xff]  }
  0xbc   :  { %6519 = vmatpush2.bf16.msra.mxu1 %v9033_v27  ;;  %6479 = vmatprep.subr.bf16.mxu0 %v9038_v28  ;;  %v9109_v27 = vld [vmem:[%s13767_s1 + $0xfa0] ss:$16 sps:$4 sm:$0xff]   ;;  %v9114_v28 = vld [vmem:[%s13767_s1 + $0xd84] ss:$16 sps:$4 sm:$0xff]  }
  0xbd   :  { %6520 = vmatprep.subr.bf16.mxu1 %v9041_v29  ;;  %v9117_v29 = vld [vmem:[%s13767_s1 + $0xf84] ss:$16 sps:$4 sm:$0xff]  }
  0xbf   :  { %6480 = vmatpush2.bf16.msra.mxu0 %v9036_v30  ;;  %v9112_v30 = vld [vmem:[%s13767_s1 + $0xd80] ss:$16 sps:$4 sm:$0xff]  }
  0xc0   :  { %6521 = vmatpush2.bf16.msra.mxu1 %v9039_v31  ;;  %6531 = vmatprep.subr.bf16.mxu0 %v9048_v32  ;;  %v9115_v31 = vld [vmem:[%s13767_s1 + $0xf80] ss:$16 sps:$4 sm:$0xff]   ;;  %v9120_v32 = vld [vmem:[%s13767_s1 + $0xd64] ss:$16 sps:$4 sm:$0xff]  }
  0xc1   :  { %6572 = vmatprep.subr.bf16.mxu1 %v9051_v33  ;;  %v9123_v33 = vld [vmem:[%s13767_s1 + $0xf64] ss:$16 sps:$4 sm:$0xff]  }
  0xc2   :  { %6482 = vmatmul.mubr.bf16.vlgmr.msra.gmra.mxu0 %v10993_v38 }
  0xc3   :  { %6523 = vmatmul.mubr.bf16.vlgmr.msra.gmra.mxu1 %v10997_v39  ;;  %6532 = vmatpush1.bf16.msra.mxu0 %v9046_v34  ;;  %v9118_v34 = vld [vmem:[%s13767_s1 + $0xd60] ss:$16 sps:$4 sm:$0xff]  }
  0xc4   :  { %6573 = vmatpush1.bf16.msra.mxu1 %v9049_v35  ;;  %6533 = vmatprep.subr.bf16.mxu0 %v9054_v22  ;;  %v9121_v35 = vld [vmem:[%s13767_s1 + $0xf60] ss:$16 sps:$4 sm:$0xff]   ;;  %v9126_v22 = vld [vmem:[%s13767_s1 + $0xd44] ss:$16 sps:$4 sm:$0xff]  }
  0xc5   :  { %6574 = vmatprep.subr.bf16.mxu1 %v9057_v23  ;;  %6563 = vmatprep.mubr.bf16.mxu0 %v11017_v42  ;;  %v9129_v23 = vld [vmem:[%s13767_s1 + $0xf44] ss:$16 sps:$4 sm:$0xff]  }
  0xc6   :  { %6604 = vmatprep.mubr.bf16.mxu1 %v11021_v43 }
  0xc7   :  { %6534 = vmatpush1.bf16.msra.mxu0 %v9052_v44  ;;  %v9124_v44 = vld [vmem:[%s13767_s1 + $0xd40] ss:$16 sps:$4 sm:$0xff]  }
  0xc8   :  { %6575 = vmatpush1.bf16.msra.mxu1 %v9055_v45  ;;  %6535 = vmatprep.subr.bf16.mxu0 %v9060_v46  ;;  %v9127_v45 = vld [vmem:[%s13767_s1 + $0xf40] ss:$16 sps:$4 sm:$0xff]   ;;  %v9132_v46 = vld [vmem:[%s13767_s1 + $0xd24] ss:$16 sps:$4 sm:$0xff]  }
  0xc9   :  { %6576 = vmatprep.subr.bf16.mxu1 %v9063_v48  ;;  %v9135_v48 = vld [vmem:[%s13767_s1 + $0xf24] ss:$16 sps:$4 sm:$0xff]  }
  0xcb   :  { %6536 = vmatpush1.bf16.msra.mxu0 %v9058_v49  ;;  %v9130_v49 = vld [vmem:[%s13767_s1 + $0xd20] ss:$16 sps:$4 sm:$0xff]  }
  0xcc   :  { %6577 = vmatpush1.bf16.msra.mxu1 %v9061_v50  ;;  %6537 = vmatprep.subr.bf16.mxu0 %v9066_v52  ;;  %v9133_v50 = vld [vmem:[%s13767_s1 + $0xf20] ss:$16 sps:$4 sm:$0xff]   ;;  %v9138_v52 = vld [vmem:[%s13767_s1 + $0xd04] ss:$16 sps:$4 sm:$0xff]  }
  0xcd   :  { %6578 = vmatprep.subr.bf16.mxu1 %v9069_v53  ;;  %v9141_v53 = vld [vmem:[%s13767_s1 + $0xf04] ss:$16 sps:$4 sm:$0xff]  }
  0xcf   :  { %6538 = vmatpush1.bf16.msra.mxu0 %v9064_v54  ;;  %v9136_v54 = vld [vmem:[%s13767_s1 + $0xd00] ss:$16 sps:$4 sm:$0xff]  }
  0xd0   :  { %6579 = vmatpush1.bf16.msra.mxu1 %v9067_v55  ;;  %6539 = vmatprep.subr.bf16.mxu0 %v9072_v56  ;;  %v9139_v55 = vld [vmem:[%s13767_s1 + $0xf00] ss:$16 sps:$4 sm:$0xff]   ;;  %v9148_v56 = vld [vmem:[%s13767_s1 + $0x10e4] ss:$16 sps:$4 sm:$0xff]  }
  0xd1   :  { %6580 = vmatprep.subr.bf16.mxu1 %v9075_v57  ;;  %v9151_v57 = vld [vmem:[%s13767_s1 + $0x12e4] ss:$16 sps:$4 sm:$0xff]  }
  0xd3   :  { %6540 = vmatpush1.bf16.msra.mxu0 %v9070_v58  ;;  %v11210_v58 = vld [vmem:[%s13768_s0 + $0x40] sm:$0xff] }
  0xd4   :  { %6581 = vmatpush1.bf16.msra.mxu1 %v9073_v59  ;;  %6541 = vmatprep.subr.bf16.mxu0 %v9078_v60  ;;  %v11214_v59 = vcombine.low %v11002_v40, %v11002_v40  ;;  %v11218_v60 = vcombine.low %v11007_v41, %v11007_v41  ;;  %v9149_v40 = vld [vmem:[%s13767_s1 + $0x12e0] ss:$16 sps:$4 sm:$0xff]   ;;  %v9154_v41 = vld [vmem:[%s13767_s1 + $0x10c4] ss:$16 sps:$4 sm:$0xff]  }
  0xd5   :  { %6582 = vmatprep.subr.bf16.mxu1 %v9081_v61  ;;  %v11223_v61 = vld [vmem:[%s13768_s0 + $0x48] sm:$0xff] }
  0xd7   :  { %6542 = vmatpush1.bf16.msra.mxu0 %v9076_v62  ;;  %v9146_v62 = vld [vmem:[%s13767_s1 + $0x10e0] ss:$16 sps:$4 sm:$0xff]  }
  0xd8   :  { %6583 = vmatpush1.bf16.msra.mxu1 %v9079_v63  ;;  %6543 = vmatprep.subr.bf16.mxu0 %v9084_v0  ;;  %v9157_v63 = vld [vmem:[%s13767_s1 + $0x12c4] ss:$16 sps:$4 sm:$0xff]   ;;  %v11239_v0 = vcombine.high %v11210_v58, %v11210_v58 }
  0xd9   :  { %6584 = vmatprep.subr.bf16.mxu1 %v9087_v1  ;;  %v11243_v1 = vcombine.high %v11223_v61, %v11223_v61 }
  0xdb   :  { %6544 = vmatpush1.bf16.msra.mxu0 %v9082_v2 }
  0xdc   :  { %6585 = vmatpush1.bf16.msra.mxu1 %v9085_v3  ;;  %6545 = vmatprep.subr.bf16.mxu0 %v9090_v4  ;;  %v9152_v4 = vld [vmem:[%s13767_s1 + $0x10c0] ss:$16 sps:$4 sm:$0xff]  }
  0xdd   :  { %6586 = vmatprep.subr.bf16.mxu1 %v9093_v5  ;;  %v9155_v5 = vld [vmem:[%s13767_s1 + $0x12c0] ss:$16 sps:$4 sm:$0xff]  }
  0xdf   :  { %6546 = vmatpush1.bf16.msra.mxu0 %v9088_v8 }
  0xe0   :  { %6587 = vmatpush1.bf16.msra.mxu1 %v9091_v9  ;;  %6547 = vmatprep.subr.bf16.mxu0 %v9096_v10  ;;  %v9160_v9 = vld [vmem:[%s13767_s1 + $0x10a4] ss:$16 sps:$4 sm:$0xff]  }
  0xe1   :  { %6588 = vmatprep.subr.bf16.mxu1 %v9099_v11 }
  0xe3   :  { %6548 = vmatpush2.bf16.msra.mxu0 %v9094_v12  ;;  %v9163_v12 = vld [vmem:[%s13767_s1 + $0x12a4] ss:$16 sps:$4 sm:$0xff]  }
  0xe4   :  { %6589 = vmatpush2.bf16.msra.mxu1 %v9097_v13  ;;  %6549 = vmatprep.subr.bf16.mxu0 %v9102_v14 }
  0xe5   :  { %6590 = vmatprep.subr.bf16.mxu1 %v9105_v15 }
  0xe7   :  { %6550 = vmatpush2.bf16.msra.mxu0 %v9100_v18  ;;  %v9158_v18 = vld [vmem:[%s13767_s1 + $0x10a0] ss:$16 sps:$4 sm:$0xff]  }
  0xe8   :  { %6591 = vmatpush2.bf16.msra.mxu1 %v9103_v19  ;;  %6551 = vmatprep.subr.bf16.mxu0 %v9108_v20  ;;  %v9161_v19 = vld [vmem:[%s13767_s1 + $0x12a0] ss:$16 sps:$4 sm:$0xff]   ;;  %v9166_v20 = vld [vmem:[%s13767_s1 + $0x1084] ss:$16 sps:$4 sm:$0xff]  }
  0xe9   :  { %6592 = vmatprep.subr.bf16.mxu1 %v9111_v21 }
  0xeb   :  { %6552 = vmatpush2.bf16.msra.mxu0 %v9106_v26 }
  0xec   :  { %6593 = vmatpush2.bf16.msra.mxu1 %v9109_v27  ;;  %6553 = vmatprep.subr.bf16.mxu0 %v9114_v28  ;;  %v9169_v27 = vld [vmem:[%s13767_s1 + $0x1284] ss:$16 sps:$4 sm:$0xff]   ;;  %v9164_v28 = vld [vmem:[%s13767_s1 + $0x1080] ss:$16 sps:$4 sm:$0xff]  }
  0xed   :  { %6594 = vmatprep.subr.bf16.mxu1 %v9117_v29  ;;  %v9167_v29 = vld [vmem:[%s13767_s1 + $0x1280] ss:$16 sps:$4 sm:$0xff]  }
  0xef   :  { %6554 = vmatpush2.bf16.msra.mxu0 %v9112_v30  ;;  %v9172_v30 = vld [vmem:[%s13767_s1 + $0x1064] ss:$16 sps:$4 sm:$0xff]  }
  0xf0   :  { %6595 = vmatpush2.bf16.msra.mxu1 %v9115_v31  ;;  %6555 = vmatprep.subr.bf16.mxu0 %v9120_v32  ;;  %v9175_v31 = vld [vmem:[%s13767_s1 + $0x1264] ss:$16 sps:$4 sm:$0xff]   ;;  %v9170_v32 = vld [vmem:[%s13767_s1 + $0x1060] ss:$16 sps:$4 sm:$0xff]  }
  0xf1   :  { %6596 = vmatprep.subr.bf16.mxu1 %v9123_v33  ;;  %v9173_v33 = vld [vmem:[%s13767_s1 + $0x1260] ss:$16 sps:$4 sm:$0xff]  }
  0xf3   :  { %6556 = vmatpush2.bf16.msra.mxu0 %v9118_v34  ;;  %v9178_v34 = vld [vmem:[%s13767_s1 + $0x1044] ss:$16 sps:$4 sm:$0xff]  }
  0xf4   :  { %6597 = vmatpush2.bf16.msra.mxu1 %v9121_v35  ;;  %6557 = vmatprep.subr.bf16.mxu0 %v9126_v22  ;;  %v9181_v35 = vld [vmem:[%s13767_s1 + $0x1244] ss:$16 sps:$4 sm:$0xff]   ;;  %v9176_v22 = vld [vmem:[%s13767_s1 + $0x1040] ss:$16 sps:$4 sm:$0xff]  }
  0xf5   :  { %6598 = vmatprep.subr.bf16.mxu1 %v9129_v23  ;;  %v9179_v23 = vld [vmem:[%s13767_s1 + $0x1240] ss:$16 sps:$4 sm:$0xff]  }
  0xf7   :  { %6558 = vmatpush2.bf16.msra.mxu0 %v9124_v44  ;;  %v9184_v44 = vld [vmem:[%s13767_s1 + $0x1024] ss:$16 sps:$4 sm:$0xff]  }
  0xf8   :  { %6599 = vmatpush2.bf16.msra.mxu1 %v9127_v45  ;;  %6559 = vmatprep.subr.bf16.mxu0 %v9132_v46  ;;  %v9187_v45 = vld [vmem:[%s13767_s1 + $0x1224] ss:$16 sps:$4 sm:$0xff]   ;;  %v9182_v46 = vld [vmem:[%s13767_s1 + $0x1020] ss:$16 sps:$4 sm:$0xff]  }
  0xf9   :  { %6600 = vmatprep.subr.bf16.mxu1 %v9135_v48  ;;  %v9185_v48 = vld [vmem:[%s13767_s1 + $0x1220] ss:$16 sps:$4 sm:$0xff]  }
  0xfb   :  { %6560 = vmatpush2.bf16.msra.mxu0 %v9130_v49  ;;  %v9190_v49 = vld [vmem:[%s13767_s1 + $0x1004] ss:$16 sps:$4 sm:$0xff]  }
  0xfc   :  { %6601 = vmatpush2.bf16.msra.mxu1 %v9133_v50  ;;  %6561 = vmatprep.subr.bf16.mxu0 %v9138_v52  ;;  %v9193_v50 = vld [vmem:[%s13767_s1 + $0x1204] ss:$16 sps:$4 sm:$0xff]   ;;  %v9188_v52 = vld [vmem:[%s13767_s1 + $0x1000] ss:$16 sps:$4 sm:$0xff]  }
  0xfd   :  { %6602 = vmatprep.subr.bf16.mxu1 %v9141_v53  ;;  %v9191_v53 = vld [vmem:[%s13767_s1 + $0x1200] ss:$16 sps:$4 sm:$0xff]  }
  0xff   :  { %6562 = vmatpush2.bf16.msra.mxu0 %v9136_v54  ;;  %v9196_v54 = vld [vmem:[%s13767_s1 + $0x11e4] ss:$16 sps:$4 sm:$0xff]  }
 0x100   :  { %6603 = vmatpush2.bf16.msra.mxu1 %v9139_v55  ;;  %6613 = vmatprep.subr.bf16.mxu0 %v9148_v56  ;;  %v9199_v55 = vld [vmem:[%s13767_s1 + $0x13e4] ss:$16 sps:$4 sm:$0xff]   ;;  %v9194_v56 = vld [vmem:[%s13767_s1 + $0x11e0] ss:$16 sps:$4 sm:$0xff]  }
 0x101   :  { %6654 = vmatprep.subr.bf16.mxu1 %v9151_v57  ;;  %v9197_v57 = vld [vmem:[%s13767_s1 + $0x13e0] ss:$16 sps:$4 sm:$0xff]  }
 0x102   :  { %v6319_v2 = vpop.f32.mrf.mxu0  ;;  %6564 = vmatmul.mubr.bf16.vlgmr.msra.gmra.mxu0 %v11214_v59 }
 0x103   :  { %v6360_v3 = vpop.f32.mrf.mxu1  ;;  %6605 = vmatmul.mubr.bf16.vlgmr.msra.gmra.mxu1 %v11218_v60  ;;  %6614 = vmatpush1.bf16.msra.mxu0 %v9146_v62  ;;  %v9202_v62 = vld [vmem:[%s13767_s1 + $0x11c4] ss:$16 sps:$4 sm:$0xff]  }
 0x104   :  { %v11253_v8 = vadd.f32 %v6360_v3, %v6319_v2  ;;  %6655 = vmatpush1.bf16.msra.mxu1 %v9149_v40  ;;  %v6321_v10 = vpop.f32.mrf.mxu0  ;;  %6615 = vmatprep.subr.bf16.mxu0 %v9154_v41  ;;  %v9205_v40 = vld [vmem:[%s13767_s1 + $0x13c4] ss:$16 sps:$4 sm:$0xff]   ;;  %v9200_v41 = vld [vmem:[%s13767_s1 + $0x11c0] ss:$16 sps:$4 sm:$0xff]  }
 0x105   :  { %v6362_v11 = vpop.f32.mrf.mxu1  ;;  %6656 = vmatprep.subr.bf16.mxu1 %v9157_v63  ;;  %6645 = vmatprep.mubr.bf16.mxu0 %v11239_v0  ;;  %v9203_v63 = vld [vmem:[%s13767_s1 + $0x13c0] ss:$16 sps:$4 sm:$0xff]   ;;  %v9208_v2 = vld [vmem:[%s13767_s1 + $0x11a4] ss:$16 sps:$4 sm:$0xff]  }
 0x106   :  { %v11261_v13 = vadd.f32 %v6362_v11, %v6321_v10  ;;  %6686 = vmatprep.mubr.bf16.mxu1 %v11243_v1  ;;  %v6323_v14 = vpop.f32.mrf.mxu0  ;;  %v9211_v3 = vld [vmem:[%s13767_s1 + $0x13a4] ss:$16 sps:$4 sm:$0xff]   ;;  %v9212_v11 = vld [vmem:[%s13767_s1 + $0x1180] ss:$16 sps:$4 sm:$0xff]  }
 0x107   :  { %v6364_v15 = vpop.f32.mrf.mxu1  ;;  %6616 = vmatpush1.bf16.msra.mxu0 %v9152_v4  ;;  %v9206_v4 = vld [vmem:[%s13767_s1 + $0x11a0] ss:$16 sps:$4 sm:$0xff]   ;;  %v9217_v10 = vld [vmem:[%s13767_s1 + $0x1384] ss:$16 sps:$4 sm:$0xff]  }
 0x108   :  { %6657 = vmatpush1.bf16.msra.mxu1 %v9155_v5  ;;  %v6324_v21 = vpop.f32.mrf.mxu0  ;;  %6617 = vmatprep.subr.bf16.mxu0 %v9160_v9  ;;  %v9209_v5 = vld [vmem:[%s13767_s1 + $0x13a0] ss:$16 sps:$4 sm:$0xff]   ;;  %v9214_v9 = vld [vmem:[%s13767_s1 + $0x1184] ss:$16 sps:$4 sm:$0xff]  }
 0x109   :  { %v6365_v26 = vpop.f32.mrf.mxu1  ;;  %6658 = vmatprep.subr.bf16.mxu1 %v9163_v12  ;;  %v9215_v12 = vld [vmem:[%s13767_s1 + $0x1380] ss:$16 sps:$4 sm:$0xff]   ;;  %v9220_v14 = vld [vmem:[%s13767_s1 + $0x1164] ss:$16 sps:$4 sm:$0xff]  }
 0x10a   :  { %v9223_v15 = vld [vmem:[%s13767_s1 + $0x1364] ss:$16 sps:$4 sm:$0xff]   ;;  %v9224_v26 = vld [vmem:[%s13767_s1 + $0x1140] ss:$16 sps:$4 sm:$0xff]  }
 0x10b   :  { %6618 = vmatpush1.bf16.msra.mxu0 %v9158_v18  ;;  %v9218_v18 = vld [vmem:[%s13767_s1 + $0x1160] ss:$16 sps:$4 sm:$0xff]   ;;  %v9229_v21 = vld [vmem:[%s13767_s1 + $0x1344] ss:$16 sps:$4 sm:$0xff]  }
 0x10c   :  { %6659 = vmatpush1.bf16.msra.mxu1 %v9161_v19  ;;  %6619 = vmatprep.subr.bf16.mxu0 %v9166_v20  ;;  %v9221_v19 = vld [vmem:[%s13767_s1 + $0x1360] ss:$16 sps:$4 sm:$0xff]   ;;  %v9226_v20 = vld [vmem:[%s13767_s1 + $0x1144] ss:$16 sps:$4 sm:$0xff]  }
 0x10d   :  { %6660 = vmatprep.subr.bf16.mxu1 %v9169_v27  ;;  %v9227_v27 = vld [vmem:[%s13767_s1 + $0x1340] ss:$16 sps:$4 sm:$0xff]  }
 0x10f   :  { %6620 = vmatpush1.bf16.msra.mxu0 %v9164_v28  ;;  %v9232_v28 = vld [vmem:[%s13767_s1 + $0x1124] ss:$16 sps:$4 sm:$0xff]  }
 0x110   :  { %6661 = vmatpush1.bf16.msra.mxu1 %v9167_v29  ;;  %6621 = vmatprep.subr.bf16.mxu0 %v9172_v30  ;;  %v9235_v29 = vld [vmem:[%s13767_s1 + $0x1324] ss:$16 sps:$4 sm:$0xff]   ;;  %v9230_v30 = vld [vmem:[%s13767_s1 + $0x1120] ss:$16 sps:$4 sm:$0xff]  }
 0x111   :  { %6662 = vmatprep.subr.bf16.mxu1 %v9175_v31  ;;  %v9233_v31 = vld [vmem:[%s13767_s1 + $0x1320] ss:$16 sps:$4 sm:$0xff]  }
 0x113   :  { %6622 = vmatpush1.bf16.msra.mxu0 %v9170_v32  ;;  %v9238_v32 = vld [vmem:[%s13767_s1 + $0x1104] ss:$16 sps:$4 sm:$0xff]  }
 0x114   :  { %6663 = vmatpush1.bf16.msra.mxu1 %v9173_v33  ;;  %6623 = vmatprep.subr.bf16.mxu0 %v9178_v34  ;;  %v9241_v33 = vld [vmem:[%s13767_s1 + $0x1304] ss:$16 sps:$4 sm:$0xff]   ;;  %v9236_v34 = vld [vmem:[%s13767_s1 + $0x1100] ss:$16 sps:$4 sm:$0xff]  }
 0x115   :  { %6664 = vmatprep.subr.bf16.mxu1 %v9181_v35  ;;  %v9239_v35 = vld [vmem:[%s13767_s1 + $0x1300] ss:$16 sps:$4 sm:$0xff]  }
 0x117   :  { %6624 = vmatpush1.bf16.msra.mxu0 %v9176_v22  ;;  %v9248_v22 = vld [vmem:[%s13767_s1 + $0x14e4] ss:$16 sps:$4 sm:$0xff]  }
 0x118   :  { %6665 = vmatpush1.bf16.msra.mxu1 %v9179_v23  ;;  %6625 = vmatprep.subr.bf16.mxu0 %v9184_v44  ;;  %v9251_v23 = vld [vmem:[%s13767_s1 + $0x16e4] ss:$16 sps:$4 sm:$0xff]   ;;  %v9246_v44 = vld [vmem:[%s13767_s1 + $0x14e0] ss:$16 sps:$4 sm:$0xff]  }
 0x119   :  { %6666 = vmatprep.subr.bf16.mxu1 %v9187_v45  ;;  %v9249_v45 = vld [vmem:[%s13767_s1 + $0x16e0] ss:$16 sps:$4 sm:$0xff]  }
 0x11b   :  { %6626 = vmatpush1.bf16.msra.mxu0 %v9182_v46  ;;  %v11441_v46 = vcombine.low %v11210_v58, %v11210_v58  ;;  %v9254_v58 = vld [vmem:[%s13767_s1 + $0x14c4] ss:$16 sps:$4 sm:$0xff]  }
 0x11c   :  { %6667 = vmatpush1.bf16.msra.mxu1 %v9185_v48  ;;  %6627 = vmatprep.subr.bf16.mxu0 %v9190_v49  ;;  %v11445_v48 = vcombine.low %v11223_v61, %v11223_v61  ;;  %v11450_v49 = vld [vmem:[%s13768_s0 + $0x50] sm:$0xff] }
 0x11d   :  { %6668 = vmatprep.subr.bf16.mxu1 %v9193_v50  ;;  %v11455_v50 = vld [vmem:[%s13768_s0 + $0x58] sm:$0xff]  ;;  %v9257_v61 = vld [vmem:[%s13767_s1 + $0x16c4] ss:$16 sps:$4 sm:$0xff]  }
 0x11f   :  { %6628 = vmatpush1.bf16.msra.mxu0 %v9188_v52  ;;  %v9252_v52 = vld [vmem:[%s13767_s1 + $0x14c0] ss:$16 sps:$4 sm:$0xff]  }
 0x120   :  { %6669 = vmatpush1.bf16.msra.mxu1 %v9191_v53  ;;  %6629 = vmatprep.subr.bf16.mxu0 %v9196_v54  ;;  %v9255_v53 = vld [vmem:[%s13767_s1 + $0x16c0] ss:$16 sps:$4 sm:$0xff]   ;;  %v11471_v54 = vcombine.high %v11450_v49, %v11450_v49 }
 0x121   :  { %6670 = vmatprep.subr.bf16.mxu1 %v9199_v55  ;;  %v11475_v55 = vcombine.high %v11455_v50, %v11455_v50 }
 0x123   :  { %6630 = vmatpush2.bf16.msra.mxu0 %v9194_v56 }
 0x124   :  { %6671 = vmatpush2.bf16.msra.mxu1 %v9197_v57  ;;  %6631 = vmatprep.subr.bf16.mxu0 %v9202_v62 }
 0x125   :  { %6672 = vmatprep.subr.bf16.mxu1 %v9205_v40 }
 0x127   :  { %6632 = vmatpush2.bf16.msra.mxu0 %v9200_v41 }
 0x128   :  { %6673 = vmatpush2.bf16.msra.mxu1 %v9203_v63  ;;  %6633 = vmatprep.subr.bf16.mxu0 %v9208_v2  ;;  %v9260_v63 = vld [vmem:[%s13767_s1 + $0x14a4] ss:$16 sps:$4 sm:$0xff]  }
 0x129   :  { %6674 = vmatprep.subr.bf16.mxu1 %v9211_v3  ;;  %v9263_v2 = vld [vmem:[%s13767_s1 + $0x16a4] ss:$16 sps:$4 sm:$0xff]  }
 0x12b   :  { %6634 = vmatpush2.bf16.msra.mxu0 %v9206_v4 }
 0x12c   :  { %6675 = vmatpush2.bf16.msra.mxu1 %v9209_v5  ;;  %6635 = vmatprep.subr.bf16.mxu0 %v9214_v9  ;;  %v9261_v5 = vld [vmem:[%s13767_s1 + $0x16a0] ss:$16 sps:$4 sm:$0xff]  }
 0x12d   :  { %6676 = vmatprep.subr.bf16.mxu1 %v9217_v10 }
 0x12f   :  { %6636 = vmatpush2.bf16.msra.mxu0 %v9212_v11 }
 0x130   :  { %6677 = vmatpush2.bf16.msra.mxu1 %v9215_v12  ;;  %6637 = vmatprep.subr.bf16.mxu0 %v9220_v14  ;;  %v9266_v14 = vld [vmem:[%s13767_s1 + $0x1484] ss:$16 sps:$4 sm:$0xff]  }
 0x131   :  { %6678 = vmatprep.subr.bf16.mxu1 %v9223_v15  ;;  %v9269_v15 = vld [vmem:[%s13767_s1 + $0x1684] ss:$16 sps:$4 sm:$0xff]  }
 0x133   :  { %6638 = vmatpush2.bf16.msra.mxu0 %v9218_v18  ;;  %v9264_v18 = vld [vmem:[%s13767_s1 + $0x1480] ss:$16 sps:$4 sm:$0xff]  }
 0x134   :  { %6679 = vmatpush2.bf16.msra.mxu1 %v9221_v19  ;;  %6639 = vmatprep.subr.bf16.mxu0 %v9226_v20  ;;  %v9267_v19 = vld [vmem:[%s13767_s1 + $0x1680] ss:$16 sps:$4 sm:$0xff]   ;;  %v9272_v20 = vld [vmem:[%s13767_s1 + $0x1464] ss:$16 sps:$4 sm:$0xff]  }
 0x135   :  { %6680 = vmatprep.subr.bf16.mxu1 %v9229_v21  ;;  %v9275_v21 = vld [vmem:[%s13767_s1 + $0x1664] ss:$16 sps:$4 sm:$0xff]  }
 0x137   :  { %6640 = vmatpush2.bf16.msra.mxu0 %v9224_v26  ;;  %v9270_v26 = vld [vmem:[%s13767_s1 + $0x1460] ss:$16 sps:$4 sm:$0xff]  }
 0x138   :  { %6681 = vmatpush2.bf16.msra.mxu1 %v9227_v27  ;;  %6641 = vmatprep.subr.bf16.mxu0 %v9232_v28  ;;  %v9273_v27 = vld [vmem:[%s13767_s1 + $0x1660] ss:$16 sps:$4 sm:$0xff]   ;;  %v9278_v28 = vld [vmem:[%s13767_s1 + $0x1444] ss:$16 sps:$4 sm:$0xff]  }
 0x139   :  { %6682 = vmatprep.subr.bf16.mxu1 %v9235_v29  ;;  %v9281_v29 = vld [vmem:[%s13767_s1 + $0x1644] ss:$16 sps:$4 sm:$0xff]  }
 0x13b   :  { %6642 = vmatpush2.bf16.msra.mxu0 %v9230_v30  ;;  %v9276_v30 = vld [vmem:[%s13767_s1 + $0x1440] ss:$16 sps:$4 sm:$0xff]  }
 0x13c   :  { %6683 = vmatpush2.bf16.msra.mxu1 %v9233_v31  ;;  %6643 = vmatprep.subr.bf16.mxu0 %v9238_v32  ;;  %v9279_v31 = vld [vmem:[%s13767_s1 + $0x1640] ss:$16 sps:$4 sm:$0xff]   ;;  %v9284_v32 = vld [vmem:[%s13767_s1 + $0x1424] ss:$16 sps:$4 sm:$0xff]  }
 0x13d   :  { %6684 = vmatprep.subr.bf16.mxu1 %v9241_v33  ;;  %v9287_v33 = vld [vmem:[%s13767_s1 + $0x1624] ss:$16 sps:$4 sm:$0xff]  }
 0x13f   :  { %6644 = vmatpush2.bf16.msra.mxu0 %v9236_v34  ;;  %v9282_v34 = vld [vmem:[%s13767_s1 + $0x1420] ss:$16 sps:$4 sm:$0xff]  }
 0x140   :  { %6685 = vmatpush2.bf16.msra.mxu1 %v9239_v35  ;;  %6695 = vmatprep.subr.bf16.mxu0 %v9248_v22  ;;  %v9285_v35 = vld [vmem:[%s13767_s1 + $0x1620] ss:$16 sps:$4 sm:$0xff]   ;;  %v9290_v22 = vld [vmem:[%s13767_s1 + $0x1404] ss:$16 sps:$4 sm:$0xff]  }
 0x141   :  { %6736 = vmatprep.subr.bf16.mxu1 %v9251_v23  ;;  %v9293_v23 = vld [vmem:[%s13767_s1 + $0x1604] ss:$16 sps:$4 sm:$0xff]  }
 0x142   :  { %v6401_v56 = vpop.f32.mrf.mxu0  ;;  %6646 = vmatmul.mubr.bf16.vlgmr.msra.gmra.mxu0 %v11441_v46 }
 0x143   :  { %v6442_v57 = vpop.f32.mrf.mxu1  ;;  %6687 = vmatmul.mubr.bf16.vlgmr.msra.gmra.mxu1 %v11445_v48  ;;  %v6402_v62 = vadd.f32 %v6401_v56, %v11253_v8  ;;  %6696 = vmatpush1.bf16.msra.mxu0 %v9246_v44  ;;  %v9258_v8 = vld [vmem:[%s13767_s1 + $0x14a0] ss:$16 sps:$4 sm:$0xff]   ;;  %v9302_v56 = vld [vmem:[%s13767_s1 + $0x15c4] ss:$16 sps:$4 sm:$0xff]  }
 0x144   :  { %6737 = vmatpush1.bf16.msra.mxu1 %v9249_v45  ;;  %v6403_v40 = vpop.f32.mrf.mxu0  ;;  %6697 = vmatprep.subr.bf16.mxu0 %v9254_v58  ;;  %v9288_v44 = vld [vmem:[%s13767_s1 + $0x1400] ss:$16 sps:$4 sm:$0xff]   ;;  %v9296_v58 = vld [vmem:[%s13767_s1 + $0x15e4] ss:$16 sps:$4 sm:$0xff]  }
 0x145   :  { %v6444_v41 = vpop.f32.mrf.mxu1  ;;  %6738 = vmatprep.subr.bf16.mxu1 %v9257_v61  ;;  %v11486_v3 = vadd.f32 %v6442_v57, %v6402_v62  ;;  %v6404_v4 = vadd.f32 %v6403_v40, %v11261_v13  ;;  %6727 = vmatprep.mubr.bf16.mxu0 %v11471_v54  ;;  %v9291_v45 = vld [vmem:[%s13767_s1 + $0x1600] ss:$16 sps:$4 sm:$0xff]   ;;  %v9299_v61 = vld [vmem:[%s13767_s1 + $0x17e4] ss:$16 sps:$4 sm:$0xff]  }
 0x146   :  { %6768 = vmatprep.mubr.bf16.mxu1 %v11475_v55  ;;  %v6405_v9 = vpop.f32.mrf.mxu0  ;;  %v9305_v57 = vld [vmem:[%s13767_s1 + $0x17c4] ss:$16 sps:$4 sm:$0xff]   ;;  %v9300_v62 = vld [vmem:[%s13767_s1 + $0x15c0] ss:$16 sps:$4 sm:$0xff]  }
 0x147   :  { %v6446_v10 = vpop.f32.mrf.mxu1  ;;  %v11497_v11 = vadd.f32 %v6444_v41, %v6404_v4  ;;  %6698 = vmatpush1.bf16.msra.mxu0 %v9252_v52  ;;  %v9294_v52 = vld [vmem:[%s13767_s1 + $0x15e0] ss:$16 sps:$4 sm:$0xff]   ;;  %v9308_v41 = vld [vmem:[%s13767_s1 + $0x15a4] ss:$16 sps:$4 sm:$0xff]  }
 0x148   :  { %6739 = vmatpush1.bf16.msra.mxu1 %v9255_v53  ;;  %v6406_v12 = vpop.f32.mrf.mxu0  ;;  %6699 = vmatprep.subr.bf16.mxu0 %v9260_v63  ;;  %v9297_v53 = vld [vmem:[%s13767_s1 + $0x17e0] ss:$16 sps:$4 sm:$0xff]   ;;  %v9311_v63 = vld [vmem:[%s13767_s1 + $0x17a4] ss:$16 sps:$4 sm:$0xff]  }
 0x149   :  { %v6447_v13 = vpop.f32.mrf.mxu1  ;;  %6740 = vmatprep.subr.bf16.mxu1 %v9263_v2  ;;  %v9303_v40 = vld [vmem:[%s13767_s1 + $0x17c0] ss:$16 sps:$4 sm:$0xff]   ;;  %v9320_v12 = vld [vmem:[%s13767_s1 + $0x1564] ss:$16 sps:$4 sm:$0xff]  }
 0x14a   :  { %v9306_v2 = vld [vmem:[%s13767_s1 + $0x15a0] ss:$16 sps:$4 sm:$0xff]   ;;  %v9323_v13 = vld [vmem:[%s13767_s1 + $0x1764] ss:$16 sps:$4 sm:$0xff]  }
 0x14b   :  { %6700 = vmatpush1.bf16.msra.mxu0 %v9258_v8  ;;  %v9309_v4 = vld [vmem:[%s13767_s1 + $0x17a0] ss:$16 sps:$4 sm:$0xff]   ;;  %v9314_v8 = vld [vmem:[%s13767_s1 + $0x1584] ss:$16 sps:$4 sm:$0xff]  }
 0x14c   :  { %6741 = vmatpush1.bf16.msra.mxu1 %v9261_v5  ;;  %6701 = vmatprep.subr.bf16.mxu0 %v9266_v14  ;;  %v9317_v5 = vld [vmem:[%s13767_s1 + $0x1784] ss:$16 sps:$4 sm:$0xff]   ;;  %v9312_v9 = vld [vmem:[%s13767_s1 + $0x1580] ss:$16 sps:$4 sm:$0xff]  }
 0x14d   :  { %6742 = vmatprep.subr.bf16.mxu1 %v9269_v15  ;;  %v9315_v10 = vld [vmem:[%s13767_s1 + $0x1780] ss:$16 sps:$4 sm:$0xff]  }
 0x14e   :  { %v9318_v14 = vld [vmem:[%s13767_s1 + $0x1560] ss:$16 sps:$4 sm:$0xff]  }
 0x14f   :  { %6702 = vmatpush1.bf16.msra.mxu0 %v9264_v18  ;;  %v9321_v15 = vld [vmem:[%s13767_s1 + $0x1760] ss:$16 sps:$4 sm:$0xff]   ;;  %v9326_v18 = vld [vmem:[%s13767_s1 + $0x1544] ss:$16 sps:$4 sm:$0xff]  }
 0x150   :  { %6743 = vmatpush1.bf16.msra.mxu1 %v9267_v19  ;;  %6703 = vmatprep.subr.bf16.mxu0 %v9272_v20  ;;  %v9329_v19 = vld [vmem:[%s13767_s1 + $0x1744] ss:$16 sps:$4 sm:$0xff]   ;;  %v9324_v20 = vld [vmem:[%s13767_s1 + $0x1540] ss:$16 sps:$4 sm:$0xff]  }
 0x151   :  { %6744 = vmatprep.subr.bf16.mxu1 %v9275_v21  ;;  %v9327_v21 = vld [vmem:[%s13767_s1 + $0x1740] ss:$16 sps:$4 sm:$0xff]  }
 0x153   :  { %6704 = vmatpush1.bf16.msra.mxu0 %v9270_v26  ;;  %v9332_v26 = vld [vmem:[%s13767_s1 + $0x1524] ss:$16 sps:$4 sm:$0xff]  }
 0x154   :  { %6745 = vmatpush1.bf16.msra.mxu1 %v9273_v27  ;;  %6705 = vmatprep.subr.bf16.mxu0 %v9278_v28  ;;  %v9335_v27 = vld [vmem:[%s13767_s1 + $0x1724] ss:$16 sps:$4 sm:$0xff]   ;;  %v9330_v28 = vld [vmem:[%s13767_s1 + $0x1520] ss:$16 sps:$4 sm:$0xff]  }
 0x155   :  { %6746 = vmatprep.subr.bf16.mxu1 %v9281_v29  ;;  %v9333_v29 = vld [vmem:[%s13767_s1 + $0x1720] ss:$16 sps:$4 sm:$0xff]  }
 0x157   :  { %6706 = vmatpush1.bf16.msra.mxu0 %v9276_v30  ;;  %v9338_v30 = vld [vmem:[%s13767_s1 + $0x1504] ss:$16 sps:$4 sm:$0xff]  }
 0x158   :  { %6747 = vmatpush1.bf16.msra.mxu1 %v9279_v31  ;;  %6707 = vmatprep.subr.bf16.mxu0 %v9284_v32  ;;  %v9341_v31 = vld [vmem:[%s13767_s1 + $0x1704] ss:$16 sps:$4 sm:$0xff]   ;;  %v9336_v32 = vld [vmem:[%s13767_s1 + $0x1500] ss:$16 sps:$4 sm:$0xff]  }
 0x159   :  { %6748 = vmatprep.subr.bf16.mxu1 %v9287_v33  ;;  %v9339_v33 = vld [vmem:[%s13767_s1 + $0x1700] ss:$16 sps:$4 sm:$0xff]  }
 0x15b   :  { %6708 = vmatpush1.bf16.msra.mxu0 %v9282_v34  ;;  %v9348_v34 = vld [vmem:[%s13767_s1 + $0x18e4] ss:$16 sps:$4 sm:$0xff]  }
 0x15c   :  { %6749 = vmatpush1.bf16.msra.mxu1 %v9285_v35  ;;  %6709 = vmatprep.subr.bf16.mxu0 %v9290_v22  ;;  %v9351_v35 = vld [vmem:[%s13767_s1 + $0x1ae4] ss:$16 sps:$4 sm:$0xff]   ;;  %v9346_v22 = vld [vmem:[%s13767_s1 + $0x18e0] ss:$16 sps:$4 sm:$0xff]  }
 0x15d   :  { %6750 = vmatprep.subr.bf16.mxu1 %v9293_v23  ;;  %v9349_v23 = vld [vmem:[%s13767_s1 + $0x1ae0] ss:$16 sps:$4 sm:$0xff]  }
 0x15f   :  { %6710 = vmatpush1.bf16.msra.mxu0 %v9288_v44  ;;  %v11669_v44 = vcombine.low %v11450_v49, %v11450_v49  ;;  %v9354_v49 = vld [vmem:[%s13767_s1 + $0x18c4] ss:$16 sps:$4 sm:$0xff]  }
 0x160   :  { %6751 = vmatpush1.bf16.msra.mxu1 %v9291_v45  ;;  %6711 = vmatprep.subr.bf16.mxu0 %v9296_v58  ;;  %v11673_v45 = vcombine.low %v11455_v50, %v11455_v50  ;;  %v11678_v58 = vld [vmem:[%s13768_s0 + $0x60] sm:$0xff] }
 0x161   :  { %6752 = vmatprep.subr.bf16.mxu1 %v9299_v61  ;;  %v11683_v61 = vld [vmem:[%s13768_s0 + $0x68] sm:$0xff]  ;;  %v9357_v50 = vld [vmem:[%s13767_s1 + $0x1ac4] ss:$16 sps:$4 sm:$0xff]  }
 0x163   :  { %6712 = vmatpush2.bf16.msra.mxu0 %v9294_v52  ;;  %v9352_v52 = vld [vmem:[%s13767_s1 + $0x18c0] ss:$16 sps:$4 sm:$0xff]  }
 0x164   :  { %6753 = vmatpush2.bf16.msra.mxu1 %v9297_v53  ;;  %6713 = vmatprep.subr.bf16.mxu0 %v9302_v56  ;;  %v9355_v53 = vld [vmem:[%s13767_s1 + $0x1ac0] ss:$16 sps:$4 sm:$0xff]   ;;  %v11699_v56 = vcombine.high %v11678_v58, %v11678_v58 }
 0x165   :  { %6754 = vmatprep.subr.bf16.mxu1 %v9305_v57  ;;  %v11703_v57 = vcombine.high %v11683_v61, %v11683_v61 }
 0x167   :  { %6714 = vmatpush2.bf16.msra.mxu0 %v9300_v62 }
 0x168   :  { %6755 = vmatpush2.bf16.msra.mxu1 %v9303_v40  ;;  %6715 = vmatprep.subr.bf16.mxu0 %v9308_v41 }
 0x169   :  { %6756 = vmatprep.subr.bf16.mxu1 %v9311_v63 }
 0x16b   :  { %6716 = vmatpush2.bf16.msra.mxu0 %v9306_v2 }
 0x16c   :  { %6757 = vmatpush2.bf16.msra.mxu1 %v9309_v4  ;;  %6717 = vmatprep.subr.bf16.mxu0 %v9314_v8  ;;  %v9360_v4 = vld [vmem:[%s13767_s1 + $0x18a4] ss:$16 sps:$4 sm:$0xff]  }
 0x16d   :  { %6758 = vmatprep.subr.bf16.mxu1 %v9317_v5  ;;  %v9363_v8 = vld [vmem:[%s13767_s1 + $0x1aa4] ss:$16 sps:$4 sm:$0xff]  }
 0x16f   :  { %6718 = vmatpush2.bf16.msra.mxu0 %v9312_v9 }
 0x170   :  { %6759 = vmatpush2.bf16.msra.mxu1 %v9315_v10  ;;  %6719 = vmatprep.subr.bf16.mxu0 %v9320_v12  ;;  %v9361_v10 = vld [vmem:[%s13767_s1 + $0x1aa0] ss:$16 sps:$4 sm:$0xff]  }
 0x171   :  { %6760 = vmatprep.subr.bf16.mxu1 %v9323_v13 }
 0x173   :  { %6720 = vmatpush2.bf16.msra.mxu0 %v9318_v14 }
 0x174   :  { %6761 = vmatpush2.bf16.msra.mxu1 %v9321_v15  ;;  %6721 = vmatprep.subr.bf16.mxu0 %v9326_v18  ;;  %v9366_v18 = vld [vmem:[%s13767_s1 + $0x1884] ss:$16 sps:$4 sm:$0xff]  }
 0x175   :  { %6762 = vmatprep.subr.bf16.mxu1 %v9329_v19  ;;  %v9369_v19 = vld [vmem:[%s13767_s1 + $0x1a84] ss:$16 sps:$4 sm:$0xff]  }
 0x177   :  { %6722 = vmatpush2.bf16.msra.mxu0 %v9324_v20  ;;  %v9364_v20 = vld [vmem:[%s13767_s1 + $0x1880] ss:$16 sps:$4 sm:$0xff]  }
 0x178   :  { %6763 = vmatpush2.bf16.msra.mxu1 %v9327_v21  ;;  %6723 = vmatprep.subr.bf16.mxu0 %v9332_v26  ;;  %v9367_v21 = vld [vmem:[%s13767_s1 + $0x1a80] ss:$16 sps:$4 sm:$0xff]   ;;  %v9372_v26 = vld [vmem:[%s13767_s1 + $0x1864] ss:$16 sps:$4 sm:$0xff]  }
 0x179   :  { %6764 = vmatprep.subr.bf16.mxu1 %v9335_v27  ;;  %v9375_v27 = vld [vmem:[%s13767_s1 + $0x1a64] ss:$16 sps:$4 sm:$0xff]  }
 0x17b   :  { %6724 = vmatpush2.bf16.msra.mxu0 %v9330_v28  ;;  %v9370_v28 = vld [vmem:[%s13767_s1 + $0x1860] ss:$16 sps:$4 sm:$0xff]  }
 0x17c   :  { %6765 = vmatpush2.bf16.msra.mxu1 %v9333_v29  ;;  %6725 = vmatprep.subr.bf16.mxu0 %v9338_v30  ;;  %v9373_v29 = vld [vmem:[%s13767_s1 + $0x1a60] ss:$16 sps:$4 sm:$0xff]   ;;  %v9378_v30 = vld [vmem:[%s13767_s1 + $0x1844] ss:$16 sps:$4 sm:$0xff]  }
 0x17d   :  { %6766 = vmatprep.subr.bf16.mxu1 %v9341_v31  ;;  %v9381_v31 = vld [vmem:[%s13767_s1 + $0x1a44] ss:$16 sps:$4 sm:$0xff]  }
 0x17f   :  { %6726 = vmatpush2.bf16.msra.mxu0 %v9336_v32  ;;  %v9376_v32 = vld [vmem:[%s13767_s1 + $0x1840] ss:$16 sps:$4 sm:$0xff]  }
 0x180   :  { %6767 = vmatpush2.bf16.msra.mxu1 %v9339_v33  ;;  %6777 = vmatprep.subr.bf16.mxu0 %v9348_v34  ;;  %v9379_v33 = vld [vmem:[%s13767_s1 + $0x1a40] ss:$16 sps:$4 sm:$0xff]   ;;  %v9384_v34 = vld [vmem:[%s13767_s1 + $0x1824] ss:$16 sps:$4 sm:$0xff]  }
 0x181   :  { %6818 = vmatprep.subr.bf16.mxu1 %v9351_v35  ;;  %v9387_v35 = vld [vmem:[%s13767_s1 + $0x1a24] ss:$16 sps:$4 sm:$0xff]  }
 0x182   :  { %v6483_v62 = vpop.f32.mrf.mxu0  ;;  %6728 = vmatmul.mubr.bf16.vlgmr.msra.gmra.mxu0 %v11669_v44 }
 0x183   :  { %v6524_v40 = vpop.f32.mrf.mxu1  ;;  %6769 = vmatmul.mubr.bf16.vlgmr.msra.gmra.mxu1 %v11673_v45  ;;  %v6484_v41 = vadd.f32 %v6483_v62, %v11486_v3  ;;  %6778 = vmatpush1.bf16.msra.mxu0 %v9346_v22  ;;  %v9358_v3 = vld [vmem:[%s13767_s1 + $0x18a0] ss:$16 sps:$4 sm:$0xff]   ;;  %v9396_v62 = vld [vmem:[%s13767_s1 + $0x19e4] ss:$16 sps:$4 sm:$0xff]  }
 0x184   :  { %6819 = vmatpush1.bf16.msra.mxu1 %v9349_v23  ;;  %v6485_v63 = vpop.f32.mrf.mxu0  ;;  %6779 = vmatprep.subr.bf16.mxu0 %v9354_v49  ;;  %v9382_v22 = vld [vmem:[%s13767_s1 + $0x1820] ss:$16 sps:$4 sm:$0xff]   ;;  %v9390_v49 = vld [vmem:[%s13767_s1 + $0x1804] ss:$16 sps:$4 sm:$0xff]  }
 0x185   :  { %v6526_v2 = vpop.f32.mrf.mxu1  ;;  %6820 = vmatprep.subr.bf16.mxu1 %v9357_v50  ;;  %v11714_v5 = vadd.f32 %v6524_v40, %v6484_v41  ;;  %v6486_v9 = vadd.f32 %v6485_v63, %v11497_v11  ;;  %6809 = vmatprep.mubr.bf16.mxu0 %v11699_v56  ;;  %v9385_v23 = vld [vmem:[%s13767_s1 + $0x1a20] ss:$16 sps:$4 sm:$0xff]   ;;  %v9393_v50 = vld [vmem:[%s13767_s1 + $0x1a04] ss:$16 sps:$4 sm:$0xff]  }
 0x186   :  { %6850 = vmatprep.mubr.bf16.mxu1 %v11703_v57  ;;  %v6487_v12 = vpop.f32.mrf.mxu0  ;;  %v9399_v40 = vld [vmem:[%s13767_s1 + $0x1be4] ss:$16 sps:$4 sm:$0xff]   ;;  %v9394_v41 = vld [vmem:[%s13767_s1 + $0x19e0] ss:$16 sps:$4 sm:$0xff]  }
 0x187   :  { %v6528_v13 = vpop.f32.mrf.mxu1  ;;  %v11725_v14 = vadd.f32 %v6526_v2, %v6486_v9  ;;  %6780 = vmatpush1.bf16.msra.mxu0 %v9352_v52  ;;  %v9388_v52 = vld [vmem:[%s13767_s1 + $0x1800] ss:$16 sps:$4 sm:$0xff]   ;;  %v9402_v2 = vld [vmem:[%s13767_s1 + $0x19c4] ss:$16 sps:$4 sm:$0xff]  }
 0x188   :  { %6821 = vmatpush1.bf16.msra.mxu1 %v9355_v53  ;;  %v6488_v15 = vpop.f32.mrf.mxu0  ;;  %6781 = vmatprep.subr.bf16.mxu0 %v9360_v4  ;;  %v9391_v53 = vld [vmem:[%s13767_s1 + $0x1a00] ss:$16 sps:$4 sm:$0xff]   ;;  %v9405_v4 = vld [vmem:[%s13767_s1 + $0x1bc4] ss:$16 sps:$4 sm:$0xff]  }
 0x189   :  { %v6529_v11 = vpop.f32.mrf.mxu1  ;;  %6822 = vmatprep.subr.bf16.mxu1 %v9363_v8  ;;  %v9397_v63 = vld [vmem:[%s13767_s1 + $0x1be0] ss:$16 sps:$4 sm:$0xff]   ;;  %v9414_v15 = vld [vmem:[%s13767_s1 + $0x1984] ss:$16 sps:$4 sm:$0xff]  }
 0x18a   :  { %v9400_v8 = vld [vmem:[%s13767_s1 + $0x19c0] ss:$16 sps:$4 sm:$0xff]   ;;  %v9417_v11 = vld [vmem:[%s13767_s1 + $0x1b84] ss:$16 sps:$4 sm:$0xff]  }
 0x18b   :  { %6782 = vmatpush1.bf16.msra.mxu0 %v9358_v3  ;;  %v9403_v9 = vld [vmem:[%s13767_s1 + $0x1bc0] ss:$16 sps:$4 sm:$0xff]   ;;  %v9408_v3 = vld [vmem:[%s13767_s1 + $0x19a4] ss:$16 sps:$4 sm:$0xff]  }
 0x18c   :  { %6823 = vmatpush1.bf16.msra.mxu1 %v9361_v10  ;;  %6783 = vmatprep.subr.bf16.mxu0 %v9366_v18  ;;  %v9411_v10 = vld [vmem:[%s13767_s1 + $0x1ba4] ss:$16 sps:$4 sm:$0xff]   ;;  %v9406_v12 = vld [vmem:[%s13767_s1 + $0x19a0] ss:$16 sps:$4 sm:$0xff]  }
 0x18d   :  { %6824 = vmatprep.subr.bf16.mxu1 %v9369_v19  ;;  %v9409_v13 = vld [vmem:[%s13767_s1 + $0x1ba0] ss:$16 sps:$4 sm:$0xff]  }
 0x18e   :  { %v9412_v18 = vld [vmem:[%s13767_s1 + $0x1980] ss:$16 sps:$4 sm:$0xff]  }
 0x18f   :  { %6784 = vmatpush1.bf16.msra.mxu0 %v9364_v20  ;;  %v9415_v19 = vld [vmem:[%s13767_s1 + $0x1b80] ss:$16 sps:$4 sm:$0xff]   ;;  %v9420_v20 = vld [vmem:[%s13767_s1 + $0x1964] ss:$16 sps:$4 sm:$0xff]  }
 0x190   :  { %6825 = vmatpush1.bf16.msra.mxu1 %v9367_v21  ;;  %6785 = vmatprep.subr.bf16.mxu0 %v9372_v26  ;;  %v9423_v21 = vld [vmem:[%s13767_s1 + $0x1b64] ss:$16 sps:$4 sm:$0xff]   ;;  %v9418_v26 = vld [vmem:[%s13767_s1 + $0x1960] ss:$16 sps:$4 sm:$0xff]  }
 0x191   :  { %6826 = vmatprep.subr.bf16.mxu1 %v9375_v27  ;;  %v9421_v27 = vld [vmem:[%s13767_s1 + $0x1b60] ss:$16 sps:$4 sm:$0xff]  }
 0x193   :  { %6786 = vmatpush1.bf16.msra.mxu0 %v9370_v28  ;;  %v9426_v28 = vld [vmem:[%s13767_s1 + $0x1944] ss:$16 sps:$4 sm:$0xff]  }
 0x194   :  { %6827 = vmatpush1.bf16.msra.mxu1 %v9373_v29  ;;  %6787 = vmatprep.subr.bf16.mxu0 %v9378_v30  ;;  %v9429_v29 = vld [vmem:[%s13767_s1 + $0x1b44] ss:$16 sps:$4 sm:$0xff]   ;;  %v9424_v30 = vld [vmem:[%s13767_s1 + $0x1940] ss:$16 sps:$4 sm:$0xff]  }
 0x195   :  { %6828 = vmatprep.subr.bf16.mxu1 %v9381_v31  ;;  %v9427_v31 = vld [vmem:[%s13767_s1 + $0x1b40] ss:$16 sps:$4 sm:$0xff]  }
 0x197   :  { %6788 = vmatpush1.bf16.msra.mxu0 %v9376_v32  ;;  %v9432_v32 = vld [vmem:[%s13767_s1 + $0x1924] ss:$16 sps:$4 sm:$0xff]  }
 0x198   :  { %6829 = vmatpush1.bf16.msra.mxu1 %v9379_v33  ;;  %6789 = vmatprep.subr.bf16.mxu0 %v9384_v34  ;;  %v9435_v33 = vld [vmem:[%s13767_s1 + $0x1b24] ss:$16 sps:$4 sm:$0xff]   ;;  %v9430_v34 = vld [vmem:[%s13767_s1 + $0x1920] ss:$16 sps:$4 sm:$0xff]  }
 0x199   :  { %6830 = vmatprep.subr.bf16.mxu1 %v9387_v35  ;;  %v9433_v35 = vld [vmem:[%s13767_s1 + $0x1b20] ss:$16 sps:$4 sm:$0xff]  }
 0x19b   :  { %6790 = vmatpush1.bf16.msra.mxu0 %v9382_v22  ;;  %v9438_v22 = vld [vmem:[%s13767_s1 + $0x1904] ss:$16 sps:$4 sm:$0xff]  }
 0x19c   :  { %6831 = vmatpush1.bf16.msra.mxu1 %v9385_v23  ;;  %6791 = vmatprep.subr.bf16.mxu0 %v9390_v49  ;;  %v9441_v23 = vld [vmem:[%s13767_s1 + $0x1b04] ss:$16 sps:$4 sm:$0xff]   ;;  %v9436_v49 = vld [vmem:[%s13767_s1 + $0x1900] ss:$16 sps:$4 sm:$0xff]  }
 0x19d   :  { %6832 = vmatprep.subr.bf16.mxu1 %v9393_v50  ;;  %v9439_v50 = vld [vmem:[%s13767_s1 + $0x1b00] ss:$16 sps:$4 sm:$0xff]  }
 0x19f   :  { %6792 = vmatpush1.bf16.msra.mxu0 %v9388_v52  ;;  %v9448_v52 = vld [vmem:[%s13767_s1 + $0x1ce4] ss:$16 sps:$4 sm:$0xff]  }
 0x1a0   :  { %6833 = vmatpush1.bf16.msra.mxu1 %v9391_v53  ;;  %6793 = vmatprep.subr.bf16.mxu0 %v9396_v62  ;;  %v9451_v53 = vld [vmem:[%s13767_s1 + $0x1ee4] ss:$16 sps:$4 sm:$0xff]  }
 0x1a1   :  { %6834 = vmatprep.subr.bf16.mxu1 %v9399_v40  ;;  %v11892_v62 = vld [vmem:[%s13768_s0 + $0x70] sm:$0xff]  ;;  %v11897_v40 = vld [vmem:[%s13768_s0 + $0x78] sm:$0xff] }
 0x1a3   :  { %6794 = vmatpush2.bf16.msra.mxu0 %v9394_v41  ;;  %v9446_v41 = vld [vmem:[%s13767_s1 + $0x1ce0] ss:$16 sps:$4 sm:$0xff]  }
 0x1a4   :  { %6835 = vmatpush2.bf16.msra.mxu1 %v9397_v63  ;;  %6795 = vmatprep.subr.bf16.mxu0 %v9402_v2  ;;  %v9449_v63 = vld [vmem:[%s13767_s1 + $0x1ee0] ss:$16 sps:$4 sm:$0xff]   ;;  %v11907_v2 = vcombine.low %v11678_v58, %v11678_v58 }
 0x1a5   :  { %6836 = vmatprep.subr.bf16.mxu1 %v9405_v4  ;;  %v11911_v4 = vcombine.low %v11683_v61, %v11683_v61  ;;  %v9452_v58 = vld [vmem:[%s13767_s1 + $0x1cc0] ss:$16 sps:$4 sm:$0xff]  }
 0x1a6   :  { %v9455_v61 = vld [vmem:[%s13767_s1 + $0x1ec0] ss:$16 sps:$4 sm:$0xff]  }
 0x1a7   :  { %6796 = vmatpush2.bf16.msra.mxu0 %v9400_v8  ;;  %v9454_v8 = vld [vmem:[%s13767_s1 + $0x1cc4] ss:$16 sps:$4 sm:$0xff]  }
 0x1a8   :  { %6837 = vmatpush2.bf16.msra.mxu1 %v9403_v9  ;;  %6797 = vmatprep.subr.bf16.mxu0 %v9408_v3  ;;  %v9457_v9 = vld [vmem:[%s13767_s1 + $0x1ec4] ss:$16 sps:$4 sm:$0xff]   ;;  %v11927_v3 = vcombine.high %v11892_v62, %v11892_v62 }
 0x1a9   :  { %6838 = vmatprep.subr.bf16.mxu1 %v9411_v10  ;;  %v11931_v10 = vcombine.high %v11897_v40, %v11897_v40 }
 0x1ab   :  { %6798 = vmatpush2.bf16.msra.mxu0 %v9406_v12 }
 0x1ac   :  { %6839 = vmatpush2.bf16.msra.mxu1 %v9409_v13  ;;  %6799 = vmatprep.subr.bf16.mxu0 %v9414_v15 }
 0x1ad   :  { %6840 = vmatprep.subr.bf16.mxu1 %v9417_v11 }
 0x1af   :  { %6800 = vmatpush2.bf16.msra.mxu0 %v9412_v18 }
 0x1b0   :  { %6841 = vmatpush2.bf16.msra.mxu1 %v9415_v19  ;;  %6801 = vmatprep.subr.bf16.mxu0 %v9420_v20  ;;  %v9460_v19 = vld [vmem:[%s13767_s1 + $0x1ca4] ss:$16 sps:$4 sm:$0xff]  }
 0x1b1   :  { %6842 = vmatprep.subr.bf16.mxu1 %v9423_v21  ;;  %v9463_v20 = vld [vmem:[%s13767_s1 + $0x1ea4] ss:$16 sps:$4 sm:$0xff]  }
 0x1b3   :  { %6802 = vmatpush2.bf16.msra.mxu0 %v9418_v26 }
 0x1b4   :  { %6843 = vmatpush2.bf16.msra.mxu1 %v9421_v27  ;;  %6803 = vmatprep.subr.bf16.mxu0 %v9426_v28  ;;  %v9461_v27 = vld [vmem:[%s13767_s1 + $0x1ea0] ss:$16 sps:$4 sm:$0xff]  }
 0x1b5   :  { %6844 = vmatprep.subr.bf16.mxu1 %v9429_v29 }
 0x1b7   :  { %6804 = vmatpush2.bf16.msra.mxu0 %v9424_v30 }
 0x1b8   :  { %6845 = vmatpush2.bf16.msra.mxu1 %v9427_v31  ;;  %6805 = vmatprep.subr.bf16.mxu0 %v9432_v32  ;;  %v9466_v32 = vld [vmem:[%s13767_s1 + $0x1c84] ss:$16 sps:$4 sm:$0xff]  }
 0x1b9   :  { %6846 = vmatprep.subr.bf16.mxu1 %v9435_v33  ;;  %v9469_v33 = vld [vmem:[%s13767_s1 + $0x1e84] ss:$16 sps:$4 sm:$0xff]  }
 0x1bb   :  { %6806 = vmatpush2.bf16.msra.mxu0 %v9430_v34  ;;  %v9464_v34 = vld [vmem:[%s13767_s1 + $0x1c80] ss:$16 sps:$4 sm:$0xff]  }
 0x1bc   :  { %6847 = vmatpush2.bf16.msra.mxu1 %v9433_v35  ;;  %6807 = vmatprep.subr.bf16.mxu0 %v9438_v22  ;;  %v9467_v35 = vld [vmem:[%s13767_s1 + $0x1e80] ss:$16 sps:$4 sm:$0xff]   ;;  %v9472_v22 = vld [vmem:[%s13767_s1 + $0x1c64] ss:$16 sps:$4 sm:$0xff]  }
 0x1bd   :  { %6848 = vmatprep.subr.bf16.mxu1 %v9441_v23  ;;  %v9475_v23 = vld [vmem:[%s13767_s1 + $0x1e64] ss:$16 sps:$4 sm:$0xff]  }
 0x1bf   :  { %6808 = vmatpush2.bf16.msra.mxu0 %v9436_v49  ;;  %v9470_v49 = vld [vmem:[%s13767_s1 + $0x1c60] ss:$16 sps:$4 sm:$0xff]  }
 0x1c0   :  { %6849 = vmatpush2.bf16.msra.mxu1 %v9439_v50  ;;  %6859 = vmatprep.subr.bf16.mxu0 %v9448_v52  ;;  %v9473_v50 = vld [vmem:[%s13767_s1 + $0x1e60] ss:$16 sps:$4 sm:$0xff]   ;;  %v9478_v52 = vld [vmem:[%s13767_s1 + $0x1c44] ss:$16 sps:$4 sm:$0xff]  }
 0x1c1   :  { %6900 = vmatprep.subr.bf16.mxu1 %v9451_v53  ;;  %v9481_v53 = vld [vmem:[%s13767_s1 + $0x1e44] ss:$16 sps:$4 sm:$0xff]  }
 0x1c2   :  { %v6565_v12 = vpop.f32.mrf.mxu0  ;;  %6810 = vmatmul.mubr.bf16.vlgmr.msra.gmra.mxu0 %v11907_v2 }
 0x1c3   :  { %v6606_v13 = vpop.f32.mrf.mxu1  ;;  %6851 = vmatmul.mubr.bf16.vlgmr.msra.gmra.mxu1 %v11911_v4  ;;  %v6566_v15 = vadd.f32 %v6565_v12, %v11714_v5  ;;  %6860 = vmatpush1.bf16.msra.mxu0 %v9446_v41  ;;  %v9458_v5 = vld [vmem:[%s13767_s1 + $0x1ca0] ss:$16 sps:$4 sm:$0xff]   ;;  %v9490_v12 = vld [vmem:[%s13767_s1 + $0x1c04] ss:$16 sps:$4 sm:$0xff]  }
 0x1c4   :  { %6901 = vmatpush1.bf16.msra.mxu1 %v9449_v63  ;;  %v6567_v11 = vpop.f32.mrf.mxu0  ;;  %6861 = vmatprep.subr.bf16.mxu0 %v9454_v8  ;;  %v9476_v41 = vld [vmem:[%s13767_s1 + $0x1c40] ss:$16 sps:$4 sm:$0xff]   ;;  %v9484_v8 = vld [vmem:[%s13767_s1 + $0x1c24] ss:$16 sps:$4 sm:$0xff]  }
 0x1c5   :  { %v6608_v18 = vpop.f32.mrf.mxu1  ;;  %6902 = vmatprep.subr.bf16.mxu1 %v9457_v9  ;;  %v11942_v21 = vadd.f32 %v6606_v13, %v6566_v15  ;;  %v6568_v26 = vadd.f32 %v6567_v11, %v11725_v14  ;;  %6891 = vmatprep.mubr.bf16.mxu0 %v11927_v3  ;;  %v9479_v63 = vld [vmem:[%s13767_s1 + $0x1e40] ss:$16 sps:$4 sm:$0xff]   ;;  %v9487_v9 = vld [vmem:[%s13767_s1 + $0x1e24] ss:$16 sps:$4 sm:$0xff]  }
 0x1c6   :  { %6932 = vmatprep.mubr.bf16.mxu1 %v11931_v10  ;;  %v6569_v28 = vpop.f32.mrf.mxu0  ;;  %v9493_v13 = vld [vmem:[%s13767_s1 + $0x1e04] ss:$16 sps:$4 sm:$0xff]   ;;  %v9488_v15 = vld [vmem:[%s13767_s1 + $0x1c00] ss:$16 sps:$4 sm:$0xff]  }
 0x1c7   :  { %v6610_v29 = vpop.f32.mrf.mxu1  ;;  %v11953_v30 = vadd.f32 %v6608_v18, %v6568_v26  ;;  %6862 = vmatpush1.bf16.msra.mxu0 %v9452_v58  ;;  %v9482_v58 = vld [vmem:[%s13767_s1 + $0x1c20] ss:$16 sps:$4 sm:$0xff]   ;;  %v9496_v18 = vld [vmem:[%s13767_s1 + $0x1de4] ss:$16 sps:$4 sm:$0xff]  }
 0x1c8   :  { %6903 = vmatpush1.bf16.msra.mxu1 %v9455_v61  ;;  %v6570_v31 = vpop.f32.mrf.mxu0  ;;  %6863 = vmatprep.subr.bf16.mxu0 %v9460_v19  ;;  %v9485_v61 = vld [vmem:[%s13767_s1 + $0x1e20] ss:$16 sps:$4 sm:$0xff]   ;;  %v9499_v19 = vld [vmem:[%s13767_s1 + $0x1fe4] ss:$16 sps:$4 sm:$0xff]  }
 0x1c9   :  { %v6611_v14 = vpop.f32.mrf.mxu1  ;;  %6904 = vmatprep.subr.bf16.mxu1 %v9463_v20  ;;  %v9491_v11 = vld [vmem:[%s13767_s1 + $0x1e00] ss:$16 sps:$4 sm:$0xff]   ;;  %v9508_v31 = vld [vmem:[%s13767_s1 + $0x1da4] ss:$16 sps:$4 sm:$0xff]  }
 0x1ca   :  { %v9494_v20 = vld [vmem:[%s13767_s1 + $0x1de0] ss:$16 sps:$4 sm:$0xff]   ;;  %v9511_v14 = vld [vmem:[%s13767_s1 + $0x1fa4] ss:$16 sps:$4 sm:$0xff]  }
 0x1cb   :  { %6864 = vmatpush1.bf16.msra.mxu0 %v9458_v5  ;;  %v9497_v26 = vld [vmem:[%s13767_s1 + $0x1fe0] ss:$16 sps:$4 sm:$0xff]   ;;  %v9502_v5 = vld [vmem:[%s13767_s1 + $0x1dc4] ss:$16 sps:$4 sm:$0xff]  }
 0x1cc   :  { %6905 = vmatpush1.bf16.msra.mxu1 %v9461_v27  ;;  %6865 = vmatprep.subr.bf16.mxu0 %v9466_v32  ;;  %v9505_v27 = vld [vmem:[%s13767_s1 + $0x1fc4] ss:$16 sps:$4 sm:$0xff]   ;;  %v9500_v28 = vld [vmem:[%s13767_s1 + $0x1dc0] ss:$16 sps:$4 sm:$0xff]  }
 0x1cd   :  { %6906 = vmatprep.subr.bf16.mxu1 %v9469_v33  ;;  %v9503_v29 = vld [vmem:[%s13767_s1 + $0x1fc0] ss:$16 sps:$4 sm:$0xff]  }
 0x1ce   :  { %v9506_v32 = vld [vmem:[%s13767_s1 + $0x1da0] ss:$16 sps:$4 sm:$0xff]  }
 0x1cf   :  { %6866 = vmatpush1.bf16.msra.mxu0 %v9464_v34  ;;  %v9509_v33 = vld [vmem:[%s13767_s1 + $0x1fa0] ss:$16 sps:$4 sm:$0xff]   ;;  %v9514_v34 = vld [vmem:[%s13767_s1 + $0x1d84] ss:$16 sps:$4 sm:$0xff]  }
 0x1d0   :  { %6907 = vmatpush1.bf16.msra.mxu1 %v9467_v35  ;;  %6867 = vmatprep.subr.bf16.mxu0 %v9472_v22  ;;  %v9517_v35 = vld [vmem:[%s13767_s1 + $0x1f84] ss:$16 sps:$4 sm:$0xff]   ;;  %v9512_v22 = vld [vmem:[%s13767_s1 + $0x1d80] ss:$16 sps:$4 sm:$0xff]  }
 0x1d1   :  { %6908 = vmatprep.subr.bf16.mxu1 %v9475_v23  ;;  %v9515_v23 = vld [vmem:[%s13767_s1 + $0x1f80] ss:$16 sps:$4 sm:$0xff]  }
 0x1d3   :  { %6868 = vmatpush1.bf16.msra.mxu0 %v9470_v49  ;;  %v9520_v49 = vld [vmem:[%s13767_s1 + $0x1d64] ss:$16 sps:$4 sm:$0xff]  }
 0x1d4   :  { %6909 = vmatpush1.bf16.msra.mxu1 %v9473_v50  ;;  %6869 = vmatprep.subr.bf16.mxu0 %v9478_v52  ;;  %v9523_v50 = vld [vmem:[%s13767_s1 + $0x1f64] ss:$16 sps:$4 sm:$0xff]   ;;  %v9518_v52 = vld [vmem:[%s13767_s1 + $0x1d60] ss:$16 sps:$4 sm:$0xff]  }
 0x1d5   :  { %6910 = vmatprep.subr.bf16.mxu1 %v9481_v53  ;;  %v9521_v53 = vld [vmem:[%s13767_s1 + $0x1f60] ss:$16 sps:$4 sm:$0xff]  }
 0x1d7   :  { %6870 = vmatpush1.bf16.msra.mxu0 %v9476_v41  ;;  %v9526_v41 = vld [vmem:[%s13767_s1 + $0x1d44] ss:$16 sps:$4 sm:$0xff]  }
 0x1d8   :  { %6911 = vmatpush1.bf16.msra.mxu1 %v9479_v63  ;;  %6871 = vmatprep.subr.bf16.mxu0 %v9484_v8  ;;  %v9529_v63 = vld [vmem:[%s13767_s1 + $0x1f44] ss:$16 sps:$4 sm:$0xff]   ;;  %v9524_v8 = vld [vmem:[%s13767_s1 + $0x1d40] ss:$16 sps:$4 sm:$0xff]  }
 0x1d9   :  { %6912 = vmatprep.subr.bf16.mxu1 %v9487_v9  ;;  %v9527_v9 = vld [vmem:[%s13767_s1 + $0x1f40] ss:$16 sps:$4 sm:$0xff]  }
 0x1db   :  { %6872 = vmatpush1.bf16.msra.mxu0 %v9482_v58  ;;  %v9532_v58 = vld [vmem:[%s13767_s1 + $0x1d24] ss:$16 sps:$4 sm:$0xff]  }
 0x1dc   :  { %6913 = vmatpush1.bf16.msra.mxu1 %v9485_v61  ;;  %6873 = vmatprep.subr.bf16.mxu0 %v9490_v12  ;;  %v9535_v61 = vld [vmem:[%s13767_s1 + $0x1f24] ss:$16 sps:$4 sm:$0xff]   ;;  %v9530_v12 = vld [vmem:[%s13767_s1 + $0x1d20] ss:$16 sps:$4 sm:$0xff]  }
 0x1dd   :  { %6914 = vmatprep.subr.bf16.mxu1 %v9493_v13  ;;  %v9533_v13 = vld [vmem:[%s13767_s1 + $0x1f20] ss:$16 sps:$4 sm:$0xff]  }
 0x1df   :  { %6874 = vmatpush1.bf16.msra.mxu0 %v9488_v15  ;;  %v9538_v15 = vld [vmem:[%s13767_s1 + $0x1d04] ss:$16 sps:$4 sm:$0xff]  }
 0x1e0   :  { %6915 = vmatpush1.bf16.msra.mxu1 %v9491_v11  ;;  %6875 = vmatprep.subr.bf16.mxu0 %v9496_v18  ;;  %v9541_v11 = vld [vmem:[%s13767_s1 + $0x1f04] ss:$16 sps:$4 sm:$0xff]   ;;  %v9536_v18 = vld [vmem:[%s13767_s1 + $0x1d00] ss:$16 sps:$4 sm:$0xff]  }
 0x1e1   :  { %6916 = vmatprep.subr.bf16.mxu1 %v9499_v19  ;;  %v9539_v19 = vld [vmem:[%s13767_s1 + $0x1f00] ss:$16 sps:$4 sm:$0xff]  }
 0x1e3   :  { %6876 = vmatpush2.bf16.msra.mxu0 %v9494_v20  ;;  %v9548_v20 = vld [vmem:[%s13767_s1 + $0xec] ss:$16 sps:$4 sm:$0xff]  }
 0x1e4   :  { %6917 = vmatpush2.bf16.msra.mxu1 %v9497_v26  ;;  %6877 = vmatprep.subr.bf16.mxu0 %v9502_v5  ;;  %v9551_v26 = vld [vmem:[%s13767_s1 + $0x2ec] ss:$16 sps:$4 sm:$0xff]   ;;  %v9546_v5 = vld [vmem:[%s13767_s1 + $0xe8] ss:$16 sps:$4 sm:$0xff]  }
 0x1e5   :  { %6918 = vmatprep.subr.bf16.mxu1 %v9505_v27  ;;  %v9549_v27 = vld [vmem:[%s13767_s1 + $0x2e8] ss:$16 sps:$4 sm:$0xff]  }
 0x1e7   :  { %6878 = vmatpush2.bf16.msra.mxu0 %v9500_v28  ;;  %v12125_v28 = vcombine.low %v11892_v62, %v11892_v62  ;;  %v9552_v62 = vld [vmem:[%s13767_s1 + $0xc8] ss:$16 sps:$4 sm:$0xff]  }
 0x1e8   :  { %6919 = vmatpush2.bf16.msra.mxu1 %v9503_v29  ;;  %6879 = vmatprep.subr.bf16.mxu0 %v9508_v31  ;;  %v12129_v29 = vcombine.low %v11897_v40, %v11897_v40  ;;  %v9554_v31 = vld [vmem:[%s13767_s1 + $0xcc] ss:$16 sps:$4 sm:$0xff]   ;;  %v9555_v40 = vld [vmem:[%s13767_s1 + $0x2c8] ss:$16 sps:$4 sm:$0xff]  }
 0x1e9   :  { %6920 = vmatprep.subr.bf16.mxu1 %v9511_v14  ;;  %v9557_v14 = vld [vmem:[%s13767_s1 + $0x2cc] ss:$16 sps:$4 sm:$0xff]  }
 0x1eb   :  { %6880 = vmatpush2.bf16.msra.mxu0 %v9506_v32 }
 0x1ec   :  { %6921 = vmatpush2.bf16.msra.mxu1 %v9509_v33  ;;  %6881 = vmatprep.subr.bf16.mxu0 %v9514_v34 }
 0x1ed   :  { %6922 = vmatprep.subr.bf16.mxu1 %v9517_v35 }
 0x1ef   :  { %6882 = vmatpush2.bf16.msra.mxu0 %v9512_v22 }
 0x1f0   :  { %6923 = vmatpush2.bf16.msra.mxu1 %v9515_v23  ;;  %6883 = vmatprep.subr.bf16.mxu0 %v9520_v49  ;;  %v9560_v23 = vld [vmem:[%s13767_s1 + $0xac] ss:$16 sps:$4 sm:$0xff]  }
 0x1f1   :  { %6924 = vmatprep.subr.bf16.mxu1 %v9523_v50  ;;  %v9563_v49 = vld [vmem:[%s13767_s1 + $0x2ac] ss:$16 sps:$4 sm:$0xff]  }
 0x1f3   :  { %6884 = vmatpush2.bf16.msra.mxu0 %v9518_v52 }
 0x1f4   :  { %6925 = vmatpush2.bf16.msra.mxu1 %v9521_v53  ;;  %6885 = vmatprep.subr.bf16.mxu0 %v9526_v41  ;;  %v9561_v53 = vld [vmem:[%s13767_s1 + $0x2a8] ss:$16 sps:$4 sm:$0xff]  }
 0x1f5   :  { %6926 = vmatprep.subr.bf16.mxu1 %v9529_v63 }
 0x1f7   :  { %6886 = vmatpush2.bf16.msra.mxu0 %v9524_v8 }
 0x1f8   :  { %6927 = vmatpush2.bf16.msra.mxu1 %v9527_v9  ;;  %6887 = vmatprep.subr.bf16.mxu0 %v9532_v58  ;;  %v9566_v58 = vld [vmem:[%s13767_s1 + $0x8c] ss:$16 sps:$4 sm:$0xff]  }
 0x1f9   :  { %6928 = vmatprep.subr.bf16.mxu1 %v9535_v61  ;;  %v9567_v61 = vld [vmem:[%s13767_s1 + $0x288] ss:$16 sps:$4 sm:$0xff]  }
 0x1fb   :  { %6888 = vmatpush2.bf16.msra.mxu0 %v9530_v12  ;;  %v9572_v12 = vld [vmem:[%s13767_s1 + $0x6c] ss:$16 sps:$4 sm:$0xff]  }
 0x1fc   :  { %6929 = vmatpush2.bf16.msra.mxu1 %v9533_v13  ;;  %6889 = vmatprep.subr.bf16.mxu0 %v9538_v15  ;;  %v9575_v13 = vld [vmem:[%s13767_s1 + $0x26c] ss:$16 sps:$4 sm:$0xff]   ;;  %v9570_v15 = vld [vmem:[%s13767_s1 + $0x68] ss:$16 sps:$4 sm:$0xff]  }
 0x1fd   :  { %6930 = vmatprep.subr.bf16.mxu1 %v9541_v11  ;;  %v9573_v11 = vld [vmem:[%s13767_s1 + $0x268] ss:$16 sps:$4 sm:$0xff]  }
 0x1ff   :  { %6890 = vmatpush2.bf16.msra.mxu0 %v9536_v18  ;;  %v9578_v18 = vld [vmem:[%s13767_s1 + $0x4c] ss:$16 sps:$4 sm:$0xff]  }
 0x200   :  { %6931 = vmatpush2.bf16.msra.mxu1 %v9539_v19  ;;  %6941 = vmatprep.subr.bf16.mxu0 %v9548_v20  ;;  %v9581_v19 = vld [vmem:[%s13767_s1 + $0x24c] ss:$16 sps:$4 sm:$0xff]   ;;  %v9576_v20 = vld [vmem:[%s13767_s1 + $0x48] ss:$16 sps:$4 sm:$0xff]  }
 0x201   :  { %6982 = vmatprep.subr.bf16.mxu1 %v9551_v26  ;;  %v9579_v26 = vld [vmem:[%s13767_s1 + $0x248] ss:$16 sps:$4 sm:$0xff]  }
 0x202   :  { %v6647_v32 = vpop.f32.mrf.mxu0  ;;  %6892 = vmatmul.mubr.bf16.vlgmr.msra.gmra.mxu0 %v12125_v28 }
 0x203   :  { %v6688_v33 = vpop.f32.mrf.mxu1  ;;  %6933 = vmatmul.mubr.bf16.vlgmr.msra.gmra.mxu1 %v12129_v29  ;;  %v6648_v34 = vadd.f32 %v6647_v32, %v11942_v21  ;;  %6942 = vmatpush1.bf16.msra.mxu0 %v9546_v5  ;;  %v9558_v21 = vld [vmem:[%s13767_s1 + $0xa8] ss:$16 sps:$4 sm:$0xff]   ;;  %v9584_v5 = vld [vmem:[%s13767_s1 + $0x2c] ss:$16 sps:$4 sm:$0xff]  }
 0x204   :  { %6983 = vmatpush1.bf16.msra.mxu1 %v9549_v27  ;;  %v6649_v35 = vpop.f32.mrf.mxu0  ;;  %6943 = vmatprep.subr.bf16.mxu0 %v9554_v31  ;;  %v9587_v27 = vld [vmem:[%s13767_s1 + $0x22c] ss:$16 sps:$4 sm:$0xff]   ;;  %v9582_v31 = vld [vmem:[%s13767_s1 + $0x28] ss:$16 sps:$4 sm:$0xff]  }
 0x205   :  { %v6690_v22 = vpop.f32.mrf.mxu1  ;;  %6984 = vmatprep.subr.bf16.mxu1 %v9557_v14  ;;  %v12152_v50 = vadd.f32 %v6688_v33, %v6648_v34  ;;  %v6650_v52 = vadd.f32 %v6649_v35, %v11953_v30  ;;  %6973 = vmatprep.mubr.bf16.mxu0 %v10476_v47  ;;  %v9569_v47 = vld [vmem:[%s13767_s1 + $0x28c] ss:$16 sps:$4 sm:$0xff]   ;;  %v9585_v14 = vld [vmem:[%s13767_s1 + $0x228] ss:$16 sps:$4 sm:$0xff]  }
 0x206   :  { %7014 = vmatprep.mubr.bf16.mxu1 %v10487_v51  ;;  %v6651_v41 = vpop.f32.mrf.mxu0  ;;  %v9564_v51 = vld [vmem:[%s13767_s1 + $0x88] ss:$16 sps:$4 sm:$0xff]   ;;  %v9596_v34 = vld [vmem:[%s13767_s1 + $0x1ec] ss:$16 sps:$4 sm:$0xff]  }
 0x207   :  { %v6692_v63 = vpop.f32.mrf.mxu1  ;;  %v12163_v8 = vadd.f32 %v6690_v22, %v6650_v52  ;;  %6944 = vmatpush1.bf16.msra.mxu0 %v9552_v62  ;;  %v9590_v62 = vld [vmem:[%s13767_s1 + $0xc] ss:$16 sps:$4 sm:$0xff]   ;;  %v9588_v32 = vld [vmem:[%s13767_s1 + $0x8] ss:$16 sps:$4 sm:$0xff]  }
 0x208   :  { %6985 = vmatpush1.bf16.msra.mxu1 %v9555_v40  ;;  %v6652_v9 = vpop.f32.mrf.mxu0  ;;  %6945 = vmatprep.subr.bf16.mxu0 %v9560_v23  ;;  %v9593_v40 = vld [vmem:[%s13767_s1 + $0x20c] ss:$16 sps:$4 sm:$0xff]   ;;  %v9591_v33 = vld [vmem:[%s13767_s1 + $0x208] ss:$16 sps:$4 sm:$0xff]  }
 0x209   :  { %v6693_v30 = vpop.f32.mrf.mxu1  ;;  %6986 = vmatprep.subr.bf16.mxu1 %v9563_v49  ;;  %v9599_v35 = vld [vmem:[%s13767_s1 + $0x3ec] ss:$16 sps:$4 sm:$0xff]   ;;  %v9594_v22 = vld [vmem:[%s13767_s1 + $0x1e8] ss:$16 sps:$4 sm:$0xff]  }
 0x20a   :  { %v9597_v23 = vld [vmem:[%s13767_s1 + $0x3e8] ss:$16 sps:$4 sm:$0xff]   ;;  %v9602_v49 = vld [vmem:[%s13767_s1 + $0x1cc] ss:$16 sps:$4 sm:$0xff]  }
 0x20b   :  { %6946 = vmatpush1.bf16.msra.mxu0 %v9558_v21  ;;  %v9605_v52 = vld [vmem:[%s13767_s1 + $0x3cc] ss:$16 sps:$4 sm:$0xff]   ;;  %v9600_v21 = vld [vmem:[%s13767_s1 + $0x1c8] ss:$16 sps:$4 sm:$0xff]  }
 0x20c   :  { %6987 = vmatpush1.bf16.msra.mxu1 %v9561_v53  ;;  %6947 = vmatprep.subr.bf16.mxu0 %v9566_v58  ;;  %v9603_v53 = vld [vmem:[%s13767_s1 + $0x3c8] ss:$16 sps:$4 sm:$0xff]   ;;  %v9608_v41 = vld [vmem:[%s13767_s1 + $0x1ac] ss:$16 sps:$4 sm:$0xff]  }
 0x20d   :  { %6988 = vmatprep.subr.bf16.mxu1 %v9569_v47  ;;  %v9611_v63 = vld [vmem:[%s13767_s1 + $0x3ac] ss:$16 sps:$4 sm:$0xff]   ;;  %v9606_v9 = vld [vmem:[%s13767_s1 + $0x1a8] ss:$16 sps:$4 sm:$0xff]  }
 0x20e   :  { %v9609_v30 = vld [vmem:[%s13767_s1 + $0x3a8] ss:$16 sps:$4 sm:$0xff]   ;;  %v9614_v58 = vld [vmem:[%s13767_s1 + $0x18c] ss:$16 sps:$4 sm:$0xff]  }
 0x20f   :  { %6948 = vmatpush1.bf16.msra.mxu0 %v9564_v51  ;;  %v9617_v47 = vld [vmem:[%s13767_s1 + $0x38c] ss:$16 sps:$4 sm:$0xff]   ;;  %v9612_v51 = vld [vmem:[%s13767_s1 + $0x188] ss:$16 sps:$4 sm:$0xff]  }
 0x210   :  { %6989 = vmatpush1.bf16.msra.mxu1 %v9567_v61  ;;  %6949 = vmatprep.subr.bf16.mxu0 %v9572_v12  ;;  %v9615_v61 = vld [vmem:[%s13767_s1 + $0x388] ss:$16 sps:$4 sm:$0xff]   ;;  %v9620_v12 = vld [vmem:[%s13767_s1 + $0x16c] ss:$16 sps:$4 sm:$0xff]  }
 0x211   :  { %6990 = vmatprep.subr.bf16.mxu1 %v9575_v13  ;;  %v9623_v13 = vld [vmem:[%s13767_s1 + $0x36c] ss:$16 sps:$4 sm:$0xff]  }
 0x213   :  { %6950 = vmatpush1.bf16.msra.mxu0 %v9570_v15  ;;  %v9618_v15 = vld [vmem:[%s13767_s1 + $0x168] ss:$16 sps:$4 sm:$0xff]  }
 0x214   :  { %6991 = vmatpush1.bf16.msra.mxu1 %v9573_v11  ;;  %6951 = vmatprep.subr.bf16.mxu0 %v9578_v18  ;;  %v9621_v11 = vld [vmem:[%s13767_s1 + $0x368] ss:$16 sps:$4 sm:$0xff]   ;;  %v9626_v18 = vld [vmem:[%s13767_s1 + $0x14c] ss:$16 sps:$4 sm:$0xff]  }
 0x215   :  { %6992 = vmatprep.subr.bf16.mxu1 %v9581_v19  ;;  %v9629_v19 = vld [vmem:[%s13767_s1 + $0x34c] ss:$16 sps:$4 sm:$0xff]  }
 0x217   :  { %6952 = vmatpush1.bf16.msra.mxu0 %v9576_v20  ;;  %v9624_v20 = vld [vmem:[%s13767_s1 + $0x148] ss:$16 sps:$4 sm:$0xff]  }
 0x218   :  { %6993 = vmatpush1.bf16.msra.mxu1 %v9579_v26  ;;  %6953 = vmatprep.subr.bf16.mxu0 %v9584_v5  ;;  %v9627_v26 = vld [vmem:[%s13767_s1 + $0x348] ss:$16 sps:$4 sm:$0xff]   ;;  %v9632_v5 = vld [vmem:[%s13767_s1 + $0x12c] ss:$16 sps:$4 sm:$0xff]  }
 0x219   :  { %6994 = vmatprep.subr.bf16.mxu1 %v9587_v27  ;;  %v9635_v27 = vld [vmem:[%s13767_s1 + $0x32c] ss:$16 sps:$4 sm:$0xff]  }
 0x21b   :  { %6954 = vmatpush1.bf16.msra.mxu0 %v9582_v31  ;;  %v9630_v31 = vld [vmem:[%s13767_s1 + $0x128] ss:$16 sps:$4 sm:$0xff]  }
 0x21c   :  { %6995 = vmatpush1.bf16.msra.mxu1 %v9585_v14  ;;  %6955 = vmatprep.subr.bf16.mxu0 %v9590_v62  ;;  %v9633_v14 = vld [vmem:[%s13767_s1 + $0x328] ss:$16 sps:$4 sm:$0xff]   ;;  %v9638_v62 = vld [vmem:[%s13767_s1 + $0x10c] ss:$16 sps:$4 sm:$0xff]  }
 0x21d   :  { %6996 = vmatprep.subr.bf16.mxu1 %v9593_v40  ;;  %v9641_v40 = vld [vmem:[%s13767_s1 + $0x30c] ss:$16 sps:$4 sm:$0xff]  }
 0x21f   :  { %6956 = vmatpush1.bf16.msra.mxu0 %v9588_v32  ;;  %v9636_v32 = vld [vmem:[%s13767_s1 + $0x108] ss:$16 sps:$4 sm:$0xff]  }
 0x220   :  { %6997 = vmatpush1.bf16.msra.mxu1 %v9591_v33  ;;  %6957 = vmatprep.subr.bf16.mxu0 %v9596_v34  ;;  %v9639_v33 = vld [vmem:[%s13767_s1 + $0x308] ss:$16 sps:$4 sm:$0xff]   ;;  %v9644_v34 = vld [vmem:[%s13767_s1 + $0x4ec] ss:$16 sps:$4 sm:$0xff]  }
 0x221   :  { %6998 = vmatprep.subr.bf16.mxu1 %v9599_v35  ;;  %v9647_v35 = vld [vmem:[%s13767_s1 + $0x6ec] ss:$16 sps:$4 sm:$0xff]  }
 0x223   :  { %6958 = vmatpush2.bf16.msra.mxu0 %v9594_v22  ;;  %v9642_v22 = vld [vmem:[%s13767_s1 + $0x4e8] ss:$16 sps:$4 sm:$0xff]  }
 0x224   :  { %6999 = vmatpush2.bf16.msra.mxu1 %v9597_v23  ;;  %6959 = vmatprep.subr.bf16.mxu0 %v9602_v49  ;;  %v9645_v23 = vld [vmem:[%s13767_s1 + $0x6e8] ss:$16 sps:$4 sm:$0xff]   ;;  %v9650_v49 = vld [vmem:[%s13767_s1 + $0x4cc] ss:$16 sps:$4 sm:$0xff]  }
 0x225   :  { %7000 = vmatprep.subr.bf16.mxu1 %v9605_v52  ;;  %v9653_v52 = vld [vmem:[%s13767_s1 + $0x6cc] ss:$16 sps:$4 sm:$0xff]  }
 0x227   :  { %6960 = vmatpush2.bf16.msra.mxu0 %v9600_v21  ;;  %v9648_v21 = vld [vmem:[%s13767_s1 + $0x4c8] ss:$16 sps:$4 sm:$0xff]  }
 0x228   :  { %7001 = vmatpush2.bf16.msra.mxu1 %v9603_v53  ;;  %6961 = vmatprep.subr.bf16.mxu0 %v9608_v41  ;;  %v9651_v53 = vld [vmem:[%s13767_s1 + $0x6c8] ss:$16 sps:$4 sm:$0xff]  }
 0x229   :  { %7002 = vmatprep.subr.bf16.mxu1 %v9611_v63 }
 0x22b   :  { %6962 = vmatpush2.bf16.msra.mxu0 %v9606_v9 }
 0x22c   :  { %7003 = vmatpush2.bf16.msra.mxu1 %v9609_v30  ;;  %6963 = vmatprep.subr.bf16.mxu0 %v9614_v58 }
 0x22d   :  { %7004 = vmatprep.subr.bf16.mxu1 %v9617_v47  ;;  %v9656_v47 = vld [vmem:[%s13767_s1 + $0x4ac] ss:$16 sps:$4 sm:$0xff]  }
 0x22f   :  { %6964 = vmatpush2.bf16.msra.mxu0 %v9612_v51  ;;  %v9659_v51 = vld [vmem:[%s13767_s1 + $0x6ac] ss:$16 sps:$4 sm:$0xff]  }
 0x230   :  { %7005 = vmatpush2.bf16.msra.mxu1 %v9615_v61  ;;  %6965 = vmatprep.subr.bf16.mxu0 %v9620_v12 }
 0x231   :  { %7006 = vmatprep.subr.bf16.mxu1 %v9623_v13  ;;  %v9654_v13 = vld [vmem:[%s13767_s1 + $0x4a8] ss:$16 sps:$4 sm:$0xff]  }
 0x233   :  { %6966 = vmatpush2.bf16.msra.mxu0 %v9618_v15  ;;  %v9657_v15 = vld [vmem:[%s13767_s1 + $0x6a8] ss:$16 sps:$4 sm:$0xff]  }
 0x234   :  { %7007 = vmatpush2.bf16.msra.mxu1 %v9621_v11  ;;  %6967 = vmatprep.subr.bf16.mxu0 %v9626_v18  ;;  %v9660_v18 = vld [vmem:[%s13767_s1 + $0x488] ss:$16 sps:$4 sm:$0xff]  }
 0x235   :  { %7008 = vmatprep.subr.bf16.mxu1 %v9629_v19  ;;  %v9663_v19 = vld [vmem:[%s13767_s1 + $0x688] ss:$16 sps:$4 sm:$0xff]  }
 0x237   :  { %6968 = vmatpush2.bf16.msra.mxu0 %v9624_v20  ;;  %v9668_v20 = vld [vmem:[%s13767_s1 + $0x46c] ss:$16 sps:$4 sm:$0xff]  }
 0x238   :  { %7009 = vmatpush2.bf16.msra.mxu1 %v9627_v26  ;;  %6969 = vmatprep.subr.bf16.mxu0 %v9632_v5  ;;  %v9671_v26 = vld [vmem:[%s13767_s1 + $0x66c] ss:$16 sps:$4 sm:$0xff]   ;;  %v9666_v5 = vld [vmem:[%s13767_s1 + $0x468] ss:$16 sps:$4 sm:$0xff]  }
 0x239   :  { %7010 = vmatprep.subr.bf16.mxu1 %v9635_v27  ;;  %v9669_v27 = vld [vmem:[%s13767_s1 + $0x668] ss:$16 sps:$4 sm:$0xff]  }
 0x23b   :  { %6970 = vmatpush2.bf16.msra.mxu0 %v9630_v31  ;;  %v9674_v31 = vld [vmem:[%s13767_s1 + $0x44c] ss:$16 sps:$4 sm:$0xff]  }
 0x23c   :  { %7011 = vmatpush2.bf16.msra.mxu1 %v9633_v14  ;;  %6971 = vmatprep.subr.bf16.mxu0 %v9638_v62  ;;  %v9677_v14 = vld [vmem:[%s13767_s1 + $0x64c] ss:$16 sps:$4 sm:$0xff]   ;;  %v9672_v62 = vld [vmem:[%s13767_s1 + $0x448] ss:$16 sps:$4 sm:$0xff]  }
 0x23d   :  { %7012 = vmatprep.subr.bf16.mxu1 %v9641_v40  ;;  %v9675_v40 = vld [vmem:[%s13767_s1 + $0x648] ss:$16 sps:$4 sm:$0xff]  }
 0x23f   :  { %6972 = vmatpush2.bf16.msra.mxu0 %v9636_v32  ;;  %v9680_v32 = vld [vmem:[%s13767_s1 + $0x42c] ss:$16 sps:$4 sm:$0xff]  }
 0x240   :  { %7013 = vmatpush2.bf16.msra.mxu1 %v9639_v33  ;;  %7023 = vmatprep.subr.bf16.mxu0 %v9644_v34  ;;  %v9683_v33 = vld [vmem:[%s13767_s1 + $0x62c] ss:$16 sps:$4 sm:$0xff]   ;;  %v9678_v34 = vld [vmem:[%s13767_s1 + $0x428] ss:$16 sps:$4 sm:$0xff]  }
 0x241   :  { %7064 = vmatprep.subr.bf16.mxu1 %v9647_v35  ;;  %v9681_v35 = vld [vmem:[%s13767_s1 + $0x628] ss:$16 sps:$4 sm:$0xff]  }
 0x242   :  { %v6729_v41 = vpop.f32.mrf.mxu0  ;;  %6974 = vmatmul.mubr.bf16.vlgmr.msra.gmra.mxu0 %v10545_v6 }
 0x243   :  { %v6770_v63 = vpop.f32.mrf.mxu1  ;;  %7015 = vmatmul.mubr.bf16.vlgmr.msra.gmra.mxu1 %v10547_v7  ;;  %v6730_v9 = vadd.f32 %v6729_v41, %v12152_v50  ;;  %7024 = vmatpush1.bf16.msra.mxu0 %v9642_v22  ;;  %v9686_v22 = vld [vmem:[%s13767_s1 + $0x40c] ss:$16 sps:$4 sm:$0xff]   ;;  %v9690_v41 = vld [vmem:[%s13767_s1 + $0x5e8] ss:$16 sps:$4 sm:$0xff]  }
 0x244   :  { %7065 = vmatpush1.bf16.msra.mxu1 %v9645_v23  ;;  %v6731_v30 = vpop.f32.mrf.mxu0  ;;  %7025 = vmatprep.subr.bf16.mxu0 %v9650_v49  ;;  %v9689_v23 = vld [vmem:[%s13767_s1 + $0x60c] ss:$16 sps:$4 sm:$0xff]   ;;  %v9684_v49 = vld [vmem:[%s13767_s1 + $0x408] ss:$16 sps:$4 sm:$0xff]  }
 0x245   :  { %v6772_v58 = vpop.f32.mrf.mxu1  ;;  %7066 = vmatprep.subr.bf16.mxu1 %v9653_v52  ;;  %v12354_v61 = vadd.f32 %v6770_v63, %v6730_v9  ;;  %v6732_v6 = vadd.f32 %v6731_v30, %v12163_v8  ;;  %7055 = vmatprep.mubr.bf16.mxu0 %v10641_v36  ;;  %v9662_v36 = vld [vmem:[%s13767_s1 + $0x48c] ss:$16 sps:$4 sm:$0xff]   ;;  %v9687_v52 = vld [vmem:[%s13767_s1 + $0x608] ss:$16 sps:$4 sm:$0xff]  }
 0x246   :  { %7096 = vmatprep.mubr.bf16.mxu1 %v10645_v37  ;;  %v6733_v7 = vpop.f32.mrf.mxu0  ;;  %v9665_v37 = vld [vmem:[%s13767_s1 + $0x68c] ss:$16 sps:$4 sm:$0xff]   ;;  %v9693_v63 = vld [vmem:[%s13767_s1 + $0x7e8] ss:$16 sps:$4 sm:$0xff]  }
 0x247   :  { %v6774_v50 = vpop.f32.mrf.mxu1  ;;  %v12359_v12 = vadd.f32 %v6772_v58, %v6732_v6  ;;  %7026 = vmatpush1.bf16.msra.mxu0 %v9648_v21  ;;  %v9692_v21 = vld [vmem:[%s13767_s1 + $0x5ec] ss:$16 sps:$4 sm:$0xff]   ;;  %v9696_v58 = vld [vmem:[%s13767_s1 + $0x5c8] ss:$16 sps:$4 sm:$0xff]  }
 0x248   :  { %7067 = vmatpush1.bf16.msra.mxu1 %v9651_v53  ;;  %v6734_v11 = vpop.f32.mrf.mxu0  ;;  %7027 = vmatprep.subr.bf16.mxu0 %v9656_v47  ;;  %v9695_v53 = vld [vmem:[%s13767_s1 + $0x7ec] ss:$16 sps:$4 sm:$0xff]   ;;  %v9699_v47 = vld [vmem:[%s13767_s1 + $0x7c8] ss:$16 sps:$4 sm:$0xff]  }
 0x249   :  { %v6775_v8 = vpop.f32.mrf.mxu1  ;;  %7068 = vmatprep.subr.bf16.mxu1 %v9659_v51  ;;  %v9698_v9 = vld [vmem:[%s13767_s1 + $0x5cc] ss:$16 sps:$4 sm:$0xff]   ;;  %v9702_v7 = vld [vmem:[%s13767_s1 + $0x5a8] ss:$16 sps:$4 sm:$0xff]  }
 0x24a   :  { %v9701_v30 = vld [vmem:[%s13767_s1 + $0x7cc] ss:$16 sps:$4 sm:$0xff]   ;;  %v9705_v50 = vld [vmem:[%s13767_s1 + $0x7a8] ss:$16 sps:$4 sm:$0xff]  }
 0x24b   :  { %7028 = vmatpush1.bf16.msra.mxu0 %v9654_v13  ;;  %v9704_v51 = vld [vmem:[%s13767_s1 + $0x5ac] ss:$16 sps:$4 sm:$0xff]   ;;  %v9708_v11 = vld [vmem:[%s13767_s1 + $0x588] ss:$16 sps:$4 sm:$0xff]  }
 0x24c   :  { %7069 = vmatpush1.bf16.msra.mxu1 %v9657_v15  ;;  %7029 = vmatprep.subr.bf16.mxu0 %v9662_v36  ;;  %v9707_v6 = vld [vmem:[%s13767_s1 + $0x7ac] ss:$16 sps:$4 sm:$0xff]   ;;  %v9711_v8 = vld [vmem:[%s13767_s1 + $0x788] ss:$16 sps:$4 sm:$0xff]  }
 0x24d   :  { %7070 = vmatprep.subr.bf16.mxu1 %v9665_v37  ;;  %v9710_v13 = vld [vmem:[%s13767_s1 + $0x58c] ss:$16 sps:$4 sm:$0xff]  }
 0x24e   :  { %v9713_v15 = vld [vmem:[%s13767_s1 + $0x78c] ss:$16 sps:$4 sm:$0xff]  }
 0x24f   :  { %7030 = vmatpush1.bf16.msra.mxu0 %v9660_v18  ;;  %v9716_v36 = vld [vmem:[%s13767_s1 + $0x56c] ss:$16 sps:$4 sm:$0xff]   ;;  %v9714_v18 = vld [vmem:[%s13767_s1 + $0x568] ss:$16 sps:$4 sm:$0xff]  }
 0x250   :  { %7071 = vmatpush1.bf16.msra.mxu1 %v9663_v19  ;;  %7031 = vmatprep.subr.bf16.mxu0 %v9668_v20  ;;  %v9719_v37 = vld [vmem:[%s13767_s1 + $0x76c] ss:$16 sps:$4 sm:$0xff]   ;;  %v9717_v19 = vld [vmem:[%s13767_s1 + $0x768] ss:$16 sps:$4 sm:$0xff]  }
 0x251   :  { %7072 = vmatprep.subr.bf16.mxu1 %v9671_v26  ;;  %v9722_v20 = vld [vmem:[%s13767_s1 + $0x54c] ss:$16 sps:$4 sm:$0xff]  }
 0x252   :  { %v9725_v26 = vld [vmem:[%s13767_s1 + $0x74c] ss:$16 sps:$4 sm:$0xff]  }
 0x253   :  { %7032 = vmatpush1.bf16.msra.mxu0 %v9666_v5  ;;  %v9720_v5 = vld [vmem:[%s13767_s1 + $0x548] ss:$16 sps:$4 sm:$0xff]  }
 0x254   :  { %7073 = vmatpush1.bf16.msra.mxu1 %v9669_v27  ;;  %7033 = vmatprep.subr.bf16.mxu0 %v9674_v31  ;;  %v9723_v27 = vld [vmem:[%s13767_s1 + $0x748] ss:$16 sps:$4 sm:$0xff]   ;;  %v9728_v31 = vld [vmem:[%s13767_s1 + $0x52c] ss:$16 sps:$4 sm:$0xff]  }
 0x255   :  { %7074 = vmatprep.subr.bf16.mxu1 %v9677_v14  ;;  %v9731_v14 = vld [vmem:[%s13767_s1 + $0x72c] ss:$16 sps:$4 sm:$0xff]  }
 0x257   :  { %7034 = vmatpush1.bf16.msra.mxu0 %v9672_v62  ;;  %v9726_v62 = vld [vmem:[%s13767_s1 + $0x528] ss:$16 sps:$4 sm:$0xff]  }
 0x258   :  { %7075 = vmatpush1.bf16.msra.mxu1 %v9675_v40  ;;  %7035 = vmatprep.subr.bf16.mxu0 %v9680_v32  ;;  %v9729_v40 = vld [vmem:[%s13767_s1 + $0x728] ss:$16 sps:$4 sm:$0xff]   ;;  %v9734_v32 = vld [vmem:[%s13767_s1 + $0x50c] ss:$16 sps:$4 sm:$0xff]  }
 0x259   :  { %7076 = vmatprep.subr.bf16.mxu1 %v9683_v33  ;;  %v9737_v33 = vld [vmem:[%s13767_s1 + $0x70c] ss:$16 sps:$4 sm:$0xff]  }
 0x25b   :  { %7036 = vmatpush1.bf16.msra.mxu0 %v9678_v34  ;;  %v9732_v34 = vld [vmem:[%s13767_s1 + $0x508] ss:$16 sps:$4 sm:$0xff]  }
 0x25c   :  { %7077 = vmatpush1.bf16.msra.mxu1 %v9681_v35  ;;  %7037 = vmatprep.subr.bf16.mxu0 %v9686_v22  ;;  %v9735_v35 = vld [vmem:[%s13767_s1 + $0x708] ss:$16 sps:$4 sm:$0xff]   ;;  %v9740_v22 = vld [vmem:[%s13767_s1 + $0x8ec] ss:$16 sps:$4 sm:$0xff]  }
 0x25d   :  { %7078 = vmatprep.subr.bf16.mxu1 %v9689_v23  ;;  %v9743_v23 = vld [vmem:[%s13767_s1 + $0xaec] ss:$16 sps:$4 sm:$0xff]  }
 0x25f   :  { %7038 = vmatpush1.bf16.msra.mxu0 %v9684_v49  ;;  %v9738_v49 = vld [vmem:[%s13767_s1 + $0x8e8] ss:$16 sps:$4 sm:$0xff]  }
 0x260   :  { %7079 = vmatpush1.bf16.msra.mxu1 %v9687_v52  ;;  %7039 = vmatprep.subr.bf16.mxu0 %v9692_v21  ;;  %v9741_v52 = vld [vmem:[%s13767_s1 + $0xae8] ss:$16 sps:$4 sm:$0xff]   ;;  %v9746_v21 = vld [vmem:[%s13767_s1 + $0x8cc] ss:$16 sps:$4 sm:$0xff]  }
 0x261   :  { %7080 = vmatprep.subr.bf16.mxu1 %v9695_v53  ;;  %v9749_v53 = vld [vmem:[%s13767_s1 + $0xacc] ss:$16 sps:$4 sm:$0xff]  }
 0x263   :  { %7040 = vmatpush2.bf16.msra.mxu0 %v9690_v41 }
 0x264   :  { %7081 = vmatpush2.bf16.msra.mxu1 %v9693_v63  ;;  %7041 = vmatprep.subr.bf16.mxu0 %v9698_v9  ;;  %v9744_v9 = vld [vmem:[%s13767_s1 + $0x8c8] ss:$16 sps:$4 sm:$0xff]  }
 0x265   :  { %7082 = vmatprep.subr.bf16.mxu1 %v9701_v30  ;;  %v9747_v30 = vld [vmem:[%s13767_s1 + $0xac8] ss:$16 sps:$4 sm:$0xff]  }
 0x267   :  { %7042 = vmatpush2.bf16.msra.mxu0 %v9696_v58 }
 0x268   :  { %7083 = vmatpush2.bf16.msra.mxu1 %v9699_v47  ;;  %7043 = vmatprep.subr.bf16.mxu0 %v9704_v51 }
 0x269   :  { %7084 = vmatprep.subr.bf16.mxu1 %v9707_v6 }
 0x26b   :  { %7044 = vmatpush2.bf16.msra.mxu0 %v9702_v7  ;;  %v9750_v7 = vld [vmem:[%s13767_s1 + $0x8a8] ss:$16 sps:$4 sm:$0xff]  }
 0x26c   :  { %7085 = vmatpush2.bf16.msra.mxu1 %v9705_v50  ;;  %7045 = vmatprep.subr.bf16.mxu0 %v9710_v13  ;;  %v9753_v50 = vld [vmem:[%s13767_s1 + $0xaa8] ss:$16 sps:$4 sm:$0xff]  }
 0x26d   :  { %7086 = vmatprep.subr.bf16.mxu1 %v9713_v15 }
 0x26f   :  { %7046 = vmatpush2.bf16.msra.mxu0 %v9708_v11  ;;  %v9756_v11 = vld [vmem:[%s13767_s1 + $0x888] ss:$16 sps:$4 sm:$0xff]  }
 0x270   :  { %7087 = vmatpush2.bf16.msra.mxu1 %v9711_v8  ;;  %7047 = vmatprep.subr.bf16.mxu0 %v9716_v36  ;;  %v9759_v8 = vld [vmem:[%s13767_s1 + $0xa88] ss:$16 sps:$4 sm:$0xff]   ;;  %v9764_v36 = vld [vmem:[%s13767_s1 + $0x86c] ss:$16 sps:$4 sm:$0xff]  }
 0x271   :  { %7088 = vmatprep.subr.bf16.mxu1 %v9719_v37  ;;  %v9767_v37 = vld [vmem:[%s13767_s1 + $0xa6c] ss:$16 sps:$4 sm:$0xff]  }
 0x273   :  { %7048 = vmatpush2.bf16.msra.mxu0 %v9714_v18  ;;  %v9762_v18 = vld [vmem:[%s13767_s1 + $0x868] ss:$16 sps:$4 sm:$0xff]  }
 0x274   :  { %7089 = vmatpush2.bf16.msra.mxu1 %v9717_v19  ;;  %7049 = vmatprep.subr.bf16.mxu0 %v9722_v20  ;;  %v9765_v19 = vld [vmem:[%s13767_s1 + $0xa68] ss:$16 sps:$4 sm:$0xff]   ;;  %v9770_v20 = vld [vmem:[%s13767_s1 + $0x84c] ss:$16 sps:$4 sm:$0xff]  }
 0x275   :  { %7090 = vmatprep.subr.bf16.mxu1 %v9725_v26  ;;  %v9773_v26 = vld [vmem:[%s13767_s1 + $0xa4c] ss:$16 sps:$4 sm:$0xff]  }
 0x277   :  { %7050 = vmatpush2.bf16.msra.mxu0 %v9720_v5  ;;  %v9768_v5 = vld [vmem:[%s13767_s1 + $0x848] ss:$16 sps:$4 sm:$0xff]  }
 0x278   :  { %7091 = vmatpush2.bf16.msra.mxu1 %v9723_v27  ;;  %7051 = vmatprep.subr.bf16.mxu0 %v9728_v31  ;;  %v9771_v27 = vld [vmem:[%s13767_s1 + $0xa48] ss:$16 sps:$4 sm:$0xff]   ;;  %v9776_v31 = vld [vmem:[%s13767_s1 + $0x82c] ss:$16 sps:$4 sm:$0xff]  }
 0x279   :  { %7092 = vmatprep.subr.bf16.mxu1 %v9731_v14  ;;  %v9779_v14 = vld [vmem:[%s13767_s1 + $0xa2c] ss:$16 sps:$4 sm:$0xff]  }
 0x27b   :  { %7052 = vmatpush2.bf16.msra.mxu0 %v9726_v62  ;;  %v9774_v62 = vld [vmem:[%s13767_s1 + $0x828] ss:$16 sps:$4 sm:$0xff]  }
 0x27c   :  { %7093 = vmatpush2.bf16.msra.mxu1 %v9729_v40  ;;  %7053 = vmatprep.subr.bf16.mxu0 %v9734_v32  ;;  %v9777_v40 = vld [vmem:[%s13767_s1 + $0xa28] ss:$16 sps:$4 sm:$0xff]   ;;  %v9782_v32 = vld [vmem:[%s13767_s1 + $0x80c] ss:$16 sps:$4 sm:$0xff]  }
 0x27d   :  { %7094 = vmatprep.subr.bf16.mxu1 %v9737_v33  ;;  %v9785_v33 = vld [vmem:[%s13767_s1 + $0xa0c] ss:$16 sps:$4 sm:$0xff]  }
 0x27f   :  { %7054 = vmatpush2.bf16.msra.mxu0 %v9732_v34  ;;  %v9780_v34 = vld [vmem:[%s13767_s1 + $0x808] ss:$16 sps:$4 sm:$0xff]  }
 0x280   :  { %7095 = vmatpush2.bf16.msra.mxu1 %v9735_v35  ;;  %7105 = vmatprep.subr.bf16.mxu0 %v9740_v22  ;;  %v9783_v35 = vld [vmem:[%s13767_s1 + $0xa08] ss:$16 sps:$4 sm:$0xff]   ;;  %v9788_v22 = vld [vmem:[%s13767_s1 + $0x9ec] ss:$16 sps:$4 sm:$0xff]  }
 0x281   :  { %7146 = vmatprep.subr.bf16.mxu1 %v9743_v23  ;;  %v9791_v23 = vld [vmem:[%s13767_s1 + $0xbec] ss:$16 sps:$4 sm:$0xff]  }
 0x282   :  { %v12541_v41 = vpop.f32.mrf.mxu0  ;;  %7056 = vmatmul.mubr.bf16.vlgmr.msra.gmra.mxu0 %v10765_v16  ;;  %v9752_v16 = vld [vmem:[%s13767_s1 + $0x8ac] ss:$16 sps:$4 sm:$0xff]  }
 0x283   :  { %v12543_v63 = vpop.f32.mrf.mxu1  ;;  %7097 = vmatmul.mubr.bf16.vlgmr.msra.gmra.mxu1 %v10769_v17  ;;  %7106 = vmatpush1.bf16.msra.mxu0 %v9738_v49  ;;  %v9755_v17 = vld [vmem:[%s13767_s1 + $0xaac] ss:$16 sps:$4 sm:$0xff]   ;;  %v9786_v49 = vld [vmem:[%s13767_s1 + $0x9e8] ss:$16 sps:$4 sm:$0xff]  }
 0x284   :  { %7147 = vmatpush1.bf16.msra.mxu1 %v9741_v52  ;;  %v12553_v58 = vpop.f32.mrf.mxu0  ;;  %7107 = vmatprep.subr.bf16.mxu0 %v9746_v21  ;;  %v9789_v52 = vld [vmem:[%s13767_s1 + $0xbe8] ss:$16 sps:$4 sm:$0xff]   ;;  %v9794_v21 = vld [vmem:[%s13767_s1 + $0x9cc] ss:$16 sps:$4 sm:$0xff]  }
 0x285   :  { %v12555_v47 = vpop.f32.mrf.mxu1  ;;  %7148 = vmatprep.subr.bf16.mxu1 %v9749_v53  ;;  %7137 = vmatprep.mubr.bf16.mxu0 %v10795_v24  ;;  %v9758_v24 = vld [vmem:[%s13767_s1 + $0x88c] ss:$16 sps:$4 sm:$0xff]  }
 0x286   :  { %7178 = vmatprep.mubr.bf16.mxu1 %v10799_v25  ;;  %v6815_v51 = vpop.f32.mrf.mxu0  ;;  %v9761_v25 = vld [vmem:[%s13767_s1 + $0xa8c] ss:$16 sps:$4 sm:$0xff]  }
 0x287   :  { %v6856_v6 = vpop.f32.mrf.mxu1  ;;  %7108 = vmatpush1.bf16.msra.mxu0 %v9744_v9  ;;  %v9797_v53 = vld [vmem:[%s13767_s1 + $0xbcc] ss:$16 sps:$4 sm:$0xff]   ;;  %v9792_v9 = vld [vmem:[%s13767_s1 + $0x9c8] ss:$16 sps:$4 sm:$0xff]  }
 0x288   :  { %7149 = vmatpush1.bf16.msra.mxu1 %v9747_v30  ;;  %v6816_v13 = vpop.f32.mrf.mxu0  ;;  %7109 = vmatprep.subr.bf16.mxu0 %v9752_v16  ;;  %v9795_v30 = vld [vmem:[%s13767_s1 + $0xbc8] ss:$16 sps:$4 sm:$0xff]   ;;  %v9800_v16 = vld [vmem:[%s13767_s1 + $0x9ac] ss:$16 sps:$4 sm:$0xff]  }
 0x289   :  { %v6857_v15 = vpop.f32.mrf.mxu1  ;;  %7150 = vmatprep.subr.bf16.mxu1 %v9755_v17  ;;  %v9803_v17 = vld [vmem:[%s13767_s1 + $0xbac] ss:$16 sps:$4 sm:$0xff]   ;;  %v9798_v51 = vld [vmem:[%s13767_s1 + $0x9a8] ss:$16 sps:$4 sm:$0xff]  }
 0x28a   :  { %v9801_v6 = vld [vmem:[%s13767_s1 + $0xba8] ss:$16 sps:$4 sm:$0xff]  }
 0x28b   :  { %7110 = vmatpush1.bf16.msra.mxu0 %v9750_v7  ;;  %v9806_v7 = vld [vmem:[%s13767_s1 + $0x98c] ss:$16 sps:$4 sm:$0xff]   ;;  %v9804_v13 = vld [vmem:[%s13767_s1 + $0x988] ss:$16 sps:$4 sm:$0xff]  }
 0x28c   :  { %7151 = vmatpush1.bf16.msra.mxu1 %v9753_v50  ;;  %7111 = vmatprep.subr.bf16.mxu0 %v9758_v24  ;;  %v9809_v50 = vld [vmem:[%s13767_s1 + $0xb8c] ss:$16 sps:$4 sm:$0xff]   ;;  %v9807_v15 = vld [vmem:[%s13767_s1 + $0xb88] ss:$16 sps:$4 sm:$0xff]  }
 0x28d   :  { %7152 = vmatprep.subr.bf16.mxu1 %v9761_v25  ;;  %v9812_v24 = vld [vmem:[%s13767_s1 + $0x96c] ss:$16 sps:$4 sm:$0xff]  }
 0x28e   :  { %v9815_v25 = vld [vmem:[%s13767_s1 + $0xb6c] ss:$16 sps:$4 sm:$0xff]  }
 0x28f   :  { %7112 = vmatpush1.bf16.msra.mxu0 %v9756_v11  ;;  %v9810_v11 = vld [vmem:[%s13767_s1 + $0x968] ss:$16 sps:$4 sm:$0xff]  }
 0x290   :  { %7153 = vmatpush1.bf16.msra.mxu1 %v9759_v8  ;;  %7113 = vmatprep.subr.bf16.mxu0 %v9764_v36  ;;  %v9813_v8 = vld [vmem:[%s13767_s1 + $0xb68] ss:$16 sps:$4 sm:$0xff]   ;;  %v9818_v36 = vld [vmem:[%s13767_s1 + $0x94c] ss:$16 sps:$4 sm:$0xff]  }
 0x291   :  { %7154 = vmatprep.subr.bf16.mxu1 %v9767_v37  ;;  %v9821_v37 = vld [vmem:[%s13767_s1 + $0xb4c] ss:$16 sps:$4 sm:$0xff]  }
 0x293   :  { %7114 = vmatpush1.bf16.msra.mxu0 %v9762_v18  ;;  %v9816_v18 = vld [vmem:[%s13767_s1 + $0x948] ss:$16 sps:$4 sm:$0xff]  }
 0x294   :  { %7155 = vmatpush1.bf16.msra.mxu1 %v9765_v19  ;;  %7115 = vmatprep.subr.bf16.mxu0 %v9770_v20  ;;  %v9819_v19 = vld [vmem:[%s13767_s1 + $0xb48] ss:$16 sps:$4 sm:$0xff]   ;;  %v9824_v20 = vld [vmem:[%s13767_s1 + $0x92c] ss:$16 sps:$4 sm:$0xff]  }
 0x295   :  { %7156 = vmatprep.subr.bf16.mxu1 %v9773_v26  ;;  %v9827_v26 = vld [vmem:[%s13767_s1 + $0xb2c] ss:$16 sps:$4 sm:$0xff]  }
 0x297   :  { %7116 = vmatpush1.bf16.msra.mxu0 %v9768_v5  ;;  %v9822_v5 = vld [vmem:[%s13767_s1 + $0x928] ss:$16 sps:$4 sm:$0xff]  }
 0x298   :  { %7157 = vmatpush1.bf16.msra.mxu1 %v9771_v27  ;;  %7117 = vmatprep.subr.bf16.mxu0 %v9776_v31  ;;  %v9825_v27 = vld [vmem:[%s13767_s1 + $0xb28] ss:$16 sps:$4 sm:$0xff]   ;;  %v9830_v31 = vld [vmem:[%s13767_s1 + $0x90c] ss:$16 sps:$4 sm:$0xff]  }
 0x299   :  { %7158 = vmatprep.subr.bf16.mxu1 %v9779_v14  ;;  %v9833_v14 = vld [vmem:[%s13767_s1 + $0xb0c] ss:$16 sps:$4 sm:$0xff]  }
 0x29b   :  { %7118 = vmatpush1.bf16.msra.mxu0 %v9774_v62  ;;  %v9828_v62 = vld [vmem:[%s13767_s1 + $0x908] ss:$16 sps:$4 sm:$0xff]  }
 0x29c   :  { %7159 = vmatpush1.bf16.msra.mxu1 %v9777_v40  ;;  %7119 = vmatprep.subr.bf16.mxu0 %v9782_v32  ;;  %v9831_v40 = vld [vmem:[%s13767_s1 + $0xb08] ss:$16 sps:$4 sm:$0xff]   ;;  %v9836_v32 = vld [vmem:[%s13767_s1 + $0xcec] ss:$16 sps:$4 sm:$0xff]  }
 0x29d   :  { %7160 = vmatprep.subr.bf16.mxu1 %v9785_v33  ;;  %v9839_v33 = vld [vmem:[%s13767_s1 + $0xeec] ss:$16 sps:$4 sm:$0xff]  }
 0x29f   :  { %7120 = vmatpush1.bf16.msra.mxu0 %v9780_v34  ;;  %v6812_v34 = vadd.f32 %v12541_v41, %v12354_v61  ;;  %v9845_v61 = vld [vmem:[%s13767_s1 + $0xecc] ss:$16 sps:$4 sm:$0xff]  }
 0x2a0   :  { %7161 = vmatpush1.bf16.msra.mxu1 %v9783_v35  ;;  %7121 = vmatprep.subr.bf16.mxu0 %v9788_v22  ;;  %v6814_v35 = vadd.f32 %v12553_v58, %v12359_v12  ;;  %v9834_v22 = vld [vmem:[%s13767_s1 + $0xce8] ss:$16 sps:$4 sm:$0xff]  }
 0x2a1   :  { %7162 = vmatprep.subr.bf16.mxu1 %v9791_v23  ;;  %v9837_v23 = vld [vmem:[%s13767_s1 + $0xee8] ss:$16 sps:$4 sm:$0xff]   ;;  %v6853_v12 = vadd.f32 %v12543_v63, %v6812_v34 }
 0x2a3   :  { %7122 = vmatpush2.bf16.msra.mxu0 %v9786_v49  ;;  %v9842_v49 = vld [vmem:[%s13767_s1 + $0xccc] ss:$16 sps:$4 sm:$0xff]  }
 0x2a4   :  { %7163 = vmatpush2.bf16.msra.mxu1 %v9789_v52  ;;  %7123 = vmatprep.subr.bf16.mxu0 %v9794_v21  ;;  %v6855_v52 = vadd.f32 %v12555_v47, %v6814_v35 }
 0x2a5   :  { %7164 = vmatprep.subr.bf16.mxu1 %v9797_v53  ;;  %v9840_v53 = vld [vmem:[%s13767_s1 + $0xcc8] ss:$16 sps:$4 sm:$0xff]  }
 0x2a7   :  { %7124 = vmatpush2.bf16.msra.mxu0 %v9792_v9  ;;  %v9843_v9 = vld [vmem:[%s13767_s1 + $0xec8] ss:$16 sps:$4 sm:$0xff]  }
 0x2a8   :  { %7165 = vmatpush2.bf16.msra.mxu1 %v9795_v30  ;;  %7125 = vmatprep.subr.bf16.mxu0 %v9800_v16 }
 0x2a9   :  { %7166 = vmatprep.subr.bf16.mxu1 %v9803_v17 }
 0x2ab   :  { %7126 = vmatpush2.bf16.msra.mxu0 %v9798_v51 }
 0x2ac   :  { %7167 = vmatpush2.bf16.msra.mxu1 %v9801_v6  ;;  %7127 = vmatprep.subr.bf16.mxu0 %v9806_v7 }
 0x2ad   :  { %7168 = vmatprep.subr.bf16.mxu1 %v9809_v50 }
 0x2af   :  { %7128 = vmatpush2.bf16.msra.mxu0 %v9804_v13  ;;  %v9846_v13 = vld [vmem:[%s13767_s1 + $0xca8] ss:$16 sps:$4 sm:$0xff]  }
 0x2b0   :  { %7169 = vmatpush2.bf16.msra.mxu1 %v9807_v15  ;;  %7129 = vmatprep.subr.bf16.mxu0 %v9812_v24  ;;  %v9854_v24 = vld [vmem:[%s13767_s1 + $0xc8c] ss:$16 sps:$4 sm:$0xff]  }
 0x2b1   :  { %7170 = vmatprep.subr.bf16.mxu1 %v9815_v25  ;;  %v9857_v25 = vld [vmem:[%s13767_s1 + $0xe8c] ss:$16 sps:$4 sm:$0xff]  }
 0x2b3   :  { %7130 = vmatpush2.bf16.msra.mxu0 %v9810_v11 }
 0x2b4   :  { %7171 = vmatpush2.bf16.msra.mxu1 %v9813_v8  ;;  %7131 = vmatprep.subr.bf16.mxu0 %v9818_v36 }
 0x2b5   :  { %7172 = vmatprep.subr.bf16.mxu1 %v9821_v37 }
 0x2b7   :  { %7132 = vmatpush2.bf16.msra.mxu0 %v9816_v18 }
 0x2b8   :  { %7173 = vmatpush2.bf16.msra.mxu1 %v9819_v19  ;;  %7133 = vmatprep.subr.bf16.mxu0 %v9824_v20 }
 0x2b9   :  { %7174 = vmatprep.subr.bf16.mxu1 %v9827_v26 }
 0x2bb   :  { %7134 = vmatpush2.bf16.msra.mxu0 %v9822_v5  ;;  %v9852_v5 = vld [vmem:[%s13767_s1 + $0xc88] ss:$16 sps:$4 sm:$0xff]  }
 0x2bc   :  { %7175 = vmatpush2.bf16.msra.mxu1 %v9825_v27  ;;  %7135 = vmatprep.subr.bf16.mxu0 %v9830_v31  ;;  %v9855_v27 = vld [vmem:[%s13767_s1 + $0xe88] ss:$16 sps:$4 sm:$0xff]   ;;  %v9860_v31 = vld [vmem:[%s13767_s1 + $0xc6c] ss:$16 sps:$4 sm:$0xff]  }
 0x2bd   :  { %7176 = vmatprep.subr.bf16.mxu1 %v9833_v14  ;;  %v9863_v14 = vld [vmem:[%s13767_s1 + $0xe6c] ss:$16 sps:$4 sm:$0xff]  }
 0x2bf   :  { %7136 = vmatpush2.bf16.msra.mxu0 %v9828_v62 }
 0x2c0   :  { %7177 = vmatpush2.bf16.msra.mxu1 %v9831_v40  ;;  %7187 = vmatprep.subr.bf16.mxu0 %v9836_v32 }
 0x2c1   :  { %7228 = vmatprep.subr.bf16.mxu1 %v9839_v33 }
 0x2c2   :  { %v6893_v41 = vpop.f32.mrf.mxu0  ;;  %7138 = vmatmul.mubr.bf16.vlgmr.msra.gmra.mxu0 %v10993_v38  ;;  %v9848_v38 = vld [vmem:[%s13767_s1 + $0xcac] ss:$16 sps:$4 sm:$0xff]  }
 0x2c3   :  { %v6934_v58 = vpop.f32.mrf.mxu1  ;;  %7179 = vmatmul.mubr.bf16.vlgmr.msra.gmra.mxu1 %v10997_v39  ;;  %v6894_v21 = vadd.f32 %v6893_v41, %v6853_v12  ;;  %7188 = vmatpush1.bf16.msra.mxu0 %v9834_v22  ;;  %v9851_v39 = vld [vmem:[%s13767_s1 + $0xeac] ss:$16 sps:$4 sm:$0xff]  }
 0x2c4   :  { %7229 = vmatpush1.bf16.msra.mxu1 %v9837_v23  ;;  %v6895_v63 = vpop.f32.mrf.mxu0  ;;  %7189 = vmatprep.subr.bf16.mxu0 %v9842_v49  ;;  %v9858_v23 = vld [vmem:[%s13767_s1 + $0xc68] ss:$16 sps:$4 sm:$0xff]   ;;  %v9869_v12 = vld [vmem:[%s13767_s1 + $0xe4c] ss:$16 sps:$4 sm:$0xff]  }
 0x2c5   :  { %v6936_v30 = vpop.f32.mrf.mxu1  ;;  %7230 = vmatprep.subr.bf16.mxu1 %v9845_v61  ;;  %v6935_v47 = vadd.f32 %v6934_v58, %v6894_v21  ;;  %v6896_v16 = vadd.f32 %v6895_v63, %v6855_v52  ;;  %7219 = vmatprep.mubr.bf16.mxu0 %v11017_v42  ;;  %v9849_v42 = vld [vmem:[%s13767_s1 + $0xea8] ss:$16 sps:$4 sm:$0xff]   ;;  %v9866_v61 = vld [vmem:[%s13767_s1 + $0xc4c] ss:$16 sps:$4 sm:$0xff]  }
 0x2c6   :  { %7260 = vmatprep.mubr.bf16.mxu1 %v11021_v43  ;;  %v6897_v17 = vpop.f32.mrf.mxu0  ;;  %v9861_v49 = vld [vmem:[%s13767_s1 + $0xe68] ss:$16 sps:$4 sm:$0xff]  }
 0x2c7   :  { %v6938_v51 = vpop.f32.mrf.mxu1  ;;  %7597 = vst [vmem:[%s13769_s2] sm:$0xff] %v6935_v47  ;;  %v7601_v6 = vrot.slane %v6935_v47, 4  ;;  %v7625_v7 = vmul.f32 %v6935_v47, %v6935_v47  ;;  %v6937_v50 = vadd.f32 %v6936_v30, %v6896_v16  ;;  %7190 = vmatpush1.bf16.msra.mxu0 %v9840_v53  ;;  %v9864_v63 = vld [vmem:[%s13767_s1 + $0xc48] ss:$16 sps:$4 sm:$0xff]  }
 0x2c8   :  { %7231 = vmatpush1.bf16.msra.mxu1 %v9843_v9  ;;  %v6898_v43 = vpop.f32.mrf.mxu0  ;;  %7191 = vmatprep.subr.bf16.mxu0 %v9848_v38  ;;  %v9867_v30 = vld [vmem:[%s13767_s1 + $0xe48] ss:$16 sps:$4 sm:$0xff]   ;;  %v9872_v38 = vld [vmem:[%s13767_s1 + $0xc2c] ss:$16 sps:$4 sm:$0xff]  }
 0x2c9   :  { %v6939_v15 = vpop.f32.mrf.mxu1  ;;  %7232 = vmatprep.subr.bf16.mxu1 %v9851_v39  ;;  %v7602_v11 = vadd.f32 %v7601_v6, %v6935_v47  ;;  %v7629_v8 = vrot.slane %v7625_v7, 4  ;;  %7598 = vst [vmem:[%s13769_s2 + $0x8] sm:$0xff] %v6937_v50  ;;  %v7607_v36 = vrot.slane %v6937_v50, 4  ;;  %v7626_v37 = vmul.f32 %v6937_v50, %v6937_v50  ;;  %v9875_v39 = vld [vmem:[%s13767_s1 + $0xe2c] ss:$16 sps:$4 sm:$0xff]  }
 0x2ca   :  { %v9881_v43 = vld [vmem:[%s13767_s1 + $0xe0c] ss:$16 sps:$4 sm:$0xff]   ;;  %v9876_v15 = vld [vmem:[%s13767_s1 + $0xc08] ss:$16 sps:$4 sm:$0xff]  }
 0x2cb   :  { %v7603_v18 = vrot.slane %v7602_v11, 2  ;;  %v7630_v19 = vadd.f32 %v7629_v8, %v7625_v7  ;;  %v7608_v20 = vadd.f32 %v7607_v36, %v6937_v50  ;;  %v7635_v26 = vrot.slane %v7626_v37, 4  ;;  %7192 = vmatpush1.bf16.msra.mxu0 %v9846_v13  ;;  %v9870_v7 = vld [vmem:[%s13767_s1 + $0xc28] ss:$16 sps:$4 sm:$0xff]  }
 0x2cc   :  { %7233 = vmatpush1.bf16.msra.mxu1 %v9849_v42  ;;  %7193 = vmatprep.subr.bf16.mxu0 %v9854_v24  ;;  %v9873_v50 = vld [vmem:[%s13767_s1 + $0xe28] ss:$16 sps:$4 sm:$0xff]   ;;  %v9878_v42 = vld [vmem:[%s13767_s1 + $0xc0c] ss:$16 sps:$4 sm:$0xff]  }
 0x2cd   :  { %7234 = vmatprep.subr.bf16.mxu1 %v9857_v25  ;;  %v7604_v62 = vadd.f32 %v7603_v18, %v7602_v11  ;;  %v7631_v40 = vrot.slane %v7630_v19, 2  ;;  %v7609_v32 = vrot.slane %v7608_v20, 2  ;;  %v7636_v33 = vadd.f32 %v7635_v26, %v7626_v37  ;;  %v9879_v24 = vld [vmem:[%s13767_s1 + $0xe08] ss:$16 sps:$4 sm:$0xff]   ;;  %v9884_v25 = vld [vmem:[%s13767_s1 + $0xdec] ss:$16 sps:$4 sm:$0xff]  }
 0x2ce   :  { %v9887_v11 = vld [vmem:[%s13767_s1 + $0xfec] ss:$16 sps:$4 sm:$0xff]   ;;  %v9882_v8 = vld [vmem:[%s13767_s1 + $0xde8] ss:$16 sps:$4 sm:$0xff]  }
 0x2cf   :  { %v7632_v34 = vadd.f32 %v7631_v40, %v7630_v19  ;;  %v7610_v35 = vadd.f32 %v7609_v32, %v7608_v20  ;;  %v7637_v22 = vrot.slane %v7636_v33, 2  ;;  %7194 = vmatpush1.bf16.msra.mxu0 %v9852_v5  ;;  %v7605_v41 = vrot.slane %v7604_v62, 1  ;;  %v9885_v36 = vld [vmem:[%s13767_s1 + $0xfe8] ss:$16 sps:$4 sm:$0xff]   ;;  %v9890_v37 = vld [vmem:[%s13767_s1 + $0xdcc] ss:$16 sps:$4 sm:$0xff]  }
 0x2d0   :  { %7235 = vmatpush1.bf16.msra.mxu1 %v9855_v27  ;;  %7195 = vmatprep.subr.bf16.mxu0 %v9860_v31  ;;  %v9893_v18 = vld [vmem:[%s13767_s1 + $0xfcc] ss:$16 sps:$4 sm:$0xff]   ;;  %v9888_v19 = vld [vmem:[%s13767_s1 + $0xdc8] ss:$16 sps:$4 sm:$0xff]  }
 0x2d1   :  { %7236 = vmatprep.subr.bf16.mxu1 %v9863_v14  ;;  %v7633_v58 = vrot.slane %v7632_v34, 1  ;;  %v7611_v52 = vrot.slane %v7610_v35, 1  ;;  %v7638_v21 = vadd.f32 %v7637_v22, %v7636_v33  ;;  %v7606_v47 = vadd.f32 %v7605_v41, %v7604_v62  ;;  %v9891_v20 = vld [vmem:[%s13767_s1 + $0xfc8] ss:$16 sps:$4 sm:$0xff]   ;;  %v9896_v26 = vld [vmem:[%s13767_s1 + $0xdac] ss:$16 sps:$4 sm:$0xff]  }
 0x2d2   :  { %v9899_v5 = vld [vmem:[%s13767_s1 + $0xfac] ss:$16 sps:$4 sm:$0xff]   ;;  %v9894_v27 = vld [vmem:[%s13767_s1 + $0xda8] ss:$16 sps:$4 sm:$0xff]  }
 0x2d3   :  { %v7634_v53 = vadd.f32 %v7633_v58, %v7632_v34  ;;  %v7639_v9 = vrot.slane %v7638_v21, 1  ;;  %7196 = vmatpush1.bf16.msra.mxu0 %v9858_v23  ;;  %v7612_v16 = vadd.f32 %v7611_v52, %v7610_v35  ;;  %v9897_v31 = vld [vmem:[%s13767_s1 + $0xfa8] ss:$16 sps:$4 sm:$0xff]   ;;  %v9902_v14 = vld [vmem:[%s13767_s1 + $0xd8c] ss:$16 sps:$4 sm:$0xff]  }
 0x2d4   :  { %7237 = vmatpush1.bf16.msra.mxu1 %v9861_v49  ;;  %7197 = vmatprep.subr.bf16.mxu0 %v9866_v61  ;;  %v9905_v62 = vld [vmem:[%s13767_s1 + $0xf8c] ss:$16 sps:$4 sm:$0xff]   ;;  %v9900_v40 = vld [vmem:[%s13767_s1 + $0xd88] ss:$16 sps:$4 sm:$0xff]  }
 0x2d5   :  { %7238 = vmatprep.subr.bf16.mxu1 %v9869_v12  ;;  %v7640_v17 = vadd.f32 %v7639_v9, %v7638_v21  ;;  %v12822_v51 = vsel %vm7653_vm0, %v7606_v47, %v7634_v53  ;;  %v9903_v32 = vld [vmem:[%s13767_s1 + $0xf88] ss:$16 sps:$4 sm:$0xff]   ;;  %v9908_v33 = vld [vmem:[%s13767_s1 + $0xd6c] ss:$16 sps:$4 sm:$0xff]  }
 0x2d6   :  { %v9911_v34 = vld [vmem:[%s13767_s1 + $0xf6c] ss:$16 sps:$4 sm:$0xff]   ;;  %v9906_v35 = vld [vmem:[%s13767_s1 + $0xd68] ss:$16 sps:$4 sm:$0xff]  }
 0x2d7   :  { %v12825_v6 = vsel %vm7653_vm0, %v7612_v16, %v7640_v17  ;;  %7198 = vmatpush1.bf16.msra.mxu0 %v9864_v63  ;;  %v9909_v22 = vld [vmem:[%s13767_s1 + $0xf68] ss:$16 sps:$4 sm:$0xff]   ;;  %v9914_v23 = vld [vmem:[%s13767_s1 + $0xd4c] ss:$16 sps:$4 sm:$0xff]  }
 0x2d8   :  { %7239 = vmatpush1.bf16.msra.mxu1 %v9867_v30  ;;  %v7662_v13 = vcombine.low %v12822_v51, %v12825_v6  ;;  %7199 = vmatprep.subr.bf16.mxu0 %v9872_v38  ;;  %v9917_v49 = vld [vmem:[%s13767_s1 + $0xf4c] ss:$16 sps:$4 sm:$0xff]   ;;  %v9912_v61 = vld [vmem:[%s13767_s1 + $0xd48] ss:$16 sps:$4 sm:$0xff]  }
 0x2d9   :  { %7240 = vmatprep.subr.bf16.mxu1 %v9875_v39  ;;  %v9915_v12 = vld [vmem:[%s13767_s1 + $0xf48] ss:$16 sps:$4 sm:$0xff]   ;;  %v9920_v41 = vld [vmem:[%s13767_s1 + $0xd2c] ss:$16 sps:$4 sm:$0xff]  }
 0x2da   :  { %v9923_v58 = vld [vmem:[%s13767_s1 + $0xf2c] ss:$16 sps:$4 sm:$0xff]   ;;  %v9918_v52 = vld [vmem:[%s13767_s1 + $0xd28] ss:$16 sps:$4 sm:$0xff]  }
 0x2db   :  { %7200 = vmatpush1.bf16.msra.mxu0 %v9870_v7  ;;  %v9921_v21 = vld [vmem:[%s13767_s1 + $0xf28] ss:$16 sps:$4 sm:$0xff]   ;;  %v9926_v53 = vld [vmem:[%s13767_s1 + $0xd0c] ss:$16 sps:$4 sm:$0xff]  }
 0x2dc   :  { %7241 = vmatpush1.bf16.msra.mxu1 %v9873_v50  ;;  %7201 = vmatprep.subr.bf16.mxu0 %v9878_v42  ;;  %v9929_v9 = vld [vmem:[%s13767_s1 + $0xf0c] ss:$16 sps:$4 sm:$0xff]   ;;  %v9924_v63 = vld [vmem:[%s13767_s1 + $0xd08] ss:$16 sps:$4 sm:$0xff]  }
 0x2dd   :  { %7242 = vmatprep.subr.bf16.mxu1 %v9881_v43  ;;  %v9927_v30 = vld [vmem:[%s13767_s1 + $0xf08] ss:$16 sps:$4 sm:$0xff]   ;;  %v9932_v38 = vld [vmem:[%s13767_s1 + $0x10ec] ss:$16 sps:$4 sm:$0xff]  }
 0x2de   :  { %v9935_v39 = vld [vmem:[%s13767_s1 + $0x12ec] ss:$16 sps:$4 sm:$0xff]   ;;  %v9930_v47 = vld [vmem:[%s13767_s1 + $0x10e8] ss:$16 sps:$4 sm:$0xff]  }
 0x2df   :  { %7202 = vmatpush1.bf16.msra.mxu0 %v9876_v15  ;;  %v9933_v16 = vld [vmem:[%s13767_s1 + $0x12e8] ss:$16 sps:$4 sm:$0xff]   ;;  %v9938_v17 = vld [vmem:[%s13767_s1 + $0x10cc] ss:$16 sps:$4 sm:$0xff]  }
 0x2e0   :  { %7243 = vmatpush1.bf16.msra.mxu1 %v9879_v24  ;;  %7203 = vmatprep.subr.bf16.mxu0 %v9884_v25  ;;  %v9941_v7 = vld [vmem:[%s13767_s1 + $0x12cc] ss:$16 sps:$4 sm:$0xff]   ;;  %v9936_v15 = vld [vmem:[%s13767_s1 + $0x10c8] ss:$16 sps:$4 sm:$0xff]  }
 0x2e1   :  { %7244 = vmatprep.subr.bf16.mxu1 %v9887_v11  ;;  %v9939_v24 = vld [vmem:[%s13767_s1 + $0x12c8] ss:$16 sps:$4 sm:$0xff]  }
 0x2e3   :  { %7204 = vmatpush2.bf16.msra.mxu0 %v9882_v8 }
 0x2e4   :  { %7245 = vmatpush2.bf16.msra.mxu1 %v9885_v36  ;;  %7205 = vmatprep.subr.bf16.mxu0 %v9890_v37 }
 0x2e5   :  { %7246 = vmatprep.subr.bf16.mxu1 %v9893_v18  ;;  %v9942_v18 = vld [vmem:[%s13767_s1 + $0x10a8] ss:$16 sps:$4 sm:$0xff]  }
 0x2e7   :  { %7206 = vmatpush2.bf16.msra.mxu0 %v9888_v19  ;;  %v9945_v19 = vld [vmem:[%s13767_s1 + $0x12a8] ss:$16 sps:$4 sm:$0xff]  }
 0x2e8   :  { %7247 = vmatpush2.bf16.msra.mxu1 %v9891_v20  ;;  %7207 = vmatprep.subr.bf16.mxu0 %v9896_v26 }
 0x2e9   :  { %7248 = vmatprep.subr.bf16.mxu1 %v9899_v5  ;;  %v9948_v5 = vld [vmem:[%s13767_s1 + $0x1088] ss:$16 sps:$4 sm:$0xff]  }
 0x2eb   :  { %7208 = vmatpush2.bf16.msra.mxu0 %v9894_v27  ;;  %v9951_v27 = vld [vmem:[%s13767_s1 + $0x1288] ss:$16 sps:$4 sm:$0xff]  }
 0x2ec   :  { %7249 = vmatpush2.bf16.msra.mxu1 %v9897_v31  ;;  %7209 = vmatprep.subr.bf16.mxu0 %v9902_v14  ;;  %v9956_v31 = vld [vmem:[%s13767_s1 + $0x106c] ss:$16 sps:$4 sm:$0xff]  }
 0x2ed   :  { %7250 = vmatprep.subr.bf16.mxu1 %v9905_v62  ;;  %v9959_v14 = vld [vmem:[%s13767_s1 + $0x126c] ss:$16 sps:$4 sm:$0xff]   ;;  %v9954_v62 = vld [vmem:[%s13767_s1 + $0x1068] ss:$16 sps:$4 sm:$0xff]  }
 0x2ef   :  { %7210 = vmatpush2.bf16.msra.mxu0 %v9900_v40  ;;  %v9957_v40 = vld [vmem:[%s13767_s1 + $0x1268] ss:$16 sps:$4 sm:$0xff]  }
 0x2f0   :  { %7251 = vmatpush2.bf16.msra.mxu1 %v9903_v32  ;;  %7211 = vmatprep.subr.bf16.mxu0 %v9908_v33  ;;  %v9962_v32 = vld [vmem:[%s13767_s1 + $0x104c] ss:$16 sps:$4 sm:$0xff]  }
 0x2f1   :  { %7252 = vmatprep.subr.bf16.mxu1 %v9911_v34  ;;  %v9965_v33 = vld [vmem:[%s13767_s1 + $0x124c] ss:$16 sps:$4 sm:$0xff]   ;;  %v9960_v34 = vld [vmem:[%s13767_s1 + $0x1048] ss:$16 sps:$4 sm:$0xff]  }
 0x2f3   :  { %7212 = vmatpush2.bf16.msra.mxu0 %v9906_v35  ;;  %v9963_v35 = vld [vmem:[%s13767_s1 + $0x1248] ss:$16 sps:$4 sm:$0xff]  }
 0x2f4   :  { %7253 = vmatpush2.bf16.msra.mxu1 %v9909_v22  ;;  %7213 = vmatprep.subr.bf16.mxu0 %v9914_v23  ;;  %v9968_v22 = vld [vmem:[%s13767_s1 + $0x102c] ss:$16 sps:$4 sm:$0xff]  }
 0x2f5   :  { %7254 = vmatprep.subr.bf16.mxu1 %v9917_v49  ;;  %v9971_v23 = vld [vmem:[%s13767_s1 + $0x122c] ss:$16 sps:$4 sm:$0xff]   ;;  %v9966_v49 = vld [vmem:[%s13767_s1 + $0x1028] ss:$16 sps:$4 sm:$0xff]  }
 0x2f7   :  { %7214 = vmatpush2.bf16.msra.mxu0 %v9912_v61  ;;  %v9969_v61 = vld [vmem:[%s13767_s1 + $0x1228] ss:$16 sps:$4 sm:$0xff]  }
 0x2f8   :  { %7255 = vmatpush2.bf16.msra.mxu1 %v9915_v12  ;;  %7215 = vmatprep.subr.bf16.mxu0 %v9920_v41  ;;  %v9974_v12 = vld [vmem:[%s13767_s1 + $0x100c] ss:$16 sps:$4 sm:$0xff]  }
 0x2f9   :  { %7256 = vmatprep.subr.bf16.mxu1 %v9923_v58  ;;  %v9977_v41 = vld [vmem:[%s13767_s1 + $0x120c] ss:$16 sps:$4 sm:$0xff]   ;;  %v9972_v58 = vld [vmem:[%s13767_s1 + $0x1008] ss:$16 sps:$4 sm:$0xff]  }
 0x2fb   :  { %7216 = vmatpush2.bf16.msra.mxu0 %v9918_v52  ;;  %v9975_v52 = vld [vmem:[%s13767_s1 + $0x1208] ss:$16 sps:$4 sm:$0xff]  }
 0x2fc   :  { %7257 = vmatpush2.bf16.msra.mxu1 %v9921_v21  ;;  %7217 = vmatprep.subr.bf16.mxu0 %v9926_v53  ;;  %v9980_v21 = vld [vmem:[%s13767_s1 + $0x11ec] ss:$16 sps:$4 sm:$0xff]  }
 0x2fd   :  { %7258 = vmatprep.subr.bf16.mxu1 %v9929_v9  ;;  %v9983_v53 = vld [vmem:[%s13767_s1 + $0x13ec] ss:$16 sps:$4 sm:$0xff]   ;;  %v9978_v9 = vld [vmem:[%s13767_s1 + $0x11e8] ss:$16 sps:$4 sm:$0xff]  }
 0x2ff   :  { %7218 = vmatpush2.bf16.msra.mxu0 %v9924_v63  ;;  %v9981_v63 = vld [vmem:[%s13767_s1 + $0x13e8] ss:$16 sps:$4 sm:$0xff]  }
 0x300   :  { %7259 = vmatpush2.bf16.msra.mxu1 %v9927_v30  ;;  %7269 = vmatprep.subr.bf16.mxu0 %v9932_v38  ;;  %v9986_v30 = vld [vmem:[%s13767_s1 + $0x11cc] ss:$16 sps:$4 sm:$0xff]  }
 0x301   :  { %7310 = vmatprep.subr.bf16.mxu1 %v9935_v39  ;;  %v9989_v38 = vld [vmem:[%s13767_s1 + $0x13cc] ss:$16 sps:$4 sm:$0xff]   ;;  %v9984_v39 = vld [vmem:[%s13767_s1 + $0x11c8] ss:$16 sps:$4 sm:$0xff]  }
 0x302   :  { %v6975_v50 = vpop.f32.mrf.mxu0  ;;  %7220 = vmatmul.mubr.bf16.vlgmr.msra.gmra.mxu0 %v11214_v59  ;;  %v9944_v59 = vld [vmem:[%s13767_s1 + $0x10ac] ss:$16 sps:$4 sm:$0xff]  }
 0x303   :  { %v7016_v42 = vpop.f32.mrf.mxu1  ;;  %7261 = vmatmul.mubr.bf16.vlgmr.msra.gmra.mxu1 %v11218_v60  ;;  %7270 = vmatpush1.bf16.msra.mxu0 %v9930_v47  ;;  %v9947_v60 = vld [vmem:[%s13767_s1 + $0x12ac] ss:$16 sps:$4 sm:$0xff]   ;;  %v9987_v47 = vld [vmem:[%s13767_s1 + $0x13c8] ss:$16 sps:$4 sm:$0xff]  }
 0x304   :  { %v12963_v43 = vadd.f32 %v7016_v42, %v6975_v50  ;;  %7311 = vmatpush1.bf16.msra.mxu1 %v9933_v16  ;;  %v6977_v25 = vpop.f32.mrf.mxu0  ;;  %7271 = vmatprep.subr.bf16.mxu0 %v9938_v17  ;;  %v9992_v16 = vld [vmem:[%s13767_s1 + $0x11ac] ss:$16 sps:$4 sm:$0xff]   ;;  %v9993_v50 = vld [vmem:[%s13767_s1 + $0x13a8] ss:$16 sps:$4 sm:$0xff]  }
 0x305   :  { %v7018_v11 = vpop.f32.mrf.mxu1  ;;  %7312 = vmatprep.subr.bf16.mxu1 %v9941_v7  ;;  %7301 = vmatprep.mubr.bf16.mxu0 %v11239_v0  ;;  %v9950_v0 = vld [vmem:[%s13767_s1 + $0x108c] ss:$16 sps:$4 sm:$0xff]   ;;  %v9990_v7 = vld [vmem:[%s13767_s1 + $0x11a8] ss:$16 sps:$4 sm:$0xff]  }
 0x306   :  { %v12977_v8 = vadd.f32 %v7018_v11, %v6977_v25  ;;  %7342 = vmatprep.mubr.bf16.mxu1 %v11243_v1  ;;  %v6979_v36 = vpop.f32.mrf.mxu0  ;;  %v9953_v1 = vld [vmem:[%s13767_s1 + $0x128c] ss:$16 sps:$4 sm:$0xff]   ;;  %v9999_v25 = vld [vmem:[%s13767_s1 + $0x1388] ss:$16 sps:$4 sm:$0xff]  }
 0x307   :  { %v7020_v37 = vpop.f32.mrf.mxu1  ;;  %7272 = vmatpush1.bf16.msra.mxu0 %v9936_v15  ;;  %v9995_v17 = vld [vmem:[%s13767_s1 + $0x13ac] ss:$16 sps:$4 sm:$0xff]   ;;  %v10005_v36 = vld [vmem:[%s13767_s1 + $0x1368] ss:$16 sps:$4 sm:$0xff]  }
 0x308   :  { %7313 = vmatpush1.bf16.msra.mxu1 %v9939_v24  ;;  %v6980_v20 = vpop.f32.mrf.mxu0  ;;  %7273 = vmatprep.subr.bf16.mxu0 %v9944_v59  ;;  %v9998_v42 = vld [vmem:[%s13767_s1 + $0x118c] ss:$16 sps:$4 sm:$0xff]   ;;  %v9996_v24 = vld [vmem:[%s13767_s1 + $0x1188] ss:$16 sps:$4 sm:$0xff]  }
 0x309   :  { %v7021_v26 = vpop.f32.mrf.mxu1  ;;  %7314 = vmatprep.subr.bf16.mxu1 %v9947_v60  ;;  %v10001_v15 = vld [vmem:[%s13767_s1 + $0x138c] ss:$16 sps:$4 sm:$0xff]   ;;  %v10002_v60 = vld [vmem:[%s13767_s1 + $0x1168] ss:$16 sps:$4 sm:$0xff]  }
 0x30a   :  { %v10004_v11 = vld [vmem:[%s13767_s1 + $0x116c] ss:$16 sps:$4 sm:$0xff]   ;;  %v10011_v20 = vld [vmem:[%s13767_s1 + $0x1348] ss:$16 sps:$4 sm:$0xff]  }
 0x30b   :  { %7274 = vmatpush1.bf16.msra.mxu0 %v9942_v18  ;;  %v10007_v59 = vld [vmem:[%s13767_s1 + $0x136c] ss:$16 sps:$4 sm:$0xff]  }
 0x30c   :  { %7315 = vmatpush1.bf16.msra.mxu1 %v9945_v19  ;;  %7275 = vmatprep.subr.bf16.mxu0 %v9950_v0  ;;  %v10010_v37 = vld [vmem:[%s13767_s1 + $0x114c] ss:$16 sps:$4 sm:$0xff]   ;;  %v10008_v19 = vld [vmem:[%s13767_s1 + $0x1148] ss:$16 sps:$4 sm:$0xff]  }
 0x30d   :  { %7316 = vmatprep.subr.bf16.mxu1 %v9953_v1  ;;  %v10013_v18 = vld [vmem:[%s13767_s1 + $0x134c] ss:$16 sps:$4 sm:$0xff]   ;;  %v10014_v1 = vld [vmem:[%s13767_s1 + $0x1128] ss:$16 sps:$4 sm:$0xff]  }
 0x30e   :  { %v10016_v26 = vld [vmem:[%s13767_s1 + $0x112c] ss:$16 sps:$4 sm:$0xff]  }
 0x30f   :  { %7276 = vmatpush1.bf16.msra.mxu0 %v9948_v5  ;;  %v10019_v0 = vld [vmem:[%s13767_s1 + $0x132c] ss:$16 sps:$4 sm:$0xff]   ;;  %v10017_v5 = vld [vmem:[%s13767_s1 + $0x1328] ss:$16 sps:$4 sm:$0xff]  }
 0x310   :  { %7317 = vmatpush1.bf16.msra.mxu1 %v9951_v27  ;;  %7277 = vmatprep.subr.bf16.mxu0 %v9956_v31  ;;  %v10022_v27 = vld [vmem:[%s13767_s1 + $0x110c] ss:$16 sps:$4 sm:$0xff]  }
 0x311   :  { %7318 = vmatprep.subr.bf16.mxu1 %v9959_v14  ;;  %v10025_v31 = vld [vmem:[%s13767_s1 + $0x130c] ss:$16 sps:$4 sm:$0xff]   ;;  %v10020_v14 = vld [vmem:[%s13767_s1 + $0x1108] ss:$16 sps:$4 sm:$0xff]  }
 0x313   :  { %7278 = vmatpush1.bf16.msra.mxu0 %v9954_v62  ;;  %v10023_v62 = vld [vmem:[%s13767_s1 + $0x1308] ss:$16 sps:$4 sm:$0xff]  }
 0x314   :  { %7319 = vmatpush1.bf16.msra.mxu1 %v9957_v40  ;;  %7279 = vmatprep.subr.bf16.mxu0 %v9962_v32  ;;  %v10028_v40 = vld [vmem:[%s13767_s1 + $0x14ec] ss:$16 sps:$4 sm:$0xff]  }
 0x315   :  { %7320 = vmatprep.subr.bf16.mxu1 %v9965_v33  ;;  %v10031_v32 = vld [vmem:[%s13767_s1 + $0x16ec] ss:$16 sps:$4 sm:$0xff]   ;;  %v10026_v33 = vld [vmem:[%s13767_s1 + $0x14e8] ss:$16 sps:$4 sm:$0xff]  }
 0x317   :  { %7280 = vmatpush1.bf16.msra.mxu0 %v9960_v34  ;;  %v10029_v34 = vld [vmem:[%s13767_s1 + $0x16e8] ss:$16 sps:$4 sm:$0xff]  }
 0x318   :  { %7321 = vmatpush1.bf16.msra.mxu1 %v9963_v35  ;;  %7281 = vmatprep.subr.bf16.mxu0 %v9968_v22  ;;  %v10034_v35 = vld [vmem:[%s13767_s1 + $0x14cc] ss:$16 sps:$4 sm:$0xff]  }
 0x319   :  { %7322 = vmatprep.subr.bf16.mxu1 %v9971_v23  ;;  %v10037_v22 = vld [vmem:[%s13767_s1 + $0x16cc] ss:$16 sps:$4 sm:$0xff]  }
 0x31b   :  { %7282 = vmatpush1.bf16.msra.mxu0 %v9966_v49 }
 0x31c   :  { %7323 = vmatpush1.bf16.msra.mxu1 %v9969_v61  ;;  %7283 = vmatprep.subr.bf16.mxu0 %v9974_v12  ;;  %v10032_v12 = vld [vmem:[%s13767_s1 + $0x14c8] ss:$16 sps:$4 sm:$0xff]  }
 0x31d   :  { %7324 = vmatprep.subr.bf16.mxu1 %v9977_v41  ;;  %v10035_v41 = vld [vmem:[%s13767_s1 + $0x16c8] ss:$16 sps:$4 sm:$0xff]  }
 0x31f   :  { %7284 = vmatpush1.bf16.msra.mxu0 %v9972_v58 }
 0x320   :  { %7325 = vmatpush1.bf16.msra.mxu1 %v9975_v52  ;;  %7285 = vmatprep.subr.bf16.mxu0 %v9980_v21 }
 0x321   :  { %7326 = vmatprep.subr.bf16.mxu1 %v9983_v53 }
 0x323   :  { %7286 = vmatpush2.bf16.msra.mxu0 %v9978_v9 }
 0x324   :  { %7327 = vmatpush2.bf16.msra.mxu1 %v9981_v63  ;;  %7287 = vmatprep.subr.bf16.mxu0 %v9986_v30  ;;  %v10038_v30 = vld [vmem:[%s13767_s1 + $0x14a8] ss:$16 sps:$4 sm:$0xff]  }
 0x325   :  { %7328 = vmatprep.subr.bf16.mxu1 %v9989_v38  ;;  %v10041_v38 = vld [vmem:[%s13767_s1 + $0x16a8] ss:$16 sps:$4 sm:$0xff]  }
 0x327   :  { %7288 = vmatpush2.bf16.msra.mxu0 %v9984_v39 }
 0x328   :  { %7329 = vmatpush2.bf16.msra.mxu1 %v9987_v47  ;;  %7289 = vmatprep.subr.bf16.mxu0 %v9992_v16  ;;  %v10044_v47 = vld [vmem:[%s13767_s1 + $0x1488] ss:$16 sps:$4 sm:$0xff]  }
 0x329   :  { %7330 = vmatprep.subr.bf16.mxu1 %v9995_v17  ;;  %v10047_v16 = vld [vmem:[%s13767_s1 + $0x1688] ss:$16 sps:$4 sm:$0xff]   ;;  %v10052_v17 = vld [vmem:[%s13767_s1 + $0x146c] ss:$16 sps:$4 sm:$0xff]  }
 0x32b   :  { %7290 = vmatpush2.bf16.msra.mxu0 %v9990_v7  ;;  %v10055_v7 = vld [vmem:[%s13767_s1 + $0x166c] ss:$16 sps:$4 sm:$0xff]  }
 0x32c   :  { %7331 = vmatpush2.bf16.msra.mxu1 %v9993_v50  ;;  %7291 = vmatprep.subr.bf16.mxu0 %v9998_v42  ;;  %v10050_v50 = vld [vmem:[%s13767_s1 + $0x1468] ss:$16 sps:$4 sm:$0xff]  }
 0x32d   :  { %7332 = vmatprep.subr.bf16.mxu1 %v10001_v15  ;;  %v10053_v42 = vld [vmem:[%s13767_s1 + $0x1668] ss:$16 sps:$4 sm:$0xff]   ;;  %v10058_v15 = vld [vmem:[%s13767_s1 + $0x144c] ss:$16 sps:$4 sm:$0xff]  }
 0x32f   :  { %7292 = vmatpush2.bf16.msra.mxu0 %v9996_v24  ;;  %v10061_v24 = vld [vmem:[%s13767_s1 + $0x164c] ss:$16 sps:$4 sm:$0xff]  }
 0x330   :  { %7333 = vmatpush2.bf16.msra.mxu1 %v9999_v25  ;;  %7293 = vmatprep.subr.bf16.mxu0 %v10004_v11  ;;  %v10056_v25 = vld [vmem:[%s13767_s1 + $0x1448] ss:$16 sps:$4 sm:$0xff]  }
 0x331   :  { %7334 = vmatprep.subr.bf16.mxu1 %v10007_v59  ;;  %v10059_v11 = vld [vmem:[%s13767_s1 + $0x1648] ss:$16 sps:$4 sm:$0xff]   ;;  %v10064_v59 = vld [vmem:[%s13767_s1 + $0x142c] ss:$16 sps:$4 sm:$0xff]  }
 0x333   :  { %7294 = vmatpush2.bf16.msra.mxu0 %v10002_v60  ;;  %v10067_v60 = vld [vmem:[%s13767_s1 + $0x162c] ss:$16 sps:$4 sm:$0xff]  }
 0x334   :  { %7335 = vmatpush2.bf16.msra.mxu1 %v10005_v36  ;;  %7295 = vmatprep.subr.bf16.mxu0 %v10010_v37  ;;  %v10062_v36 = vld [vmem:[%s13767_s1 + $0x1428] ss:$16 sps:$4 sm:$0xff]  }
 0x335   :  { %7336 = vmatprep.subr.bf16.mxu1 %v10013_v18  ;;  %v10065_v37 = vld [vmem:[%s13767_s1 + $0x1628] ss:$16 sps:$4 sm:$0xff]   ;;  %v10070_v18 = vld [vmem:[%s13767_s1 + $0x140c] ss:$16 sps:$4 sm:$0xff]  }
 0x337   :  { %7296 = vmatpush2.bf16.msra.mxu0 %v10008_v19  ;;  %v10073_v19 = vld [vmem:[%s13767_s1 + $0x160c] ss:$16 sps:$4 sm:$0xff]  }
 0x338   :  { %7337 = vmatpush2.bf16.msra.mxu1 %v10011_v20  ;;  %7297 = vmatprep.subr.bf16.mxu0 %v10016_v26  ;;  %v10068_v20 = vld [vmem:[%s13767_s1 + $0x1408] ss:$16 sps:$4 sm:$0xff]  }
 0x339   :  { %7338 = vmatprep.subr.bf16.mxu1 %v10019_v0  ;;  %v10071_v26 = vld [vmem:[%s13767_s1 + $0x1608] ss:$16 sps:$4 sm:$0xff]   ;;  %v10076_v0 = vld [vmem:[%s13767_s1 + $0x15ec] ss:$16 sps:$4 sm:$0xff]  }
 0x33b   :  { %7298 = vmatpush2.bf16.msra.mxu0 %v10014_v1  ;;  %v10079_v1 = vld [vmem:[%s13767_s1 + $0x17ec] ss:$16 sps:$4 sm:$0xff]  }
 0x33c   :  { %7339 = vmatpush2.bf16.msra.mxu1 %v10017_v5  ;;  %7299 = vmatprep.subr.bf16.mxu0 %v10022_v27  ;;  %v10074_v5 = vld [vmem:[%s13767_s1 + $0x15e8] ss:$16 sps:$4 sm:$0xff]  }
 0x33d   :  { %7340 = vmatprep.subr.bf16.mxu1 %v10025_v31  ;;  %v10077_v27 = vld [vmem:[%s13767_s1 + $0x17e8] ss:$16 sps:$4 sm:$0xff]   ;;  %v10082_v31 = vld [vmem:[%s13767_s1 + $0x15cc] ss:$16 sps:$4 sm:$0xff]  }
 0x33f   :  { %7300 = vmatpush2.bf16.msra.mxu0 %v10020_v14  ;;  %v10085_v14 = vld [vmem:[%s13767_s1 + $0x17cc] ss:$16 sps:$4 sm:$0xff]  }
 0x340   :  { %7341 = vmatpush2.bf16.msra.mxu1 %v10023_v62  ;;  %7351 = vmatprep.subr.bf16.mxu0 %v10028_v40  ;;  %v10080_v62 = vld [vmem:[%s13767_s1 + $0x15c8] ss:$16 sps:$4 sm:$0xff]  }
 0x341   :  { %7392 = vmatprep.subr.bf16.mxu1 %v10031_v32  ;;  %v10083_v40 = vld [vmem:[%s13767_s1 + $0x17c8] ss:$16 sps:$4 sm:$0xff]   ;;  %v10088_v32 = vld [vmem:[%s13767_s1 + $0x15ac] ss:$16 sps:$4 sm:$0xff]  }
 0x342   :  { %v7057_v23 = vpop.f32.mrf.mxu0  ;;  %7302 = vmatmul.mubr.bf16.vlgmr.msra.gmra.mxu0 %v11441_v46  ;;  %v10040_v46 = vld [vmem:[%s13767_s1 + $0x14ac] ss:$16 sps:$4 sm:$0xff]  }
 0x343   :  { %v7098_v49 = vpop.f32.mrf.mxu1  ;;  %7343 = vmatmul.mubr.bf16.vlgmr.msra.gmra.mxu1 %v11445_v48  ;;  %v7058_v61 = vadd.f32 %v7057_v23, %v12963_v43  ;;  %7352 = vmatpush1.bf16.msra.mxu0 %v10026_v33  ;;  %v10043_v48 = vld [vmem:[%s13767_s1 + $0x16ac] ss:$16 sps:$4 sm:$0xff]  }
 0x344   :  { %7393 = vmatpush1.bf16.msra.mxu1 %v10029_v34  ;;  %v7059_v58 = vpop.f32.mrf.mxu0  ;;  %7353 = vmatprep.subr.bf16.mxu0 %v10034_v35  ;;  %v10091_v33 = vld [vmem:[%s13767_s1 + $0x17ac] ss:$16 sps:$4 sm:$0xff]   ;;  %v10086_v34 = vld [vmem:[%s13767_s1 + $0x15a8] ss:$16 sps:$4 sm:$0xff]  }
 0x345   :  { %v7100_v52 = vpop.f32.mrf.mxu1  ;;  %7394 = vmatprep.subr.bf16.mxu1 %v10037_v22  ;;  %v13176_v43 = vadd.f32 %v7098_v49, %v7058_v61  ;;  %v7060_v21 = vadd.f32 %v7059_v58, %v12977_v8  ;;  %7383 = vmatprep.mubr.bf16.mxu0 %v11471_v54  ;;  %v10046_v54 = vld [vmem:[%s13767_s1 + $0x148c] ss:$16 sps:$4 sm:$0xff]   ;;  %v10089_v35 = vld [vmem:[%s13767_s1 + $0x17a8] ss:$16 sps:$4 sm:$0xff]  }
 0x346   :  { %7424 = vmatprep.mubr.bf16.mxu1 %v11475_v55  ;;  %v7061_v53 = vpop.f32.mrf.mxu0  ;;  %v10049_v55 = vld [vmem:[%s13767_s1 + $0x168c] ss:$16 sps:$4 sm:$0xff]   ;;  %v10092_v49 = vld [vmem:[%s13767_s1 + $0x1588] ss:$16 sps:$4 sm:$0xff]  }
 0x347   :  { %v7102_v9 = vpop.f32.mrf.mxu1  ;;  %v13181_v63 = vadd.f32 %v7100_v52, %v7060_v21  ;;  %7354 = vmatpush1.bf16.msra.mxu0 %v10032_v12  ;;  %v10094_v22 = vld [vmem:[%s13767_s1 + $0x158c] ss:$16 sps:$4 sm:$0xff]   ;;  %v10095_v61 = vld [vmem:[%s13767_s1 + $0x1788] ss:$16 sps:$4 sm:$0xff]  }
 0x348   :  { %7395 = vmatpush1.bf16.msra.mxu1 %v10035_v41  ;;  %v7062_v39 = vpop.f32.mrf.mxu0  ;;  %7355 = vmatprep.subr.bf16.mxu0 %v10040_v46  ;;  %v10097_v23 = vld [vmem:[%s13767_s1 + $0x178c] ss:$16 sps:$4 sm:$0xff]   ;;  %v10098_v58 = vld [vmem:[%s13767_s1 + $0x1568] ss:$16 sps:$4 sm:$0xff]  }
 0x349   :  { %v7103_v8 = vpop.f32.mrf.mxu1  ;;  %7396 = vmatprep.subr.bf16.mxu1 %v10043_v48  ;;  %v10100_v12 = vld [vmem:[%s13767_s1 + $0x156c] ss:$16 sps:$4 sm:$0xff]   ;;  %v10101_v52 = vld [vmem:[%s13767_s1 + $0x1768] ss:$16 sps:$4 sm:$0xff]  }
 0x34a   :  { %v10103_v41 = vld [vmem:[%s13767_s1 + $0x176c] ss:$16 sps:$4 sm:$0xff]   ;;  %v10104_v21 = vld [vmem:[%s13767_s1 + $0x1548] ss:$16 sps:$4 sm:$0xff]  }
 0x34b   :  { %7356 = vmatpush1.bf16.msra.mxu0 %v10038_v30  ;;  %v10106_v46 = vld [vmem:[%s13767_s1 + $0x154c] ss:$16 sps:$4 sm:$0xff]   ;;  %v10107_v53 = vld [vmem:[%s13767_s1 + $0x1748] ss:$16 sps:$4 sm:$0xff]  }
 0x34c   :  { %7397 = vmatpush1.bf16.msra.mxu1 %v10041_v38  ;;  %7357 = vmatprep.subr.bf16.mxu0 %v10046_v54  ;;  %v10109_v48 = vld [vmem:[%s13767_s1 + $0x174c] ss:$16 sps:$4 sm:$0xff]   ;;  %v10110_v38 = vld [vmem:[%s13767_s1 + $0x1528] ss:$16 sps:$4 sm:$0xff]  }
 0x34d   :  { %7398 = vmatprep.subr.bf16.mxu1 %v10049_v55  ;;  %v10112_v9 = vld [vmem:[%s13767_s1 + $0x152c] ss:$16 sps:$4 sm:$0xff]   ;;  %v10113_v39 = vld [vmem:[%s13767_s1 + $0x1728] ss:$16 sps:$4 sm:$0xff]  }
 0x34e   :  { %v10115_v30 = vld [vmem:[%s13767_s1 + $0x172c] ss:$16 sps:$4 sm:$0xff]   ;;  %v10116_v55 = vld [vmem:[%s13767_s1 + $0x1508] ss:$16 sps:$4 sm:$0xff]  }
 0x34f   :  { %7358 = vmatpush1.bf16.msra.mxu0 %v10044_v47  ;;  %v10118_v8 = vld [vmem:[%s13767_s1 + $0x150c] ss:$16 sps:$4 sm:$0xff]   ;;  %v10119_v47 = vld [vmem:[%s13767_s1 + $0x1708] ss:$16 sps:$4 sm:$0xff]  }
 0x350   :  { %7399 = vmatpush1.bf16.msra.mxu1 %v10047_v16  ;;  %7359 = vmatprep.subr.bf16.mxu0 %v10052_v17  ;;  %v10121_v54 = vld [vmem:[%s13767_s1 + $0x170c] ss:$16 sps:$4 sm:$0xff]  }
 0x351   :  { %7400 = vmatprep.subr.bf16.mxu1 %v10055_v7  ;;  %v10124_v16 = vld [vmem:[%s13767_s1 + $0x18ec] ss:$16 sps:$4 sm:$0xff]   ;;  %v10122_v7 = vld [vmem:[%s13767_s1 + $0x18e8] ss:$16 sps:$4 sm:$0xff]  }
 0x352   :  { %v10127_v17 = vld [vmem:[%s13767_s1 + $0x1aec] ss:$16 sps:$4 sm:$0xff]  }
 0x353   :  { %7360 = vmatpush1.bf16.msra.mxu0 %v10050_v50  ;;  %v10125_v50 = vld [vmem:[%s13767_s1 + $0x1ae8] ss:$16 sps:$4 sm:$0xff]  }
 0x354   :  { %7401 = vmatpush1.bf16.msra.mxu1 %v10053_v42  ;;  %7361 = vmatprep.subr.bf16.mxu0 %v10058_v15  ;;  %v10130_v42 = vld [vmem:[%s13767_s1 + $0x18cc] ss:$16 sps:$4 sm:$0xff]  }
 0x355   :  { %7402 = vmatprep.subr.bf16.mxu1 %v10061_v24  ;;  %v10133_v15 = vld [vmem:[%s13767_s1 + $0x1acc] ss:$16 sps:$4 sm:$0xff]  }
 0x357   :  { %7362 = vmatpush1.bf16.msra.mxu0 %v10056_v25 }
 0x358   :  { %7403 = vmatpush1.bf16.msra.mxu1 %v10059_v11  ;;  %7363 = vmatprep.subr.bf16.mxu0 %v10064_v59  ;;  %v10128_v59 = vld [vmem:[%s13767_s1 + $0x18c8] ss:$16 sps:$4 sm:$0xff]  }
 0x359   :  { %7404 = vmatprep.subr.bf16.mxu1 %v10067_v60  ;;  %v10131_v60 = vld [vmem:[%s13767_s1 + $0x1ac8] ss:$16 sps:$4 sm:$0xff]  }
 0x35b   :  { %7364 = vmatpush1.bf16.msra.mxu0 %v10062_v36 }
 0x35c   :  { %7405 = vmatpush1.bf16.msra.mxu1 %v10065_v37  ;;  %7365 = vmatprep.subr.bf16.mxu0 %v10070_v18 }
 0x35d   :  { %7406 = vmatprep.subr.bf16.mxu1 %v10073_v19 }
 0x35f   :  { %7366 = vmatpush1.bf16.msra.mxu0 %v10068_v20 }
 0x360   :  { %7407 = vmatpush1.bf16.msra.mxu1 %v10071_v26  ;;  %7367 = vmatprep.subr.bf16.mxu0 %v10076_v0  ;;  %v10134_v0 = vld [vmem:[%s13767_s1 + $0x18a8] ss:$16 sps:$4 sm:$0xff]  }
 0x361   :  { %7408 = vmatprep.subr.bf16.mxu1 %v10079_v1  ;;  %v10137_v1 = vld [vmem:[%s13767_s1 + $0x1aa8] ss:$16 sps:$4 sm:$0xff]  }
 0x363   :  { %7368 = vmatpush2.bf16.msra.mxu0 %v10074_v5 }
 0x364   :  { %7409 = vmatpush2.bf16.msra.mxu1 %v10077_v27  ;;  %7369 = vmatprep.subr.bf16.mxu0 %v10082_v31  ;;  %v10140_v27 = vld [vmem:[%s13767_s1 + $0x1888] ss:$16 sps:$4 sm:$0xff]  }
 0x365   :  { %7410 = vmatprep.subr.bf16.mxu1 %v10085_v14  ;;  %v10143_v31 = vld [vmem:[%s13767_s1 + $0x1a88] ss:$16 sps:$4 sm:$0xff]   ;;  %v10148_v14 = vld [vmem:[%s13767_s1 + $0x186c] ss:$16 sps:$4 sm:$0xff]  }
 0x367   :  { %7370 = vmatpush2.bf16.msra.mxu0 %v10080_v62  ;;  %v10151_v62 = vld [vmem:[%s13767_s1 + $0x1a6c] ss:$16 sps:$4 sm:$0xff]  }
 0x368   :  { %7411 = vmatpush2.bf16.msra.mxu1 %v10083_v40  ;;  %7371 = vmatprep.subr.bf16.mxu0 %v10088_v32  ;;  %v10146_v40 = vld [vmem:[%s13767_s1 + $0x1868] ss:$16 sps:$4 sm:$0xff]  }
 0x369   :  { %7412 = vmatprep.subr.bf16.mxu1 %v10091_v33  ;;  %v10149_v32 = vld [vmem:[%s13767_s1 + $0x1a68] ss:$16 sps:$4 sm:$0xff]   ;;  %v10154_v33 = vld [vmem:[%s13767_s1 + $0x184c] ss:$16 sps:$4 sm:$0xff]  }
 0x36b   :  { %7372 = vmatpush2.bf16.msra.mxu0 %v10086_v34  ;;  %v10157_v34 = vld [vmem:[%s13767_s1 + $0x1a4c] ss:$16 sps:$4 sm:$0xff]  }
 0x36c   :  { %7413 = vmatpush2.bf16.msra.mxu1 %v10089_v35  ;;  %7373 = vmatprep.subr.bf16.mxu0 %v10094_v22  ;;  %v10152_v35 = vld [vmem:[%s13767_s1 + $0x1848] ss:$16 sps:$4 sm:$0xff]  }
 0x36d   :  { %7414 = vmatprep.subr.bf16.mxu1 %v10097_v23  ;;  %v10155_v22 = vld [vmem:[%s13767_s1 + $0x1a48] ss:$16 sps:$4 sm:$0xff]   ;;  %v10160_v23 = vld [vmem:[%s13767_s1 + $0x182c] ss:$16 sps:$4 sm:$0xff]  }
 0x36f   :  { %7374 = vmatpush2.bf16.msra.mxu0 %v10092_v49  ;;  %v10163_v49 = vld [vmem:[%s13767_s1 + $0x1a2c] ss:$16 sps:$4 sm:$0xff]  }
 0x370   :  { %7415 = vmatpush2.bf16.msra.mxu1 %v10095_v61  ;;  %7375 = vmatprep.subr.bf16.mxu0 %v10100_v12  ;;  %v10158_v61 = vld [vmem:[%s13767_s1 + $0x1828] ss:$16 sps:$4 sm:$0xff]  }
 0x371   :  { %7416 = vmatprep.subr.bf16.mxu1 %v10103_v41  ;;  %v10161_v12 = vld [vmem:[%s13767_s1 + $0x1a28] ss:$16 sps:$4 sm:$0xff]   ;;  %v10166_v41 = vld [vmem:[%s13767_s1 + $0x180c] ss:$16 sps:$4 sm:$0xff]  }
 0x373   :  { %7376 = vmatpush2.bf16.msra.mxu0 %v10098_v58  ;;  %v10169_v58 = vld [vmem:[%s13767_s1 + $0x1a0c] ss:$16 sps:$4 sm:$0xff]  }
 0x374   :  { %7417 = vmatpush2.bf16.msra.mxu1 %v10101_v52  ;;  %7377 = vmatprep.subr.bf16.mxu0 %v10106_v46  ;;  %v10164_v52 = vld [vmem:[%s13767_s1 + $0x1808] ss:$16 sps:$4 sm:$0xff]  }
 0x375   :  { %7418 = vmatprep.subr.bf16.mxu1 %v10109_v48  ;;  %v10167_v46 = vld [vmem:[%s13767_s1 + $0x1a08] ss:$16 sps:$4 sm:$0xff]   ;;  %v10172_v48 = vld [vmem:[%s13767_s1 + $0x19ec] ss:$16 sps:$4 sm:$0xff]  }
 0x377   :  { %7378 = vmatpush2.bf16.msra.mxu0 %v10104_v21  ;;  %v10175_v21 = vld [vmem:[%s13767_s1 + $0x1bec] ss:$16 sps:$4 sm:$0xff]  }
 0x378   :  { %7419 = vmatpush2.bf16.msra.mxu1 %v10107_v53  ;;  %7379 = vmatprep.subr.bf16.mxu0 %v10112_v9  ;;  %v10170_v53 = vld [vmem:[%s13767_s1 + $0x19e8] ss:$16 sps:$4 sm:$0xff]  }
 0x379   :  { %7420 = vmatprep.subr.bf16.mxu1 %v10115_v30  ;;  %v10173_v9 = vld [vmem:[%s13767_s1 + $0x1be8] ss:$16 sps:$4 sm:$0xff]   ;;  %v10178_v30 = vld [vmem:[%s13767_s1 + $0x19cc] ss:$16 sps:$4 sm:$0xff]  }
 0x37b   :  { %7380 = vmatpush2.bf16.msra.mxu0 %v10110_v38  ;;  %v10181_v38 = vld [vmem:[%s13767_s1 + $0x1bcc] ss:$16 sps:$4 sm:$0xff]  }
 0x37c   :  { %7421 = vmatpush2.bf16.msra.mxu1 %v10113_v39  ;;  %7381 = vmatprep.subr.bf16.mxu0 %v10118_v8  ;;  %v10176_v39 = vld [vmem:[%s13767_s1 + $0x19c8] ss:$16 sps:$4 sm:$0xff]  }
 0x37d   :  { %7422 = vmatprep.subr.bf16.mxu1 %v10121_v54  ;;  %v10179_v8 = vld [vmem:[%s13767_s1 + $0x1bc8] ss:$16 sps:$4 sm:$0xff]   ;;  %v10184_v54 = vld [vmem:[%s13767_s1 + $0x19ac] ss:$16 sps:$4 sm:$0xff]  }
 0x37f   :  { %7382 = vmatpush2.bf16.msra.mxu0 %v10116_v55  ;;  %v10187_v55 = vld [vmem:[%s13767_s1 + $0x1bac] ss:$16 sps:$4 sm:$0xff]  }
 0x380   :  { %7423 = vmatpush2.bf16.msra.mxu1 %v10119_v47  ;;  %7433 = vmatprep.subr.bf16.mxu0 %v10124_v16  ;;  %v10182_v47 = vld [vmem:[%s13767_s1 + $0x19a8] ss:$16 sps:$4 sm:$0xff]  }
 0x381   :  { %7474 = vmatprep.subr.bf16.mxu1 %v10127_v17  ;;  %v10185_v16 = vld [vmem:[%s13767_s1 + $0x1ba8] ss:$16 sps:$4 sm:$0xff]   ;;  %v10190_v17 = vld [vmem:[%s13767_s1 + $0x198c] ss:$16 sps:$4 sm:$0xff]  }
 0x382   :  { %v7139_v24 = vpop.f32.mrf.mxu0  ;;  %7384 = vmatmul.mubr.bf16.vlgmr.msra.gmra.mxu0 %v11669_v44  ;;  %v10136_v44 = vld [vmem:[%s13767_s1 + $0x18ac] ss:$16 sps:$4 sm:$0xff]  }
 0x383   :  { %v7180_v25 = vpop.f32.mrf.mxu1  ;;  %7425 = vmatmul.mubr.bf16.vlgmr.msra.gmra.mxu1 %v11673_v45  ;;  %v7140_v11 = vadd.f32 %v7139_v24, %v13176_v43  ;;  %7434 = vmatpush1.bf16.msra.mxu0 %v10122_v7  ;;  %v10139_v45 = vld [vmem:[%s13767_s1 + $0x1aac] ss:$16 sps:$4 sm:$0xff]  }
 0x384   :  { %7475 = vmatpush1.bf16.msra.mxu1 %v10125_v50  ;;  %v7141_v36 = vpop.f32.mrf.mxu0  ;;  %7435 = vmatprep.subr.bf16.mxu0 %v10130_v42  ;;  %v10193_v7 = vld [vmem:[%s13767_s1 + $0x1b8c] ss:$16 sps:$4 sm:$0xff]   ;;  %v10188_v50 = vld [vmem:[%s13767_s1 + $0x1988] ss:$16 sps:$4 sm:$0xff]  }
 0x385   :  { %v7182_v37 = vpop.f32.mrf.mxu1  ;;  %7476 = vmatprep.subr.bf16.mxu1 %v10133_v15  ;;  %v13378_v43 = vadd.f32 %v7180_v25, %v7140_v11  ;;  %v7142_v18 = vadd.f32 %v7141_v36, %v13181_v63  ;;  %7465 = vmatprep.mubr.bf16.mxu0 %v11699_v56  ;;  %v10142_v56 = vld [vmem:[%s13767_s1 + $0x188c] ss:$16 sps:$4 sm:$0xff]   ;;  %v10191_v42 = vld [vmem:[%s13767_s1 + $0x1b88] ss:$16 sps:$4 sm:$0xff]  }
 0x386   :  { %7506 = vmatprep.mubr.bf16.mxu1 %v11703_v57  ;;  %v7143_v19 = vpop.f32.mrf.mxu0  ;;  %v10145_v57 = vld [vmem:[%s13767_s1 + $0x1a8c] ss:$16 sps:$4 sm:$0xff]   ;;  %v10194_v25 = vld [vmem:[%s13767_s1 + $0x1968] ss:$16 sps:$4 sm:$0xff]  }
 0x387   :  { %v7184_v20 = vpop.f32.mrf.mxu1  ;;  %v13383_v26 = vadd.f32 %v7182_v37, %v7142_v18  ;;  %7436 = vmatpush1.bf16.msra.mxu0 %v10128_v59  ;;  %v10196_v15 = vld [vmem:[%s13767_s1 + $0x196c] ss:$16 sps:$4 sm:$0xff]   ;;  %v10197_v11 = vld [vmem:[%s13767_s1 + $0x1b68] ss:$16 sps:$4 sm:$0xff]  }
 0x388   :  { %7477 = vmatpush1.bf16.msra.mxu1 %v10131_v60  ;;  %v7144_v5 = vpop.f32.mrf.mxu0  ;;  %7437 = vmatprep.subr.bf16.mxu0 %v10136_v44  ;;  %v10199_v24 = vld [vmem:[%s13767_s1 + $0x1b6c] ss:$16 sps:$4 sm:$0xff]   ;;  %v10200_v36 = vld [vmem:[%s13767_s1 + $0x1948] ss:$16 sps:$4 sm:$0xff]  }
 0x389   :  { %v7185_v63 = vpop.f32.mrf.mxu1  ;;  %7478 = vmatprep.subr.bf16.mxu1 %v10139_v45  ;;  %v10202_v59 = vld [vmem:[%s13767_s1 + $0x194c] ss:$16 sps:$4 sm:$0xff]   ;;  %v10203_v37 = vld [vmem:[%s13767_s1 + $0x1b48] ss:$16 sps:$4 sm:$0xff]  }
 0x38a   :  { %v10205_v60 = vld [vmem:[%s13767_s1 + $0x1b4c] ss:$16 sps:$4 sm:$0xff]   ;;  %v10206_v18 = vld [vmem:[%s13767_s1 + $0x1928] ss:$16 sps:$4 sm:$0xff]  }
 0x38b   :  { %7438 = vmatpush1.bf16.msra.mxu0 %v10134_v0  ;;  %v10208_v44 = vld [vmem:[%s13767_s1 + $0x192c] ss:$16 sps:$4 sm:$0xff]   ;;  %v10209_v19 = vld [vmem:[%s13767_s1 + $0x1b28] ss:$16 sps:$4 sm:$0xff]  }
 0x38c   :  { %7479 = vmatpush1.bf16.msra.mxu1 %v10137_v1  ;;  %7439 = vmatprep.subr.bf16.mxu0 %v10142_v56  ;;  %v10211_v45 = vld [vmem:[%s13767_s1 + $0x1b2c] ss:$16 sps:$4 sm:$0xff]   ;;  %v10212_v1 = vld [vmem:[%s13767_s1 + $0x1908] ss:$16 sps:$4 sm:$0xff]  }
 0x38d   :  { %7480 = vmatprep.subr.bf16.mxu1 %v10145_v57  ;;  %v10214_v20 = vld [vmem:[%s13767_s1 + $0x190c] ss:$16 sps:$4 sm:$0xff]   ;;  %v10215_v5 = vld [vmem:[%s13767_s1 + $0x1b08] ss:$16 sps:$4 sm:$0xff]  }
 0x38e   :  { %v10217_v0 = vld [vmem:[%s13767_s1 + $0x1b0c] ss:$16 sps:$4 sm:$0xff]   ;;  %v10218_v57 = vld [vmem:[%s13767_s1 + $0x1ce8] ss:$16 sps:$4 sm:$0xff]  }
 0x38f   :  { %7440 = vmatpush1.bf16.msra.mxu0 %v10140_v27  ;;  %v10220_v63 = vld [vmem:[%s13767_s1 + $0x1cec] ss:$16 sps:$4 sm:$0xff]   ;;  %v10221_v27 = vld [vmem:[%s13767_s1 + $0x1ee8] ss:$16 sps:$4 sm:$0xff]  }
 0x390   :  { %7481 = vmatpush1.bf16.msra.mxu1 %v10143_v31  ;;  %7441 = vmatprep.subr.bf16.mxu0 %v10148_v14  ;;  %v10223_v56 = vld [vmem:[%s13767_s1 + $0x1eec] ss:$16 sps:$4 sm:$0xff]  }
 0x391   :  { %7482 = vmatprep.subr.bf16.mxu1 %v10151_v62  ;;  %v10226_v31 = vld [vmem:[%s13767_s1 + $0x1ccc] ss:$16 sps:$4 sm:$0xff]  }
 0x392   :  { %v10229_v14 = vld [vmem:[%s13767_s1 + $0x1ecc] ss:$16 sps:$4 sm:$0xff]  }
 0x393   :  { %7442 = vmatpush1.bf16.msra.mxu0 %v10146_v40 }
 0x394   :  { %7483 = vmatpush1.bf16.msra.mxu1 %v10149_v32  ;;  %7443 = vmatprep.subr.bf16.mxu0 %v10154_v33  ;;  %v10224_v33 = vld [vmem:[%s13767_s1 + $0x1cc8] ss:$16 sps:$4 sm:$0xff]  }
 0x395   :  { %7484 = vmatprep.subr.bf16.mxu1 %v10157_v34  ;;  %v10227_v34 = vld [vmem:[%s13767_s1 + $0x1ec8] ss:$16 sps:$4 sm:$0xff]  }
 0x397   :  { %7444 = vmatpush1.bf16.msra.mxu0 %v10152_v35 }
 0x398   :  { %7485 = vmatpush1.bf16.msra.mxu1 %v10155_v22  ;;  %7445 = vmatprep.subr.bf16.mxu0 %v10160_v23 }
 0x399   :  { %7486 = vmatprep.subr.bf16.mxu1 %v10163_v49 }
 0x39b   :  { %7446 = vmatpush1.bf16.msra.mxu0 %v10158_v61 }
 0x39c   :  { %7487 = vmatpush1.bf16.msra.mxu1 %v10161_v12  ;;  %7447 = vmatprep.subr.bf16.mxu0 %v10166_v41  ;;  %v10230_v41 = vld [vmem:[%s13767_s1 + $0x1ca8] ss:$16 sps:$4 sm:$0xff]  }
 0x39d   :  { %7488 = vmatprep.subr.bf16.mxu1 %v10169_v58  ;;  %v10233_v58 = vld [vmem:[%s13767_s1 + $0x1ea8] ss:$16 sps:$4 sm:$0xff]  }
 0x39f   :  { %7448 = vmatpush1.bf16.msra.mxu0 %v10164_v52 }
 0x3a0   :  { %7489 = vmatpush1.bf16.msra.mxu1 %v10167_v46  ;;  %7449 = vmatprep.subr.bf16.mxu0 %v10172_v48  ;;  %v10236_v46 = vld [vmem:[%s13767_s1 + $0x1c88] ss:$16 sps:$4 sm:$0xff]  }
 0x3a1   :  { %7490 = vmatprep.subr.bf16.mxu1 %v10175_v21  ;;  %v10239_v48 = vld [vmem:[%s13767_s1 + $0x1e88] ss:$16 sps:$4 sm:$0xff]   ;;  %v10244_v21 = vld [vmem:[%s13767_s1 + $0x1c6c] ss:$16 sps:$4 sm:$0xff]  }
 0x3a3   :  { %7450 = vmatpush2.bf16.msra.mxu0 %v10170_v53  ;;  %v10247_v53 = vld [vmem:[%s13767_s1 + $0x1e6c] ss:$16 sps:$4 sm:$0xff]  }
 0x3a4   :  { %7491 = vmatpush2.bf16.msra.mxu1 %v10173_v9  ;;  %7451 = vmatprep.subr.bf16.mxu0 %v10178_v30  ;;  %v10242_v9 = vld [vmem:[%s13767_s1 + $0x1c68] ss:$16 sps:$4 sm:$0xff]  }
 0x3a5   :  { %7492 = vmatprep.subr.bf16.mxu1 %v10181_v38  ;;  %v10245_v30 = vld [vmem:[%s13767_s1 + $0x1e68] ss:$16 sps:$4 sm:$0xff]   ;;  %v10250_v38 = vld [vmem:[%s13767_s1 + $0x1c4c] ss:$16 sps:$4 sm:$0xff]  }
 0x3a7   :  { %7452 = vmatpush2.bf16.msra.mxu0 %v10176_v39  ;;  %v10253_v39 = vld [vmem:[%s13767_s1 + $0x1e4c] ss:$16 sps:$4 sm:$0xff]  }
 0x3a8   :  { %7493 = vmatpush2.bf16.msra.mxu1 %v10179_v8  ;;  %7453 = vmatprep.subr.bf16.mxu0 %v10184_v54  ;;  %v10248_v8 = vld [vmem:[%s13767_s1 + $0x1c48] ss:$16 sps:$4 sm:$0xff]  }
 0x3a9   :  { %7494 = vmatprep.subr.bf16.mxu1 %v10187_v55  ;;  %v10251_v54 = vld [vmem:[%s13767_s1 + $0x1e48] ss:$16 sps:$4 sm:$0xff]   ;;  %v10256_v55 = vld [vmem:[%s13767_s1 + $0x1c2c] ss:$16 sps:$4 sm:$0xff]  }
 0x3ab   :  { %7454 = vmatpush2.bf16.msra.mxu0 %v10182_v47  ;;  %v10259_v47 = vld [vmem:[%s13767_s1 + $0x1e2c] ss:$16 sps:$4 sm:$0xff]  }
 0x3ac   :  { %7495 = vmatpush2.bf16.msra.mxu1 %v10185_v16  ;;  %7455 = vmatprep.subr.bf16.mxu0 %v10190_v17  ;;  %v10254_v16 = vld [vmem:[%s13767_s1 + $0x1c28] ss:$16 sps:$4 sm:$0xff]  }
 0x3ad   :  { %7496 = vmatprep.subr.bf16.mxu1 %v10193_v7  ;;  %v10257_v17 = vld [vmem:[%s13767_s1 + $0x1e28] ss:$16 sps:$4 sm:$0xff]   ;;  %v10262_v7 = vld [vmem:[%s13767_s1 + $0x1c0c] ss:$16 sps:$4 sm:$0xff]  }
 0x3af   :  { %7456 = vmatpush2.bf16.msra.mxu0 %v10188_v50  ;;  %v10265_v50 = vld [vmem:[%s13767_s1 + $0x1e0c] ss:$16 sps:$4 sm:$0xff]  }
 0x3b0   :  { %7497 = vmatpush2.bf16.msra.mxu1 %v10191_v42  ;;  %7457 = vmatprep.subr.bf16.mxu0 %v10196_v15  ;;  %v10260_v42 = vld [vmem:[%s13767_s1 + $0x1c08] ss:$16 sps:$4 sm:$0xff]  }
 0x3b1   :  { %7498 = vmatprep.subr.bf16.mxu1 %v10199_v24  ;;  %v10263_v15 = vld [vmem:[%s13767_s1 + $0x1e08] ss:$16 sps:$4 sm:$0xff]   ;;  %v10268_v24 = vld [vmem:[%s13767_s1 + $0x1dec] ss:$16 sps:$4 sm:$0xff]  }
 0x3b3   :  { %7458 = vmatpush2.bf16.msra.mxu0 %v10194_v25  ;;  %v10271_v25 = vld [vmem:[%s13767_s1 + $0x1fec] ss:$16 sps:$4 sm:$0xff]  }
 0x3b4   :  { %7499 = vmatpush2.bf16.msra.mxu1 %v10197_v11  ;;  %7459 = vmatprep.subr.bf16.mxu0 %v10202_v59  ;;  %v10266_v11 = vld [vmem:[%s13767_s1 + $0x1de8] ss:$16 sps:$4 sm:$0xff]  }
 0x3b5   :  { %7500 = vmatprep.subr.bf16.mxu1 %v10205_v60  ;;  %v10269_v59 = vld [vmem:[%s13767_s1 + $0x1fe8] ss:$16 sps:$4 sm:$0xff]   ;;  %v10274_v60 = vld [vmem:[%s13767_s1 + $0x1dcc] ss:$16 sps:$4 sm:$0xff]  }
 0x3b7   :  { %7460 = vmatpush2.bf16.msra.mxu0 %v10200_v36  ;;  %v10277_v36 = vld [vmem:[%s13767_s1 + $0x1fcc] ss:$16 sps:$4 sm:$0xff]  }
 0x3b8   :  { %7501 = vmatpush2.bf16.msra.mxu1 %v10203_v37  ;;  %7461 = vmatprep.subr.bf16.mxu0 %v10208_v44  ;;  %v10272_v37 = vld [vmem:[%s13767_s1 + $0x1dc8] ss:$16 sps:$4 sm:$0xff]  }
 0x3b9   :  { %7502 = vmatprep.subr.bf16.mxu1 %v10211_v45  ;;  %v10275_v44 = vld [vmem:[%s13767_s1 + $0x1fc8] ss:$16 sps:$4 sm:$0xff]   ;;  %v10280_v45 = vld [vmem:[%s13767_s1 + $0x1dac] ss:$16 sps:$4 sm:$0xff]  }
 0x3bb   :  { %7462 = vmatpush2.bf16.msra.mxu0 %v10206_v18  ;;  %v10283_v18 = vld [vmem:[%s13767_s1 + $0x1fac] ss:$16 sps:$4 sm:$0xff]  }
 0x3bc   :  { %7503 = vmatpush2.bf16.msra.mxu1 %v10209_v19  ;;  %7463 = vmatprep.subr.bf16.mxu0 %v10214_v20  ;;  %v10278_v19 = vld [vmem:[%s13767_s1 + $0x1da8] ss:$16 sps:$4 sm:$0xff]  }
 0x3bd   :  { %7504 = vmatprep.subr.bf16.mxu1 %v10217_v0  ;;  %v10281_v20 = vld [vmem:[%s13767_s1 + $0x1fa8] ss:$16 sps:$4 sm:$0xff]   ;;  %v10286_v0 = vld [vmem:[%s13767_s1 + $0x1d8c] ss:$16 sps:$4 sm:$0xff]  }
 0x3bf   :  { %7464 = vmatpush2.bf16.msra.mxu0 %v10212_v1  ;;  %v10289_v1 = vld [vmem:[%s13767_s1 + $0x1f8c] ss:$16 sps:$4 sm:$0xff]  }
 0x3c0   :  { %7505 = vmatpush2.bf16.msra.mxu1 %v10215_v5  ;;  %7515 = vmatprep.subr.bf16.mxu0 %v10220_v63  ;;  %v10284_v5 = vld [vmem:[%s13767_s1 + $0x1d88] ss:$16 sps:$4 sm:$0xff]  }
 0x3c1   :  { %7556 = vmatprep.subr.bf16.mxu1 %v10223_v56  ;;  %v10287_v63 = vld [vmem:[%s13767_s1 + $0x1f88] ss:$16 sps:$4 sm:$0xff]   ;;  %v10292_v56 = vld [vmem:[%s13767_s1 + $0x1d6c] ss:$16 sps:$4 sm:$0xff]  }
 0x3c2   :  { %v7221_v62 = vpop.f32.mrf.mxu0  ;;  %7466 = vmatmul.mubr.bf16.vlgmr.msra.gmra.mxu0 %v11907_v2  ;;  %v10232_v2 = vld [vmem:[%s13767_s1 + $0x1cac] ss:$16 sps:$4 sm:$0xff]  }
 0x3c3   :  { %v7262_v40 = vpop.f32.mrf.mxu1  ;;  %7507 = vmatmul.mubr.bf16.vlgmr.msra.gmra.mxu1 %v11911_v4  ;;  %v7222_v32 = vadd.f32 %v7221_v62, %v13378_v43  ;;  %7516 = vmatpush1.bf16.msra.mxu0 %v10218_v57  ;;  %v10235_v4 = vld [vmem:[%s13767_s1 + $0x1eac] ss:$16 sps:$4 sm:$0xff]  }
 0x3c4   :  { %7557 = vmatpush1.bf16.msra.mxu1 %v10221_v27  ;;  %v7223_v35 = vpop.f32.mrf.mxu0  ;;  %7517 = vmatprep.subr.bf16.mxu0 %v10226_v31  ;;  %v10295_v57 = vld [vmem:[%s13767_s1 + $0x1f6c] ss:$16 sps:$4 sm:$0xff]   ;;  %v10290_v27 = vld [vmem:[%s13767_s1 + $0x1d68] ss:$16 sps:$4 sm:$0xff]  }
 0x3c5   :  { %v7264_v22 = vpop.f32.mrf.mxu1  ;;  %7558 = vmatprep.subr.bf16.mxu1 %v10229_v14  ;;  %v13580_v43 = vadd.f32 %v7262_v40, %v7222_v32  ;;  %v7224_v23 = vadd.f32 %v7223_v35, %v13383_v26  ;;  %7547 = vmatprep.mubr.bf16.mxu0 %v11927_v3  ;;  %v10238_v3 = vld [vmem:[%s13767_s1 + $0x1c8c] ss:$16 sps:$4 sm:$0xff]   ;;  %v10293_v31 = vld [vmem:[%s13767_s1 + $0x1f68] ss:$16 sps:$4 sm:$0xff]  }
 0x3c6   :  { %7588 = vmatprep.mubr.bf16.mxu1 %v11931_v10  ;;  %v7225_v49 = vpop.f32.mrf.mxu0  ;;  %v10241_v10 = vld [vmem:[%s13767_s1 + $0x1e8c] ss:$16 sps:$4 sm:$0xff]   ;;  %v10296_v40 = vld [vmem:[%s13767_s1 + $0x1d48] ss:$16 sps:$4 sm:$0xff]  }
 0x3c7   :  { %v7266_v61 = vpop.f32.mrf.mxu1  ;;  %v13585_v12 = vadd.f32 %v7264_v22, %v7224_v23  ;;  %7518 = vmatpush1.bf16.msra.mxu0 %v10224_v33  ;;  %v10298_v14 = vld [vmem:[%s13767_s1 + $0x1d4c] ss:$16 sps:$4 sm:$0xff]   ;;  %v10299_v32 = vld [vmem:[%s13767_s1 + $0x1f48] ss:$16 sps:$4 sm:$0xff]  }
 0x3c8   :  { %7559 = vmatpush1.bf16.msra.mxu1 %v10227_v34  ;;  %v7226_v52 = vpop.f32.mrf.mxu0  ;;  %7519 = vmatprep.subr.bf16.mxu0 %v10232_v2  ;;  %v10301_v62 = vld [vmem:[%s13767_s1 + $0x1f4c] ss:$16 sps:$4 sm:$0xff]   ;;  %v10302_v35 = vld [vmem:[%s13767_s1 + $0x1d28] ss:$16 sps:$4 sm:$0xff]  }
 0x3c9   :  { %v7267_v26 = vpop.f32.mrf.mxu1  ;;  %7560 = vmatprep.subr.bf16.mxu1 %v10235_v4  ;;  %v10304_v33 = vld [vmem:[%s13767_s1 + $0x1d2c] ss:$16 sps:$4 sm:$0xff]   ;;  %v10305_v22 = vld [vmem:[%s13767_s1 + $0x1f28] ss:$16 sps:$4 sm:$0xff]  }
 0x3ca   :  { %v10307_v34 = vld [vmem:[%s13767_s1 + $0x1f2c] ss:$16 sps:$4 sm:$0xff]   ;;  %v10308_v23 = vld [vmem:[%s13767_s1 + $0x1d08] ss:$16 sps:$4 sm:$0xff]  }
 0x3cb   :  { %7520 = vmatpush1.bf16.msra.mxu0 %v10230_v41  ;;  %v10310_v2 = vld [vmem:[%s13767_s1 + $0x1d0c] ss:$16 sps:$4 sm:$0xff]   ;;  %v10311_v49 = vld [vmem:[%s13767_s1 + $0x1f08] ss:$16 sps:$4 sm:$0xff]  }
 0x3cc   :  { %7561 = vmatpush1.bf16.msra.mxu1 %v10233_v58  ;;  %7521 = vmatprep.subr.bf16.mxu0 %v10238_v3  ;;  %v10313_v4 = vld [vmem:[%s13767_s1 + $0x1f0c] ss:$16 sps:$4 sm:$0xff]  }
 0x3cd   :  { %7562 = vmatprep.subr.bf16.mxu1 %v10241_v10 }
 0x3cf   :  { %7522 = vmatpush1.bf16.msra.mxu0 %v10236_v46 }
 0x3d0   :  { %7563 = vmatpush1.bf16.msra.mxu1 %v10239_v48  ;;  %7523 = vmatprep.subr.bf16.mxu0 %v10244_v21 }
 0x3d1   :  { %7564 = vmatprep.subr.bf16.mxu1 %v10247_v53 }
 0x3d3   :  { %7524 = vmatpush1.bf16.msra.mxu0 %v10242_v9 }
 0x3d4   :  { %7565 = vmatpush1.bf16.msra.mxu1 %v10245_v30  ;;  %7525 = vmatprep.subr.bf16.mxu0 %v10250_v38 }
 0x3d5   :  { %7566 = vmatprep.subr.bf16.mxu1 %v10253_v39 }
 0x3d7   :  { %7526 = vmatpush1.bf16.msra.mxu0 %v10248_v8 }
 0x3d8   :  { %7567 = vmatpush1.bf16.msra.mxu1 %v10251_v54  ;;  %7527 = vmatprep.subr.bf16.mxu0 %v10256_v55 }
 0x3d9   :  { %7568 = vmatprep.subr.bf16.mxu1 %v10259_v47 }
 0x3db   :  { %7528 = vmatpush1.bf16.msra.mxu0 %v10254_v16 }
 0x3dc   :  { %7569 = vmatpush1.bf16.msra.mxu1 %v10257_v17  ;;  %7529 = vmatprep.subr.bf16.mxu0 %v10262_v7 }
 0x3dd   :  { %7570 = vmatprep.subr.bf16.mxu1 %v10265_v50 }
 0x3df   :  { %7530 = vmatpush1.bf16.msra.mxu0 %v10260_v42 }
 0x3e0   :  { %7571 = vmatpush1.bf16.msra.mxu1 %v10263_v15  ;;  %7531 = vmatprep.subr.bf16.mxu0 %v10268_v24 }
 0x3e1   :  { %7572 = vmatprep.subr.bf16.mxu1 %v10271_v25 }
 0x3e3   :  { %7532 = vmatpush2.bf16.msra.mxu0 %v10266_v11 }
 0x3e4   :  { %7573 = vmatpush2.bf16.msra.mxu1 %v10269_v59  ;;  %7533 = vmatprep.subr.bf16.mxu0 %v10274_v60 }
 0x3e5   :  { %7574 = vmatprep.subr.bf16.mxu1 %v10277_v36 }
 0x3e7   :  { %7534 = vmatpush2.bf16.msra.mxu0 %v10272_v37 }
 0x3e8   :  { %7575 = vmatpush2.bf16.msra.mxu1 %v10275_v44  ;;  %7535 = vmatprep.subr.bf16.mxu0 %v10280_v45 }
 0x3e9   :  { %7576 = vmatprep.subr.bf16.mxu1 %v10283_v18 }
 0x3eb   :  { %7536 = vmatpush2.bf16.msra.mxu0 %v10278_v19 }
 0x3ec   :  { %7577 = vmatpush2.bf16.msra.mxu1 %v10281_v20  ;;  %7537 = vmatprep.subr.bf16.mxu0 %v10286_v0 }
 0x3ed   :  { %7578 = vmatprep.subr.bf16.mxu1 %v10289_v1 }
 0x3ef   :  { %7538 = vmatpush2.bf16.msra.mxu0 %v10284_v5 }
 0x3f0   :  { %7579 = vmatpush2.bf16.msra.mxu1 %v10287_v63  ;;  %7539 = vmatprep.subr.bf16.mxu0 %v10292_v56 }
 0x3f1   :  { %7580 = vmatprep.subr.bf16.mxu1 %v10295_v57 }
 0x3f3   :  { %7540 = vmatpush2.bf16.msra.mxu0 %v10290_v27 }
 0x3f4   :  { %7581 = vmatpush2.bf16.msra.mxu1 %v10293_v31  ;;  %7541 = vmatprep.subr.bf16.mxu0 %v10298_v14 }
 0x3f5   :  { %7582 = vmatprep.subr.bf16.mxu1 %v10301_v62 }
 0x3f7   :  { %7542 = vmatpush2.bf16.msra.mxu0 %v10296_v40 }
 0x3f8   :  { %7583 = vmatpush2.bf16.msra.mxu1 %v10299_v32  ;;  %7543 = vmatprep.subr.bf16.mxu0 %v10304_v33 }
 0x3f9   :  { %7584 = vmatprep.subr.bf16.mxu1 %v10307_v34 }
 0x3fb   :  { %7544 = vmatpush2.bf16.msra.mxu0 %v10302_v35 }
 0x3fc   :  { %7585 = vmatpush2.bf16.msra.mxu1 %v10305_v22  ;;  %7545 = vmatprep.subr.bf16.mxu0 %v10310_v2 }
 0x3fd   :  { %7586 = vmatprep.subr.bf16.mxu1 %v10313_v4 }
 0x3ff   :  { %7546 = vmatpush2.bf16.msra.mxu0 %v10308_v23 }
 0x400   :  { %7587 = vmatpush2.bf16.msra.mxu1 %v10311_v49 }
 0x402   :  { %v7303_v61 = vpop.f32.mrf.mxu0  ;;  %7548 = vmatmul.mubr.bf16.vlgmr.msra.gmra.mxu0 %v12125_v28 }
 0x403   :  { %v7344_v41 = vpop.f32.mrf.mxu1  ;;  %7589 = vmatmul.mubr.bf16.vlgmr.msra.gmra.mxu1 %v12129_v29  ;;  %v7304_v58 = vadd.f32 %v7303_v61, %v13580_v43 }
 0x404   :  { %v7305_v52 = vpop.f32.mrf.mxu0 }
 0x405   :  { %v7346_v26 = vpop.f32.mrf.mxu1  ;;  %v7345_v3 = vadd.f32 %v7344_v41, %v7304_v58  ;;  %v7306_v10 = vadd.f32 %v7305_v52, %v13585_v12  ;;  %v10314_v41 = vmov 1983009808   ;;  %v7667_v52 = vlaneseq }
 0x406   :  { %v7307_v46 = vpop.f32.mrf.mxu0  ;;  %v7665_v58 = vunpack.c.l.s4 %v10314_v41 }
 0x407   :  { %v7348_v48 = vpop.f32.mrf.mxu1  ;;  %v7347_v21 = vadd.f32 %v7346_v26, %v7306_v10 }
 0x408   :  { %v7308_v53 = vpop.f32.mrf.mxu0 }
 0x409   :  { %v7349_v9 = vpop.f32.mrf.mxu1 }
 0x40a   :  { %v7666_v9 = vunpack.c.0.s8 %v7665_v58 }
 0x442   :  { %v7385_v30 = vpop.f32.mrf.mxu0 }
 0x443   :  { %v7426_v38 = vpop.f32.mrf.mxu1  ;;  %v7386_v39 = vadd.f32 %v7385_v30, %v7345_v3  ;;  %v7668_v30 = vshrl.u32 %v7667_v52, 7 }
 0x444   :  { %v7387_v8 = vpop.f32.mrf.mxu0 }
 0x445   :  { %v7428_v54 = vpop.f32.mrf.mxu1  ;;  %v7427_v28 = vadd.f32 %v7426_v38, %v7386_v39  ;;  %v7388_v55 = vadd.f32 %v7387_v8, %v7347_v21 }
 0x446   :  { %v7389_v29 = vpop.f32.mrf.mxu0 }
 0x447   :  { %v7430_v47 = vpop.f32.mrf.mxu1  ;;  %v7429_v43 = vadd.f32 %v7428_v54, %v7388_v55  ;;  %v7669_v55 = vsub.s32 %v7666_v9, %v7668_v30 }
 0x448   :  { %v7390_v16 = vpop.f32.mrf.mxu0 }
 0x449   :  { %v7431_v17 = vpop.f32.mrf.mxu1  ;;  %v7670_v16 = vrot.slane %v7662_v13, %v7669_v55 }
 0x482   :  { %v7467_v7 = vpop.f32.mrf.mxu0 }
 0x483   :  { %v7508_v50 = vpop.f32.mrf.mxu1  ;;  %v7468_v59 = vadd.f32 %v7467_v7, %v7427_v28 }
 0x484   :  { %v7469_v12 = vpop.f32.mrf.mxu0 }
 0x485   :  { %v7510_v42 = vpop.f32.mrf.mxu1  ;;  %v7470_v60 = vadd.f32 %v7469_v12, %v7429_v43  ;;  %v7509_v36 = vadd.f32 %v7508_v50, %v7468_v59 }
 0x486   :  { %v7471_v15 = vpop.f32.mrf.mxu0 }
 0x487   :  { %v7512_v24 = vpop.f32.mrf.mxu1  ;;  %v7511_v45 = vadd.f32 %v7510_v42, %v7470_v60 }
 0x488   :  { %v7472_v25 = vpop.f32.mrf.mxu0 }
 0x489   :  { %v7513_v11 = vpop.f32.mrf.mxu1 }
 0x4c2   :  { %v7549_v37 = vpop.f32.mrf.mxu0 }
 0x4c3   :  { %v7590_v44 = vpop.f32.mrf.mxu1  ;;  %v7550_v18 = vadd.f32 %v7549_v37, %v7509_v36 }
 0x4c4   :  { %v7551_v19 = vpop.f32.mrf.mxu0 }
 0x4c5   :  { %v7592_v20 = vpop.f32.mrf.mxu1  ;;  %v7591_v0 = vadd.f32 %v7590_v44, %v7550_v18  ;;  %v7552_v1 = vadd.f32 %v7551_v19, %v7511_v45 }
 0x4c6   :  { %v7553_v5 = vpop.f32.mrf.mxu0 }
 0x4c7   :  { %v7594_v63 = vpop.f32.mrf.mxu1  ;;  %7599 = vst [vmem:[%s13769_s2 + $0x10] sm:$0xff] %v7591_v0  ;;  %v7613_v56 = vrot.slane %v7591_v0, 4  ;;  %v7627_v57 = vmul.f32 %v7591_v0, %v7591_v0  ;;  %v7593_v27 = vadd.f32 %v7592_v20, %v7552_v1 }
 0x4c8   :  { %v7554_v31 = vpop.f32.mrf.mxu0 }
 0x4c9   :  { %v7595_v14 = vpop.f32.mrf.mxu1  ;;  %v7614_v62 = vadd.f32 %v7613_v56, %v7591_v0  ;;  %v7641_v40 = vrot.slane %v7627_v57, 4  ;;  %7600 = vst [vmem:[%s13769_s2 + $0x18] sm:$0xff] %v7593_v27  ;;  %v7619_v32 = vrot.slane %v7593_v27, 4  ;;  %v7628_v33 = vmul.f32 %v7593_v27, %v7593_v27 }
 0x4cb   :  { %v7615_v34 = vrot.slane %v7614_v62, 2  ;;  %v7642_v35 = vadd.f32 %v7641_v40, %v7627_v57  ;;  %v7620_v22 = vadd.f32 %v7619_v32, %v7593_v27  ;;  %v7647_v2 = vrot.slane %v7628_v33, 4 }
 0x4cd   :  { %v7616_v4 = vadd.f32 %v7615_v34, %v7614_v62  ;;  %v7643_v23 = vrot.slane %v7642_v35, 2  ;;  %v7621_v49 = vrot.slane %v7620_v22, 2  ;;  %v7648_v61 = vadd.f32 %v7647_v2, %v7628_v33 }
 0x4cf   :  { %v7644_v26 = vadd.f32 %v7643_v23, %v7642_v35  ;;  %v7622_v3 = vadd.f32 %v7621_v49, %v7620_v22  ;;  %v7649_v10 = vrot.slane %v7648_v61, 2  ;;  %v7617_v46 = vrot.slane %v7616_v4, 1 }
 0x4d1   :  { %v7645_v48 = vrot.slane %v7644_v26, 1  ;;  %v7623_v21 = vrot.slane %v7622_v3, 1  ;;  %v7650_v53 = vadd.f32 %v7649_v10, %v7648_v61  ;;  %v7618_v8 = vadd.f32 %v7617_v46, %v7616_v4 }
 0x4d3   :  { %v7646_v38 = vadd.f32 %v7645_v48, %v7644_v26  ;;  %v7651_v39 = vrot.slane %v7650_v53, 1  ;;  %v7624_v54 = vadd.f32 %v7623_v21, %v7622_v3 }
 0x4d5   :  { %v7652_v28 = vadd.f32 %v7651_v39, %v7650_v53  ;;  %v7656_v29 = vsel %vm7653_vm0, %v7618_v8, %v7646_v38 }
 0x4d7   :  { %v7657_v47 = vsel %vm7653_vm0, %v7624_v54, %v7652_v28 }
 0x4d8   :  { %v7663_v43 = vcombine.low %v7656_v29, %v7657_v47 }
 0x4da   :  { %v7677_v17 = vrot.slane %v7663_v43, %v7669_v55 }
 0x4dc   :  { %v7678_v7 = vcombine.low %v7670_v16, %v7677_v17 }
 0x4de   :  { %7680 = vst [vmem:[%s13770_s3] sm:$0xff] %v7678_v7 }

</bundles_post_ra>
